<compile_context>
chip_gen: v6e
topology: v6e:2x2x1
jax: 0.10.0
libtpu: 0.0.40
codegen_flags: <defaults>
</compile_context>

<pallas_src>
import functools

import jax
import jax.numpy as jnp
import numpy as np
from jax import lax
from jax.experimental import pallas as pl
from jax.experimental.pallas import tpu as pltpu


# ----------------------------------------------------------------------------
# Fused kernel: one output row-tile per grid step.
# ----------------------------------------------------------------------------
def resblock_kernel(x_ref, w1_ref, w2_ref, sh1_ref, sh2_ref, o_ref,
                    slab1_ref, slab2_ref, *, H, W, TH, Wpa):
    """Conv1+BN1+SiLU -> reflect-pad -> Conv2+BN2 -> +x for rows t0..t0+TH-1.

    x_ref     : (1, H, W, C) f32   whole NHWC image (VMEM resident)
    w*_ref    : (3, 3*C, C)  bf16  per-kernel-row weight blocks, BN scale folded
    sh*_ref   : (1, C)       f32   BN shifts
    o_ref     : (1, TH, W, C) f32  output row tile
    slab1_ref : ((TH+5)*Wpa, C) bf16  reflect-padded conv1 input (flat rows)
    slab2_ref : ((TH+3)*Wpa, C) bf16  reflect-padded conv2 input (flat rows)
    """
    C = o_ref.shape[3]
    Wp = W + 2                 # reflect-padded width
    npad = Wpa - Wp            # junk columns per flat row (only garbage reads)
    NR = TH + 2                # conv1 output rows (activation rows incl. halo)
    L1 = NR * Wpa              # conv1 flat output rows (cols >= W are garbage)
    L2 = TH * Wpa              # conv2 flat output rows
    t0 = pl.program_id(1) * TH

    def reflect(v):
        r = jnp.where(v < 0, -v, v)
        r = jnp.where(r > H - 1, 2 * (H - 1) - r, r)
        return jnp.clip(r, 0, H - 1)

    # ---- 1. Conv1 input slab: image rows t0-2 .. t0+TH+1 (reflected at the
    #         image border), columns reflect-padded, aligned row stride Wpa. ---
    for j in range(TH + 4):
        r = reflect(t0 - 2 + j)
        row = x_ref[0, pl.ds(r, 1), :, :].astype(jnp.bfloat16)           # (1,W,C)
        prow = jnp.concatenate([row[:, 1:2, :], row, row[:, W - 2:W - 1, :]],
                               axis=1)                                    # (1,Wp,C)
        slab1_ref[pl.ds(j * Wpa, Wp), :] = prow.reshape(Wp, C)

    # ---- 2. Conv1 (+folded BN1 scale): 3 accumulating MXU matmuls (K=3C),
    #         one per kernel row, so the im2col build overlaps the MXU. -------
    acc = None
    for dy in range(3):
        lhs = jnp.concatenate(
            [slab1_ref[pl.ds(dy * Wpa + dx, L1), :] for dx in range(3)], axis=1)
        part = jnp.dot(lhs, w1_ref[dy], preferred_element_type=jnp.float32)
        acc = part if acc is None else acc + part

    # ---- 3. Fused epilogue: BN1 shift + SiLU (Dropout(0.5)=id in eval), then
    #         bulk column-reflect-pad and store the conv2 input slab. ---------
    a = acc + sh1_ref[...]
    a = a * jax.nn.sigmoid(a)                                   # SiLU, f32
    a = a.reshape(NR, Wpa, C)
    pieces = [a[:, 1:2, :], a[:, :W, :], a[:, W - 2:W - 1, :]]
    if npad:
        pieces.append(jnp.zeros((NR, npad, C), jnp.float32))
    ap = jnp.concatenate(pieces, axis=1).reshape(NR * Wpa, C)
    slab2_ref[pl.ds(0, NR * Wpa), :] = ap.astype(jnp.bfloat16)

    # Row-reflection fixups: only the first / last row tile has one slab row
    # whose conv1 result is invalid (it maps to an out-of-range image row);
    # overwrite it with the in-range duplicate required by ReflectionPad2d(1).
    @pl.when(t0 == 0)
    def _():
        dup = slab2_ref[pl.ds(2 * Wpa, Wpa), :]
        slab2_ref[pl.ds(0, Wpa), :] = dup

    @pl.when(t0 + TH == H)
    def _():
        dup = slab2_ref[pl.ds((TH - 1) * Wpa, Wpa), :]
        slab2_ref[pl.ds((TH + 1) * Wpa, Wpa), :] = dup

    # ---- 4. Conv2 (+folded BN2 scale): same 3-way split-K accumulation. -----
    acc2 = None
    for dy in range(3):
        lhs = jnp.concatenate(
            [slab2_ref[pl.ds(dy * Wpa + dx, L2), :] for dx in range(3)], axis=1)
        part = jnp.dot(lhs, w2_ref[dy], preferred_element_type=jnp.float32)
        acc2 = part if acc2 is None else acc2 + part

    # ---- 5. BN2 shift + residual add (all f32); drop garbage columns. -------
    y = acc2.reshape(TH, Wpa, C)[:, :W, :]
    res = x_ref[0, pl.ds(t0, TH), :, :]                          # (TH, W, C) f32
    o_ref[0] = (res + y + sh2_ref[...]).astype(o_ref.dtype)


# ----------------------------------------------------------------------------
# Wrapper
# ----------------------------------------------------------------------------
def _fold_bn(gamma, beta, mean, var, eps=1e-5):
    scale = gamma / jnp.sqrt(var + eps)
    shift = beta - mean * scale
    return scale, shift


def _default_max_tile_h():
    """TH cap from physical VMEM: 32 on 128-MiB parts (v5e/v6e) to cut halo
    re-compute, 16 otherwise (v7x has 64 MiB/TC).  Conservative fallback."""
    try:
        vmem = int(pltpu.get_tpu_info().vmem_capacity_bytes)
    except Exception:
        vmem = 64 << 20
    return 32 if vmem >= (100 << 20) else 16


def _pick_tile_h(H, max_th):
    for th in (32, 16, 8, 4, 2, 1):
        if th <= max_th and H % th == 0:
            return th
    return 1


def _resident_spec(shape, index_map):
    """BlockSpec for constant-index inputs: single-buffer when supported
    (avoids a duplicate VMEM copy of the weights)."""
    try:
        return pl.BlockSpec(shape, index_map, pipeline_mode=pl.Buffered(1))
    except Exception:
        return pl.BlockSpec(shape, index_map)


@functools.partial(jax.jit, static_argnames=("max_tile_h",))
def resblock_forward(x_nchw, params, max_tile_h=None):
    """ResBlock eval-mode forward.  x_nchw: (N, C, H, W) float32."""
    N, C, H, W = x_nchw.shape
    if max_tile_h is None:
        max_tile_h = _default_max_tile_h()
    TH = _pick_tile_h(H, max_tile_h)
    T = H // TH
    Wpa = ((W + 2 + 7) // 8) * 8          # 8-aligned flat row stride (72 @ W=64)

    # NHWC: channels ride the lane dim (lane-dense for C >= 128; tiny-C shapes
    # are correctness-only).
    x = jnp.transpose(x_nchw, (0, 2, 3, 1))

    def prep_w(w_torch, scale):
        # (Cout,Cin,3,3) -> (ky,kx,Cin,Cout), fold BN scale, -> (3, 3*Cin, Cout)
        w = jnp.transpose(w_torch, (2, 3, 1, 0)) * scale
        return w.reshape(3, 3 * C, C).astype(jnp.bfloat16)

    sc1, sh1 = _fold_bn(params["g1"], params["b1"], params["m1"], params["v1"])
    sc2, sh2 = _fold_bn(params["g2"], params["b2"], params["m2"], params["v2"])
    w1 = prep_w(params["w1"], sc1)
    w2 = prep_w(params["w2"], sc2)
    sh1 = sh1.reshape(1, C).astype(jnp.float32)
    sh2 = sh2.reshape(1, C).astype(jnp.float32)

    kernel = functools.partial(resblock_kernel, H=H, W=W, TH=TH, Wpa=Wpa)
    out = pl.pallas_call(
        kernel,
        out_shape=jax.ShapeDtypeStruct((N, H, W, C), x.dtype),
        grid=(N, T),
        in_specs=[
            pl.BlockSpec((1, H, W, C), lambda n, t: (n, 0, 0, 0)),    # image
            _resident_spec((3, 3 * C, C), lambda n, t: (0, 0, 0)),    # w1
            _resident_spec((3, 3 * C, C), lambda n, t: (0, 0, 0)),    # w2
            _resident_spec((1, C), lambda n, t: (0, 0)),              # shift1
            _resident_spec((1, C), lambda n, t: (0, 0)),              # shift2
        ],
        out_specs=pl.BlockSpec((1, TH, W, C), lambda n, t: (n, t, 0, 0)),
        scratch_shapes=[
            pltpu.VMEM(((TH + 5) * Wpa, C), jnp.bfloat16),   # conv1 input slab
            pltpu.VMEM(((TH + 3) * Wpa, C), jnp.bfloat16),   # conv2 input slab
        ],
        compiler_params=pltpu.CompilerParams(
            dimension_semantics=("parallel", "parallel"),
            vmem_limit_bytes=(100 << 20) if TH > 16 else (48 << 20),
        ),
    )(x, w1, w2, sh1, sh2)

    return jnp.transpose(out, (0, 3, 1, 2))                   # back to NCHW


# ----------------------------------------------------------------------------
# Pure-JAX reference for correctness checks.
# ----------------------------------------------------------------------------
def resblock_reference(x_nchw, params, conv_dtype=jnp.float32):
    """conv_dtype=float32 reproduces the PyTorch module's f32 math exactly;
    conv_dtype=bfloat16 mirrors the kernel's MXU precision (bf16 operands,
    f32 accumulate) so structural errors are isolated at large C."""
    x = jnp.transpose(x_nchw, (0, 2, 3, 1))
    pad = ((0, 0), (1, 1), (1, 1), (0, 0))
    dn = ("NHWC", "HWIO", "NHWC")

    def conv(z, w_torch, scale):
        w = (jnp.transpose(w_torch, (2, 3, 1, 0)) * scale).astype(conv_dtype)
        z = jnp.pad(z, pad, mode="reflect").astype(conv_dtype)
        return lax.conv_general_dilated(z, w, (1, 1), "VALID",
                                        dimension_numbers=dn,
                                        preferred_element_type=jnp.float32)

    s1, t1 = _fold_bn(params["g1"], params["b1"], params["m1"], params["v1"])
    s2, t2 = _fold_bn(params["g2"], params["b2"], params["m2"], params["v2"])

    y = conv(x, params["w1"], s1) + t1
    y = y * jax.nn.sigmoid(y)                     # SiLU; Dropout(0.5) eval = id
    y = conv(y, params["w2"], s2) + t2
    return jnp.transpose(x + y, (0, 3, 1, 2))


# ----------------------------------------------------------------------------
def make_params(key, dim):
    ks = jax.random.split(key, 10)
    return {
        "w1": 0.1 * jax.random.normal(ks[0], (dim, dim, 3, 3), jnp.float32),
        "w2": 0.1 * jax.random.normal(ks[1], (dim, dim, 3, 3), jnp.float32),
        "g1": jax.random.uniform(ks[2], (dim,), jnp.float32, 0.5, 1.5),
        "b1": 0.1 * jax.random.normal(ks[3], (dim,), jnp.float32),
        "m1": 0.1 * jax.random.normal(ks[4], (dim,), jnp.float32),
        "v1": jax.random.uniform(ks[5], (dim,), jnp.float32, 0.5, 1.5),
        "g2": jax.random.uniform(ks[6], (dim,), jnp.float32, 0.5, 1.5),
        "b2": 0.1 * jax.random.normal(ks[7], (dim,), jnp.float32),
        "m2": 0.1 * jax.random.normal(ks[8], (dim,), jnp.float32),
        "v2": jax.random.uniform(ks[9], (dim,), jnp.float32, 0.5, 1.5),
    }


if __name__ == "__main__":
    key = jax.random.PRNGKey(0)
    cases = [
        # (N, C, H, W, max_tile_h)  -- max_tile_h=None -> auto (hardware VMEM)
        (2, 4, 16, 16, None),   # baseline small shape
        (2, 4, 16, 16, 4),      # 4 row tiles: first / interior / last paths
        (1, 128, 16, 16, 8),    # lane-dense channel count (review concern)
    ]
    for (n, c, h, w, mth) in cases:
        key, kx, kp = jax.random.split(key, 3)
        x = jax.random.normal(kx, (n, c, h, w), jnp.float32)
        params = make_params(kp, c)

        out = jax.block_until_ready(resblock_forward(x, params, max_tile_h=mth))

        if c >= 128:
            # bf16-operand reference isolates structural errors from the
            # intentional bf16 MXU rounding at large K = 9*C.
            ref = resblock_reference(x, params, conv_dtype=jnp.bfloat16)
            rtol = atol = 1e-2
        else:
            ref = resblock_reference(x, params)   # exact f32 module math
            rtol = atol = 2e-2
        np.testing.assert_allclose(np.asarray(out), np.asarray(ref),
                                   rtol=rtol, atol=atol)
    print("KERNEL_OK")
</pallas_src>

<mosaic_0001>
module attributes {stable_mosaic.version = 11 : i64} {
  func.func @resblock_kernel(%arg0: i32, %arg1: i32, %arg2: memref<1x16x16x4xf32, #tpu.memory_space<vmem>>, %arg3: memref<3x12x4xbf16, #tpu.memory_space<vmem>>, %arg4: memref<3x12x4xbf16, #tpu.memory_space<vmem>>, %arg5: memref<1x4xf32, #tpu.memory_space<vmem>>, %arg6: memref<1x4xf32, #tpu.memory_space<vmem>>, %arg7: memref<1x16x16x4xf32, #tpu.memory_space<vmem>>, %arg8: memref<504x4xbf16, #tpu.memory_space<vmem>>, %arg9: memref<456x4xbf16, #tpu.memory_space<vmem>>) attributes {dimension_semantics = [#tpu.dimension_semantics<parallel>, #tpu.dimension_semantics<parallel>], iteration_bounds = array<i64: 2, 1>, scalar_prefetch = 0 : i64, scratch_operands = 2 : i64, tpu.core_type = #tpu.core_type<tc>, window_params = [{transform_indices = @transform_0, window_bounds = array<i64: 1, 16, 16, 4>}, {pipeline_mode = #tpu.pipeline_mode<synchronous>, transform_indices = @transform_1, window_bounds = array<i64: 3, 12, 4>}, {pipeline_mode = #tpu.pipeline_mode<synchronous>, transform_indices = @transform_2, window_bounds = array<i64: 3, 12, 4>}, {pipeline_mode = #tpu.pipeline_mode<synchronous>, transform_indices = @transform_3, window_bounds = array<i64: 1, 4>}, {pipeline_mode = #tpu.pipeline_mode<synchronous>, transform_indices = @transform_4, window_bounds = array<i64: 1, 4>}, {transform_indices = @transform_5, window_bounds = array<i64: 1, 16, 16, 4>}]} {
    %c16_i32 = arith.constant 16 : i32
    %0 = arith.muli %arg1, %c16_i32 : i32
    %c2_i32 = arith.constant 2 : i32
    %1 = arith.subi %0, %c2_i32 : i32
    %c0_i32 = arith.constant 0 : i32
    %2 = arith.addi %1, %c0_i32 : i32
    %c0_i32_0 = arith.constant 0 : i32
    %3 = arith.cmpi slt, %2, %c0_i32_0 : i32
    %c0_i32_1 = arith.constant 0 : i32
    %4 = arith.subi %c0_i32_1, %2 : i32
    %5 = arith.select %3, %4, %2 : i32
    %c15_i32 = arith.constant 15 : i32
    %6 = arith.cmpi sgt, %5, %c15_i32 : i32
    %c30_i32 = arith.constant 30 : i32
    %7 = arith.subi %c30_i32, %5 : i32
    %8 = arith.select %6, %7, %5 : i32
    %c0_i32_2 = arith.constant 0 : i32
    %c15_i32_3 = arith.constant 15 : i32
    %9 = arith.maxsi %c0_i32_2, %8 : i32
    %10 = arith.minsi %c15_i32_3, %9 : i32
    %c0 = arith.constant 0 : index
    %11 = arith.index_cast %10 : i32 to index
    %c0_4 = arith.constant 0 : index
    %c0_5 = arith.constant 0 : index
    %12 = vector.load %arg2[%c0, %11, %c0_4, %c0_5] : memref<1x16x16x4xf32, #tpu.memory_space<vmem>>, vector<1x1x16x4xf32>
    %13 = vector.shape_cast %12 : vector<1x1x16x4xf32> to vector<1x16x4xf32>
    %14 = arith.truncf %13 : vector<1x16x4xf32> to vector<1x16x4xbf16>
    %15 = vector.extract_strided_slice %14 {offsets = [0, 1, 0], sizes = [1, 1, 4], strides = [1, 1, 1]} : vector<1x16x4xbf16> to vector<1x1x4xbf16>
    %16 = vector.extract_strided_slice %14 {offsets = [0, 14, 0], sizes = [1, 1, 4], strides = [1, 1, 1]} : vector<1x16x4xbf16> to vector<1x1x4xbf16>
    %17 = tpu.concatenate %15, %14, %16 in 1 : vector<1x1x4xbf16>, vector<1x16x4xbf16>, vector<1x1x4xbf16> -> vector<1x18x4xbf16>
    %18 = vector.shape_cast %17 : vector<1x18x4xbf16> to vector<18x4xbf16>
    %c0_6 = arith.constant 0 : index
    %c0_7 = arith.constant 0 : index
    %19 = vector.load %arg8[%c0_6, %c0_7] : memref<504x4xbf16, #tpu.memory_space<vmem>>, vector<18x4xbf16>
    tpu.vector_store %arg8[%c0_6, %c0_7], %18 {strides = array<i32>} : memref<504x4xbf16, #tpu.memory_space<vmem>>, vector<18x4xbf16>,
    %c2_i32_8 = arith.constant 2 : i32
    %20 = arith.subi %0, %c2_i32_8 : i32
    %c1_i32 = arith.constant 1 : i32
    %21 = arith.addi %20, %c1_i32 : i32
    %c0_i32_9 = arith.constant 0 : i32
    %22 = arith.cmpi slt, %21, %c0_i32_9 : i32
    %c0_i32_10 = arith.constant 0 : i32
    %23 = arith.subi %c0_i32_10, %21 : i32
    %24 = arith.select %22, %23, %21 : i32
    %c15_i32_11 = arith.constant 15 : i32
    %25 = arith.cmpi sgt, %24, %c15_i32_11 : i32
    %c30_i32_12 = arith.constant 30 : i32
    %26 = arith.subi %c30_i32_12, %24 : i32
    %27 = arith.select %25, %26, %24 : i32
    %c0_i32_13 = arith.constant 0 : i32
    %c15_i32_14 = arith.constant 15 : i32
    %28 = arith.maxsi %c0_i32_13, %27 : i32
    %29 = arith.minsi %c15_i32_14, %28 : i32
    %c0_15 = arith.constant 0 : index
    %30 = arith.index_cast %29 : i32 to index
    %c0_16 = arith.constant 0 : index
    %c0_17 = arith.constant 0 : index
    %31 = vector.load %arg2[%c0_15, %30, %c0_16, %c0_17] : memref<1x16x16x4xf32, #tpu.memory_space<vmem>>, vector<1x1x16x4xf32>
    %32 = vector.shape_cast %31 : vector<1x1x16x4xf32> to vector<1x16x4xf32>
    %33 = arith.truncf %32 : vector<1x16x4xf32> to vector<1x16x4xbf16>
    %34 = vector.extract_strided_slice %33 {offsets = [0, 1, 0], sizes = [1, 1, 4], strides = [1, 1, 1]} : vector<1x16x4xbf16> to vector<1x1x4xbf16>
    %35 = vector.extract_strided_slice %33 {offsets = [0, 14, 0], sizes = [1, 1, 4], strides = [1, 1, 1]} : vector<1x16x4xbf16> to vector<1x1x4xbf16>
    %36 = tpu.concatenate %34, %33, %35 in 1 : vector<1x1x4xbf16>, vector<1x16x4xbf16>, vector<1x1x4xbf16> -> vector<1x18x4xbf16>
    %37 = vector.shape_cast %36 : vector<1x18x4xbf16> to vector<18x4xbf16>
    %c24 = arith.constant 24 : index
    %c0_18 = arith.constant 0 : index
    %38 = vector.load %arg8[%c24, %c0_18] : memref<504x4xbf16, #tpu.memory_space<vmem>>, vector<18x4xbf16>
    tpu.vector_store %arg8[%c24, %c0_18], %37 {strides = array<i32>} : memref<504x4xbf16, #tpu.memory_space<vmem>>, vector<18x4xbf16>,
    %c2_i32_19 = arith.constant 2 : i32
    %39 = arith.subi %0, %c2_i32_19 : i32
    %c2_i32_20 = arith.constant 2 : i32
    %40 = arith.addi %39, %c2_i32_20 : i32
    %c0_i32_21 = arith.constant 0 : i32
    %41 = arith.cmpi slt, %40, %c0_i32_21 : i32
    %c0_i32_22 = arith.constant 0 : i32
    %42 = arith.subi %c0_i32_22, %40 : i32
    %43 = arith.select %41, %42, %40 : i32
    %c15_i32_23 = arith.constant 15 : i32
    %44 = arith.cmpi sgt, %43, %c15_i32_23 : i32
    %c30_i32_24 = arith.constant 30 : i32
    %45 = arith.subi %c30_i32_24, %43 : i32
    %46 = arith.select %44, %45, %43 : i32
    %c0_i32_25 = arith.constant 0 : i32
    %c15_i32_26 = arith.constant 15 : i32
    %47 = arith.maxsi %c0_i32_25, %46 : i32
    %48 = arith.minsi %c15_i32_26, %47 : i32
    %c0_27 = arith.constant 0 : index
    %49 = arith.index_cast %48 : i32 to index
    %c0_28 = arith.constant 0 : index
    %c0_29 = arith.constant 0 : index
    %50 = vector.load %arg2[%c0_27, %49, %c0_28, %c0_29] : memref<1x16x16x4xf32, #tpu.memory_space<vmem>>, vector<1x1x16x4xf32>
    %51 = vector.shape_cast %50 : vector<1x1x16x4xf32> to vector<1x16x4xf32>
    %52 = arith.truncf %51 : vector<1x16x4xf32> to vector<1x16x4xbf16>
    %53 = vector.extract_strided_slice %52 {offsets = [0, 1, 0], sizes = [1, 1, 4], strides = [1, 1, 1]} : vector<1x16x4xbf16> to vector<1x1x4xbf16>
    %54 = vector.extract_strided_slice %52 {offsets = [0, 14, 0], sizes = [1, 1, 4], strides = [1, 1, 1]} : vector<1x16x4xbf16> to vector<1x1x4xbf16>
    %55 = tpu.concatenate %53, %52, %54 in 1 : vector<1x1x4xbf16>, vector<1x16x4xbf16>, vector<1x1x4xbf16> -> vector<1x18x4xbf16>
    %56 = vector.shape_cast %55 : vector<1x18x4xbf16> to vector<18x4xbf16>
    %c48 = arith.constant 48 : index
    %c0_30 = arith.constant 0 : index
    %57 = vector.load %arg8[%c48, %c0_30] : memref<504x4xbf16, #tpu.memory_space<vmem>>, vector<18x4xbf16>
    tpu.vector_store %arg8[%c48, %c0_30], %56 {strides = array<i32>} : memref<504x4xbf16, #tpu.memory_space<vmem>>, vector<18x4xbf16>,
    %c2_i32_31 = arith.constant 2 : i32
    %58 = arith.subi %0, %c2_i32_31 : i32
    %c3_i32 = arith.constant 3 : i32
    %59 = arith.addi %58, %c3_i32 : i32
    %c0_i32_32 = arith.constant 0 : i32
    %60 = arith.cmpi slt, %59, %c0_i32_32 : i32
    %c0_i32_33 = arith.constant 0 : i32
    %61 = arith.subi %c0_i32_33, %59 : i32
    %62 = arith.select %60, %61, %59 : i32
    %c15_i32_34 = arith.constant 15 : i32
    %63 = arith.cmpi sgt, %62, %c15_i32_34 : i32
    %c30_i32_35 = arith.constant 30 : i32
    %64 = arith.subi %c30_i32_35, %62 : i32
    %65 = arith.select %63, %64, %62 : i32
    %c0_i32_36 = arith.constant 0 : i32
    %c15_i32_37 = arith.constant 15 : i32
    %66 = arith.maxsi %c0_i32_36, %65 : i32
    %67 = arith.minsi %c15_i32_37, %66 : i32
    %c0_38 = arith.constant 0 : index
    %68 = arith.index_cast %67 : i32 to index
    %c0_39 = arith.constant 0 : index
    %c0_40 = arith.constant 0 : index
    %69 = vector.load %arg2[%c0_38, %68, %c0_39, %c0_40] : memref<1x16x16x4xf32, #tpu.memory_space<vmem>>, vector<1x1x16x4xf32>
    %70 = vector.shape_cast %69 : vector<1x1x16x4xf32> to vector<1x16x4xf32>
    %71 = arith.truncf %70 : vector<1x16x4xf32> to vector<1x16x4xbf16>
    %72 = vector.extract_strided_slice %71 {offsets = [0, 1, 0], sizes = [1, 1, 4], strides = [1, 1, 1]} : vector<1x16x4xbf16> to vector<1x1x4xbf16>
    %73 = vector.extract_strided_slice %71 {offsets = [0, 14, 0], sizes = [1, 1, 4], strides = [1, 1, 1]} : vector<1x16x4xbf16> to vector<1x1x4xbf16>
    %74 = tpu.concatenate %72, %71, %73 in 1 : vector<1x1x4xbf16>, vector<1x16x4xbf16>, vector<1x1x4xbf16> -> vector<1x18x4xbf16>
    %75 = vector.shape_cast %74 : vector<1x18x4xbf16> to vector<18x4xbf16>
    %c72 = arith.constant 72 : index
    %c0_41 = arith.constant 0 : index
    %76 = vector.load %arg8[%c72, %c0_41] : memref<504x4xbf16, #tpu.memory_space<vmem>>, vector<18x4xbf16>
    tpu.vector_store %arg8[%c72, %c0_41], %75 {strides = array<i32>} : memref<504x4xbf16, #tpu.memory_space<vmem>>, vector<18x4xbf16>,
    %c2_i32_42 = arith.constant 2 : i32
    %77 = arith.subi %0, %c2_i32_42 : i32
    %c4_i32 = arith.constant 4 : i32
    %78 = arith.addi %77, %c4_i32 : i32
    %c0_i32_43 = arith.constant 0 : i32
    %79 = arith.cmpi slt, %78, %c0_i32_43 : i32
    %c0_i32_44 = arith.constant 0 : i32
    %80 = arith.subi %c0_i32_44, %78 : i32
    %81 = arith.select %79, %80, %78 : i32
    %c15_i32_45 = arith.constant 15 : i32
    %82 = arith.cmpi sgt, %81, %c15_i32_45 : i32
    %c30_i32_46 = arith.constant 30 : i32
    %83 = arith.subi %c30_i32_46, %81 : i32
    %84 = arith.select %82, %83, %81 : i32
    %c0_i32_47 = arith.constant 0 : i32
    %c15_i32_48 = arith.constant 15 : i32
    %85 = arith.maxsi %c0_i32_47, %84 : i32
    %86 = arith.minsi %c15_i32_48, %85 : i32
    %c0_49 = arith.constant 0 : index
    %87 = arith.index_cast %86 : i32 to index
    %c0_50 = arith.constant 0 : index
    %c0_51 = arith.constant 0 : index
    %88 = vector.load %arg2[%c0_49, %87, %c0_50, %c0_51] : memref<1x16x16x4xf32, #tpu.memory_space<vmem>>, vector<1x1x16x4xf32>
    %89 = vector.shape_cast %88 : vector<1x1x16x4xf32> to vector<1x16x4xf32>
    %90 = arith.truncf %89 : vector<1x16x4xf32> to vector<1x16x4xbf16>
    %91 = vector.extract_strided_slice %90 {offsets = [0, 1, 0], sizes = [1, 1, 4], strides = [1, 1, 1]} : vector<1x16x4xbf16> to vector<1x1x4xbf16>
    %92 = vector.extract_strided_slice %90 {offsets = [0, 14, 0], sizes = [1, 1, 4], strides = [1, 1, 1]} : vector<1x16x4xbf16> to vector<1x1x4xbf16>
    %93 = tpu.concatenate %91, %90, %92 in 1 : vector<1x1x4xbf16>, vector<1x16x4xbf16>, vector<1x1x4xbf16> -> vector<1x18x4xbf16>
    %94 = vector.shape_cast %93 : vector<1x18x4xbf16> to vector<18x4xbf16>
    %c96 = arith.constant 96 : index
    %c0_52 = arith.constant 0 : index
    %95 = vector.load %arg8[%c96, %c0_52] : memref<504x4xbf16, #tpu.memory_space<vmem>>, vector<18x4xbf16>
    tpu.vector_store %arg8[%c96, %c0_52], %94 {strides = array<i32>} : memref<504x4xbf16, #tpu.memory_space<vmem>>, vector<18x4xbf16>,
    %c2_i32_53 = arith.constant 2 : i32
    %96 = arith.subi %0, %c2_i32_53 : i32
    %c5_i32 = arith.constant 5 : i32
    %97 = arith.addi %96, %c5_i32 : i32
    %c0_i32_54 = arith.constant 0 : i32
    %98 = arith.cmpi slt, %97, %c0_i32_54 : i32
    %c0_i32_55 = arith.constant 0 : i32
    %99 = arith.subi %c0_i32_55, %97 : i32
    %100 = arith.select %98, %99, %97 : i32
    %c15_i32_56 = arith.constant 15 : i32
    %101 = arith.cmpi sgt, %100, %c15_i32_56 : i32
    %c30_i32_57 = arith.constant 30 : i32
    %102 = arith.subi %c30_i32_57, %100 : i32
    %103 = arith.select %101, %102, %100 : i32
    %c0_i32_58 = arith.constant 0 : i32
    %c15_i32_59 = arith.constant 15 : i32
    %104 = arith.maxsi %c0_i32_58, %103 : i32
    %105 = arith.minsi %c15_i32_59, %104 : i32
    %c0_60 = arith.constant 0 : index
    %106 = arith.index_cast %105 : i32 to index
    %c0_61 = arith.constant 0 : index
    %c0_62 = arith.constant 0 : index
    %107 = vector.load %arg2[%c0_60, %106, %c0_61, %c0_62] : memref<1x16x16x4xf32, #tpu.memory_space<vmem>>, vector<1x1x16x4xf32>
    %108 = vector.shape_cast %107 : vector<1x1x16x4xf32> to vector<1x16x4xf32>
    %109 = arith.truncf %108 : vector<1x16x4xf32> to vector<1x16x4xbf16>
    %110 = vector.extract_strided_slice %109 {offsets = [0, 1, 0], sizes = [1, 1, 4], strides = [1, 1, 1]} : vector<1x16x4xbf16> to vector<1x1x4xbf16>
    %111 = vector.extract_strided_slice %109 {offsets = [0, 14, 0], sizes = [1, 1, 4], strides = [1, 1, 1]} : vector<1x16x4xbf16> to vector<1x1x4xbf16>
    %112 = tpu.concatenate %110, %109, %111 in 1 : vector<1x1x4xbf16>, vector<1x16x4xbf16>, vector<1x1x4xbf16> -> vector<1x18x4xbf16>
    %113 = vector.shape_cast %112 : vector<1x18x4xbf16> to vector<18x4xbf16>
    %c120 = arith.constant 120 : index
    %c0_63 = arith.constant 0 : index
    %114 = vector.load %arg8[%c120, %c0_63] : memref<504x4xbf16, #tpu.memory_space<vmem>>, vector<18x4xbf16>
    tpu.vector_store %arg8[%c120, %c0_63], %113 {strides = array<i32>} : memref<504x4xbf16, #tpu.memory_space<vmem>>, vector<18x4xbf16>,
    %c2_i32_64 = arith.constant 2 : i32
    %115 = arith.subi %0, %c2_i32_64 : i32
    %c6_i32 = arith.constant 6 : i32
    %116 = arith.addi %115, %c6_i32 : i32
    %c0_i32_65 = arith.constant 0 : i32
    %117 = arith.cmpi slt, %116, %c0_i32_65 : i32
    %c0_i32_66 = arith.constant 0 : i32
    %118 = arith.subi %c0_i32_66, %116 : i32
    %119 = arith.select %117, %118, %116 : i32
    %c15_i32_67 = arith.constant 15 : i32
    %120 = arith.cmpi sgt, %119, %c15_i32_67 : i32
    %c30_i32_68 = arith.constant 30 : i32
    %121 = arith.subi %c30_i32_68, %119 : i32
    %122 = arith.select %120, %121, %119 : i32
    %c0_i32_69 = arith.constant 0 : i32
    %c15_i32_70 = arith.constant 15 : i32
    %123 = arith.maxsi %c0_i32_69, %122 : i32
    %124 = arith.minsi %c15_i32_70, %123 : i32
    %c0_71 = arith.constant 0 : index
    %125 = arith.index_cast %124 : i32 to index
    %c0_72 = arith.constant 0 : index
    %c0_73 = arith.constant 0 : index
    %126 = vector.load %arg2[%c0_71, %125, %c0_72, %c0_73] : memref<1x16x16x4xf32, #tpu.memory_space<vmem>>, vector<1x1x16x4xf32>
    %127 = vector.shape_cast %126 : vector<1x1x16x4xf32> to vector<1x16x4xf32>
    %128 = arith.truncf %127 : vector<1x16x4xf32> to vector<1x16x4xbf16>
    %129 = vector.extract_strided_slice %128 {offsets = [0, 1, 0], sizes = [1, 1, 4], strides = [1, 1, 1]} : vector<1x16x4xbf16> to vector<1x1x4xbf16>
    %130 = vector.extract_strided_slice %128 {offsets = [0, 14, 0], sizes = [1, 1, 4], strides = [1, 1, 1]} : vector<1x16x4xbf16> to vector<1x1x4xbf16>
    %131 = tpu.concatenate %129, %128, %130 in 1 : vector<1x1x4xbf16>, vector<1x16x4xbf16>, vector<1x1x4xbf16> -> vector<1x18x4xbf16>
    %132 = vector.shape_cast %131 : vector<1x18x4xbf16> to vector<18x4xbf16>
    %c144 = arith.constant 144 : index
    %c0_74 = arith.constant 0 : index
    %133 = vector.load %arg8[%c144, %c0_74] : memref<504x4xbf16, #tpu.memory_space<vmem>>, vector<18x4xbf16>
    tpu.vector_store %arg8[%c144, %c0_74], %132 {strides = array<i32>} : memref<504x4xbf16, #tpu.memory_space<vmem>>, vector<18x4xbf16>,
    %c2_i32_75 = arith.constant 2 : i32
    %134 = arith.subi %0, %c2_i32_75 : i32
    %c7_i32 = arith.constant 7 : i32
    %135 = arith.addi %134, %c7_i32 : i32
    %c0_i32_76 = arith.constant 0 : i32
    %136 = arith.cmpi slt, %135, %c0_i32_76 : i32
    %c0_i32_77 = arith.constant 0 : i32
    %137 = arith.subi %c0_i32_77, %135 : i32
    %138 = arith.select %136, %137, %135 : i32
    %c15_i32_78 = arith.constant 15 : i32
    %139 = arith.cmpi sgt, %138, %c15_i32_78 : i32
    %c30_i32_79 = arith.constant 30 : i32
    %140 = arith.subi %c30_i32_79, %138 : i32
    %141 = arith.select %139, %140, %138 : i32
    %c0_i32_80 = arith.constant 0 : i32
    %c15_i32_81 = arith.constant 15 : i32
    %142 = arith.maxsi %c0_i32_80, %141 : i32
    %143 = arith.minsi %c15_i32_81, %142 : i32
    %c0_82 = arith.constant 0 : index
    %144 = arith.index_cast %143 : i32 to index
    %c0_83 = arith.constant 0 : index
    %c0_84 = arith.constant 0 : index
    %145 = vector.load %arg2[%c0_82, %144, %c0_83, %c0_84] : memref<1x16x16x4xf32, #tpu.memory_space<vmem>>, vector<1x1x16x4xf32>
    %146 = vector.shape_cast %145 : vector<1x1x16x4xf32> to vector<1x16x4xf32>
    %147 = arith.truncf %146 : vector<1x16x4xf32> to vector<1x16x4xbf16>
    %148 = vector.extract_strided_slice %147 {offsets = [0, 1, 0], sizes = [1, 1, 4], strides = [1, 1, 1]} : vector<1x16x4xbf16> to vector<1x1x4xbf16>
    %149 = vector.extract_strided_slice %147 {offsets = [0, 14, 0], sizes = [1, 1, 4], strides = [1, 1, 1]} : vector<1x16x4xbf16> to vector<1x1x4xbf16>
    %150 = tpu.concatenate %148, %147, %149 in 1 : vector<1x1x4xbf16>, vector<1x16x4xbf16>, vector<1x1x4xbf16> -> vector<1x18x4xbf16>
    %151 = vector.shape_cast %150 : vector<1x18x4xbf16> to vector<18x4xbf16>
    %c168 = arith.constant 168 : index
    %c0_85 = arith.constant 0 : index
    %152 = vector.load %arg8[%c168, %c0_85] : memref<504x4xbf16, #tpu.memory_space<vmem>>, vector<18x4xbf16>
    tpu.vector_store %arg8[%c168, %c0_85], %151 {strides = array<i32>} : memref<504x4xbf16, #tpu.memory_space<vmem>>, vector<18x4xbf16>,
    %c2_i32_86 = arith.constant 2 : i32
    %153 = arith.subi %0, %c2_i32_86 : i32
    %c8_i32 = arith.constant 8 : i32
    %154 = arith.addi %153, %c8_i32 : i32
    %c0_i32_87 = arith.constant 0 : i32
    %155 = arith.cmpi slt, %154, %c0_i32_87 : i32
    %c0_i32_88 = arith.constant 0 : i32
    %156 = arith.subi %c0_i32_88, %154 : i32
    %157 = arith.select %155, %156, %154 : i32
    %c15_i32_89 = arith.constant 15 : i32
    %158 = arith.cmpi sgt, %157, %c15_i32_89 : i32
    %c30_i32_90 = arith.constant 30 : i32
    %159 = arith.subi %c30_i32_90, %157 : i32
    %160 = arith.select %158, %159, %157 : i32
    %c0_i32_91 = arith.constant 0 : i32
    %c15_i32_92 = arith.constant 15 : i32
    %161 = arith.maxsi %c0_i32_91, %160 : i32
    %162 = arith.minsi %c15_i32_92, %161 : i32
    %c0_93 = arith.constant 0 : index
    %163 = arith.index_cast %162 : i32 to index
    %c0_94 = arith.constant 0 : index
    %c0_95 = arith.constant 0 : index
    %164 = vector.load %arg2[%c0_93, %163, %c0_94, %c0_95] : memref<1x16x16x4xf32, #tpu.memory_space<vmem>>, vector<1x1x16x4xf32>
    %165 = vector.shape_cast %164 : vector<1x1x16x4xf32> to vector<1x16x4xf32>
    %166 = arith.truncf %165 : vector<1x16x4xf32> to vector<1x16x4xbf16>
    %167 = vector.extract_strided_slice %166 {offsets = [0, 1, 0], sizes = [1, 1, 4], strides = [1, 1, 1]} : vector<1x16x4xbf16> to vector<1x1x4xbf16>
    %168 = vector.extract_strided_slice %166 {offsets = [0, 14, 0], sizes = [1, 1, 4], strides = [1, 1, 1]} : vector<1x16x4xbf16> to vector<1x1x4xbf16>
    %169 = tpu.concatenate %167, %166, %168 in 1 : vector<1x1x4xbf16>, vector<1x16x4xbf16>, vector<1x1x4xbf16> -> vector<1x18x4xbf16>
    %170 = vector.shape_cast %169 : vector<1x18x4xbf16> to vector<18x4xbf16>
    %c192 = arith.constant 192 : index
    %c0_96 = arith.constant 0 : index
    %171 = vector.load %arg8[%c192, %c0_96] : memref<504x4xbf16, #tpu.memory_space<vmem>>, vector<18x4xbf16>
    tpu.vector_store %arg8[%c192, %c0_96], %170 {strides = array<i32>} : memref<504x4xbf16, #tpu.memory_space<vmem>>, vector<18x4xbf16>,
    %c2_i32_97 = arith.constant 2 : i32
    %172 = arith.subi %0, %c2_i32_97 : i32
    %c9_i32 = arith.constant 9 : i32
    %173 = arith.addi %172, %c9_i32 : i32
    %c0_i32_98 = arith.constant 0 : i32
    %174 = arith.cmpi slt, %173, %c0_i32_98 : i32
    %c0_i32_99 = arith.constant 0 : i32
    %175 = arith.subi %c0_i32_99, %173 : i32
    %176 = arith.select %174, %175, %173 : i32
    %c15_i32_100 = arith.constant 15 : i32
    %177 = arith.cmpi sgt, %176, %c15_i32_100 : i32
    %c30_i32_101 = arith.constant 30 : i32
    %178 = arith.subi %c30_i32_101, %176 : i32
    %179 = arith.select %177, %178, %176 : i32
    %c0_i32_102 = arith.constant 0 : i32
    %c15_i32_103 = arith.constant 15 : i32
    %180 = arith.maxsi %c0_i32_102, %179 : i32
    %181 = arith.minsi %c15_i32_103, %180 : i32
    %c0_104 = arith.constant 0 : index
    %182 = arith.index_cast %181 : i32 to index
    %c0_105 = arith.constant 0 : index
    %c0_106 = arith.constant 0 : index
    %183 = vector.load %arg2[%c0_104, %182, %c0_105, %c0_106] : memref<1x16x16x4xf32, #tpu.memory_space<vmem>>, vector<1x1x16x4xf32>
    %184 = vector.shape_cast %183 : vector<1x1x16x4xf32> to vector<1x16x4xf32>
    %185 = arith.truncf %184 : vector<1x16x4xf32> to vector<1x16x4xbf16>
    %186 = vector.extract_strided_slice %185 {offsets = [0, 1, 0], sizes = [1, 1, 4], strides = [1, 1, 1]} : vector<1x16x4xbf16> to vector<1x1x4xbf16>
    %187 = vector.extract_strided_slice %185 {offsets = [0, 14, 0], sizes = [1, 1, 4], strides = [1, 1, 1]} : vector<1x16x4xbf16> to vector<1x1x4xbf16>
    %188 = tpu.concatenate %186, %185, %187 in 1 : vector<1x1x4xbf16>, vector<1x16x4xbf16>, vector<1x1x4xbf16> -> vector<1x18x4xbf16>
    %189 = vector.shape_cast %188 : vector<1x18x4xbf16> to vector<18x4xbf16>
    %c216 = arith.constant 216 : index
    %c0_107 = arith.constant 0 : index
    %190 = vector.load %arg8[%c216, %c0_107] : memref<504x4xbf16, #tpu.memory_space<vmem>>, vector<18x4xbf16>
    tpu.vector_store %arg8[%c216, %c0_107], %189 {strides = array<i32>} : memref<504x4xbf16, #tpu.memory_space<vmem>>, vector<18x4xbf16>,
    %c2_i32_108 = arith.constant 2 : i32
    %191 = arith.subi %0, %c2_i32_108 : i32
    %c10_i32 = arith.constant 10 : i32
    %192 = arith.addi %191, %c10_i32 : i32
    %c0_i32_109 = arith.constant 0 : i32
    %193 = arith.cmpi slt, %192, %c0_i32_109 : i32
    %c0_i32_110 = arith.constant 0 : i32
    %194 = arith.subi %c0_i32_110, %192 : i32
    %195 = arith.select %193, %194, %192 : i32
    %c15_i32_111 = arith.constant 15 : i32
    %196 = arith.cmpi sgt, %195, %c15_i32_111 : i32
    %c30_i32_112 = arith.constant 30 : i32
    %197 = arith.subi %c30_i32_112, %195 : i32
    %198 = arith.select %196, %197, %195 : i32
    %c0_i32_113 = arith.constant 0 : i32
    %c15_i32_114 = arith.constant 15 : i32
    %199 = arith.maxsi %c0_i32_113, %198 : i32
    %200 = arith.minsi %c15_i32_114, %199 : i32
    %c0_115 = arith.constant 0 : index
    %201 = arith.index_cast %200 : i32 to index
    %c0_116 = arith.constant 0 : index
    %c0_117 = arith.constant 0 : index
    %202 = vector.load %arg2[%c0_115, %201, %c0_116, %c0_117] : memref<1x16x16x4xf32, #tpu.memory_space<vmem>>, vector<1x1x16x4xf32>
    %203 = vector.shape_cast %202 : vector<1x1x16x4xf32> to vector<1x16x4xf32>
    %204 = arith.truncf %203 : vector<1x16x4xf32> to vector<1x16x4xbf16>
    %205 = vector.extract_strided_slice %204 {offsets = [0, 1, 0], sizes = [1, 1, 4], strides = [1, 1, 1]} : vector<1x16x4xbf16> to vector<1x1x4xbf16>
    %206 = vector.extract_strided_slice %204 {offsets = [0, 14, 0], sizes = [1, 1, 4], strides = [1, 1, 1]} : vector<1x16x4xbf16> to vector<1x1x4xbf16>
    %207 = tpu.concatenate %205, %204, %206 in 1 : vector<1x1x4xbf16>, vector<1x16x4xbf16>, vector<1x1x4xbf16> -> vector<1x18x4xbf16>
    %208 = vector.shape_cast %207 : vector<1x18x4xbf16> to vector<18x4xbf16>
    %c240 = arith.constant 240 : index
    %c0_118 = arith.constant 0 : index
    %209 = vector.load %arg8[%c240, %c0_118] : memref<504x4xbf16, #tpu.memory_space<vmem>>, vector<18x4xbf16>
    tpu.vector_store %arg8[%c240, %c0_118], %208 {strides = array<i32>} : memref<504x4xbf16, #tpu.memory_space<vmem>>, vector<18x4xbf16>,
    %c2_i32_119 = arith.constant 2 : i32
    %210 = arith.subi %0, %c2_i32_119 : i32
    %c11_i32 = arith.constant 11 : i32
    %211 = arith.addi %210, %c11_i32 : i32
    %c0_i32_120 = arith.constant 0 : i32
    %212 = arith.cmpi slt, %211, %c0_i32_120 : i32
    %c0_i32_121 = arith.constant 0 : i32
    %213 = arith.subi %c0_i32_121, %211 : i32
    %214 = arith.select %212, %213, %211 : i32
    %c15_i32_122 = arith.constant 15 : i32
    %215 = arith.cmpi sgt, %214, %c15_i32_122 : i32
    %c30_i32_123 = arith.constant 30 : i32
    %216 = arith.subi %c30_i32_123, %214 : i32
    %217 = arith.select %215, %216, %214 : i32
    %c0_i32_124 = arith.constant 0 : i32
    %c15_i32_125 = arith.constant 15 : i32
    %218 = arith.maxsi %c0_i32_124, %217 : i32
    %219 = arith.minsi %c15_i32_125, %218 : i32
    %c0_126 = arith.constant 0 : index
    %220 = arith.index_cast %219 : i32 to index
    %c0_127 = arith.constant 0 : index
    %c0_128 = arith.constant 0 : index
    %221 = vector.load %arg2[%c0_126, %220, %c0_127, %c0_128] : memref<1x16x16x4xf32, #tpu.memory_space<vmem>>, vector<1x1x16x4xf32>
    %222 = vector.shape_cast %221 : vector<1x1x16x4xf32> to vector<1x16x4xf32>
    %223 = arith.truncf %222 : vector<1x16x4xf32> to vector<1x16x4xbf16>
    %224 = vector.extract_strided_slice %223 {offsets = [0, 1, 0], sizes = [1, 1, 4], strides = [1, 1, 1]} : vector<1x16x4xbf16> to vector<1x1x4xbf16>
    %225 = vector.extract_strided_slice %223 {offsets = [0, 14, 0], sizes = [1, 1, 4], strides = [1, 1, 1]} : vector<1x16x4xbf16> to vector<1x1x4xbf16>
    %226 = tpu.concatenate %224, %223, %225 in 1 : vector<1x1x4xbf16>, vector<1x16x4xbf16>, vector<1x1x4xbf16> -> vector<1x18x4xbf16>
    %227 = vector.shape_cast %226 : vector<1x18x4xbf16> to vector<18x4xbf16>
    %c264 = arith.constant 264 : index
    %c0_129 = arith.constant 0 : index
    %228 = vector.load %arg8[%c264, %c0_129] : memref<504x4xbf16, #tpu.memory_space<vmem>>, vector<18x4xbf16>
    tpu.vector_store %arg8[%c264, %c0_129], %227 {strides = array<i32>} : memref<504x4xbf16, #tpu.memory_space<vmem>>, vector<18x4xbf16>,
    %c2_i32_130 = arith.constant 2 : i32
    %229 = arith.subi %0, %c2_i32_130 : i32
    %c12_i32 = arith.constant 12 : i32
    %230 = arith.addi %229, %c12_i32 : i32
    %c0_i32_131 = arith.constant 0 : i32
    %231 = arith.cmpi slt, %230, %c0_i32_131 : i32
    %c0_i32_132 = arith.constant 0 : i32
    %232 = arith.subi %c0_i32_132, %230 : i32
    %233 = arith.select %231, %232, %230 : i32
    %c15_i32_133 = arith.constant 15 : i32
    %234 = arith.cmpi sgt, %233, %c15_i32_133 : i32
    %c30_i32_134 = arith.constant 30 : i32
    %235 = arith.subi %c30_i32_134, %233 : i32
    %236 = arith.select %234, %235, %233 : i32
    %c0_i32_135 = arith.constant 0 : i32
    %c15_i32_136 = arith.constant 15 : i32
    %237 = arith.maxsi %c0_i32_135, %236 : i32
    %238 = arith.minsi %c15_i32_136, %237 : i32
    %c0_137 = arith.constant 0 : index
    %239 = arith.index_cast %238 : i32 to index
    %c0_138 = arith.constant 0 : index
    %c0_139 = arith.constant 0 : index
    %240 = vector.load %arg2[%c0_137, %239, %c0_138, %c0_139] : memref<1x16x16x4xf32, #tpu.memory_space<vmem>>, vector<1x1x16x4xf32>
    %241 = vector.shape_cast %240 : vector<1x1x16x4xf32> to vector<1x16x4xf32>
    %242 = arith.truncf %241 : vector<1x16x4xf32> to vector<1x16x4xbf16>
    %243 = vector.extract_strided_slice %242 {offsets = [0, 1, 0], sizes = [1, 1, 4], strides = [1, 1, 1]} : vector<1x16x4xbf16> to vector<1x1x4xbf16>
    %244 = vector.extract_strided_slice %242 {offsets = [0, 14, 0], sizes = [1, 1, 4], strides = [1, 1, 1]} : vector<1x16x4xbf16> to vector<1x1x4xbf16>
    %245 = tpu.concatenate %243, %242, %244 in 1 : vector<1x1x4xbf16>, vector<1x16x4xbf16>, vector<1x1x4xbf16> -> vector<1x18x4xbf16>
    %246 = vector.shape_cast %245 : vector<1x18x4xbf16> to vector<18x4xbf16>
    %c288 = arith.constant 288 : index
    %c0_140 = arith.constant 0 : index
    %247 = vector.load %arg8[%c288, %c0_140] : memref<504x4xbf16, #tpu.memory_space<vmem>>, vector<18x4xbf16>
    tpu.vector_store %arg8[%c288, %c0_140], %246 {strides = array<i32>} : memref<504x4xbf16, #tpu.memory_space<vmem>>, vector<18x4xbf16>,
    %c2_i32_141 = arith.constant 2 : i32
    %248 = arith.subi %0, %c2_i32_141 : i32
    %c13_i32 = arith.constant 13 : i32
    %249 = arith.addi %248, %c13_i32 : i32
    %c0_i32_142 = arith.constant 0 : i32
    %250 = arith.cmpi slt, %249, %c0_i32_142 : i32
    %c0_i32_143 = arith.constant 0 : i32
    %251 = arith.subi %c0_i32_143, %249 : i32
    %252 = arith.select %250, %251, %249 : i32
    %c15_i32_144 = arith.constant 15 : i32
    %253 = arith.cmpi sgt, %252, %c15_i32_144 : i32
    %c30_i32_145 = arith.constant 30 : i32
    %254 = arith.subi %c30_i32_145, %252 : i32
    %255 = arith.select %253, %254, %252 : i32
    %c0_i32_146 = arith.constant 0 : i32
    %c15_i32_147 = arith.constant 15 : i32
    %256 = arith.maxsi %c0_i32_146, %255 : i32
    %257 = arith.minsi %c15_i32_147, %256 : i32
    %c0_148 = arith.constant 0 : index
    %258 = arith.index_cast %257 : i32 to index
    %c0_149 = arith.constant 0 : index
    %c0_150 = arith.constant 0 : index
    %259 = vector.load %arg2[%c0_148, %258, %c0_149, %c0_150] : memref<1x16x16x4xf32, #tpu.memory_space<vmem>>, vector<1x1x16x4xf32>
    %260 = vector.shape_cast %259 : vector<1x1x16x4xf32> to vector<1x16x4xf32>
    %261 = arith.truncf %260 : vector<1x16x4xf32> to vector<1x16x4xbf16>
    %262 = vector.extract_strided_slice %261 {offsets = [0, 1, 0], sizes = [1, 1, 4], strides = [1, 1, 1]} : vector<1x16x4xbf16> to vector<1x1x4xbf16>
    %263 = vector.extract_strided_slice %261 {offsets = [0, 14, 0], sizes = [1, 1, 4], strides = [1, 1, 1]} : vector<1x16x4xbf16> to vector<1x1x4xbf16>
    %264 = tpu.concatenate %262, %261, %263 in 1 : vector<1x1x4xbf16>, vector<1x16x4xbf16>, vector<1x1x4xbf16> -> vector<1x18x4xbf16>
    %265 = vector.shape_cast %264 : vector<1x18x4xbf16> to vector<18x4xbf16>
    %c312 = arith.constant 312 : index
    %c0_151 = arith.constant 0 : index
    %266 = vector.load %arg8[%c312, %c0_151] : memref<504x4xbf16, #tpu.memory_space<vmem>>, vector<18x4xbf16>
    tpu.vector_store %arg8[%c312, %c0_151], %265 {strides = array<i32>} : memref<504x4xbf16, #tpu.memory_space<vmem>>, vector<18x4xbf16>,
    %c2_i32_152 = arith.constant 2 : i32
    %267 = arith.subi %0, %c2_i32_152 : i32
    %c14_i32 = arith.constant 14 : i32
    %268 = arith.addi %267, %c14_i32 : i32
    %c0_i32_153 = arith.constant 0 : i32
    %269 = arith.cmpi slt, %268, %c0_i32_153 : i32
    %c0_i32_154 = arith.constant 0 : i32
    %270 = arith.subi %c0_i32_154, %268 : i32
    %271 = arith.select %269, %270, %268 : i32
    %c15_i32_155 = arith.constant 15 : i32
    %272 = arith.cmpi sgt, %271, %c15_i32_155 : i32
    %c30_i32_156 = arith.constant 30 : i32
    %273 = arith.subi %c30_i32_156, %271 : i32
    %274 = arith.select %272, %273, %271 : i32
    %c0_i32_157 = arith.constant 0 : i32
    %c15_i32_158 = arith.constant 15 : i32
    %275 = arith.maxsi %c0_i32_157, %274 : i32
    %276 = arith.minsi %c15_i32_158, %275 : i32
    %c0_159 = arith.constant 0 : index
    %277 = arith.index_cast %276 : i32 to index
    %c0_160 = arith.constant 0 : index
    %c0_161 = arith.constant 0 : index
    %278 = vector.load %arg2[%c0_159, %277, %c0_160, %c0_161] : memref<1x16x16x4xf32, #tpu.memory_space<vmem>>, vector<1x1x16x4xf32>
    %279 = vector.shape_cast %278 : vector<1x1x16x4xf32> to vector<1x16x4xf32>
    %280 = arith.truncf %279 : vector<1x16x4xf32> to vector<1x16x4xbf16>
    %281 = vector.extract_strided_slice %280 {offsets = [0, 1, 0], sizes = [1, 1, 4], strides = [1, 1, 1]} : vector<1x16x4xbf16> to vector<1x1x4xbf16>
    %282 = vector.extract_strided_slice %280 {offsets = [0, 14, 0], sizes = [1, 1, 4], strides = [1, 1, 1]} : vector<1x16x4xbf16> to vector<1x1x4xbf16>
    %283 = tpu.concatenate %281, %280, %282 in 1 : vector<1x1x4xbf16>, vector<1x16x4xbf16>, vector<1x1x4xbf16> -> vector<1x18x4xbf16>
    %284 = vector.shape_cast %283 : vector<1x18x4xbf16> to vector<18x4xbf16>
    %c336 = arith.constant 336 : index
    %c0_162 = arith.constant 0 : index
    %285 = vector.load %arg8[%c336, %c0_162] : memref<504x4xbf16, #tpu.memory_space<vmem>>, vector<18x4xbf16>
    tpu.vector_store %arg8[%c336, %c0_162], %284 {strides = array<i32>} : memref<504x4xbf16, #tpu.memory_space<vmem>>, vector<18x4xbf16>,
    %c2_i32_163 = arith.constant 2 : i32
    %286 = arith.subi %0, %c2_i32_163 : i32
    %c15_i32_164 = arith.constant 15 : i32
    %287 = arith.addi %286, %c15_i32_164 : i32
    %c0_i32_165 = arith.constant 0 : i32
    %288 = arith.cmpi slt, %287, %c0_i32_165 : i32
    %c0_i32_166 = arith.constant 0 : i32
    %289 = arith.subi %c0_i32_166, %287 : i32
    %290 = arith.select %288, %289, %287 : i32
    %c15_i32_167 = arith.constant 15 : i32
    %291 = arith.cmpi sgt, %290, %c15_i32_167 : i32
    %c30_i32_168 = arith.constant 30 : i32
    %292 = arith.subi %c30_i32_168, %290 : i32
    %293 = arith.select %291, %292, %290 : i32
    %c0_i32_169 = arith.constant 0 : i32
    %c15_i32_170 = arith.constant 15 : i32
    %294 = arith.maxsi %c0_i32_169, %293 : i32
    %295 = arith.minsi %c15_i32_170, %294 : i32
    %c0_171 = arith.constant 0 : index
    %296 = arith.index_cast %295 : i32 to index
    %c0_172 = arith.constant 0 : index
    %c0_173 = arith.constant 0 : index
    %297 = vector.load %arg2[%c0_171, %296, %c0_172, %c0_173] : memref<1x16x16x4xf32, #tpu.memory_space<vmem>>, vector<1x1x16x4xf32>
    %298 = vector.shape_cast %297 : vector<1x1x16x4xf32> to vector<1x16x4xf32>
    %299 = arith.truncf %298 : vector<1x16x4xf32> to vector<1x16x4xbf16>
    %300 = vector.extract_strided_slice %299 {offsets = [0, 1, 0], sizes = [1, 1, 4], strides = [1, 1, 1]} : vector<1x16x4xbf16> to vector<1x1x4xbf16>
    %301 = vector.extract_strided_slice %299 {offsets = [0, 14, 0], sizes = [1, 1, 4], strides = [1, 1, 1]} : vector<1x16x4xbf16> to vector<1x1x4xbf16>
    %302 = tpu.concatenate %300, %299, %301 in 1 : vector<1x1x4xbf16>, vector<1x16x4xbf16>, vector<1x1x4xbf16> -> vector<1x18x4xbf16>
    %303 = vector.shape_cast %302 : vector<1x18x4xbf16> to vector<18x4xbf16>
    %c360 = arith.constant 360 : index
    %c0_174 = arith.constant 0 : index
    %304 = vector.load %arg8[%c360, %c0_174] : memref<504x4xbf16, #tpu.memory_space<vmem>>, vector<18x4xbf16>
    tpu.vector_store %arg8[%c360, %c0_174], %303 {strides = array<i32>} : memref<504x4xbf16, #tpu.memory_space<vmem>>, vector<18x4xbf16>,
    %c2_i32_175 = arith.constant 2 : i32
    %305 = arith.subi %0, %c2_i32_175 : i32
    %c16_i32_176 = arith.constant 16 : i32
    %306 = arith.addi %305, %c16_i32_176 : i32
    %c0_i32_177 = arith.constant 0 : i32
    %307 = arith.cmpi slt, %306, %c0_i32_177 : i32
    %c0_i32_178 = arith.constant 0 : i32
    %308 = arith.subi %c0_i32_178, %306 : i32
    %309 = arith.select %307, %308, %306 : i32
    %c15_i32_179 = arith.constant 15 : i32
    %310 = arith.cmpi sgt, %309, %c15_i32_179 : i32
    %c30_i32_180 = arith.constant 30 : i32
    %311 = arith.subi %c30_i32_180, %309 : i32
    %312 = arith.select %310, %311, %309 : i32
    %c0_i32_181 = arith.constant 0 : i32
    %c15_i32_182 = arith.constant 15 : i32
    %313 = arith.maxsi %c0_i32_181, %312 : i32
    %314 = arith.minsi %c15_i32_182, %313 : i32
    %c0_183 = arith.constant 0 : index
    %315 = arith.index_cast %314 : i32 to index
    %c0_184 = arith.constant 0 : index
    %c0_185 = arith.constant 0 : index
    %316 = vector.load %arg2[%c0_183, %315, %c0_184, %c0_185] : memref<1x16x16x4xf32, #tpu.memory_space<vmem>>, vector<1x1x16x4xf32>
    %317 = vector.shape_cast %316 : vector<1x1x16x4xf32> to vector<1x16x4xf32>
    %318 = arith.truncf %317 : vector<1x16x4xf32> to vector<1x16x4xbf16>
    %319 = vector.extract_strided_slice %318 {offsets = [0, 1, 0], sizes = [1, 1, 4], strides = [1, 1, 1]} : vector<1x16x4xbf16> to vector<1x1x4xbf16>
    %320 = vector.extract_strided_slice %318 {offsets = [0, 14, 0], sizes = [1, 1, 4], strides = [1, 1, 1]} : vector<1x16x4xbf16> to vector<1x1x4xbf16>
    %321 = tpu.concatenate %319, %318, %320 in 1 : vector<1x1x4xbf16>, vector<1x16x4xbf16>, vector<1x1x4xbf16> -> vector<1x18x4xbf16>
    %322 = vector.shape_cast %321 : vector<1x18x4xbf16> to vector<18x4xbf16>
    %c384 = arith.constant 384 : index
    %c0_186 = arith.constant 0 : index
    %323 = vector.load %arg8[%c384, %c0_186] : memref<504x4xbf16, #tpu.memory_space<vmem>>, vector<18x4xbf16>
    tpu.vector_store %arg8[%c384, %c0_186], %322 {strides = array<i32>} : memref<504x4xbf16, #tpu.memory_space<vmem>>, vector<18x4xbf16>,
    %c2_i32_187 = arith.constant 2 : i32
    %324 = arith.subi %0, %c2_i32_187 : i32
    %c17_i32 = arith.constant 17 : i32
    %325 = arith.addi %324, %c17_i32 : i32
    %c0_i32_188 = arith.constant 0 : i32
    %326 = arith.cmpi slt, %325, %c0_i32_188 : i32
    %c0_i32_189 = arith.constant 0 : i32
    %327 = arith.subi %c0_i32_189, %325 : i32
    %328 = arith.select %326, %327, %325 : i32
    %c15_i32_190 = arith.constant 15 : i32
    %329 = arith.cmpi sgt, %328, %c15_i32_190 : i32
    %c30_i32_191 = arith.constant 30 : i32
    %330 = arith.subi %c30_i32_191, %328 : i32
    %331 = arith.select %329, %330, %328 : i32
    %c0_i32_192 = arith.constant 0 : i32
    %c15_i32_193 = arith.constant 15 : i32
    %332 = arith.maxsi %c0_i32_192, %331 : i32
    %333 = arith.minsi %c15_i32_193, %332 : i32
    %c0_194 = arith.constant 0 : index
    %334 = arith.index_cast %333 : i32 to index
    %c0_195 = arith.constant 0 : index
    %c0_196 = arith.constant 0 : index
    %335 = vector.load %arg2[%c0_194, %334, %c0_195, %c0_196] : memref<1x16x16x4xf32, #tpu.memory_space<vmem>>, vector<1x1x16x4xf32>
    %336 = vector.shape_cast %335 : vector<1x1x16x4xf32> to vector<1x16x4xf32>
    %337 = arith.truncf %336 : vector<1x16x4xf32> to vector<1x16x4xbf16>
    %338 = vector.extract_strided_slice %337 {offsets = [0, 1, 0], sizes = [1, 1, 4], strides = [1, 1, 1]} : vector<1x16x4xbf16> to vector<1x1x4xbf16>
    %339 = vector.extract_strided_slice %337 {offsets = [0, 14, 0], sizes = [1, 1, 4], strides = [1, 1, 1]} : vector<1x16x4xbf16> to vector<1x1x4xbf16>
    %340 = tpu.concatenate %338, %337, %339 in 1 : vector<1x1x4xbf16>, vector<1x16x4xbf16>, vector<1x1x4xbf16> -> vector<1x18x4xbf16>
    %341 = vector.shape_cast %340 : vector<1x18x4xbf16> to vector<18x4xbf16>
    %c408 = arith.constant 408 : index
    %c0_197 = arith.constant 0 : index
    %342 = vector.load %arg8[%c408, %c0_197] : memref<504x4xbf16, #tpu.memory_space<vmem>>, vector<18x4xbf16>
    tpu.vector_store %arg8[%c408, %c0_197], %341 {strides = array<i32>} : memref<504x4xbf16, #tpu.memory_space<vmem>>, vector<18x4xbf16>,
    %c2_i32_198 = arith.constant 2 : i32
    %343 = arith.subi %0, %c2_i32_198 : i32
    %c18_i32 = arith.constant 18 : i32
    %344 = arith.addi %343, %c18_i32 : i32
    %c0_i32_199 = arith.constant 0 : i32
    %345 = arith.cmpi slt, %344, %c0_i32_199 : i32
    %c0_i32_200 = arith.constant 0 : i32
    %346 = arith.subi %c0_i32_200, %344 : i32
    %347 = arith.select %345, %346, %344 : i32
    %c15_i32_201 = arith.constant 15 : i32
    %348 = arith.cmpi sgt, %347, %c15_i32_201 : i32
    %c30_i32_202 = arith.constant 30 : i32
    %349 = arith.subi %c30_i32_202, %347 : i32
    %350 = arith.select %348, %349, %347 : i32
    %c0_i32_203 = arith.constant 0 : i32
    %c15_i32_204 = arith.constant 15 : i32
    %351 = arith.maxsi %c0_i32_203, %350 : i32
    %352 = arith.minsi %c15_i32_204, %351 : i32
    %c0_205 = arith.constant 0 : index
    %353 = arith.index_cast %352 : i32 to index
    %c0_206 = arith.constant 0 : index
    %c0_207 = arith.constant 0 : index
    %354 = vector.load %arg2[%c0_205, %353, %c0_206, %c0_207] : memref<1x16x16x4xf32, #tpu.memory_space<vmem>>, vector<1x1x16x4xf32>
    %355 = vector.shape_cast %354 : vector<1x1x16x4xf32> to vector<1x16x4xf32>
    %356 = arith.truncf %355 : vector<1x16x4xf32> to vector<1x16x4xbf16>
    %357 = vector.extract_strided_slice %356 {offsets = [0, 1, 0], sizes = [1, 1, 4], strides = [1, 1, 1]} : vector<1x16x4xbf16> to vector<1x1x4xbf16>
    %358 = vector.extract_strided_slice %356 {offsets = [0, 14, 0], sizes = [1, 1, 4], strides = [1, 1, 1]} : vector<1x16x4xbf16> to vector<1x1x4xbf16>
    %359 = tpu.concatenate %357, %356, %358 in 1 : vector<1x1x4xbf16>, vector<1x16x4xbf16>, vector<1x1x4xbf16> -> vector<1x18x4xbf16>
    %360 = vector.shape_cast %359 : vector<1x18x4xbf16> to vector<18x4xbf16>
    %c432 = arith.constant 432 : index
    %c0_208 = arith.constant 0 : index
    %361 = vector.load %arg8[%c432, %c0_208] : memref<504x4xbf16, #tpu.memory_space<vmem>>, vector<18x4xbf16>
    tpu.vector_store %arg8[%c432, %c0_208], %360 {strides = array<i32>} : memref<504x4xbf16, #tpu.memory_space<vmem>>, vector<18x4xbf16>,
    %c2_i32_209 = arith.constant 2 : i32
    %362 = arith.subi %0, %c2_i32_209 : i32
    %c19_i32 = arith.constant 19 : i32
    %363 = arith.addi %362, %c19_i32 : i32
    %c0_i32_210 = arith.constant 0 : i32
    %364 = arith.cmpi slt, %363, %c0_i32_210 : i32
    %c0_i32_211 = arith.constant 0 : i32
    %365 = arith.subi %c0_i32_211, %363 : i32
    %366 = arith.select %364, %365, %363 : i32
    %c15_i32_212 = arith.constant 15 : i32
    %367 = arith.cmpi sgt, %366, %c15_i32_212 : i32
    %c30_i32_213 = arith.constant 30 : i32
    %368 = arith.subi %c30_i32_213, %366 : i32
    %369 = arith.select %367, %368, %366 : i32
    %c0_i32_214 = arith.constant 0 : i32
    %c15_i32_215 = arith.constant 15 : i32
    %370 = arith.maxsi %c0_i32_214, %369 : i32
    %371 = arith.minsi %c15_i32_215, %370 : i32
    %c0_216 = arith.constant 0 : index
    %372 = arith.index_cast %371 : i32 to index
    %c0_217 = arith.constant 0 : index
    %c0_218 = arith.constant 0 : index
    %373 = vector.load %arg2[%c0_216, %372, %c0_217, %c0_218] : memref<1x16x16x4xf32, #tpu.memory_space<vmem>>, vector<1x1x16x4xf32>
    %374 = vector.shape_cast %373 : vector<1x1x16x4xf32> to vector<1x16x4xf32>
    %375 = arith.truncf %374 : vector<1x16x4xf32> to vector<1x16x4xbf16>
    %376 = vector.extract_strided_slice %375 {offsets = [0, 1, 0], sizes = [1, 1, 4], strides = [1, 1, 1]} : vector<1x16x4xbf16> to vector<1x1x4xbf16>
    %377 = vector.extract_strided_slice %375 {offsets = [0, 14, 0], sizes = [1, 1, 4], strides = [1, 1, 1]} : vector<1x16x4xbf16> to vector<1x1x4xbf16>
    %378 = tpu.concatenate %376, %375, %377 in 1 : vector<1x1x4xbf16>, vector<1x16x4xbf16>, vector<1x1x4xbf16> -> vector<1x18x4xbf16>
    %379 = vector.shape_cast %378 : vector<1x18x4xbf16> to vector<18x4xbf16>
    %c456 = arith.constant 456 : index
    %c0_219 = arith.constant 0 : index
    %380 = vector.load %arg8[%c456, %c0_219] : memref<504x4xbf16, #tpu.memory_space<vmem>>, vector<18x4xbf16>
    tpu.vector_store %arg8[%c456, %c0_219], %379 {strides = array<i32>} : memref<504x4xbf16, #tpu.memory_space<vmem>>, vector<18x4xbf16>,
    %c0_220 = arith.constant 0 : index
    %c0_221 = arith.constant 0 : index
    %381 = vector.load %arg8[%c0_220, %c0_221] : memref<504x4xbf16, #tpu.memory_space<vmem>>, vector<432x4xbf16>
    %c1 = arith.constant 1 : index
    %c0_222 = arith.constant 0 : index
    %382 = vector.load %arg8[%c1, %c0_222] : memref<504x4xbf16, #tpu.memory_space<vmem>>, vector<432x4xbf16>
    %c2 = arith.constant 2 : index
    %c0_223 = arith.constant 0 : index
    %383 = vector.load %arg8[%c2, %c0_223] : memref<504x4xbf16, #tpu.memory_space<vmem>>, vector<432x4xbf16>
    %384 = tpu.concatenate %381, %382, %383 in 1 : vector<432x4xbf16>, vector<432x4xbf16>, vector<432x4xbf16> -> vector<432x12xbf16>
    %c0_224 = arith.constant 0 : index
    %c0_225 = arith.constant 0 : index
    %c0_226 = arith.constant 0 : index
    %385 = vector.load %arg3[%c0_224, %c0_225, %c0_226] : memref<3x12x4xbf16, #tpu.memory_space<vmem>>, vector<1x12x4xbf16>
    %386 = vector.shape_cast %385 : vector<1x12x4xbf16> to vector<12x4xbf16>
    %cst = arith.constant dense<0.000000e+00> : vector<432x4xf32>
    %387 = tpu.matmul %384, %386, %cst {dimension_numbers = #tpu.dot_dimension_numbers<[1], [0], [0], [1], [0, 0, 1, 1], [], []>} : vector<432x12xbf16>, vector<12x4xbf16>, vector<432x4xf32> -> vector<432x4xf32>
    %c24_227 = arith.constant 24 : index
    %c0_228 = arith.constant 0 : index
    %388 = vector.load %arg8[%c24_227, %c0_228] : memref<504x4xbf16, #tpu.memory_space<vmem>>, vector<432x4xbf16>
    %c25 = arith.constant 25 : index
    %c0_229 = arith.constant 0 : index
    %389 = vector.load %arg8[%c25, %c0_229] : memref<504x4xbf16, #tpu.memory_space<vmem>>, vector<432x4xbf16>
    %c26 = arith.constant 26 : index
    %c0_230 = arith.constant 0 : index
    %390 = vector.load %arg8[%c26, %c0_230] : memref<504x4xbf16, #tpu.memory_space<vmem>>, vector<432x4xbf16>
    %391 = tpu.concatenate %388, %389, %390 in 1 : vector<432x4xbf16>, vector<432x4xbf16>, vector<432x4xbf16> -> vector<432x12xbf16>
    %c1_231 = arith.constant 1 : index
    %c0_232 = arith.constant 0 : index
    %c0_233 = arith.constant 0 : index
    %392 = vector.load %arg3[%c1_231, %c0_232, %c0_233] : memref<3x12x4xbf16, #tpu.memory_space<vmem>>, vector<1x12x4xbf16>
    %393 = vector.shape_cast %392 : vector<1x12x4xbf16> to vector<12x4xbf16>
    %cst_234 = arith.constant dense<0.000000e+00> : vector<432x4xf32>
    %394 = tpu.matmul %391, %393, %cst_234 {dimension_numbers = #tpu.dot_dimension_numbers<[1], [0], [0], [1], [0, 0, 1, 1], [], []>} : vector<432x12xbf16>, vector<12x4xbf16>, vector<432x4xf32> -> vector<432x4xf32>
    %395 = arith.addf %387, %394 : vector<432x4xf32>
    %c48_235 = arith.constant 48 : index
    %c0_236 = arith.constant 0 : index
    %396 = vector.load %arg8[%c48_235, %c0_236] : memref<504x4xbf16, #tpu.memory_space<vmem>>, vector<432x4xbf16>
    %c49 = arith.constant 49 : index
    %c0_237 = arith.constant 0 : index
    %397 = vector.load %arg8[%c49, %c0_237] : memref<504x4xbf16, #tpu.memory_space<vmem>>, vector<432x4xbf16>
    %c50 = arith.constant 50 : index
    %c0_238 = arith.constant 0 : index
    %398 = vector.load %arg8[%c50, %c0_238] : memref<504x4xbf16, #tpu.memory_space<vmem>>, vector<432x4xbf16>
    %399 = tpu.concatenate %396, %397, %398 in 1 : vector<432x4xbf16>, vector<432x4xbf16>, vector<432x4xbf16> -> vector<432x12xbf16>
    %c2_239 = arith.constant 2 : index
    %c0_240 = arith.constant 0 : index
    %c0_241 = arith.constant 0 : index
    %400 = vector.load %arg3[%c2_239, %c0_240, %c0_241] : memref<3x12x4xbf16, #tpu.memory_space<vmem>>, vector<1x12x4xbf16>
    %401 = vector.shape_cast %400 : vector<1x12x4xbf16> to vector<12x4xbf16>
    %cst_242 = arith.constant dense<0.000000e+00> : vector<432x4xf32>
    %402 = tpu.matmul %399, %401, %cst_242 {dimension_numbers = #tpu.dot_dimension_numbers<[1], [0], [0], [1], [0, 0, 1, 1], [], []>} : vector<432x12xbf16>, vector<12x4xbf16>, vector<432x4xf32> -> vector<432x4xf32>
    %403 = arith.addf %395, %402 : vector<432x4xf32>
    %c0_243 = arith.constant 0 : index
    %c0_244 = arith.constant 0 : index
    %404 = vector.load %arg5[%c0_243, %c0_244] : memref<1x4xf32, #tpu.memory_space<vmem>>, vector<1x4xf32>
    %405 = vector.broadcast %404 : vector<1x4xf32> to vector<432x4xf32>
    %406 = arith.addf %403, %405 : vector<432x4xf32>
    %407 = arith.negf %406 : vector<432x4xf32>
    %408 = math.exp %407 : vector<432x4xf32>
    %cst_245 = arith.constant 1.000000e+00 : f32
    %409 = vector.broadcast %cst_245 : f32 to vector<432x4xf32>
    %410 = arith.addf %409, %408 : vector<432x4xf32>
    %411 = arith.divf %409, %410 : vector<432x4xf32>
    %412 = arith.mulf %406, %411 : vector<432x4xf32>
    %413 = vector.shape_cast %412 : vector<432x4xf32> to vector<18x24x4xf32>
    %414 = vector.extract_strided_slice %413 {offsets = [0, 1, 0], sizes = [18, 1, 4], strides = [1, 1, 1]} : vector<18x24x4xf32> to vector<18x1x4xf32>
    %415 = vector.extract_strided_slice %413 {offsets = [0, 0, 0], sizes = [18, 16, 4], strides = [1, 1, 1]} : vector<18x24x4xf32> to vector<18x16x4xf32>
    %416 = vector.extract_strided_slice %413 {offsets = [0, 14, 0], sizes = [18, 1, 4], strides = [1, 1, 1]} : vector<18x24x4xf32> to vector<18x1x4xf32>
    %cst_246 = arith.constant 0.000000e+00 : f32
    %417 = vector.broadcast %cst_246 : f32 to vector<18x6x4xf32>
    %418 = tpu.concatenate %414, %415, %416, %417 in 1 : vector<18x1x4xf32>, vector<18x16x4xf32>, vector<18x1x4xf32>, vector<18x6x4xf32> -> vector<18x24x4xf32>
    %419 = vector.shape_cast %418 : vector<18x24x4xf32> to vector<432x4xf32>
    %420 = arith.truncf %419 : vector<432x4xf32> to vector<432x4xbf16>
    %c0_247 = arith.constant 0 : index
    %c0_248 = arith.constant 0 : index
    %421 = vector.load %arg9[%c0_247, %c0_248] : memref<456x4xbf16, #tpu.memory_space<vmem>>, vector<432x4xbf16>
    tpu.vector_store %arg9[%c0_247, %c0_248], %420 {strides = array<i32>} : memref<456x4xbf16, #tpu.memory_space<vmem>>, vector<432x4xbf16>,
    %c0_i32_249 = arith.constant 0 : i32
    %422 = arith.cmpi eq, %0, %c0_i32_249 : i32
    %423 = arith.extui %422 : i1 to i32
    %c0_i32_250 = arith.constant 0 : i32
    %424 = arith.cmpi ne, %423, %c0_i32_250 : i32
    scf.if %424 {
      %c48_293 = arith.constant 48 : index
      %c0_294 = arith.constant 0 : index
      %465 = vector.load %arg9[%c48_293, %c0_294] : memref<456x4xbf16, #tpu.memory_space<vmem>>, vector<24x4xbf16>
      %c0_295 = arith.constant 0 : index
      %c0_296 = arith.constant 0 : index
      %466 = vector.load %arg9[%c0_295, %c0_296] : memref<456x4xbf16, #tpu.memory_space<vmem>>, vector<24x4xbf16>
      tpu.vector_store %arg9[%c0_295, %c0_296], %465 {strides = array<i32>} : memref<456x4xbf16, #tpu.memory_space<vmem>>, vector<24x4xbf16>,
    } else {
    }
    %c16_i32_251 = arith.constant 16 : i32
    %425 = arith.addi %0, %c16_i32_251 : i32
    %c16_i32_252 = arith.constant 16 : i32
    %426 = arith.cmpi eq, %425, %c16_i32_252 : i32
    %427 = arith.extui %426 : i1 to i32
    %c0_i32_253 = arith.constant 0 : i32
    %428 = arith.cmpi ne, %427, %c0_i32_253 : i32
    scf.if %428 {
      %c360_293 = arith.constant 360 : index
      %c0_294 = arith.constant 0 : index
      %465 = vector.load %arg9[%c360_293, %c0_294] : memref<456x4xbf16, #tpu.memory_space<vmem>>, vector<24x4xbf16>
      %c408_295 = arith.constant 408 : index
      %c0_296 = arith.constant 0 : index
      %466 = vector.load %arg9[%c408_295, %c0_296] : memref<456x4xbf16, #tpu.memory_space<vmem>>, vector<24x4xbf16>
      tpu.vector_store %arg9[%c408_295, %c0_296], %465 {strides = array<i32>} : memref<456x4xbf16, #tpu.memory_space<vmem>>, vector<24x4xbf16>,
    } else {
    }
    %c0_254 = arith.constant 0 : index
    %c0_255 = arith.constant 0 : index
    %429 = vector.load %arg9[%c0_254, %c0_255] : memref<456x4xbf16, #tpu.memory_space<vmem>>, vector<384x4xbf16>
    %c1_256 = arith.constant 1 : index
    %c0_257 = arith.constant 0 : index
    %430 = vector.load %arg9[%c1_256, %c0_257] : memref<456x4xbf16, #tpu.memory_space<vmem>>, vector<384x4xbf16>
    %c2_258 = arith.constant 2 : index
    %c0_259 = arith.constant 0 : index
    %431 = vector.load %arg9[%c2_258, %c0_259] : memref<456x4xbf16, #tpu.memory_space<vmem>>, vector<384x4xbf16>
    %432 = tpu.concatenate %429, %430, %431 in 1 : vector<384x4xbf16>, vector<384x4xbf16>, vector<384x4xbf16> -> vector<384x12xbf16>
    %c0_260 = arith.constant 0 : index
    %c0_261 = arith.constant 0 : index
    %c0_262 = arith.constant 0 : index
    %433 = vector.load %arg4[%c0_260, %c0_261, %c0_262] : memref<3x12x4xbf16, #tpu.memory_space<vmem>>, vector<1x12x4xbf16>
    %434 = vector.shape_cast %433 : vector<1x12x4xbf16> to vector<12x4xbf16>
    %cst_263 = arith.constant dense<0.000000e+00> : vector<384x4xf32>
    %435 = tpu.matmul %432, %434, %cst_263 {dimension_numbers = #tpu.dot_dimension_numbers<[1], [0], [0], [1], [0, 0, 1, 1], [], []>} : vector<384x12xbf16>, vector<12x4xbf16>, vector<384x4xf32> -> vector<384x4xf32>
    %c24_264 = arith.constant 24 : index
    %c0_265 = arith.constant 0 : index
    %436 = vector.load %arg9[%c24_264, %c0_265] : memref<456x4xbf16, #tpu.memory_space<vmem>>, vector<384x4xbf16>
    %c25_266 = arith.constant 25 : index
    %c0_267 = arith.constant 0 : index
    %437 = vector.load %arg9[%c25_266, %c0_267] : memref<456x4xbf16, #tpu.memory_space<vmem>>, vector<384x4xbf16>
    %c26_268 = arith.constant 26 : index
    %c0_269 = arith.constant 0 : index
    %438 = vector.load %arg9[%c26_268, %c0_269] : memref<456x4xbf16, #tpu.memory_space<vmem>>, vector<384x4xbf16>
    %439 = tpu.concatenate %436, %437, %438 in 1 : vector<384x4xbf16>, vector<384x4xbf16>, vector<384x4xbf16> -> vector<384x12xbf16>
    %c1_270 = arith.constant 1 : index
    %c0_271 = arith.constant 0 : index
    %c0_272 = arith.constant 0 : index
    %440 = vector.load %arg4[%c1_270, %c0_271, %c0_272] : memref<3x12x4xbf16, #tpu.memory_space<vmem>>, vector<1x12x4xbf16>
    %441 = vector.shape_cast %440 : vector<1x12x4xbf16> to vector<12x4xbf16>
    %cst_273 = arith.constant dense<0.000000e+00> : vector<384x4xf32>
    %442 = tpu.matmul %439, %441, %cst_273 {dimension_numbers = #tpu.dot_dimension_numbers<[1], [0], [0], [1], [0, 0, 1, 1], [], []>} : vector<384x12xbf16>, vector<12x4xbf16>, vector<384x4xf32> -> vector<384x4xf32>
    %443 = arith.addf %435, %442 : vector<384x4xf32>
    %c48_274 = arith.constant 48 : index
    %c0_275 = arith.constant 0 : index
    %444 = vector.load %arg9[%c48_274, %c0_275] : memref<456x4xbf16, #tpu.memory_space<vmem>>, vector<384x4xbf16>
    %c49_276 = arith.constant 49 : index
    %c0_277 = arith.constant 0 : index
    %445 = vector.load %arg9[%c49_276, %c0_277] : memref<456x4xbf16, #tpu.memory_space<vmem>>, vector<384x4xbf16>
    %c50_278 = arith.constant 50 : index
    %c0_279 = arith.constant 0 : index
    %446 = vector.load %arg9[%c50_278, %c0_279] : memref<456x4xbf16, #tpu.memory_space<vmem>>, vector<384x4xbf16>
    %447 = tpu.concatenate %444, %445, %446 in 1 : vector<384x4xbf16>, vector<384x4xbf16>, vector<384x4xbf16> -> vector<384x12xbf16>
    %c2_280 = arith.constant 2 : index
    %c0_281 = arith.constant 0 : index
    %c0_282 = arith.constant 0 : index
    %448 = vector.load %arg4[%c2_280, %c0_281, %c0_282] : memref<3x12x4xbf16, #tpu.memory_space<vmem>>, vector<1x12x4xbf16>
    %449 = vector.shape_cast %448 : vector<1x12x4xbf16> to vector<12x4xbf16>
    %cst_283 = arith.constant dense<0.000000e+00> : vector<384x4xf32>
    %450 = tpu.matmul %447, %449, %cst_283 {dimension_numbers = #tpu.dot_dimension_numbers<[1], [0], [0], [1], [0, 0, 1, 1], [], []>} : vector<384x12xbf16>, vector<12x4xbf16>, vector<384x4xf32> -> vector<384x4xf32>
    %451 = arith.addf %443, %450 : vector<384x4xf32>
    %452 = vector.shape_cast %451 : vector<384x4xf32> to vector<16x24x4xf32>
    %453 = vector.extract_strided_slice %452 {offsets = [0, 0, 0], sizes = [16, 16, 4], strides = [1, 1, 1]} : vector<16x24x4xf32> to vector<16x16x4xf32>
    %c0_284 = arith.constant 0 : index
    %454 = arith.index_cast %0 : i32 to index
    %c0_285 = arith.constant 0 : index
    %c0_286 = arith.constant 0 : index
    %455 = vector.load %arg2[%c0_284, %454, %c0_285, %c0_286] : memref<1x16x16x4xf32, #tpu.memory_space<vmem>>, vector<1x16x16x4xf32>
    %456 = vector.shape_cast %455 : vector<1x16x16x4xf32> to vector<16x16x4xf32>
    %457 = arith.addf %456, %453 : vector<16x16x4xf32>
    %c0_287 = arith.constant 0 : index
    %c0_288 = arith.constant 0 : index
    %458 = vector.load %arg6[%c0_287, %c0_288] : memref<1x4xf32, #tpu.memory_space<vmem>>, vector<1x4xf32>
    %459 = vector.shape_cast %458 : vector<1x4xf32> to vector<1x1x4xf32>
    %460 = vector.broadcast %459 : vector<1x1x4xf32> to vector<16x16x4xf32>
    %461 = arith.addf %457, %460 : vector<16x16x4xf32>
    %c0_289 = arith.constant 0 : index
    %c0_290 = arith.constant 0 : index
    %c0_291 = arith.constant 0 : index
    %c0_292 = arith.constant 0 : index
    %462 = vector.load %arg7[%c0_289, %c0_290, %c0_291, %c0_292] : memref<1x16x16x4xf32, #tpu.memory_space<vmem>>, vector<1x16x16x4xf32>
    %463 = vector.shape_cast %462 : vector<1x16x16x4xf32> to vector<16x16x4xf32>
    %464 = vector.shape_cast %461 : vector<16x16x4xf32> to vector<1x16x16x4xf32>
    tpu.vector_store %arg7[%c0_289, %c0_290, %c0_291, %c0_292], %464 {strides = array<i32>} : memref<1x16x16x4xf32, #tpu.memory_space<vmem>>, vector<1x16x16x4xf32>,
    return
  }
  func.func @transform_0(%arg0: i32, %arg1: i32) -> (i32, i32, i32, i32) {
    %c0_i32 = arith.constant 0 : i32
    %c0_i32_0 = arith.constant 0 : i32
    %c0_i32_1 = arith.constant 0 : i32
    %c0_i32_2 = arith.constant 0 : i32
    return %arg0, %c0_i32, %c0_i32_0, %c0_i32_1 : i32, i32, i32, i32
  }
  func.func @transform_1(%arg0: i32, %arg1: i32) -> (i32, i32, i32) {
    %c0_i32 = arith.constant 0 : i32
    %c0_i32_0 = arith.constant 0 : i32
    %c0_i32_1 = arith.constant 0 : i32
    %c0_i32_2 = arith.constant 0 : i32
    return %c0_i32, %c0_i32_0, %c0_i32_1 : i32, i32, i32
  }
  func.func @transform_2(%arg0: i32, %arg1: i32) -> (i32, i32, i32) {
    %c0_i32 = arith.constant 0 : i32
    %c0_i32_0 = arith.constant 0 : i32
    %c0_i32_1 = arith.constant 0 : i32
    %c0_i32_2 = arith.constant 0 : i32
    return %c0_i32, %c0_i32_0, %c0_i32_1 : i32, i32, i32
  }
  func.func @transform_3(%arg0: i32, %arg1: i32) -> (i32, i32) {
    %c0_i32 = arith.constant 0 : i32
    %c0_i32_0 = arith.constant 0 : i32
    %c0_i32_1 = arith.constant 0 : i32
    return %c0_i32, %c0_i32_0 : i32, i32
  }
  func.func @transform_4(%arg0: i32, %arg1: i32) -> (i32, i32) {
    %c0_i32 = arith.constant 0 : i32
    %c0_i32_0 = arith.constant 0 : i32
    %c0_i32_1 = arith.constant 0 : i32
    return %c0_i32, %c0_i32_0 : i32, i32
  }
  func.func @transform_5(%arg0: i32, %arg1: i32) -> (i32, i32, i32, i32) {
    %c0_i32 = arith.constant 0 : i32
    %c0_i32_0 = arith.constant 0 : i32
    %c0_i32_1 = arith.constant 0 : i32
    return %arg0, %arg1, %c0_i32, %c0_i32_0 : i32, i32, i32, i32
  }
}

</mosaic_0001>

<bundles_post_ra>
// kernel: resblock_forward.1
= control target key start
LH: loop header
LB: loop body
LE: loop exit
PB: predicated region body
PF: predicated region fallthrough
CT: control target
= control target key end

     0   :  { %s9301_s18 = smov 0   ;;  %s9303_s19 = smov 0   ;;  %s13148_s0 = inlined_call_operand.vmem [shape: f32[2,16,16,4], index: 0, kind: input, shape index: {}]   ;;  %s13149_s1 = inlined_call_operand.vmem [shape: bf16[3,12,4], index: 1, kind: input, shape index: {}]   ;;  %s13150_s2 = inlined_call_operand.vmem [shape: bf16[3,12,4], index: 2, kind: input, shape index: {}]   ;;  %s13151_s3 = inlined_call_operand.vmem [shape: f32[1,4], index: 3, kind: input, shape index: {}]   ;;  %s13152_s4 = inlined_call_operand.vmem [shape: f32[1,4], index: 4, kind: input, shape index: {}]   ;;  %s13153_s5 = inlined_call_operand.vmem [shape: f32[2,16,16,4], index: 5, kind: output, shape index: {}]  }
   0x1   :  { %s9305_s20 = smov 0  }
   0x2 LB: > { %s27_s21 = sadd.s32 1, %s9261_s19  ;;  %p7642_p0 = scmp.ge.s32.totalorder %s9265_s20, 1  ;;  %s9265_s20 = sphi %s9305_s20, %s15_s20   ;;  %s9261_s19 = sphi %s9303_s19, %s13297_s19   ;;  %s9257_s18 = sphi %s9301_s18, %s13296_s18  }
   0x3   : > { %p29_p1 = scmp.ge.s32.totalorder %s27_s21, 2  ;;  %p201_p2 = scmp.lt.s32.totalorder %s9265_s20, 3 }
   0x5   : > { %s13299_s21 = smov (%p29_p1, %s27_s21), 0  ;;  %p202_p3 = pnand %p7642_p0, %p201_p2 }
   0x7   : > { %205 = sbr.rel (%p202_p3) target bundleno = 1389 (0x56d), region = 40 }
   0xc   : > { %p234_p4 = scmp.lt.s32.totalorder %s9257_s18, 1  ;;  %vm280_vm0 = vcmask 1040384   ;;  %vm281_vm1 = vsmask.f32 256  ;;  %vm296_vm2 = vcmask 27648   ;;  %vm299_vm3 = vcmask 24576  }
   0xd   : > { %vm9338_vm4 = vmand %vm280_vm0, %vm281_vm1  ;;  %vm1330_vm5 = vsmask.f32 7424  ;;  %vm1608_vm6 = vcmask 1046528   ;;  %s9267_s26 = smov 4   ;;  %s9268_s27 = smov 8   ;;  %vm2428_vm7 = vcmask 1045504  }
   0xe   : > { %s13301_s18 = smov (!%p234_p4, %s9257_s18), 1  ;;  %vm9270_vm8 = vmmov 0   ;;  %vm1718_vm9 = vcmask 31744   ;;  %vm1773_vm10 = vcmask 64512   ;;  %vm2373_vm11 = vcmask 97280  }
   0xf   : > { %s8171_s22 = sshll.u32 %s13301_s18, 8  ;;  %vm4524_vm12 = vcmask 1041408  }
  0x10   : > { %s9327_s25 = scalar_lea.vmem %s13148_s0, %s8171_s22  ;;  %s12954_s29 = scalar_lea.vmem %s13153_s5, %s8171_s22 }
  0x11   : > { %v7652_v0 = vld [vmem:[%s9327_s25 + $0x10] sm:$0xff]  ;;  %v7653_v1 = vld [vmem:[%s9327_s25 + $0x18] sm:$0xff]  ;;  %v357_v2 = vld [vmem:[%s9327_s25] sm:$0xff] }
  0x12   : > { %v316_v3 = vpack.c.bf16 %v7653_v1, %v7652_v0  ;;  %v358_v4 = vld [vmem:[%s9327_s25 + $0x8] sm:$0xff]  ;;  %v7647_v5 = vld [vmem:[%s9327_s25 + $0x20] sm:$0xff]  ;;  %v7670_v9 = vld [vmem:[%s9327_s25 + $0x30] sm:$0xff] }
  0x13   : > { %v7648_v6 = vld [vmem:[%s9327_s25 + $0x28] sm:$0xff]  ;;  %v359_v7 = vpack.c.bf16 %v358_v4, %v357_v2  ;;  %v7671_v10 = vld [vmem:[%s9327_s25 + $0x38] sm:$0xff]  ;;  %v7675_v39 = vld [vmem:[%s9327_s25 + $0x40] sm:$0xff] }
  0x14   : > { %v267_v8 = vpack.c.bf16 %v7648_v6, %v7647_v5  ;;  %v318_v11 = vshrl.u32 %v316_v3, 16  ;;  %v322_v12 = vshll.u32 %v316_v3, 16  ;;  %v491_v13 = vpack.c.bf16 %v7671_v10, %v7670_v9  ;;  %v7676_v44 = vld [vmem:[%s9327_s25 + $0x48] sm:$0xff]  ;;  %v7680_v45 = vld [vmem:[%s9327_s25 + $0x50] sm:$0xff]  ;;  %v7681_v46 = vld [vmem:[%s9327_s25 + $0x58] sm:$0xff] }
  0x15   : > { %v361_v15 = vshrl.u32 %v359_v7, 16  ;;  %v365_v16 = vshll.u32 %v359_v7, 16  ;;  %v7685_v51 = vld [vmem:[%s9327_s25 + $0x60] sm:$0xff]  ;;  %v7686_v52 = vld [vmem:[%s9327_s25 + $0x68] sm:$0xff]  ;;  %v9379_v59 = vpack.c.bf16 %v7676_v44, %v7675_v39  ;;  %v9381_v60 = vpack.c.bf16 %v7681_v46, %v7680_v45  ;;  %v7690_v61 = vld [vmem:[%s9327_s25 + $0x70] sm:$0xff] }
  0x16   : > { %v269_v17 = vshrl.u32 %v267_v8, 16  ;;  %v273_v18 = vshll.u32 %v267_v8, 16  ;;  %v321_v19 = vrot.slane %v318_v11, 7  ;;  %v327_v20 = vrot.slane %v322_v12, 7  ;;  %v7691_v62 = vld [vmem:[%s9327_s25 + $0x78] sm:$0xff]  ;;  %v7695_v3 = vld [vmem:[%s9327_s25 + $0x80] sm:$0xff] }
  0x17   : > { %v493_v21 = vshrl.u32 %v491_v13, 16  ;;  %v497_v22 = vshll.u32 %v491_v13, 16  ;;  %v364_v23 = vrot.slane %v361_v15, 7  ;;  %v370_v26 = vrot.slane %v365_v16, 7  ;;  %v7696_v4 = vld [vmem:[%s9327_s25 + $0x88] sm:$0xff]  ;;  %v7700_v9 = vld [vmem:[%s9327_s25 + $0x90] sm:$0xff] }
  0x18   : > { %v272_v24 = vrot.slane %v269_v17, 7  ;;  %v278_v25 = vrot.slane %v273_v18, 7  ;;  %v324_v27 = vor.u32 %v322_v12, %v321_v19  ;;  %v330_v28 = vsel %vm9338_vm4, %v321_v19, %v327_v20  ;;  %v7701_v10 = vld [vmem:[%s9327_s25 + $0x98] sm:$0xff] }
  0x19   : > { %v496_v29 = vrot.slane %v493_v21, 7  ;;  %v502_v30 = vrot.slane %v497_v22, 7  ;;  %v7656_v31 = vcombine.low %v330_v28, %v330_v28  ;;  %v367_v32 = vor.u32 %v365_v16, %v364_v23 }
  0x1a   : > { %v284_v33 = vsel %vm9338_vm4, %v272_v24, %v278_v25  ;;  %v373_v34 = vsel %vm9338_vm4, %v364_v23, %v370_v26  ;;  %v329_v35 = vsel %vm9338_vm4, %v318_v11, %v324_v27  ;;  %v455_v38 = vor.u32 %v273_v18, %v272_v24 }
  0x1b   : > { %v7651_v36 = vcombine.low %v284_v33, %v284_v33  ;;  %v7659_v37 = vcombine.low %v373_v34, %v373_v34  ;;  %v7654_v40 = vcombine.low %v329_v35, %v329_v35  ;;  %v7655_v41 = vcombine.high %v329_v35, %v329_v35  ;;  %344 = vst.msk [vmem:[#allocation2 + $0x14] sm:$0x1] %vm299_vm3, %v7656_v31 }
  0x1c   : > { %v372_v42 = vsel %vm9338_vm4, %v361_v15, %v367_v32  ;;  %431 = vst.msk [vmem:[#allocation2 + $0x2c] sm:$0x1] %vm299_vm3, %v7656_v31  ;;  %v499_v43 = vor.u32 %v497_v22, %v496_v29  ;;  %v460_v49 = vsel %vm9338_vm4, %v269_v17, %v455_v38  ;;  %v505_v50 = vsel %vm9338_vm4, %v496_v29, %v502_v30 }
  0x1d   : > { %v7657_v47 = vcombine.low %v372_v42, %v372_v42  ;;  %300 = vst.msk [vmem:[#allocation2 + $0x8] sm:$0x1] %vm299_vm3, %v7651_v36  ;;  %v7658_v48 = vcombine.high %v372_v42, %v372_v42  ;;  %387 = vst.msk [vmem:[#allocation2 + $0x20] sm:$0x1] %vm299_vm3, %v7659_v37  ;;  %v9371_v53 = vcombine.low %v460_v49, %v460_v49  ;;  %v537_v0 = vshrl.u32 %v9379_v59, 16 }
  0x1e   : > { %475 = vst.msk [vmem:[#allocation2 + $0x38] sm:$0x1] %vm299_vm3, %v7651_v36  ;;  %v9373_v54 = vcombine.high %v460_v49, %v460_v49  ;;  %v504_v55 = vsel %vm9338_vm4, %v493_v21, %v499_v43  ;;  %v7674_v56 = vcombine.low %v505_v50, %v505_v50  ;;  %v9390_v63 = vpack.c.bf16 %v7686_v52, %v7685_v51 }
  0x1f   : > { %342 = vst.msk [vmem:[#allocation2 + $0xc] sm:$0xf] %vm296_vm2, %v7654_v40  ;;  %343 = vst.msk [vmem:[#allocation2 + $0x10] sm:$0xf] %vm296_vm2, %v7655_v41  ;;  %v7672_v57 = vcombine.low %v504_v55, %v504_v55  ;;  %v7673_v58 = vcombine.high %v504_v55, %v504_v55  ;;  %v541_v1 = vshll.u32 %v9379_v59, 16  ;;  %v9396_v2 = vpack.c.bf16 %v7691_v62, %v7690_v61 }
  0x20   : > { %429 = vst.msk [vmem:[#allocation2 + $0x24] sm:$0xf] %vm296_vm2, %v7654_v40  ;;  %430 = vst.msk [vmem:[#allocation2 + $0x28] sm:$0xf] %vm296_vm2, %v7655_v41  ;;  %v540_v5 = vrot.slane %v537_v0, 7  ;;  %v581_v7 = vshrl.u32 %v9381_v60, 16  ;;  %v9419_v25 = vpack.c.bf16 %v7696_v4, %v7695_v3  ;;  %v9421_v26 = vpack.c.bf16 %v7701_v10, %v7700_v9 }
  0x21   : > { %385 = vst.msk [vmem:[#allocation2 + $0x18] sm:$0xf] %vm296_vm2, %v7657_v47  ;;  %386 = vst.msk [vmem:[#allocation2 + $0x1c] sm:$0xf] %vm296_vm2, %v7658_v48  ;;  %v546_v6 = vrot.slane %v541_v1, 7  ;;  %v585_v8 = vshll.u32 %v9381_v60, 16 }
  0x22   : > { %473 = vst.msk [vmem:[#allocation2 + $0x30] sm:$0xf] %vm296_vm2, %v9371_v53  ;;  %474 = vst.msk [vmem:[#allocation2 + $0x34] sm:$0xf] %vm296_vm2, %v9373_v54  ;;  %v9404_v11 = vld [vmem:[#allocation2 + $0x14] sm:$0xf]  ;;  %v543_v41 = vor.u32 %v541_v1, %v540_v5 }
  0x23   : > { %519 = vst.msk [vmem:[#allocation2 + $0x44] sm:$0x1] %vm299_vm3, %v7674_v56  ;;  %v625_v13 = vshrl.u32 %v9390_v63, 16  ;;  %v629_v15 = vshll.u32 %v9390_v63, 16  ;;  %v549_v19 = vsel %vm9338_vm4, %v540_v5, %v546_v6  ;;  %v669_v31 = vshrl.u32 %v9396_v2, 16 }
  0x24   : > { %517 = vst.msk [vmem:[#allocation2 + $0x3c] sm:$0xf] %vm296_vm2, %v7672_v57  ;;  %518 = vst.msk [vmem:[#allocation2 + $0x40] sm:$0xf] %vm296_vm2, %v7673_v58  ;;  %v1144_v12 = vld [vmem:[#allocation2 + $0x20] sm:$0xf]  ;;  %v7679_v24 = vcombine.low %v549_v19, %v549_v19  ;;  %v548_v62 = vsel %vm9338_vm4, %v537_v0, %v543_v41 }
  0x25   : > { %v1147_v35 = vld [vmem:[#allocation2 + $0x2c] sm:$0xf]  ;;  %v673_v36 = vshll.u32 %v9396_v2, 16  ;;  %v1150_v45 = vld [vmem:[#allocation2 + $0x38] sm:$0xf]  ;;  %v584_v41 = vrot.slane %v581_v7, 7 }
  0x26   : > { %v1139_v16 = vld [vmem:[#allocation2 + $0xc] sm:$0xf]  ;;  %v9408_v17 = vld [vmem:[#allocation2 + $0x10] sm:$0xf]  ;;  %563 = vst.msk [vmem:[#allocation2 + $0x50] sm:$0x1] %vm299_vm3, %v7679_v24 }
  0x27   : > { %v1834_v18 = vld [vmem:[#allocation2 + $0xc] sm:$0xe]  ;;  %v9415_v21 = vcombine.low %v1139_v16, %v9408_v17  ;;  %v1145_v23 = vld [vmem:[#allocation2 + $0x24] sm:$0xf]  ;;  %v1146_v30 = vld [vmem:[#allocation2 + $0x28] sm:$0xf] }
  0x28   : > { %v9412_v20 = vld [vmem:[#allocation2 + $0x18] sm:$0xf]  ;;  %v9417_v22 = vld [vmem:[#allocation2 + $0x1c] sm:$0xf]  ;;  %v7802_v29 = vcombine.low %v1834_v18, %v9408_v17  ;;  %v9434_v34 = vcombine.low %v1145_v23, %v1146_v30  ;;  %v7678_v30 = vcombine.high %v548_v62, %v548_v62  ;;  %297 = vst.msk [vmem:[#allocation2] sm:$0xf] %vm296_vm2, %v9371_v53 }
  0x29   : > { %v9425_v27 = vcombine.low %v9404_v11, %v9412_v20  ;;  %v9428_v28 = vcombine.low %v9417_v22, %v1144_v12  ;;  %v1872_v32 = vshrl.u32 %v9415_v21, 16  ;;  %v1874_v33 = vshll.u32 %v9415_v21, 16  ;;  %v1148_v40 = vld [vmem:[#allocation2 + $0x30] sm:$0xf]  ;;  %v1149_v50 = vld [vmem:[#allocation2 + $0x34] sm:$0xf] }
  0x2a   : > { %v1895_v44 = vshll.u32 %v9434_v34, 16  ;;  %v2148_v48 = vrot.slane %v7802_v29, 1  ;;  %v2153_v55 = vrot.slane %v9434_v34, 1  ;;  %v9446_v56 = vcombine.low %v1147_v35, %v1148_v40  ;;  %562 = vst.msk [vmem:[#allocation2 + $0x4c] sm:$0xf] %vm296_vm2, %v7678_v30 }
  0x2b   : > { %v1879_v37 = vshll.u32 %v9425_v27, 16  ;;  %v1883_v38 = vshrl.u32 %v9425_v27, 16  ;;  %v1887_v39 = vshll.u32 %v9428_v28, 16  ;;  %v1876_v42 = vrot.slane %v1874_v33, 1  ;;  %v1151_v57 = vld [vmem:[#allocation2 + $0x3c] sm:$0xf] }
  0x2c   : > { %v1891_v43 = vshrl.u32 %v9428_v28, 16  ;;  %v2149_v49 = vrot.slane %v9425_v27, 1  ;;  %v2151_v52 = vrot.slane %v9428_v28, 1  ;;  %v1897_v59 = vrot.slane %v1895_v44, 1  ;;  %v1152_v6 = vld [vmem:[#allocation2 + $0x40] sm:$0xf] }
  0x2d   : > { %v1881_v46 = vrot.slane %v1879_v37, 1  ;;  %v1889_v47 = vrot.slane %v1887_v39, 1  ;;  %v1877_v51 = vor.u32 %v1876_v42, %v1872_v32  ;;  %v1899_v61 = vshrl.u32 %v9434_v34, 16  ;;  %298 = vst.msk [vmem:[#allocation2 + $0x4] sm:$0xf] %vm296_vm2, %v9373_v54 }
  0x2e   : > { %v1903_v4 = vshll.u32 %v9446_v56, 16  ;;  %v9453_v5 = vcombine.low %v1149_v50, %v1150_v45  ;;  %v2155_v10 = vrot.slane %v9446_v56, 1  ;;  %v1907_v12 = vshrl.u32 %v9446_v56, 16 }
  0x2f   : > { %v1885_v58 = vor.u32 %v1883_v38, %v1881_v46  ;;  %v1882_v1 = vsel %vm1330_vm5, %v1877_v51, %v1881_v46  ;;  %v1893_v3 = vor.u32 %v1891_v43, %v1889_v47  ;;  %v2150_v0 = vsel %vm1608_vm6, %v2148_v48, %v2149_v49 }
  0x30   : > { %2091 = vrot.lane.b32.xlu0 %v1882_v1, %s9267_s26  ;;  %v1901_v16 = vor.u32 %v1899_v61, %v1897_v59  ;;  %v1905_v18 = vrot.slane %v1903_v4, 1  ;;  %v1911_v19 = vshll.u32 %v9453_v5, 16  ;;  %v2152_v23 = vsel %vm1608_vm6, %v2149_v49, %v2151_v52  ;;  %v1153_v61 = vld [vmem:[#allocation2 + $0x44] sm:$0xf] }
  0x31   : > { %v1890_v9 = vsel %vm1330_vm5, %v1885_v58, %v1889_v47  ;;  %v9463_v24 = vcombine.low %v1151_v57, %v1152_v6  ;;  %v7677_v29 = vcombine.low %v548_v62, %v548_v62  ;;  %v1898_v32 = vsel %vm1330_vm5, %v1893_v3, %v1897_v59 }
  0x32   : > { %2093 = vrot.lane.b32.xlu1 %v1890_v9, %s9267_s26  ;;  %v2154_v33 = vsel %vm1608_vm6, %v2151_v52, %v2153_v55  ;;  %v1909_v35 = vor.u32 %v1907_v12, %v1905_v18  ;;  %v1913_v37 = vrot.slane %v1911_v19, 1  ;;  %v2156_v38 = vsel %vm1608_vm6, %v2153_v55, %v2155_v10 }
  0x33   : > { %v1915_v39 = vshrl.u32 %v9453_v5, 16  ;;  %v1919_v40 = vshll.u32 %v9463_v24, 16  ;;  %561 = vst.msk [vmem:[#allocation2 + $0x48] sm:$0xf] %vm296_vm2, %v7677_v29  ;;  %v1906_v42 = vsel %vm1330_vm5, %v1901_v16, %v1905_v18  ;;  %v2157_v43 = vrot.slane %v9453_v5, 1 }
  0x34   : > { %2203 = vrot.lane.b32.xlu0 %v2150_v0, %s9268_s27  ;;  %v590_v44 = vrot.slane %v585_v8, 7  ;;  %v628_v45 = vrot.slane %v625_v13, 7  ;;  %v1914_v46 = vsel %vm1330_vm5, %v1909_v35, %v1913_v37  ;;  %v1923_v47 = vshrl.u32 %v9463_v24, 16  ;;  %v1155_v0 = vld [vmem:[#allocation2 + $0x4c] sm:$0xf] }
  0x35   : > { %v587_v48 = vor.u32 %v585_v8, %v584_v41  ;;  %v634_v49 = vrot.slane %v629_v15, 7  ;;  %v672_v52 = vrot.slane %v669_v31, 7  ;;  %v678_v55 = vrot.slane %v673_v36, 7 }
  0x36   : > { %2205 = vrot.lane.b32.xlu1 %v2152_v23, %s9268_s27  ;;  %v593_v50 = vsel %vm9338_vm4, %v584_v41, %v590_v44  ;;  %v631_v51 = vor.u32 %v629_v15, %v628_v45  ;;  %v1917_v57 = vor.u32 %v1915_v39, %v1913_v37  ;;  %v1921_v58 = vrot.slane %v1919_v40, 1  ;;  %v1156_v15 = vld [vmem:[#allocation2 + $0x50] sm:$0xf]  ;;  %v7706_v39 = vld [vmem:[%s9327_s25 + $0xa8] sm:$0xff] }
  0x37   : > { %v592_v8 = vsel %vm9338_vm4, %v581_v7, %v587_v48  ;;  %v7684_v59 = vcombine.low %v593_v50, %v593_v50  ;;  %v637_v4 = vsel %vm9338_vm4, %v628_v45, %v634_v49  ;;  %v675_v9 = vor.u32 %v673_v36, %v672_v52 }
  0x38   : > { %2095 = vrot.lane.b32.xlu0 %v1898_v32, %s9267_s26  ;;  %v7682_v62 = vcombine.low %v592_v8, %v592_v8  ;;  %v7683_v1 = vcombine.high %v592_v8, %v592_v8  ;;  %v636_v3 = vsel %vm9338_vm4, %v625_v13, %v631_v51  ;;  %v7689_v7 = vcombine.low %v637_v4, %v637_v4  ;;  %v7710_v51 = vld [vmem:[%s9327_s25 + $0xb0] sm:$0xff] }
  0x39   : > { %607 = vst.msk [vmem:[#allocation2 + $0x5c] sm:$0x1] %vm299_vm3, %v7684_v59  ;;  %v7687_v60 = vcombine.low %v636_v3, %v636_v3  ;;  %v7688_v6 = vcombine.high %v636_v3, %v636_v3  ;;  %v681_v63 = vsel %vm9338_vm4, %v672_v52, %v678_v55  ;;  %v713_v13 = vshrl.u32 %v9419_v25, 16  ;;  %v7715_v52 = vld [vmem:[%s9327_s25 + $0xc0] sm:$0xff]  ;;  %v7716_v55 = vld [vmem:[%s9327_s25 + $0xc8] sm:$0xff] }
  0x3a   : > { %2207 = vrot.lane.b32.xlu1 %v2154_v33, %s9268_s27  ;;  %v1154_v12 = vld [vmem:[#allocation2 + $0x48] sm:$0xf]  ;;  %605 = vst.msk [vmem:[#allocation2 + $0x54] sm:$0xf] %vm296_vm2, %v7682_v62  ;;  %606 = vst.msk [vmem:[#allocation2 + $0x58] sm:$0xf] %vm296_vm2, %v7683_v1  ;;  %v9522_v19 = vcombine.low %v1155_v0, %v1156_v15  ;;  %v680_v36 = vsel %vm9338_vm4, %v669_v31, %v675_v9  ;;  %v7694_v23 = vcombine.low %v681_v63, %v681_v63 }
  0x3b   : > { %v717_v16 = vshll.u32 %v9419_v25, 16  ;;  %v9520_v18 = vcombine.low %v1153_v61, %v1154_v12  ;;  %649 = vst.msk [vmem:[#allocation2 + $0x60] sm:$0xf] %vm296_vm2, %v7687_v60  ;;  %650 = vst.msk [vmem:[#allocation2 + $0x64] sm:$0xf] %vm296_vm2, %v7688_v6  ;;  %v7692_v25 = vcombine.low %v680_v36, %v680_v36  ;;  %v7693_v29 = vcombine.high %v680_v36, %v680_v36 }
  0x3c   : > { %2097 = vrot.lane.b32.xlu0 %v1906_v42, %s9267_s26  ;;  %651 = vst.msk [vmem:[#allocation2 + $0x68] sm:$0x1] %vm299_vm3, %v7689_v7  ;;  %v716_v30 = vrot.slane %v713_v13, 7  ;;  %v2158_v2 = vsel %vm1608_vm6, %v2155_v10, %v2157_v43  ;;  %v2159_v31 = vrot.slane %v9463_v24, 1  ;;  %695 = vst.msk [vmem:[#allocation2 + $0x74] sm:$0x1] %vm299_vm3, %v7694_v23  ;;  %v1922_v35 = vsel %vm1330_vm5, %v1917_v57, %v1921_v58 }
  0x3d   : > { %v722_v32 = vrot.slane %v717_v16, 7  ;;  %v1927_v33 = vshll.u32 %v9520_v18, 16  ;;  %v1925_v37 = vor.u32 %v1923_v47, %v1921_v58  ;;  %693 = vst.msk [vmem:[#allocation2 + $0x6c] sm:$0xf] %vm296_vm2, %v7692_v25  ;;  %694 = vst.msk [vmem:[#allocation2 + $0x70] sm:$0xf] %vm296_vm2, %v7693_v29  ;;  %v9572_v60 = vcombine.low %v9408_v17, %v9404_v11 }
  0x3e   : > { %2209 = vrot.lane.b32.xlu1 %v2156_v38, %s9268_s27  ;;  %v719_v53 = vor.u32 %v717_v16, %v716_v30  ;;  %v7705_v10 = vld [vmem:[%s9327_s25 + $0xa0] sm:$0xff]  ;;  %v2161_v40 = vrot.slane %v9520_v18, 1  ;;  %v1931_v41 = vshrl.u32 %v9520_v18, 16  ;;  %v1935_v42 = vshll.u32 %v9522_v19, 16  ;;  %v7720_v25 = vld [vmem:[%s9327_s25 + $0xd0] sm:$0xff] }
  0x3f   : > { %v725_v38 = vsel %vm9338_vm4, %v716_v30, %v722_v32  ;;  %v1929_v45 = vrot.slane %v1927_v33, 1  ;;  %v1939_v47 = vshrl.u32 %v9522_v19, 16  ;;  %v757_v50 = vshrl.u32 %v9421_v26, 16  ;;  %13181 = vst [vmem:[#allocation4_spill] sm:$0xff] %v9572_v60 }
  0x40   : > { %2099 = vrot.lane.b32.xlu0 %v1914_v46, %s9267_s26  ;;  %v7699_v44 = vcombine.low %v725_v38, %v725_v38  ;;  %v1159_v48 = vld [vmem:[#allocation2 + $0x5c] sm:$0xf]  ;;  %v724_v49 = vsel %vm9338_vm4, %v713_v13, %v719_v53  ;;  %v2160_v57 = vsel %vm1608_vm6, %v2157_v43, %v2159_v31  ;;  %v9566_v61 = vpack.c.bf16 %v7706_v39, %v7705_v10 }
  0x41   : > { %v7711_v46 = vld [vmem:[%s9327_s25 + $0xb8] sm:$0xff]  ;;  %v1157_v58 = vld [vmem:[#allocation2 + $0x54] sm:$0xf]  ;;  %v7697_v59 = vcombine.low %v724_v49, %v724_v49  ;;  %v7698_v4 = vcombine.high %v724_v49, %v724_v49  ;;  %v1933_v43 = vor.u32 %v1931_v41, %v1929_v45  ;;  %v1937_v6 = vrot.slane %v1935_v42, 1  ;;  %v7725_v41 = vld [vmem:[%s9327_s25 + $0xe0] sm:$0xff] }
  0x42   : > { %2211 = vrot.lane.b32.xlu1 %v2158_v2, %s9268_s27  ;;  %v1158_v8 = vld [vmem:[#allocation2 + $0x58] sm:$0xf]  ;;  %739 = vst.msk [vmem:[#allocation2 + $0x80] sm:$0x1] %vm299_vm3, %v7699_v44  ;;  %v1160_v62 = vld [vmem:[#allocation2 + $0x60] sm:$0xf]  ;;  %v1930_v12 = vsel %vm1330_vm5, %v1925_v37, %v1929_v45  ;;  %v2162_v63 = vsel %vm1608_vm6, %v2159_v31, %v2161_v40  ;;  %v9591_v36 = vpack.c.bf16 %v7711_v46, %v7710_v51 }
  0x43   : > { %v9568_v15 = vcombine.low %v1157_v58, %v1158_v8  ;;  %v1161_v1 = vld [vmem:[#allocation2 + $0x64] sm:$0xf]  ;;  %v1162_v3 = vld [vmem:[#allocation2 + $0x68] sm:$0xf]  ;;  %v9575_v7 = vcombine.low %v1159_v48, %v1160_v62  ;;  %737 = vst.msk [vmem:[#allocation2 + $0x78] sm:$0xf] %vm296_vm2, %v7697_v59  ;;  %v9593_v23 = vpack.c.bf16 %v7716_v55, %v7715_v52  ;;  %v1941_v29 = vor.u32 %v1939_v47, %v1937_v6 }
  0x44   : > { %2101 = vrot.lane.b32.xlu0 %v1922_v35, %s9267_s26  ;;  %v9577_v9 = vcombine.low %v1161_v1, %v1162_v3  ;;  %738 = vst.msk [vmem:[#allocation2 + $0x7c] sm:$0xf] %vm296_vm2, %v7698_v4  ;;  %v760_v11 = vrot.slane %v757_v50, 7  ;;  %v761_v17 = vshll.u32 %v9421_v26, 16  ;;  %v2163_v13 = vrot.slane %v9522_v19, 1  ;;  %v7721_v2 = vld [vmem:[%s9327_s25 + $0xd8] sm:$0xff] }
  0x45   : > { %v1943_v0 = vshll.u32 %v9568_v15, 16  ;;  %v1163_v16 = vld [vmem:[#allocation2 + $0x6c] sm:$0xf]  ;;  %v1947_v30 = vshrl.u32 %v9568_v15, 16  ;;  %v1951_v26 = vshll.u32 %v9575_v7, 16  ;;  %v1938_v31 = vsel %vm1330_vm5, %v1933_v43, %v1937_v6  ;;  %v7730_v55 = vld [vmem:[%s9327_s25 + $0xf0] sm:$0xff] }
  0x46   : > { %2213 = vrot.lane.b32.xlu1 %v2160_v57, %s9268_s27  ;;  %v1164_v54 = vld [vmem:[#allocation2 + $0x70] sm:$0xf]  ;;  %v766_v32 = vrot.slane %v761_v17, 7  ;;  %v1959_v35 = vshll.u32 %v9577_v9, 16  ;;  %v2165_v53 = vrot.slane %v9568_v15, 1  ;;  %v2167_v38 = vrot.slane %v9575_v7, 1 }
  0x47   : > { %v1945_v33 = vrot.slane %v1943_v0, 1  ;;  %v9602_v37 = vcombine.low %v1163_v16, %v1164_v54  ;;  %v1955_v10 = vshrl.u32 %v9575_v7, 16  ;;  %v763_v39 = vor.u32 %v761_v17, %v760_v11  ;;  %v7726_v42 = vld [vmem:[%s9327_s25 + $0xe8] sm:$0xff]  ;;  %v7731_v57 = vld [vmem:[%s9327_s25 + $0xf8] sm:$0xff]  ;;  %v1165_v62 = vld [vmem:[#allocation2 + $0x74] sm:$0xf] }
  0x48   : > { %2103 = vrot.lane.b32.xlu0 %v1930_v12, %s9267_s26  ;;  %v2164_v44 = vsel %vm1608_vm6, %v2161_v40, %v2163_v13  ;;  %v1963_v45 = vshrl.u32 %v9577_v9, 16  ;;  %v9615_v48 = vpack.c.bf16 %v7721_v2, %v7720_v25  ;;  %v1953_v49 = vrot.slane %v1951_v26, 1 }
  0x49   : > { %v1967_v47 = vshll.u32 %v9602_v37, 16  ;;  %v2169_v51 = vrot.slane %v9577_v9, 1  ;;  %v768_v46 = vsel %vm9338_vm4, %v757_v50, %v763_v39  ;;  %v769_v52 = vsel %vm9338_vm4, %v760_v11, %v766_v32 }
  0x4a   : > { %2215 = vrot.lane.b32.xlu1 %v2162_v63, %s9268_s27  ;;  %v1946_v40 = vsel %vm1330_vm5, %v1941_v29, %v1945_v33  ;;  %v1949_v58 = vor.u32 %v1947_v30, %v1945_v33  ;;  %v1961_v8 = vrot.slane %v1959_v35, 1  ;;  %v2171_v59 = vrot.slane %v9602_v37, 1  ;;  %v1166_v1 = vld [vmem:[#allocation2 + $0x78] sm:$0xf]  ;;  %v1168_v29 = vld [vmem:[#allocation2 + $0x80] sm:$0xf] }
  0x4b   : > { %v1957_v3 = vor.u32 %v1955_v10, %v1953_v49  ;;  %v7702_v4 = vcombine.low %v768_v46, %v768_v46  ;;  %v7703_v50 = vcombine.high %v768_v46, %v768_v46  ;;  %v7704_v43 = vcombine.low %v769_v52, %v769_v52  ;;  %v1167_v25 = vld [vmem:[#allocation2 + $0x7c] sm:$0xf] }
  0x4c   : > { %2105 = vrot.lane.b32.xlu0 %v1938_v31, %s9267_s26  ;;  %v2166_v6 = vsel %vm1608_vm6, %v2163_v13, %v2165_v53  ;;  %v1965_v12 = vor.u32 %v1963_v45, %v1961_v8  ;;  %v1969_v0 = vrot.slane %v1967_v47, 1  ;;  %v9629_v11 = vpack.c.bf16 %v7726_v42, %v7725_v41 }
  0x4d   : > { %v2168_v17 = vsel %vm1608_vm6, %v2165_v53, %v2167_v38  ;;  %v2170_v63 = vsel %vm1608_vm6, %v2167_v38, %v2169_v51  ;;  %v1971_v16 = vshrl.u32 %v9602_v37, 16  ;;  %781 = vst.msk [vmem:[#allocation2 + $0x84] sm:$0xf] %vm296_vm2, %v7702_v4  ;;  %782 = vst.msk [vmem:[#allocation2 + $0x88] sm:$0xf] %vm296_vm2, %v7703_v50  ;;  %v9637_v30 = vpack.c.bf16 %v7731_v57, %v7730_v55 }
  0x4e   : > { %2217 = vrot.lane.b32.xlu1 %v2164_v44, %s9268_s27  ;;  %783 = vst.msk [vmem:[#allocation2 + $0x8c] sm:$0x1] %vm299_vm3, %v7704_v43  ;;  %v1954_v13 = vsel %vm1330_vm5, %v1949_v58, %v1953_v49  ;;  %v9641_v26 = vcombine.low %v1165_v62, %v1166_v1  ;;  %v801_v54 = vshrl.u32 %v9566_v61, 16  ;;  %v805_v32 = vshll.u32 %v9566_v61, 16 }
  0x4f   : > { %v1962_v2 = vsel %vm1330_vm5, %v1957_v3, %v1961_v8  ;;  %v2172_v31 = vsel %vm1608_vm6, %v2169_v51, %v2171_v59  ;;  %v845_v33 = vshrl.u32 %v9591_v36, 16  ;;  %v849_v35 = vshll.u32 %v9591_v36, 16 }
  0x50   : > { %2107 = vrot.lane.b32.xlu0 %v1946_v40, %s9267_s26  ;;  %v1970_v53 = vsel %vm1330_vm5, %v1965_v12, %v1969_v0  ;;  %v9653_v38 = vcombine.low %v1167_v25, %v1168_v29  ;;  %v804_v10 = vrot.slane %v801_v54, 7  ;;  %v810_v39 = vrot.slane %v805_v32, 7 }
  0x51   : > { %v1973_v41 = vor.u32 %v1971_v16, %v1969_v0  ;;  %v848_v61 = vrot.slane %v845_v33, 7  ;;  %v854_v42 = vrot.slane %v849_v35, 7  ;;  %v889_v44 = vshrl.u32 %v9593_v23, 16 }
  0x52   : > { %2219 = vrot.lane.b32.xlu1 %v2166_v6, %s9268_s27  ;;  %v1975_v45 = vshll.u32 %v9641_v26, 16  ;;  %v807_v47 = vor.u32 %v805_v32, %v804_v10  ;;  %v813_v49 = vsel %vm9338_vm4, %v804_v10, %v810_v39  ;;  %v893_v36 = vshll.u32 %v9593_v23, 16 }
  0x53   : > { %v7709_v51 = vcombine.low %v813_v49, %v813_v49  ;;  %v851_v46 = vor.u32 %v849_v35, %v848_v61  ;;  %v857_v52 = vsel %vm9338_vm4, %v848_v61, %v854_v42  ;;  %v892_v55 = vrot.slane %v889_v44, 7 }
  0x54   : > { %2109 = vrot.lane.b32.xlu0 %v1954_v13, %s9267_s26  ;;  %v1979_v57 = vshrl.u32 %v9641_v26, 16  ;;  %v1983_v40 = vshll.u32 %v9653_v38, 16  ;;  %v1169_v58 = vld [vmem:[#allocation2 + $0x84] sm:$0xf]  ;;  %v1170_v8 = vld [vmem:[#allocation2 + $0x88] sm:$0xf]  ;;  %v812_v62 = vsel %vm9338_vm4, %v801_v54, %v807_v47  ;;  %v7714_v1 = vcombine.low %v857_v52, %v857_v52 }
  0x55   : > { %v9668_v3 = vcombine.low %v1169_v58, %v1170_v8  ;;  %v7707_v23 = vcombine.low %v812_v62, %v812_v62  ;;  %v7708_v4 = vcombine.high %v812_v62, %v812_v62  ;;  %827 = vst.msk [vmem:[#allocation2 + $0x98] sm:$0x1] %vm299_vm3, %v7709_v51  ;;  %v856_v50 = vsel %vm9338_vm4, %v845_v33, %v851_v46 }
  0x56   : > { %2221 = vrot.lane.b32.xlu1 %v2168_v17, %s9268_s27  ;;  %v7712_v43 = vcombine.low %v856_v50, %v856_v50  ;;  %v7713_v6 = vcombine.high %v856_v50, %v856_v50  ;;  %871 = vst.msk [vmem:[#allocation2 + $0xa4] sm:$0x1] %vm299_vm3, %v7714_v1  ;;  %v895_v12 = vor.u32 %v893_v36, %v892_v55  ;;  %v898_v0 = vrot.slane %v893_v36, 7  ;;  %v1171_v36 = vld [vmem:[#allocation2 + $0x8c] sm:$0xf] }
  0x57   : > { %v1977_v17 = vrot.slane %v1975_v45, 1  ;;  %v2173_v16 = vrot.slane %v9641_v26, 1  ;;  %v1987_v25 = vshrl.u32 %v9653_v38, 16  ;;  %825 = vst.msk [vmem:[#allocation2 + $0x90] sm:$0xf] %vm296_vm2, %v7707_v23  ;;  %v933_v29 = vshrl.u32 %v9615_v48, 16 }
  0x58   : > { %2111 = vrot.lane.b32.xlu0 %v1962_v2, %s9267_s26  ;;  %826 = vst.msk [vmem:[#allocation2 + $0x94] sm:$0xf] %vm296_vm2, %v7708_v4  ;;  %869 = vst.msk [vmem:[#allocation2 + $0x9c] sm:$0xf] %vm296_vm2, %v7712_v43  ;;  %v900_v13 = vsel %vm9338_vm4, %v889_v44, %v895_v12  ;;  %v937_v54 = vshll.u32 %v9615_v48, 16  ;;  %v977_v32 = vshrl.u32 %v9629_v11, 16  ;;  %v9716_v23 = vcombine.low %v9412_v20, %v9417_v22 }
  0x59   : > { %870 = vst.msk [vmem:[#allocation2 + $0xa0] sm:$0xf] %vm296_vm2, %v7713_v6  ;;  %v1981_v2 = vor.u32 %v1979_v57, %v1977_v17  ;;  %v1985_v33 = vrot.slane %v1983_v40, 1  ;;  %v7717_v35 = vcombine.low %v900_v13, %v900_v13  ;;  %v7718_v10 = vcombine.high %v900_v13, %v900_v13 }
  0x5a   : > { %2223 = vrot.lane.b32.xlu1 %v2170_v63, %s9268_s27  ;;  %v901_v63 = vsel %vm9338_vm4, %v892_v55, %v898_v0  ;;  %v1991_v39 = vshll.u32 %v9668_v3, 16  ;;  %v936_v42 = vrot.slane %v933_v29, 7  ;;  %v942_v45 = vrot.slane %v937_v54, 7  ;;  %13182 = vst [vmem:[#allocation5_spill] sm:$0xff] %v9716_v23 }
  0x5b   : > { %v7719_v61 = vcombine.low %v901_v63, %v901_v63  ;;  %v1978_v44 = vsel %vm1330_vm5, %v1973_v41, %v1977_v17  ;;  %v2174_v48 = vsel %vm1608_vm6, %v2171_v59, %v2173_v16  ;;  %v2175_v47 = vrot.slane %v9653_v38, 1  ;;  %913 = vst.msk [vmem:[#allocation2 + $0xa8] sm:$0xf] %vm296_vm2, %v7717_v35  ;;  %914 = vst.msk [vmem:[#allocation2 + $0xac] sm:$0xf] %vm296_vm2, %v7718_v10 }
  0x5c   : > { %2113 = vrot.lane.b32.xlu0 %v1970_v53, %s9267_s26  ;;  %v1989_v49 = vor.u32 %v1987_v25, %v1985_v33  ;;  %v1174_v53 = vld [vmem:[#allocation2 + $0x98] sm:$0xf]  ;;  %v939_v51 = vor.u32 %v937_v54, %v936_v42  ;;  %v980_v41 = vrot.slane %v977_v32, 7  ;;  %v981_v59 = vshll.u32 %v9629_v11, 16 }
  0x5d   : > { %915 = vst.msk [vmem:[#allocation2 + $0xb0] sm:$0x1] %vm299_vm3, %v7719_v61  ;;  %v1986_v46 = vsel %vm1330_vm5, %v1981_v2, %v1985_v33  ;;  %v2177_v52 = vrot.slane %v9668_v3, 1  ;;  %v1995_v55 = vshrl.u32 %v9668_v3, 16  ;;  %v1993_v40 = vrot.slane %v1991_v39, 1 }
  0x5e   : > { %2225 = vrot.lane.b32.xlu1 %v2172_v31, %s9268_s27  ;;  %v945_v31 = vsel %vm9338_vm4, %v936_v42, %v942_v45  ;;  %v1172_v58 = vld [vmem:[#allocation2 + $0x90] sm:$0xf]  ;;  %v944_v62 = vsel %vm9338_vm4, %v933_v29, %v939_v51  ;;  %v1021_v1 = vshrl.u32 %v9637_v30, 16  ;;  %v2176_v17 = vsel %vm1608_vm6, %v2173_v16, %v2175_v47  ;;  %v1177_v13 = vld [vmem:[#allocation2 + $0xa4] sm:$0xf] }
  0x5f   : > { %v9708_v57 = vcombine.low %v945_v31, %v945_v31  ;;  %v1173_v8 = vld [vmem:[#allocation2 + $0x94] sm:$0xf]  ;;  %v9719_v4 = vcombine.low %v1171_v36, %v1172_v58  ;;  %v1175_v43 = vld [vmem:[#allocation2 + $0x9c] sm:$0xf]  ;;  %v7722_v12 = vcombine.low %v944_v62, %v944_v62  ;;  %v7723_v0 = vcombine.high %v944_v62, %v944_v62 }
  0x60   : > { %2115 = vrot.lane.b32.xlu0 %v1978_v44, %s9267_s26  ;;  %v9721_v50 = vcombine.low %v1173_v8, %v1174_v53  ;;  %v1176_v6 = vld [vmem:[#allocation2 + $0xa0] sm:$0xf]  ;;  %v983_v25 = vor.u32 %v981_v59, %v980_v41  ;;  %v1994_v22 = vsel %vm1330_vm5, %v1989_v49, %v1993_v40  ;;  %v986_v63 = vrot.slane %v981_v59, 7 }
  0x61   : > { %959 = vst.msk [vmem:[#allocation2 + $0xbc] sm:$0x1] %vm299_vm3, %v9708_v57  ;;  %v1999_v29 = vshll.u32 %v9719_v4, 16  ;;  %v9727_v20 = vcombine.low %v1175_v43, %v1176_v6  ;;  %v1024_v16 = vrot.slane %v1021_v1, 7  ;;  %v1025_v54 = vshll.u32 %v9637_v30, 16 }
  0x62   : > { %2227 = vrot.lane.b32.xlu1 %v2174_v48, %s9268_s27  ;;  %957 = vst.msk [vmem:[#allocation2 + $0xb4] sm:$0xf] %vm296_vm2, %v7722_v12  ;;  %958 = vst.msk [vmem:[#allocation2 + $0xb8] sm:$0xf] %vm296_vm2, %v7723_v0  ;;  %v1997_v2 = vor.u32 %v1995_v55, %v1993_v40  ;;  %v2003_v35 = vshrl.u32 %v9719_v4, 16  ;;  %v2007_v10 = vshll.u32 %v9721_v50, 16  ;;  %v2178_v61 = vsel %vm1608_vm6, %v2175_v47, %v2177_v52 }
  0x63   : > { %1133 = vst.msk [vmem:[#allocation2 + $0xe4] sm:$0xf] %vm296_vm2, %v7722_v12  ;;  %1134 = vst.msk [vmem:[#allocation2 + $0xe8] sm:$0xf] %vm296_vm2, %v7723_v0  ;;  %v2001_v33 = vrot.slane %v1999_v29, 1  ;;  %v2179_v42 = vrot.slane %v9719_v4, 1  ;;  %v988_v45 = vsel %vm9338_vm4, %v977_v32, %v983_v25  ;;  %v989_v49 = vsel %vm9338_vm4, %v980_v41, %v986_v63 }
  0x64   : > { %2117 = vrot.lane.b32.xlu0 %v1986_v46, %s9267_s26  ;;  %v1178_v39 = vld [vmem:[#allocation2 + $0xa8] sm:$0xf]  ;;  %v2015_v30 = vshll.u32 %v9727_v20, 16  ;;  %v2011_v44 = vshrl.u32 %v9721_v50, 16  ;;  %v1027_v36 = vor.u32 %v1025_v54, %v1024_v16  ;;  %v2009_v53 = vrot.slane %v2007_v10, 1 }
  0x65   : > { %v9748_v48 = vcombine.low %v1177_v13, %v1178_v39  ;;  %v2002_v47 = vsel %vm1330_vm5, %v1997_v2, %v2001_v33  ;;  %v2005_v11 = vor.u32 %v2003_v35, %v2001_v33  ;;  %v7727_v51 = vcombine.low %v988_v45, %v988_v45  ;;  %v1179_v59 = vld [vmem:[#allocation2 + $0xac] sm:$0xf]  ;;  %v1180_v46 = vld [vmem:[#allocation2 + $0xb0] sm:$0xf]  ;;  %1135 = vst.msk [vmem:[#allocation2 + $0xec] sm:$0x1] %vm299_vm3, %v9708_v57 }
  0x66   : > { %2229 = vrot.lane.b32.xlu1 %v2176_v17, %s9268_s27  ;;  %v2180_v32 = vsel %vm1608_vm6, %v2177_v52, %v2179_v42  ;;  %v2181_v31 = vrot.slane %v9721_v50, 1  ;;  %v7728_v55 = vcombine.high %v988_v45, %v988_v45  ;;  %v1030_v40 = vrot.slane %v1025_v54, 7 }
  0x67   : > { %v2017_v58 = vrot.slane %v2015_v30, 1  ;;  %v2183_v8 = vrot.slane %v9727_v20, 1  ;;  %1001 = vst.msk [vmem:[#allocation2 + $0xc0] sm:$0xf] %vm296_vm2, %v7727_v51  ;;  %1089 = vst.msk [vmem:[#allocation2 + $0xd8] sm:$0xf] %vm296_vm2, %v7727_v51  ;;  %v7729_v52 = vcombine.low %v989_v49, %v989_v49  ;;  %v1032_v43 = vsel %vm9338_vm4, %v1021_v1, %v1027_v36 }
  0x68   : > { %2119 = vrot.lane.b32.xlu0 %v1994_v22, %s9267_s26  ;;  %v2019_v41 = vshrl.u32 %v9727_v20, 16  ;;  %v2023_v62 = vshll.u32 %v9748_v48, 16  ;;  %1002 = vst.msk [vmem:[#allocation2 + $0xc4] sm:$0xf] %vm296_vm2, %v7728_v55  ;;  %1090 = vst.msk [vmem:[#allocation2 + $0xdc] sm:$0xf] %vm296_vm2, %v7728_v55  ;;  %v2010_v6 = vsel %vm1330_vm5, %v2005_v11, %v2009_v53  ;;  %v2013_v12 = vor.u32 %v2011_v44, %v2009_v53 }
  0x69   : > { %v9768_v0 = vcombine.low %v1179_v59, %v1180_v46  ;;  %v7732_v17 = vcombine.low %v1032_v43, %v1032_v43  ;;  %v2182_v25 = vsel %vm1608_vm6, %v2179_v42, %v2181_v31  ;;  %v1181_v29 = vld [vmem:[#allocation2 + $0xb4] sm:$0xf]  ;;  %v1182_v22 = vld [vmem:[#allocation2 + $0xb8] sm:$0xf]  ;;  %1003 = vst.msk [vmem:[#allocation2 + $0xc8] sm:$0x1] %vm299_vm3, %v7729_v52  ;;  %v7733_v13 = vcombine.high %v1032_v43, %v1032_v43 }
  0x6a   : > { %2231 = vrot.lane.b32.xlu1 %v2178_v61, %s9268_s27  ;;  %v1033_v1 = vsel %vm9338_vm4, %v1024_v16, %v1030_v40  ;;  %1091 = vst.msk [vmem:[#allocation2 + $0xe0] sm:$0x1] %vm299_vm3, %v7729_v52  ;;  %v2021_v54 = vor.u32 %v2019_v41, %v2017_v58  ;;  %v2025_v2 = vrot.slane %v2023_v62, 1  ;;  %v2018_v33 = vsel %vm1330_vm5, %v2013_v12, %v2017_v58  ;;  %v1183_v10 = vld [vmem:[#allocation2 + $0xbc] sm:$0xf] }
  0x6b   : > { %1045 = vst.msk [vmem:[#allocation2 + $0xcc] sm:$0xf] %vm296_vm2, %v7732_v17  ;;  %v7734_v63 = vcombine.low %v1033_v1, %v1033_v1  ;;  %1046 = vst.msk [vmem:[#allocation2 + $0xd0] sm:$0xf] %vm296_vm2, %v7733_v13  ;;  %v2027_v35 = vshrl.u32 %v9748_v48, 16  ;;  %v2031_v14 = vshll.u32 %v9768_v0, 16  ;;  %v9782_v16 = vcombine.low %v1181_v29, %v1182_v22 }
  0x6c   : > { %2121 = vrot.lane.b32.xlu0 %v2002_v47, %s9267_s26  ;;  %v2184_v39 = vsel %vm1608_vm6, %v2181_v31, %v2183_v8  ;;  %v2185_v61 = vrot.slane %v9748_v48, 1  ;;  %v2026_v45 = vsel %vm1330_vm5, %v2021_v54, %v2025_v2  ;;  %v2187_v30 = vrot.slane %v9768_v0, 1  ;;  %v8929_v12 = vld [vmem:[%s13149_s1 + $0x8] sm:$0x3f]   ;;  %v8930_v29 = vld [vmem:[%s13149_s1] sm:$0x3f]  }
  0x6d   : > { %1047 = vst.msk [vmem:[#allocation2 + $0xd4] sm:$0x1] %vm299_vm3, %v7734_v63  ;;  %v2029_v49 = vor.u32 %v2027_v35, %v2025_v2  ;;  %v2033_v36 = vrot.slane %v2031_v14, 1  ;;  %v2035_v47 = vshrl.u32 %v9768_v0, 16  ;;  %v2039_v11 = vshll.u32 %v9782_v16, 16 }
  0x6e   : > { %2233 = vrot.lane.b32.xlu1 %v2180_v32, %s9268_s27  ;;  %v1184_v42 = vld [vmem:[#allocation2 + $0xc0] sm:$0xf]  ;;  %v13154_v53 = vmov 0.0   ;;  %v2186_v51 = vsel %vm1608_vm6, %v2183_v8, %v2185_v61  ;;  %v2189_v59 = vrot.slane %v9782_v16, 1  ;;  %v2043_v46 = vshrl.u32 %v9782_v16, 16 }
  0x6f   : > { %v9790_v44 = vcombine.low %v1183_v10, %v1184_v42  ;;  %8386 = vmatprep.subr.bf16.mxu0 %v13154_v53  ;;  %v1185_v32 = vld [vmem:[#allocation2 + $0xc4] sm:$0xf]  ;;  %8866 = vmatprep.subr.bf16.mxu1 %v13154_v53  ;;  %v2034_v40 = vsel %vm1330_vm5, %v2029_v49, %v2033_v36  ;;  %v2037_v58 = vor.u32 %v2035_v47, %v2033_v36  ;;  %v2041_v41 = vrot.slane %v2039_v11, 1 }
  0x70   : > { %2123 = vrot.lane.b32.xlu0 %v2010_v6, %s9267_s26  ;;  %v1186_v31 = vld [vmem:[#allocation2 + $0xc8] sm:$0xf]  ;;  %v2188_v8 = vsel %vm1608_vm6, %v2185_v61, %v2187_v30  ;;  %v2190_v63 = vsel %vm1608_vm6, %v2187_v30, %v2189_v59  ;;  %v2430_v35 = vsel %vm2428_vm7, %v8929_v12, 0  ;;  %8388 = vmatprep.mubr.msk.bf16.mxu0 %vm9270_vm8, %v13154_v53  ;;  %v9836_v36 = vsel %vm2428_vm7, %v8930_v29, 0 }
  0x71   : > { %v2047_v55 = vshll.u32 %v9790_v44, 16  ;;  %v9804_v62 = vcombine.low %v1185_v32, %v1186_v31  ;;  %v2051_v6 = vshrl.u32 %v9790_v44, 16  ;;  %v2045_v17 = vor.u32 %v2043_v46, %v2041_v41  ;;  %8387 = vmatpush3.bf16.msra.mxu0 %v2430_v35  ;;  %8514 = vmatprep.mubr.msk.bf16.mxu1 %vm9270_vm8, %v13154_v53  ;;  %v8925_v11 = vld [vmem:[#allocation2 + $0xdc] sm:$0xff]  }
  0x72   : > { %2235 = vrot.lane.b32.xlu1 %v2182_v25, %s9268_s27  ;;  %v1187_v52 = vld [vmem:[#allocation2 + $0xcc] sm:$0xf]  ;;  %v1188_v43 = vld [vmem:[#allocation2 + $0xd0] sm:$0xf]  ;;  %v2042_v22 = vsel %vm1330_vm5, %v2037_v58, %v2041_v41  ;;  %v2191_v54 = vrot.slane %v9790_v44, 1  ;;  %8496 = vmatprep.subr.bf16.mxu0 %v13154_v53  ;;  %v2079_v41 = vshll.u32 %v8925_v11, 16 }
  0x73   : > { %13183 = vst [vmem:[#allocation6_spill] sm:$0xff] %v9804_v62  ;;  %v2049_v25 = vrot.slane %v2047_v55, 1  ;;  %v2055_v13 = vshll.u32 %v9804_v62, 16  ;;  %v9818_v1 = vcombine.low %v1187_v52, %v1188_v43  ;;  %v2193_v49 = vrot.slane %v9804_v62, 1  ;;  %8867 = vmatpush3.bf16.msra.mxu1 %v9836_v36  ;;  %v1136_v46 = vld [vmem:[#allocation2] sm:$0xf] }
  0x74   : > { %2125 = vrot.lane.b32.xlu0 %v2018_v33, %s9267_s26  ;;  %v1189_v2 = vld [vmem:[#allocation2 + $0xd4] sm:$0xf]  ;;  %v1830_v33 = vld [vmem:[#allocation2 + $0xd8] sm:$0xf]  ;;  %v2192_v30 = vsel %vm1608_vm6, %v2189_v59, %v2191_v54  ;;  %v1137_v55 = vld [vmem:[#allocation2 + $0x4] sm:$0xf] }
  0x75   : > { %13184 = vst [vmem:[#allocation7_spill] sm:$0xff] %v9818_v1  ;;  %v2050_v14 = vsel %vm1330_vm5, %v2045_v17, %v2049_v25  ;;  %v2053_v10 = vor.u32 %v2051_v6, %v2049_v25  ;;  %v2057_v61 = vrot.slane %v2055_v13, 1  ;;  %v2063_v42 = vshll.u32 %v9818_v1, 16  ;;  %v1138_v43 = vld [vmem:[#allocation2 + $0x8] sm:$0xf] }
  0x76   : > { %2237 = vrot.lane.b32.xlu1 %v2184_v39, %s9268_s27  ;;  %v2059_v39 = vshrl.u32 %v9804_v62, 16  ;;  %v2067_v47 = vshrl.u32 %v9818_v1, 16  ;;  %v2195_v58 = vrot.slane %v9818_v1, 1  ;;  %v9849_v52 = vcombine.low %v1136_v46, %v1137_v55  ;;  %v9167_v13 = vld [vmem:[#allocation2 + $0xc] sm:$0xf] }
  0x77   : > { %v2065_v31 = vrot.slane %v2063_v42, 1  ;;  %v1191_v42 = vld [vmem:[#allocation2] sm:$0xe] }
  0x78   : > { %2127 = vrot.lane.b32.xlu0 %v2026_v45, %s9267_s26  ;;  %v9828_v45 = vcombine.low %v1189_v2, %v1830_v33  ;;  %v2061_v32 = vor.u32 %v2059_v39, %v2057_v61  ;;  %13186 = vst [vmem:[#allocation9_spill] sm:$0xff] %v9849_v52  ;;  %v2196_v29 = vsel %vm1608_vm6, %v2193_v49, %v2195_v58  ;;  %v1334_v2 = vshll.u32 %v9849_v52, 16 }
  0x79   : > { %v2069_v12 = vor.u32 %v2067_v47, %v2065_v31 }
  0x7a   : > { %2239 = vrot.lane.b32.xlu1 %v2186_v51, %s9268_s27  ;;  %13185 = vst [vmem:[#allocation8_spill] sm:$0xff] %v9828_v45  ;;  %v2058_v51 = vsel %vm1330_vm5, %v2053_v10, %v2057_v61  ;;  %v2071_v59 = vshll.u32 %v9828_v45, 16  ;;  %v2066_v6 = vsel %vm1330_vm5, %v2061_v32, %v2065_v31  ;;  %v2075_v25 = vshrl.u32 %v9828_v45, 16 }
  0x7b   : > { %v2083_v10 = vshrl.u32 %v8925_v11, 16  ;;  %v2199_v61 = vrot.slane %v8925_v11, 1 }
  0x7c   : > { %2129 = vrot.lane.b32.xlu0 %v2034_v40, %s9267_s26  ;;  %v2194_v40 = vsel %vm1608_vm6, %v2191_v54, %v2193_v49  ;;  %v2073_v17 = vrot.slane %v2071_v59, 1  ;;  %v1336_v49 = vrot.slane %v1334_v2, 1  ;;  %v1355_v2 = vshll.u32 %v9716_v23, 16 }
  0x7e   : > { %2241 = vrot.lane.b32.xlu1 %v2188_v8, %s9268_s27  ;;  %v8926_v8 = vld [vmem:[#allocation2 + $0xe4] ss:$0 sps:$4 sm:$0x11]   ;;  %v2074_v33 = vsel %vm1330_vm5, %v2069_v12, %v2073_v17  ;;  %v2077_v35 = vor.u32 %v2075_v25, %v2073_v17 }
  0x7f   : > { %v2087_v54 = vshll.u32 %v8926_v8, 16  ;;  %v2201_v46 = vrot.slane %v8926_v8, 1  ;;  %v2957_v8 = vld [vmem:[#allocation2 + $0x1c] sm:$0xf] }
  0x80   : > { %2131 = vrot.lane.b32.xlu0 %v2042_v22, %s9267_s26  ;;  %v2197_v22 = vrot.slane %v9828_v45, 1 }
  0x81   : > { %v2089_v32 = vrot.slane %v2087_v54, 1  ;;  %v2202_v12 = vsel %vm1608_vm6, %v2199_v61, %v2201_v46  ;;  %v1614_v46 = vrot.slane %v9716_v23, 1 }
  0x82   : > { %2243 = vrot.lane.b32.xlu1 %v2190_v63, %s9268_s27  ;;  %v9856_v63 = vcombine.low %v1138_v43, %v9167_v13  ;;  %v2198_v39 = vsel %vm1608_vm6, %v2195_v58, %v2197_v22  ;;  %v2200_v59 = vsel %vm1608_vm6, %v2197_v22, %v2199_v61  ;;  %v1347_v58 = vshll.u32 %v9572_v60, 16 }
  0x83   : > { %v1351_v13 = vshrl.u32 %v9572_v60, 16  ;;  %v1612_v61 = vrot.slane %v9572_v60, 1 }
  0x84   : > { %2133 = vrot.lane.b32.xlu0 %v2050_v14, %s9267_s26  ;;  %13187 = vst [vmem:[#allocation10_spill] sm:$0xff] %v9856_v63  ;;  %v2081_v14 = vrot.slane %v2079_v41, 1  ;;  %v1339_v31 = vshll.u32 %v9856_v63, 16  ;;  %v1343_v11 = vshrl.u32 %v9856_v63, 16  ;;  %v1610_v25 = vrot.slane %v9856_v63, 1 }
  0x85   : > { %v1349_v22 = vrot.slane %v1347_v58, 1 }
  0x86   : > { %2245 = vrot.lane.b32.xlu1 %v2192_v30, %s9268_s27  ;;  %v1332_v30 = vshrl.u32 %v9849_v52, 16  ;;  %v2082_v47 = vsel %vm1330_vm5, %v2077_v35, %v2081_v14  ;;  %v9169_v35 = vld [vmem:[#allocation2 + $0x24] sm:$0xf] }
  0x88   : > { %2135 = vrot.lane.b32.xlu0 %v2058_v51, %s9267_s26  ;;  %v2085_v51 = vor.u32 %v2083_v10, %v2081_v14  ;;  %v1337_v43 = vor.u32 %v1336_v49, %v1332_v30  ;;  %v1353_v30 = vor.u32 %v1351_v13, %v1349_v22  ;;  %v9889_v49 = vld [vmem:[#allocation2 + $0x20] sm:$0xff]  }
  0x89   : > { %v3158_v58 = vshll.u32 %v9889_v49, 16 }
  0x8a   : > { %2247 = vrot.lane.b32.xlu1 %v2194_v40, %s9268_s27  ;;  %v7773_v40 = vcombine.low %v1191_v42, %v1137_v55  ;;  %v2090_v41 = vsel %vm1330_vm5, %v2085_v51, %v2089_v32  ;;  %v1359_v51 = vshrl.u32 %v9716_v23, 16  ;;  %v9181_v23 = vld [vmem:[#allocation2 + $0x54] sm:$0xf] }
  0x8c   : > { %2137 = vrot.lane.b32.xlu0 %v2066_v6, %s9267_s26  ;;  %v1341_v6 = vrot.slane %v1339_v31, 1  ;;  %v1609_v17 = vrot.slane %v7773_v40, 1  ;;  %v3011_v40 = vld [vmem:[#allocation2 + $0x18] sm:$0xe] }
  0x8e   : > { %2249 = vrot.lane.b32.xlu1 %v2196_v29, %s9268_s27  ;;  %v2956_v29 = vld [vmem:[#allocation2 + $0x18] sm:$0xf]  ;;  %v1345_v55 = vor.u32 %v1343_v11, %v1341_v6  ;;  %v1342_v54 = vsel %vm1330_vm5, %v1337_v43, %v1341_v6 }
  0x8f   : > { %v9883_v10 = vcombine.low %v2956_v29, %v2957_v8  ;;  %v1615_v29 = vsel %vm1608_vm6, %v1612_v61, %v1614_v46 }
  0x90   : > { %2139 = vrot.lane.b32.xlu0 %v2074_v33, %s9267_s26  ;;  %v9168_v33 = vld [vmem:[#allocation2 + $0x20] sm:$0xf]  ;;  %v1350_v42 = vsel %vm1330_vm5, %v1345_v55, %v1349_v22  ;;  %v7889_v22 = vcombine.low %v3011_v40, %v2957_v8  ;;  %v9926_v40 = vld [vmem:[#allocation2 + $0x38] sm:$0xff]  }
  0x91   : > { %v9881_v14 = vcombine.low %v9168_v33, %v9169_v35  ;;  %13188 = vst [vmem:[#allocation11_spill] sm:$0xff] %v9883_v10  ;;  %v3153_v31 = vshll.u32 %v9883_v10, 16  ;;  %v3151_v11 = vshrl.u32 %v9883_v10, 16  ;;  %v3162_v35 = vshrl.u32 %v9889_v49, 16 }
  0x92   : > { %2251 = vrot.lane.b32.xlu1 %v2198_v39, %s9268_s27  ;;  %v1611_v39 = vsel %vm1608_vm6, %v1609_v17, %v1610_v25  ;;  %v9904_v17 = vld [vmem:[#allocation2 + $0x28] sm:$0xff]  }
  0x93   : > { %v1363_v32 = vshll.u32 %v9881_v14, 16  ;;  %v1616_v55 = vrot.slane %v9881_v14, 1 }
  0x94   : > { %2141 = vrot.lane.b32.xlu0 %v2082_v47, %s9267_s26  ;;  %v1357_v47 = vrot.slane %v1355_v2, 1 }
  0x95   : > { %v9902_v6 = vrot.slane %v1363_v32, 1 }
  0x96   : > { %2253 = vrot.lane.b32.xlu1 %v2200_v59, %s9268_s27  ;;  %v1613_v59 = vsel %vm1608_vm6, %v1610_v25, %v1612_v61  ;;  %v1361_v43 = vor.u32 %v1359_v51, %v1357_v47  ;;  %v9914_v61 = vld [vmem:[#allocation2 + $0x30] sm:$0xff]   ;;  %v3428_v51 = vrot.slane %v9889_v49, 1 }
  0x97   : > { %v3174_v49 = vshll.u32 %v9914_v61, 16 }
  0x98   : > { %2143 = vrot.lane.b32.xlu0 %v2090_v41, %s9267_s26  ;;  %v1358_v41 = vsel %vm1330_vm5, %v1353_v30, %v1357_v47  ;;  %v1366_v2 = vsel %vm1330_vm5, %v1361_v43, %v9902_v6  ;;  %v1617_v30 = vsel %vm1608_vm6, %v1614_v46, %v1616_v55  ;;  %v3427_v47 = vrot.slane %v7889_v22, 1 }
  0x99   : > { %v3430_v43 = vrot.slane %v9904_v17, 1 }
  0x9a   : > { %2255 = vrot.lane.b32.xlu1 %v2202_v12, %s9268_s27  ;;  %v3155_v12 = vrot.slane %v3153_v31, 1 }
  0x9c   : > { %1551 = vrot.lane.b32.xlu0 %v1342_v54, %s9267_s26  ;;  %v3160_v54 = vrot.slane %v3158_v58, 1  ;;  %v3156_v33 = vor.u32 %v3155_v12, %v3151_v11 }
  0x9e   : > { %1664 = vrot.lane.b32.xlu1 %v1611_v39, %s9268_s27  ;;  %v3166_v39 = vshll.u32 %v9904_v17, 16  ;;  %v3164_v46 = vor.u32 %v3162_v35, %v3160_v54 }
  0xa0   : > { %1553 = vrot.lane.b32.xlu0 %v1350_v42, %s9267_s26  ;;  %v3168_v11 = vrot.slane %v3166_v39, 1 }
  0xa2   : > { %1666 = vrot.lane.b32.xlu1 %v1613_v59, %s9268_s27  ;;  %v2092_v25 = vpop.permute.xlu0 %2091  ;;  %v3170_v59 = vshrl.u32 %v9904_v17, 16  ;;  %v3169_v22 = vsel %vm1330_vm5, %v3164_v46, %v3168_v11  ;;  %v9171_v17 = vld [vmem:[#allocation2 + $0x2c] sm:$0xf] }
  0xa3   : > { %v2258_v8 = vsel %vm1718_vm9, %v9415_v21, %v2092_v25  ;;  %v3161_v21 = vsel %vm1330_vm5, %v3156_v33, %v3160_v54  ;;  %v3178_v25 = vshrl.u32 %v9914_v61, 16  ;;  %v9170_v33 = vld [vmem:[#allocation2 + $0x28] sm:$0xf] }
  0xa4   : > { %v2094_v13 = vpop.permute.xlu1 %2093  ;;  %1555 = vrot.lane.b32.xlu0 %v1358_v41, %s9267_s26  ;;  %v3429_v41 = vsel %vm1608_vm6, %v3427_v47, %v3428_v51  ;;  %v3172_v54 = vor.u32 %v3170_v59, %v3168_v11  ;;  %v9944_v35 = vcombine.low %v9170_v33, %v9171_v17  ;;  %v3434_v11 = vrot.slane %v9926_v40, 1 }
  0xa6   : > { %1668 = vrot.lane.b32.xlu1 %v1615_v29, %s9268_s27  ;;  %v2204_v42 = vpop.permute.xlu0 %2203  ;;  %v3182_v29 = vshll.u32 %v9926_v40, 16  ;;  %v1618_v17 = vrot.slane %v9944_v35, 1 }
  0xa7   : > { %v2312_v32 = vsel %vm1773_vm10, %v2258_v8, %v2204_v42  ;;  %v3431_v8 = vsel %vm1608_vm6, %v3428_v51, %v3430_v43  ;;  %v1371_v51 = vshll.u32 %v9944_v35, 16 }
  0xa8   : > { %v2206_v31 = vpop.permute.xlu1 %2205  ;;  %8389 = vmatmul.mubr.msk.bf16.vlgmr.msra.gmra.mxu0 %vm2373_vm11, %v2312_v32  ;;  %1557 = vrot.lane.b32.xlu0 %v1366_v2, %s9267_s26  ;;  %v3176_v2 = vrot.slane %v3174_v49, 1  ;;  %v3184_v47 = vrot.slane %v3182_v29, 1  ;;  %v9951_v32 = vld [vmem:[#allocation2 + $0x40] sm:$0xff]  }
  0xa9   : > { %8497 = vmatpush3.bf16.msra.mxu0 %v9836_v36  ;;  %8392 = vmatprep.mubr.msk.bf16.mxu0 %vm9270_vm8, %v13154_v53  ;;  %v2260_v36 = vsel %vm1718_vm9, %v9425_v27, %v2094_v13  ;;  %v3432_v27 = vrot.slane %v9914_v61, 1  ;;  %v1367_v61 = vshrl.u32 %v9881_v14, 16 }
  0xaa   : > { %1670 = vrot.lane.b32.xlu1 %v1617_v30, %s9268_s27  ;;  %v2096_v58 = vpop.permute.xlu0 %2095  ;;  %8606 = vmatprep.subr.bf16.mxu0 %v13154_v53  ;;  %v2314_v13 = vsel %vm1773_vm10, %v2260_v36, %v2206_v31  ;;  %v3180_v30 = vor.u32 %v3178_v25, %v3176_v2  ;;  %v3177_v59 = vsel %vm1330_vm5, %v3172_v54, %v3176_v2  ;;  %v3186_v36 = vshrl.u32 %v9926_v40, 16 }
  0xab   : > { %v2262_v31 = vsel %vm1718_vm9, %v9428_v28, %v2096_v58  ;;  %v3433_v46 = vsel %vm1608_vm6, %v3430_v43, %v3432_v27  ;;  %v3190_v25 = vshll.u32 %v9951_v32, 16  ;;  %v1369_v28 = vor.u32 %v1367_v61, %v9902_v6  ;;  %v9172_v43 = vld [vmem:[#allocation2 + $0x30] sm:$0xf]  ;;  %v9982_v6 = vld [vmem:[#allocation2 + $0x48] sm:$0xff]  }
  0xac   : > { %v2208_v12 = vpop.permute.xlu1 %2207  ;;  %3370 = vrot.lane.b32.xlu0 %v3161_v21, %s9267_s26  ;;  %v1373_v58 = vrot.slane %v1371_v51, 1  ;;  %v3435_v33 = vsel %vm1608_vm6, %v3432_v27, %v3434_v11  ;;  %v1375_v27 = vshrl.u32 %v9944_v35, 16  ;;  %v3436_v51 = vrot.slane %v9951_v32, 1 }
  0xad   : > { %v2316_v29 = vsel %vm1773_vm10, %v2262_v31, %v2208_v12  ;;  %v3188_v12 = vor.u32 %v3186_v36, %v3184_v47  ;;  %v3198_v36 = vshll.u32 %v9982_v6, 16 }
  0xae   : > { %3482 = vrot.lane.b32.xlu1 %v3429_v41, %s9268_s27  ;;  %v2098_v39 = vpop.permute.xlu0 %2097  ;;  %v3185_v41 = vsel %vm1330_vm5, %v3180_v30, %v3184_v47  ;;  %v1619_v47 = vsel %vm1608_vm6, %v1616_v55, %v1618_v17  ;;  %v9175_v55 = vld [vmem:[#allocation2 + $0x3c] sm:$0xf] }
  0xb0   : > { %v2210_v42 = vpop.permute.xlu1 %2209  ;;  %8393 = vmatmul.mubr.msk.bf16.gmra.mxu0 %vm2373_vm11, %v2314_v13  ;;  %3372 = vrot.lane.b32.xlu0 %v3169_v22, %s9267_s26  ;;  %v9173_v22 = vld [vmem:[#allocation2 + $0x34] sm:$0xf]  ;;  %v1374_v13 = vsel %vm1330_vm5, %v1369_v28, %v1373_v58 }
  0xb1   : > { %8396 = vmatprep.mubr.msk.bf16.mxu0 %vm9270_vm8, %v13154_v53  ;;  %v9972_v54 = vcombine.low %v9172_v43, %v9173_v22  ;;  %v3437_v22 = vsel %vm1608_vm6, %v3434_v11, %v3436_v51 }
  0xb2   : > { %3484 = vrot.lane.b32.xlu1 %v3431_v8, %s9268_s27  ;;  %v2100_v21 = vpop.permute.xlu0 %2099  ;;  %v3192_v8 = vrot.slane %v3190_v25, 1 }
  0xb3   : > { %v1379_v30 = vshll.u32 %v9972_v54, 16  ;;  %v1383_v11 = vshrl.u32 %v9972_v54, 16 }
  0xb4   : > { %v9963_v49 = vpop.permute.xlu1 %2211  ;;  %3374 = vrot.lane.b32.xlu0 %v3177_v59, %s9267_s26  ;;  %v2264_v59 = vsel %vm1718_vm9, %v9434_v34, %v2098_v39  ;;  %v1377_v39 = vor.u32 %v1375_v27, %v1373_v58  ;;  %v10016_v58 = vld [vmem:[#allocation2 + $0x50] sm:$0xff]  }
  0xb5   : > { %v2318_v34 = vsel %vm1773_vm10, %v2264_v59, %v2210_v42  ;;  %v1381_v25 = vrot.slane %v1379_v30, 1  ;;  %v2266_v30 = vsel %vm1718_vm9, %v9446_v56, %v2100_v21 }
  0xb6   : > { %3486 = vrot.lane.b32.xlu1 %v3433_v46, %s9268_s27  ;;  %v9974_v2 = vpop.permute.xlu0 %2101  ;;  %v3193_v46 = vsel %vm1330_vm5, %v3188_v12, %v3192_v8 }
  0xb7   : > { %v1385_v56 = vor.u32 %v1383_v11, %v1381_v25 }
  0xb8   : > { %v9978_v40 = vpop.permute.xlu1 %2213  ;;  %8397 = vmatmul.mubr.msk.bf16.gmra.mxu0 %vm2373_vm11, %v2316_v29  ;;  %3376 = vrot.lane.b32.xlu0 %v3185_v41, %s9267_s26  ;;  %v3194_v41 = vshrl.u32 %v9951_v32, 16  ;;  %v9174_v29 = vld [vmem:[#allocation2 + $0x38] sm:$0xf]  ;;  %v3200_v32 = vrot.slane %v3198_v36, 1  ;;  %v3202_v36 = vshrl.u32 %v9982_v6, 16 }
  0xb9   : > { %8400 = vmatprep.mubr.msk.bf16.mxu0 %vm9270_vm8, %v13154_v53  ;;  %v10006_v28 = vcombine.low %v9174_v29, %v9175_v55  ;;  %v9177_v29 = vld [vmem:[#allocation2 + $0x44] sm:$0xf] }
  0xba   : > { %3488 = vrot.lane.b32.xlu1 %v3435_v33, %s9268_s27  ;;  %v9992_v61 = vpop.permute.xlu0 %2103  ;;  %v1620_v33 = vrot.slane %v9972_v54, 1  ;;  %v3196_v42 = vor.u32 %v3194_v41, %v3192_v8 }
  0xbb   : > { %v1387_v27 = vshll.u32 %v10006_v28, 16 }
  0xbc   : > { %v9998_v31 = vpop.permute.xlu1 %2215  ;;  %1559 = vrot.lane.b32.xlu0 %v1374_v13, %s9267_s26  ;;  %v1382_v13 = vsel %vm1330_vm5, %v1377_v39, %v1381_v25  ;;  %v1621_v8 = vsel %vm1608_vm6, %v1618_v17, %v1620_v33  ;;  %v3201_v41 = vsel %vm1330_vm5, %v3196_v42, %v3200_v32  ;;  %v2320_v39 = vsel %vm1773_vm10, %v2266_v30, %v9963_v49  ;;  %v9176_v17 = vld [vmem:[#allocation2 + $0x40] sm:$0xf]  ;;  %v10049_v25 = vld [vmem:[#allocation2 + $0x58] sm:$0xff]  }
  0xbd   : > { %v1389_v21 = vrot.slane %v1387_v27, 1  ;;  %v10039_v55 = vcombine.low %v9176_v17, %v9177_v29  ;;  %v1622_v42 = vrot.slane %v10006_v28, 1  ;;  %v3204_v49 = vor.u32 %v3202_v36, %v3200_v32 }
  0xbe   : > { %1672 = vrot.lane.b32.xlu1 %v1619_v47, %s9268_s27  ;;  %v10008_v43 = vpop.permute.xlu0 %2105  ;;  %v3438_v47 = vrot.slane %v9982_v6, 1  ;;  %v3440_v36 = vrot.slane %v10016_v58, 1  ;;  %v3214_v17 = vshll.u32 %v10049_v25, 16 }
  0xbf   : > { %v1390_v11 = vsel %vm1330_vm5, %v1385_v56, %v1389_v21  ;;  %v1395_v27 = vshll.u32 %v10039_v55, 16  ;;  %v1623_v32 = vsel %vm1608_vm6, %v1620_v33, %v1622_v42  ;;  %v3210_v56 = vshrl.u32 %v10016_v58, 16  ;;  %v9178_v33 = vld [vmem:[#allocation2 + $0x48] sm:$0xf] }
  0xc0   : > { %v10012_v12 = vpop.permute.xlu1 %2217  ;;  %8401 = vmatmul.mubr.msk.bf16.gmra.mxu0 %vm2373_vm11, %v2318_v34  ;;  %3378 = vrot.lane.b32.xlu0 %v3193_v46, %s9267_s26  ;;  %v3206_v34 = vshll.u32 %v10016_v58, 16 }
  0xc1   : > { %8404 = vmatprep.mubr.msk.bf16.mxu0 %vm9270_vm8, %v13154_v53 }
  0xc2   : > { %3490 = vrot.lane.b32.xlu1 %v3437_v22, %s9268_s27  ;;  %v10026_v59 = vpop.permute.xlu0 %2107  ;;  %v3208_v30 = vrot.slane %v3206_v34, 1 }
  0xc4   : > { %v10030_v46 = vpop.permute.xlu1 %2219  ;;  %1561 = vrot.lane.b32.xlu0 %v1382_v13, %s9267_s26  ;;  %v3439_v13 = vsel %vm1608_vm6, %v3436_v51, %v3438_v47  ;;  %v1391_v51 = vshrl.u32 %v10006_v28, 16 }
  0xc6   : > { %1674 = vrot.lane.b32.xlu1 %v1621_v8, %s9268_s27  ;;  %v10041_v22 = vpop.permute.xlu0 %2109  ;;  %v2268_v8 = vsel %vm1718_vm9, %v9453_v5, %v9974_v2  ;;  %v1393_v5 = vor.u32 %v1391_v51, %v1389_v21  ;;  %v1397_v2 = vrot.slane %v1395_v27, 1  ;;  %v10083_v21 = vld [vmem:[#allocation2 + $0x60] sm:$0xff]   ;;  %v13190_v27 = vmov 0.0  }
  0xc7   : > { %v2322_v29 = vsel %vm1773_vm10, %v2268_v8, %v9978_v40  ;;  %v3212_v40 = vor.u32 %v3210_v56, %v3208_v30  ;;  %v3216_v8 = vrot.slane %v3214_v17, 1  ;;  %v3442_v56 = vrot.slane %v10049_v25, 1 }
  0xc8   : > { %v10045_v6 = vpop.permute.xlu1 %2221  ;;  %8405 = vmatmul.mubr.msk.bf16.gmra.mxu0 %vm2373_vm11, %v2320_v39  ;;  %3380 = vrot.lane.b32.xlu0 %v3201_v41, %s9267_s26  ;;  %v3209_v39 = vsel %vm1330_vm5, %v3204_v49, %v3208_v30  ;;  %v1624_v49 = vrot.slane %v10039_v55, 1  ;;  %v1398_v51 = vsel %vm1330_vm5, %v1393_v5, %v1397_v2  ;;  %v2276_v57 = vsel %vm1718_vm9, %v9568_v15, %v10041_v22 }
  0xc9   : > { %8408 = vmatprep.mubr.msk.bf16.mxu0 %vm9270_vm8, %v13154_v53  ;;  %v3217_v5 = vsel %vm1330_vm5, %v3212_v40, %v3216_v8 }
  0xca   : > { %3492 = vrot.lane.b32.xlu1 %v3439_v13, %s9268_s27  ;;  %v10060_v41 = vpop.permute.xlu0 %2111  ;;  %v9179_v13 = vld [vmem:[#allocation2 + $0x4c] sm:$0xf]  ;;  %v1625_v30 = vsel %vm1608_vm6, %v1622_v42, %v1624_v49  ;;  %v9180_v42 = vld [vmem:[#allocation2 + $0x50] sm:$0xf] }
  0xcb   : > { %v10073_v53 = vcombine.low %v9178_v33, %v9179_v13  ;;  %v3218_v33 = vshrl.u32 %v10049_v25, 16  ;;  %v3222_v13 = vshll.u32 %v10083_v21, 16  ;;  %v10107_v60 = vcombine.low %v9180_v42, %v9181_v23 }
  0xcc   : > { %v10064_v34 = vpop.permute.xlu1 %2223  ;;  %1563 = vrot.lane.b32.xlu0 %v1390_v11, %s9267_s26  ;;  %v3441_v11 = vsel %vm1608_vm6, %v3438_v47, %v3440_v36  ;;  %v1399_v47 = vshrl.u32 %v10039_v55, 16 }
  0xcd   : > { %13189 = vst [vmem:[#allocation12_spill] sm:$0xff] %v10073_v53  ;;  %13191 = vst [vmem:[#allocation13_spill] sm:$0xff] %v10107_v60  ;;  %v1626_v40 = vrot.slane %v10073_v53, 1 }
  0xce   : > { %1676 = vrot.lane.b32.xlu1 %v1623_v32, %s9268_s27  ;;  %v10075_v10 = vpop.permute.xlu0 %2113  ;;  %v1403_v32 = vshll.u32 %v10073_v53, 16 }
  0xd0   : > { %v10079_v58 = vpop.permute.xlu1 %2225  ;;  %8409 = vmatmul.mubr.msk.bf16.gmra.mxu0 %vm2373_vm11, %v2322_v29  ;;  %3382 = vrot.lane.b32.xlu0 %v3209_v39, %s9267_s26  ;;  %v2270_v29 = vsel %vm1718_vm9, %v9463_v24, %v9992_v61  ;;  %v1401_v24 = vor.u32 %v1399_v47, %v1397_v2  ;;  %v1405_v61 = vrot.slane %v1403_v32, 1  ;;  %v10117_v2 = vld [vmem:[#allocation2 + $0x68] sm:$0xff]   ;;  %v1411_v47 = vshll.u32 %v10107_v60, 16 }
  0xd1   : > { %8412 = vmatprep.mubr.msk.bf16.mxu0 %vm9270_vm8, %v13190_v27  ;;  %v2272_v32 = vsel %vm1718_vm9, %v9520_v18, %v10008_v43 }
  0xd2   : > { %3494 = vrot.lane.b32.xlu1 %v3441_v11, %s9268_s27  ;;  %v10094_v39 = vpop.permute.xlu0 %2115  ;;  %v2324_v11 = vsel %vm1773_vm10, %v2270_v29, %v9998_v31  ;;  %v3220_v31 = vor.u32 %v3218_v33, %v3216_v8  ;;  %v3224_v29 = vrot.slane %v3222_v13, 1  ;;  %v1406_v23 = vsel %vm1330_vm5, %v1401_v24, %v1405_v61 }
  0xd3   : > { %v1627_v8 = vsel %vm1608_vm6, %v1624_v49, %v1626_v40  ;;  %v3230_v24 = vshll.u32 %v10117_v2, 16  ;;  %v2326_v42 = vsel %vm1773_vm10, %v2272_v32, %v10012_v12  ;;  %v1413_v43 = vrot.slane %v1411_v47, 1  ;;  %v9182_v49 = vld [vmem:[#allocation2 + $0x5c] sm:$0xf] }
  0xd4   : > { %v10098_v17 = vpop.permute.xlu1 %2227  ;;  %1565 = vrot.lane.b32.xlu0 %v1398_v51, %s9267_s26  ;;  %v3443_v51 = vsel %vm1608_vm6, %v3440_v36, %v3442_v56  ;;  %v1407_v36 = vshrl.u32 %v10073_v53, 16  ;;  %v3225_v13 = vsel %vm1330_vm5, %v3220_v31, %v3224_v29  ;;  %v1628_v31 = vrot.slane %v10107_v60, 1 }
  0xd5   : > { %v3232_v32 = vrot.slane %v3230_v24, 1 }
  0xd6   : > { %1678 = vrot.lane.b32.xlu1 %v1625_v30, %s9268_s27  ;;  %v10109_v63 = vpop.permute.xlu0 %2117  ;;  %v1409_v18 = vor.u32 %v1407_v36, %v1405_v61  ;;  %v1415_v61 = vshrl.u32 %v10107_v60, 16  ;;  %v10152_v36 = vld [vmem:[#allocation2 + $0x70] sm:$0xff]  }
  0xd8   : > { %v10113_v25 = vpop.permute.xlu1 %2229  ;;  %8413 = vmatmul.mubr.msk.bf16.gmra.mxu0 %vm2373_vm11, %v2324_v11  ;;  %3384 = vrot.lane.b32.xlu0 %v3217_v5, %s9267_s26  ;;  %v3444_v5 = vrot.slane %v10083_v21, 1  ;;  %v3226_v11 = vshrl.u32 %v10083_v21, 16  ;;  %v1414_v47 = vsel %vm1330_vm5, %v1409_v18, %v1413_v43  ;;  %v1417_v18 = vor.u32 %v1415_v61, %v1413_v43 }
  0xd9   : > { %8416 = vmatprep.mubr.msk.bf16.mxu0 %vm9270_vm8, %v13190_v27 }
  0xda   : > { %3496 = vrot.lane.b32.xlu1 %v3443_v51, %s9268_s27  ;;  %v10128_v30 = vpop.permute.xlu0 %2119  ;;  %v9183_v51 = vld [vmem:[#allocation2 + $0x58] sm:$0xf]  ;;  %v3228_v12 = vor.u32 %v3226_v11, %v3224_v29  ;;  %v1629_v29 = vsel %vm1608_vm6, %v1626_v40, %v1628_v31  ;;  %v3446_v11 = vrot.slane %v10117_v2, 1  ;;  %v9184_v40 = vld [vmem:[#allocation2 + $0x60] sm:$0xf] }
  0xdb   : > { %v10141_v52 = vcombine.low %v9183_v51, %v9182_v49  ;;  %v3234_v49 = vshrl.u32 %v10117_v2, 16  ;;  %v3238_v51 = vshll.u32 %v10152_v36, 16 }
  0xdc   : > { %v10132_v33 = vpop.permute.xlu1 %2231  ;;  %1567 = vrot.lane.b32.xlu0 %v1406_v23, %s9267_s26  ;;  %v3445_v23 = vsel %vm1608_vm6, %v3442_v56, %v3444_v5 }
  0xdd   : > { %13192 = vst [vmem:[#allocation14_spill] sm:$0xff] %v10141_v52  ;;  %v1419_v56 = vshll.u32 %v10141_v52, 16  ;;  %v1630_v43 = vrot.slane %v10141_v52, 1  ;;  %v3240_v2 = vrot.slane %v3238_v51, 1  ;;  %v1423_v61 = vshrl.u32 %v10141_v52, 16 }
  0xde   : > { %1680 = vrot.lane.b32.xlu1 %v1627_v8, %s9268_s27  ;;  %v10143_v45 = vpop.permute.xlu0 %2121  ;;  %v2274_v8 = vsel %vm1718_vm9, %v9522_v19, %v10026_v59 }
  0xdf   : > { %v2328_v19 = vsel %vm1773_vm10, %v2274_v8, %v10030_v46  ;;  %v1421_v59 = vrot.slane %v1419_v56, 1  ;;  %v3236_v46 = vor.u32 %v3234_v49, %v3232_v32  ;;  %v10193_v8 = vld [vmem:[#allocation2 + $0x78] sm:$0xff]  }
  0xe0   : > { %v10147_v21 = vpop.permute.xlu1 %2233  ;;  %8417 = vmatmul.mubr.msk.bf16.gmra.mxu0 %vm2373_vm11, %v2326_v42  ;;  %3386 = vrot.lane.b32.xlu0 %v3225_v13, %s9267_s26  ;;  %v3233_v42 = vsel %vm1330_vm5, %v3228_v12, %v3232_v32  ;;  %v1631_v32 = vsel %vm1608_vm6, %v1628_v31, %v1630_v43  ;;  %v3246_v22 = vshll.u32 %v10193_v8, 16  ;;  %v9186_v31 = vld [vmem:[#allocation2 + $0x68] sm:$0xf] }
  0xe1   : > { %8420 = vmatprep.mubr.msk.bf16.mxu0 %vm9270_vm8, %v13190_v27  ;;  %v1422_v56 = vsel %vm1330_vm5, %v1417_v18, %v1421_v59  ;;  %v3241_v18 = vsel %vm1330_vm5, %v3236_v46, %v3240_v2  ;;  %v1425_v51 = vor.u32 %v1423_v61, %v1421_v59 }
  0xe2   : > { %3498 = vrot.lane.b32.xlu1 %v3445_v23, %s9268_s27  ;;  %v10162_v13 = vpop.permute.xlu0 %2123  ;;  %v9185_v23 = vld [vmem:[#allocation2 + $0x64] sm:$0xf] }
  0xe3   : > { %v10175_v1 = vcombine.low %v9184_v40, %v9185_v23  ;;  %v2330_v40 = vsel %vm1773_vm10, %v2276_v57, %v10045_v6  ;;  %v9187_v23 = vld [vmem:[#allocation2 + $0x6c] sm:$0xf] }
  0xe4   : > { %v10166_v24 = vpop.permute.xlu1 %2235  ;;  %1569 = vrot.lane.b32.xlu0 %v1414_v47, %s9267_s26  ;;  %v3447_v47 = vsel %vm1608_vm6, %v3444_v5, %v3446_v11 }
  0xe5   : > { %13193 = vst [vmem:[#allocation15_spill] sm:$0xff] %v10175_v1  ;;  %v1427_v5 = vshll.u32 %v10175_v1, 16  ;;  %v1632_v59 = vrot.slane %v10175_v1, 1  ;;  %v1431_v6 = vshrl.u32 %v10175_v1, 16 }
  0xe6   : > { %1682 = vrot.lane.b32.xlu1 %v1629_v29, %s9268_s27  ;;  %v10177_v60 = vpop.permute.xlu0 %2125 }
  0xe7   : > { %v1429_v15 = vrot.slane %v1427_v5, 1  ;;  %v3248_v5 = vrot.slane %v3246_v22, 1 }
  0xe8   : > { %v10181_v12 = vpop.permute.xlu1 %2237  ;;  %8421 = vmatmul.mubr.msk.bf16.gmra.mxu0 %vm2373_vm11, %v2328_v19  ;;  %3388 = vrot.lane.b32.xlu0 %v3233_v42, %s9267_s26  ;;  %v3448_v42 = vrot.slane %v10152_v36, 1  ;;  %v3242_v19 = vshrl.u32 %v10152_v36, 16  ;;  %v10222_v36 = vld [vmem:[#allocation2 + $0x80] sm:$0xff]  }
  0xe9   : > { %8424 = vmatprep.mubr.msk.bf16.mxu0 %vm9270_vm8, %v13190_v27  ;;  %v1430_v61 = vsel %vm1330_vm5, %v1425_v51, %v1429_v15  ;;  %v1433_v51 = vor.u32 %v1431_v6, %v1429_v15 }
  0xea   : > { %3500 = vrot.lane.b32.xlu1 %v3447_v47, %s9268_s27  ;;  %v10198_v29 = vpop.permute.xlu0 %2127  ;;  %v10211_v47 = vcombine.low %v9186_v31, %v9187_v23  ;;  %v3450_v31 = vrot.slane %v10193_v8, 1 }
  0xec   : > { %v10202_v49 = vpop.permute.xlu1 %2239  ;;  %1571 = vrot.lane.b32.xlu0 %v1422_v56, %s9267_s26  ;;  %13194 = vst [vmem:[#allocation16_spill] sm:$0xff] %v10211_v47  ;;  %v3449_v56 = vsel %vm1608_vm6, %v3446_v11, %v3448_v42  ;;  %v3244_v11 = vor.u32 %v3242_v19, %v3240_v2  ;;  %v1435_v57 = vshll.u32 %v10211_v47, 16  ;;  %v3250_v2 = vshrl.u32 %v10193_v8, 16 }
  0xed   : > { %v3254_v19 = vshll.u32 %v10222_v36, 16  ;;  %v3451_v15 = vsel %vm1608_vm6, %v3448_v42, %v3450_v31  ;;  %v1634_v8 = vrot.slane %v10211_v47, 1  ;;  %v1439_v42 = vshrl.u32 %v10211_v47, 16 }
  0xee   : > { %1684 = vrot.lane.b32.xlu1 %v1631_v32, %s9268_s27  ;;  %v10213_v52 = vpop.permute.xlu0 %2129  ;;  %v2278_v32 = vsel %vm1718_vm9, %v9575_v7, %v10060_v41  ;;  %v3249_v7 = vsel %vm1330_vm5, %v3244_v11, %v3248_v5  ;;  %v1437_v41 = vrot.slane %v1435_v57, 1  ;;  %v10255_v11 = vld [vmem:[#allocation2 + $0x88] sm:$0xff]  }
  0xef   : > { %v2332_v22 = vsel %vm1773_vm10, %v2278_v32, %v10064_v34  ;;  %v3252_v34 = vor.u32 %v3250_v2, %v3248_v5  ;;  %v1635_v5 = vsel %vm1608_vm6, %v1632_v59, %v1634_v8  ;;  %v3452_v2 = vrot.slane %v10222_v36, 1 }
  0xf0   : > { %v10217_v46 = vpop.permute.xlu1 %2241  ;;  %8425 = vmatmul.mubr.msk.bf16.gmra.mxu0 %vm2373_vm11, %v2330_v40  ;;  %3390 = vrot.lane.b32.xlu0 %v3241_v18, %s9267_s26  ;;  %v1633_v40 = vsel %vm1608_vm6, %v1630_v43, %v1632_v59  ;;  %v9188_v43 = vld [vmem:[#allocation2 + $0x70] sm:$0xf]  ;;  %v1438_v57 = vsel %vm1330_vm5, %v1433_v51, %v1437_v41  ;;  %v9190_v59 = vld [vmem:[#allocation2 + $0x78] sm:$0xf] }
  0xf1   : > { %8428 = vmatprep.mubr.msk.bf16.mxu0 %vm9270_vm8, %v13190_v27 }
  0xf2   : > { %3502 = vrot.lane.b32.xlu1 %v3449_v56, %s9268_s27  ;;  %v10232_v18 = vpop.permute.xlu0 %2131  ;;  %v9189_v56 = vld [vmem:[#allocation2 + $0x74] sm:$0xf] }
  0xf3   : > { %v10245_v1 = vcombine.low %v9188_v43, %v9189_v56  ;;  %v3262_v43 = vshll.u32 %v10255_v11, 16 }
  0xf4   : > { %v10236_v23 = vpop.permute.xlu1 %2243  ;;  %1573 = vrot.lane.b32.xlu0 %v1430_v61, %s9267_s26  ;;  %v3256_v61 = vrot.slane %v3254_v19, 1 }
  0xf5   : > { %13195 = vst [vmem:[#allocation17_spill] sm:$0xff] %v10245_v1  ;;  %v1443_v32 = vshll.u32 %v10245_v1, 16 }
  0xf6   : > { %1686 = vrot.lane.b32.xlu1 %v1633_v40, %s9268_s27  ;;  %v10247_v62 = vpop.permute.xlu0 %2133  ;;  %v2280_v40 = vsel %vm1718_vm9, %v9577_v9, %v10075_v10  ;;  %v3257_v51 = vsel %vm1330_vm5, %v3252_v34, %v3256_v61  ;;  %v1441_v9 = vor.u32 %v1439_v42, %v1437_v41  ;;  %v1636_v34 = vrot.slane %v10245_v1, 1  ;;  %v10289_v41 = vld [vmem:[#allocation2 + $0x90] sm:$0xff]  }
  0xf7   : > { %v2334_v56 = vsel %vm1773_vm10, %v2280_v40, %v10079_v58  ;;  %v1445_v10 = vrot.slane %v1443_v32, 1  ;;  %v3264_v40 = vrot.slane %v3262_v43, 1 }
  0xf8   : > { %v10251_v6 = vpop.permute.xlu1 %2245  ;;  %8429 = vmatmul.mubr.msk.bf16.gmra.mxu0 %vm2373_vm11, %v2332_v22  ;;  %3392 = vrot.lane.b32.xlu0 %v3249_v7, %s9267_s26  ;;  %v3258_v7 = vshrl.u32 %v10222_v36, 16 }
  0xf9   : > { %8432 = vmatprep.mubr.msk.bf16.mxu0 %vm9270_vm8, %v13190_v27  ;;  %v1446_v42 = vsel %vm1330_vm5, %v1441_v9, %v1445_v10  ;;  %v3266_v9 = vshrl.u32 %v10255_v11, 16 }
  0xfa   : > { %3504 = vrot.lane.b32.xlu1 %v3451_v15, %s9268_s27  ;;  %v10266_v22 = vpop.permute.xlu0 %2135  ;;  %v9191_v15 = vld [vmem:[#allocation2 + $0x7c] sm:$0xf]  ;;  %v3260_v58 = vor.u32 %v3258_v7, %v3256_v61  ;;  %v1637_v61 = vsel %vm1608_vm6, %v1634_v8, %v1636_v34  ;;  %v3454_v7 = vrot.slane %v10255_v11, 1  ;;  %v9192_v8 = vld [vmem:[#allocation2 + $0x80] sm:$0xf] }
  0xfb   : > { %v10279_v47 = vcombine.low %v9190_v59, %v9191_v15  ;;  %v3270_v59 = vshll.u32 %v10289_v41, 16 }
  0xfc   : > { %v10270_v19 = vpop.permute.xlu1 %2247  ;;  %1575 = vrot.lane.b32.xlu0 %v1438_v57, %s9267_s26  ;;  %v3453_v57 = vsel %vm1608_vm6, %v3450_v31, %v3452_v2  ;;  %v1447_v31 = vshrl.u32 %v10245_v1, 16 }
  0xfd   : > { %13196 = vst [vmem:[#allocation18_spill] sm:$0xff] %v10279_v47  ;;  %v1451_v32 = vshll.u32 %v10279_v47, 16 }
  0xfe   : > { %1688 = vrot.lane.b32.xlu1 %v1635_v5, %s9268_s27  ;;  %v10281_v53 = vpop.permute.xlu0 %2137  ;;  %v2282_v5 = vsel %vm1718_vm9, %v9602_v37, %v10094_v39  ;;  %v1449_v37 = vor.u32 %v1447_v31, %v1445_v10  ;;  %v10323_v10 = vld [vmem:[#allocation2 + $0x98] sm:$0xff]  }
  0xff   : > { %v2336_v15 = vsel %vm1773_vm10, %v2282_v5, %v10098_v17  ;;  %v1453_v39 = vrot.slane %v1451_v32, 1  ;;  %v3268_v17 = vor.u32 %v3266_v9, %v3264_v40  ;;  %v3272_v5 = vrot.slane %v3270_v59, 1 }
 0x100   : > { %v10285_v36 = vpop.permute.xlu1 %2249  ;;  %8433 = vmatmul.mubr.msk.bf16.gmra.mxu0 %vm2373_vm11, %v2334_v56  ;;  %3394 = vrot.lane.b32.xlu0 %v3257_v51, %s9267_s26  ;;  %v3265_v56 = vsel %vm1330_vm5, %v3260_v58, %v3264_v40  ;;  %v1638_v58 = vrot.slane %v10279_v47, 1  ;;  %v3456_v9 = vrot.slane %v10289_v41, 1 }
 0x101   : > { %8436 = vmatprep.mubr.msk.bf16.mxu0 %vm9270_vm8, %v13190_v27  ;;  %v1454_v31 = vsel %vm1330_vm5, %v1449_v37, %v1453_v39  ;;  %v3274_v37 = vshrl.u32 %v10289_v41, 16 }
 0x102   : > { %3506 = vrot.lane.b32.xlu1 %v3453_v57, %s9268_s27  ;;  %v10300_v51 = vpop.permute.xlu0 %2139  ;;  %v9193_v57 = vld [vmem:[#allocation2 + $0x84] sm:$0xf]  ;;  %v1639_v40 = vsel %vm1608_vm6, %v1636_v34, %v1638_v58  ;;  %v9194_v34 = vld [vmem:[#allocation2 + $0x88] sm:$0xf] }
 0x103   : > { %v10313_v1 = vcombine.low %v9192_v8, %v9193_v57  ;;  %v3278_v8 = vshll.u32 %v10323_v10, 16 }
 0x104   : > { %v10304_v43 = vpop.permute.xlu1 %2251  ;;  %1577 = vrot.lane.b32.xlu0 %v1446_v42, %s9267_s26  ;;  %v3455_v42 = vsel %vm1608_vm6, %v3452_v2, %v3454_v7  ;;  %v1455_v2 = vshrl.u32 %v10279_v47, 16 }
 0x105   : > { %13197 = vst [vmem:[#allocation19_spill] sm:$0xff] %v10304_v43  ;;  %13198 = vst [vmem:[#allocation20_spill] sm:$0xff] %v10313_v1  ;;  %v1459_v32 = vshll.u32 %v10313_v1, 16 }
 0x106   : > { %1690 = vrot.lane.b32.xlu1 %v1637_v61, %s9268_s27  ;;  %v10315_v43 = vpop.permute.xlu0 %2141  ;;  %v2284_v61 = vsel %vm1718_vm9, %v9641_v26, %v10109_v63  ;;  %v1457_v26 = vor.u32 %v1455_v2, %v1453_v39  ;;  %v10357_v39 = vld [vmem:[#allocation2 + $0xa0] sm:$0xff]  }
 0x107   : > { %v2338_v57 = vsel %vm1773_vm10, %v2284_v61, %v10113_v25  ;;  %v1461_v63 = vrot.slane %v1459_v32, 1  ;;  %v3276_v25 = vor.u32 %v3274_v37, %v3272_v5  ;;  %v3280_v61 = vrot.slane %v3278_v8, 1 }
 0x108   : > { %v10319_v11 = vpop.permute.xlu1 %2253  ;;  %8437 = vmatmul.mubr.msk.bf16.gmra.mxu0 %vm2373_vm11, %v2336_v15  ;;  %3396 = vrot.lane.b32.xlu0 %v3265_v56, %s9267_s26  ;;  %v3273_v15 = vsel %vm1330_vm5, %v3268_v17, %v3272_v5  ;;  %v1640_v17 = vrot.slane %v10313_v1, 1  ;;  %v3458_v37 = vrot.slane %v10323_v10, 1 }
 0x109   : > { %8440 = vmatprep.mubr.msk.bf16.mxu0 %vm9270_vm8, %v13190_v27  ;;  %v1462_v2 = vsel %vm1330_vm5, %v1457_v26, %v1461_v63  ;;  %v3282_v26 = vshrl.u32 %v10323_v10, 16 }
 0x10a   : > { %3508 = vrot.lane.b32.xlu1 %v3455_v42, %s9268_s27  ;;  %v10334_v56 = vpop.permute.xlu0 %2143  ;;  %v9195_v42 = vld [vmem:[#allocation2 + $0x8c] sm:$0xf]  ;;  %v1641_v5 = vsel %vm1608_vm6, %v1638_v58, %v1640_v17  ;;  %v9196_v58 = vld [vmem:[#allocation2 + $0x90] sm:$0xf] }
 0x10b   : > { %v10347_v47 = vcombine.low %v9194_v34, %v9195_v42  ;;  %v3286_v34 = vshll.u32 %v10357_v39, 16 }
 0x10c   : > { %v10338_v59 = vpop.permute.xlu1 %2255  ;;  %1579 = vrot.lane.b32.xlu0 %v1454_v31, %s9267_s26  ;;  %v3457_v31 = vsel %vm1608_vm6, %v3454_v7, %v3456_v9  ;;  %v1463_v7 = vshrl.u32 %v10313_v1, 16 }
 0x10d   : > { %13199 = vst [vmem:[#allocation21_spill] sm:$0xff] %v10338_v59  ;;  %13200 = vst [vmem:[#allocation22_spill] sm:$0xff] %v10347_v47  ;;  %v1467_v32 = vshll.u32 %v10347_v47, 16 }
 0x10e   : > { %1692 = vrot.lane.b32.xlu1 %v1639_v40, %s9268_s27  ;;  %v10349_v59 = vpop.permute.xlu0 %1551  ;;  %v2286_v40 = vsel %vm1718_vm9, %v9653_v38, %v10128_v30  ;;  %v1465_v38 = vor.u32 %v1463_v7, %v1461_v63  ;;  %v10391_v63 = vld [vmem:[#allocation2 + $0xa8] sm:$0xff]  }
 0x10f   : > { %v2340_v42 = vsel %vm1773_vm10, %v2286_v40, %v10132_v33  ;;  %v1469_v30 = vrot.slane %v1467_v32, 1  ;;  %v3284_v33 = vor.u32 %v3282_v26, %v3280_v61  ;;  %v3288_v40 = vrot.slane %v3286_v34, 1 }
 0x110   : > { %v10353_v41 = vpop.permute.xlu1 %1664  ;;  %8441 = vmatmul.mubr.msk.bf16.gmra.mxu0 %vm2373_vm11, %v2338_v57  ;;  %3398 = vrot.lane.b32.xlu0 %v3273_v15, %s9267_s26  ;;  %v3281_v57 = vsel %vm1330_vm5, %v3276_v25, %v3280_v61  ;;  %v1642_v25 = vrot.slane %v10347_v47, 1  ;;  %v3460_v26 = vrot.slane %v10357_v39, 1 }
 0x111   : > { %8444 = vmatprep.mubr.msk.bf16.mxu0 %vm9270_vm8, %v13190_v27  ;;  %v1470_v7 = vsel %vm1330_vm5, %v1465_v38, %v1469_v30  ;;  %v3290_v38 = vshrl.u32 %v10357_v39, 16 }
 0x112   : > { %3510 = vrot.lane.b32.xlu1 %v3457_v31, %s9268_s27  ;;  %v10368_v15 = vpop.permute.xlu0 %1553  ;;  %v9197_v31 = vld [vmem:[#allocation2 + $0x94] sm:$0xf]  ;;  %v1643_v61 = vsel %vm1608_vm6, %v1640_v17, %v1642_v25  ;;  %v9198_v17 = vld [vmem:[#allocation2 + $0x98] sm:$0xf] }
 0x113   : > { %v10381_v1 = vcombine.low %v9196_v58, %v9197_v31  ;;  %v3294_v58 = vshll.u32 %v10391_v63, 16 }
 0x114   : > { %v10372_v8 = vpop.permute.xlu1 %1666  ;;  %1581 = vrot.lane.b32.xlu0 %v1462_v2, %s9267_s26  ;;  %v3459_v2 = vsel %vm1608_vm6, %v3456_v9, %v3458_v37  ;;  %v1471_v9 = vshrl.u32 %v10347_v47, 16 }
 0x115   : > { %13201 = vst [vmem:[#allocation23_spill] sm:$0xff] %v10372_v8  ;;  %v1475_v32 = vshll.u32 %v10381_v1, 16 }
 0x116   : > { %1694 = vrot.lane.b32.xlu1 %v1641_v5, %s9268_s27  ;;  %v10383_v8 = vpop.permute.xlu0 %1555  ;;  %v2288_v5 = vsel %vm1718_vm9, %v9668_v3, %v10143_v45  ;;  %v1473_v3 = vor.u32 %v1471_v9, %v1469_v30  ;;  %v10425_v30 = vld [vmem:[#allocation2 + $0xb0] sm:$0xff]  }
 0x117   : > { %v2342_v31 = vsel %vm1773_vm10, %v2288_v5, %v10147_v21  ;;  %v1477_v45 = vrot.slane %v1475_v32, 1  ;;  %v3292_v21 = vor.u32 %v3290_v38, %v3288_v40  ;;  %v3296_v5 = vrot.slane %v3294_v58, 1 }
 0x118   : > { %v10387_v10 = vpop.permute.xlu1 %1668  ;;  %8445 = vmatmul.mubr.msk.bf16.gmra.mxu0 %vm2373_vm11, %v2340_v42  ;;  %3400 = vrot.lane.b32.xlu0 %v3281_v57, %s9267_s26  ;;  %v3289_v42 = vsel %vm1330_vm5, %v3284_v33, %v3288_v40  ;;  %v1644_v33 = vrot.slane %v10381_v1, 1  ;;  %v3462_v38 = vrot.slane %v10391_v63, 1 }
 0x119   : > { %8448 = vmatprep.mubr.msk.bf16.mxu0 %vm9270_vm8, %v13190_v27  ;;  %v1478_v9 = vsel %vm1330_vm5, %v1473_v3, %v1477_v45  ;;  %v3298_v3 = vshrl.u32 %v10391_v63, 16 }
 0x11a   : > { %3512 = vrot.lane.b32.xlu1 %v3459_v2, %s9268_s27  ;;  %v10402_v57 = vpop.permute.xlu0 %1557  ;;  %v9199_v2 = vld [vmem:[#allocation2 + $0x9c] sm:$0xf]  ;;  %v1645_v40 = vsel %vm1608_vm6, %v1642_v25, %v1644_v33  ;;  %v9200_v25 = vld [vmem:[#allocation2 + $0xa0] sm:$0xf] }
 0x11b   : > { %v10415_v47 = vcombine.low %v9198_v17, %v9199_v2  ;;  %v3302_v17 = vshll.u32 %v10425_v30, 16 }
 0x11c   : > { %v10406_v34 = vpop.permute.xlu1 %1670  ;;  %1583 = vrot.lane.b32.xlu0 %v1470_v7, %s9267_s26  ;;  %v3461_v7 = vsel %vm1608_vm6, %v3458_v37, %v3460_v26  ;;  %v1479_v37 = vshrl.u32 %v10381_v1, 16 }
 0x11d   : > { %13202 = vst [vmem:[#allocation24_spill] sm:$0xff] %v10406_v34  ;;  %v1483_v32 = vshll.u32 %v10415_v47, 16 }
 0x11e   : > { %1696 = vrot.lane.b32.xlu1 %v1643_v61, %s9268_s27  ;;  %v10417_v34 = vpop.permute.xlu0 %3370  ;;  %v2290_v61 = vsel %vm1718_vm9, %v9719_v4, %v10162_v13  ;;  %v1481_v4 = vor.u32 %v1479_v37, %v1477_v45  ;;  %v10459_v45 = vld [vmem:[#allocation2 + $0xb8] sm:$0xff]  }
 0x11f   : > { %v2344_v2 = vsel %vm1773_vm10, %v2290_v61, %v10166_v24  ;;  %v1485_v13 = vrot.slane %v1483_v32, 1  ;;  %v3300_v24 = vor.u32 %v3298_v3, %v3296_v5  ;;  %v3304_v61 = vrot.slane %v3302_v17, 1 }
 0x120   : > { %v10421_v39 = vpop.permute.xlu1 %3482  ;;  %8449 = vmatmul.mubr.msk.bf16.gmra.mxu0 %vm2373_vm11, %v2342_v31  ;;  %3402 = vrot.lane.b32.xlu0 %v3289_v42, %s9267_s26  ;;  %v3297_v31 = vsel %vm1330_vm5, %v3292_v21, %v3296_v5  ;;  %v1646_v21 = vrot.slane %v10415_v47, 1  ;;  %v3464_v3 = vrot.slane %v10425_v30, 1 }
 0x121   : > { %8452 = vmatprep.mubr.msk.bf16.mxu0 %vm9270_vm8, %v13190_v27  ;;  %v1486_v37 = vsel %vm1330_vm5, %v1481_v4, %v1485_v13  ;;  %v3306_v4 = vshrl.u32 %v10425_v30, 16 }
 0x122   : > { %3514 = vrot.lane.b32.xlu1 %v3461_v7, %s9268_s27  ;;  %v10436_v42 = vpop.permute.xlu0 %3372  ;;  %v9201_v7 = vld [vmem:[#allocation2 + $0xa4] sm:$0xf]  ;;  %v1647_v5 = vsel %vm1608_vm6, %v1644_v33, %v1646_v21  ;;  %v9202_v33 = vld [vmem:[#allocation2 + $0xa8] sm:$0xf] }
 0x123   : > { %13203 = vst [vmem:[#allocation25_spill] sm:$0xff] %v10436_v42  ;;  %v10449_v42 = vcombine.low %v9200_v25, %v9201_v7  ;;  %v3310_v25 = vshll.u32 %v10459_v45, 16 }
 0x124   : > { %v10440_v58 = vpop.permute.xlu1 %3484  ;;  %1585 = vrot.lane.b32.xlu0 %v1478_v9, %s9267_s26  ;;  %v3463_v9 = vsel %vm1608_vm6, %v3460_v26, %v3462_v38  ;;  %v1487_v26 = vshrl.u32 %v10415_v47, 16 }
 0x125   : > { %13204 = vst [vmem:[#allocation26_spill] sm:$0xff] %v10440_v58  ;;  %v1491_v32 = vshll.u32 %v10449_v42, 16 }
 0x126   : > { %1698 = vrot.lane.b32.xlu1 %v1645_v40, %s9268_s27  ;;  %v10451_v58 = vpop.permute.xlu0 %3374  ;;  %v2292_v40 = vsel %vm1718_vm9, %v9721_v50, %v10177_v60  ;;  %v1489_v60 = vor.u32 %v1487_v26, %v1485_v13  ;;  %v3312_v13 = vrot.slane %v3310_v25, 1  ;;  %v10492_v26 = vld [vmem:[#allocation2 + $0xc0] sm:$0xff]   ;;  %v9204_v25 = vld [vmem:[#allocation2 + $0xb0] sm:$0xf] }
 0x127   : > { %13205 = vst [vmem:[#allocation27_spill] sm:$0xff] %v10451_v58  ;;  %v2346_v7 = vsel %vm1773_vm10, %v2292_v40, %v10181_v12  ;;  %v1493_v50 = vrot.slane %v1491_v32, 1  ;;  %v3308_v12 = vor.u32 %v3306_v4, %v3304_v61  ;;  %v1495_v32 = vshrl.u32 %v10449_v42, 16 }
 0x128   : > { %v10455_v63 = vpop.permute.xlu1 %3486  ;;  %8453 = vmatmul.mubr.msk.bf16.gmra.mxu0 %vm2373_vm11, %v2344_v2  ;;  %3404 = vrot.lane.b32.xlu0 %v3297_v31, %s9267_s26  ;;  %v3305_v2 = vsel %vm1330_vm5, %v3300_v24, %v3304_v61  ;;  %v1648_v24 = vrot.slane %v10449_v42, 1 }
 0x129   : > { %13206 = vst [vmem:[#allocation28_spill] sm:$0xff] %v10455_v63  ;;  %8456 = vmatprep.mubr.msk.bf16.mxu0 %vm9270_vm8, %v13190_v27 }
 0x12a   : > { %3516 = vrot.lane.b32.xlu1 %v3463_v9, %s9268_s27  ;;  %v10470_v31 = vpop.permute.xlu0 %3376  ;;  %v9203_v9 = vld [vmem:[#allocation2 + $0xac] sm:$0xf]  ;;  %v1649_v61 = vsel %vm1608_vm6, %v1646_v21, %v1648_v24 }
 0x12b   : > { %13207 = vst [vmem:[#allocation29_spill] sm:$0xff] %v10470_v31  ;;  %v10483_v31 = vcombine.low %v9202_v33, %v9203_v9 }
 0x12c   : > { %v10474_v17 = vpop.permute.xlu1 %3488  ;;  %1587 = vrot.lane.b32.xlu0 %v1486_v37, %s9267_s26  ;;  %v3465_v37 = vsel %vm1608_vm6, %v3462_v38, %v3464_v3  ;;  %v1494_v38 = vsel %vm1330_vm5, %v1489_v60, %v1493_v50 }
 0x12d   : > { %13208 = vst [vmem:[#allocation30_spill] sm:$0xff] %v10474_v17 }
 0x12e   : > { %1700 = vrot.lane.b32.xlu1 %v1647_v5, %s9268_s27  ;;  %v1560_v17 = vpop.permute.xlu0 %1559 }
 0x12f   : > { %v1728_v30 = vsel %vm1718_vm9, %v9881_v14, %v1560_v17  ;;  %v1499_v14 = vshll.u32 %v10483_v31, 16  ;;  %v3313_v17 = vsel %vm1330_vm5, %v3308_v12, %v3312_v13 }
 0x130   : > { %v1673_v63 = vpop.permute.xlu1 %1672  ;;  %8457 = vmatmul.mubr.msk.bf16.gmra.mxu0 %vm2373_vm11, %v2346_v7  ;;  %3406 = vrot.lane.b32.xlu0 %v3305_v2, %s9267_s26  ;;  %v1497_v2 = vor.u32 %v1495_v32, %v1493_v50  ;;  %v9205_v7 = vld [vmem:[#allocation2 + $0xb4] sm:$0xf]  ;;  %v1503_v32 = vshrl.u32 %v10483_v31, 16 }
 0x131   : > { %v1783_v58 = vsel %vm1773_vm10, %v1728_v30, %v1673_v63  ;;  %v2294_v63 = vsel %vm1718_vm9, %v9727_v20, %v10198_v29  ;;  %8460 = vmatprep.mubr.msk.bf16.mxu0 %vm9270_vm8, %v13190_v27  ;;  %v3314_v20 = vshrl.u32 %v10459_v45, 16  ;;  %v3318_v29 = vshll.u32 %v10492_v26, 16 }
 0x132   : > { %3518 = vrot.lane.b32.xlu1 %v3465_v37, %s9268_s27  ;;  %8515 = vmatmul.mubr.msk.bf16.vlgmr.msra.gmra.mxu1 %vm2373_vm11, %v1783_v58  ;;  %v10502_v40 = vpop.permute.xlu0 %3378  ;;  %v3466_v58 = vrot.slane %v10459_v45, 1  ;;  %v2348_v21 = vsel %vm1773_vm10, %v2294_v63, %v10202_v49  ;;  %v1501_v4 = vrot.slane %v1499_v14, 1  ;;  %v10519_v60 = vcombine.low %v9204_v25, %v9205_v7  ;;  %v9207_v25 = vld [vmem:[#allocation2 + $0xbc] sm:$0xf] }
 0x133   : > { %8518 = vmatprep.mubr.msk.bf16.mxu1 %vm9270_vm8, %v13190_v27  ;;  %v1650_v37 = vrot.slane %v10483_v31, 1  ;;  %v3316_v49 = vor.u32 %v3314_v20, %v3312_v13  ;;  %v3320_v50 = vrot.slane %v3318_v29, 1  ;;  %v2296_v14 = vsel %vm1718_vm9, %v9748_v48, %v10213_v52 }
 0x134   : > { %v10510_v5 = vpop.permute.xlu1 %3490  ;;  %1589 = vrot.lane.b32.xlu0 %v1494_v38, %s9267_s26  ;;  %v3467_v9 = vsel %vm1608_vm6, %v3464_v3, %v3466_v58  ;;  %v10528_v38 = vld [vmem:[#allocation2 + $0xc8] sm:$0xff]   ;;  %v1502_v3 = vsel %vm1330_vm5, %v1497_v2, %v1501_v4  ;;  %v3322_v48 = vshrl.u32 %v10492_v26, 16  ;;  %v1505_v29 = vor.u32 %v1503_v32, %v1501_v4  ;;  %v9206_v2 = vld [vmem:[#allocation2 + $0xb8] sm:$0xf] }
 0x135   : > { %v1651_v13 = vsel %vm1608_vm6, %v1648_v24, %v1650_v37  ;;  %v3321_v20 = vsel %vm1330_vm5, %v3316_v49, %v3320_v50  ;;  %v3326_v52 = vshll.u32 %v10528_v38, 16  ;;  %v2350_v24 = vsel %vm1773_vm10, %v2296_v14, %v10217_v46  ;;  %v10564_v49 = vld [vmem:[#allocation2 + $0xd0] sm:$0xff]  }
 0x136   : > { %1702 = vrot.lane.b32.xlu1 %v1649_v61, %s9268_s27  ;;  %v1562_v33 = vpop.permute.xlu0 %1561  ;;  %v3468_v61 = vrot.slane %v10492_v26, 1  ;;  %v10555_v7 = vcombine.low %v9206_v2, %v9207_v25  ;;  %v3324_v46 = vor.u32 %v3322_v48, %v3320_v50  ;;  %v2298_v32 = vsel %vm1718_vm9, %v9768_v0, %v10232_v18 }
 0x137   : > { %v1730_v45 = vsel %vm1718_vm9, %v9944_v35, %v1562_v33  ;;  %v1507_v35 = vshll.u32 %v10519_v60, 16  ;;  %v3328_v4 = vrot.slane %v3326_v52, 1  ;;  %v3470_v14 = vrot.slane %v10528_v38, 1 }
 0x138   : > { %v1675_v30 = vpop.permute.xlu1 %1674  ;;  %8461 = vmatmul.mubr.msk.bf16.gmra.mxu0 %vm2373_vm11, %v2348_v21  ;;  %3408 = vrot.lane.b32.xlu0 %v3313_v17, %s9267_s26  ;;  %v3330_v0 = vshrl.u32 %v10528_v38, 16  ;;  %v3334_v18 = vshll.u32 %v10564_v49, 16 }
 0x139   : > { %v1785_v12 = vsel %vm1773_vm10, %v1730_v45, %v1675_v30  ;;  %8464 = vmatprep.mubr.msk.bf16.mxu0 %vm9270_vm8, %v13190_v27  ;;  %v1509_v21 = vrot.slane %v1507_v35, 1  ;;  %v1652_v45 = vrot.slane %v10519_v60, 1 }
 0x13a   : > { %3520 = vrot.lane.b32.xlu1 %v3467_v9, %s9268_s27  ;;  %8519 = vmatmul.mubr.msk.bf16.gmra.mxu1 %vm2373_vm11, %v1785_v12  ;;  %v10538_v63 = vpop.permute.xlu0 %3380  ;;  %v3469_v9 = vsel %vm1608_vm6, %v3466_v58, %v3468_v61 }
 0x13b   : > { %8522 = vmatprep.mubr.msk.bf16.mxu1 %vm9270_vm8, %v13190_v27  ;;  %v1510_v58 = vsel %vm1330_vm5, %v1505_v29, %v1509_v21  ;;  %v1653_v50 = vsel %vm1608_vm6, %v1650_v37, %v1652_v45  ;;  %v2352_v37 = vsel %vm1773_vm10, %v2298_v32, %v10236_v23  ;;  %v9209_v29 = vld [vmem:[#allocation2 + $0xc4] sm:$0xf]  ;;  %v3332_v23 = vor.u32 %v3330_v0, %v3328_v4 }
 0x13c   : > { %v10546_v17 = vpop.permute.xlu1 %3492  ;;  %1591 = vrot.lane.b32.xlu0 %v1502_v3, %s9267_s26  ;;  %v1511_v3 = vshrl.u32 %v10519_v60, 16 }
 0x13e   : > { %1704 = vrot.lane.b32.xlu1 %v1651_v13, %s9268_s27  ;;  %v1564_v33 = vpop.permute.xlu0 %1563  ;;  %v1513_v48 = vor.u32 %v1511_v3, %v1509_v21  ;;  %v3336_v21 = vrot.slane %v3334_v18, 1  ;;  %v9210_v18 = vld [vmem:[#allocation2 + $0xc8] sm:$0xf] }
 0x13f   : > { %v1732_v26 = vsel %vm1718_vm9, %v9972_v54, %v1564_v33  ;;  %v1515_v54 = vshll.u32 %v10555_v7, 16  ;;  %v3471_v33 = vsel %vm1608_vm6, %v3468_v61, %v3470_v14 }
 0x140   : > { %v1677_v30 = vpop.permute.xlu1 %1676  ;;  %8465 = vmatmul.mubr.msk.bf16.gmra.mxu0 %vm2373_vm11, %v2350_v24  ;;  %3410 = vrot.lane.b32.xlu0 %v3321_v20, %s9267_s26  ;;  %v3329_v20 = vsel %vm1330_vm5, %v3324_v46, %v3328_v4  ;;  %v9208_v24 = vld [vmem:[#allocation2 + $0xc0] sm:$0xf] }
 0x141   : > { %v1787_v12 = vsel %vm1773_vm10, %v1732_v26, %v1677_v30  ;;  %8468 = vmatprep.mubr.msk.bf16.mxu0 %vm9270_vm8, %v13190_v27  ;;  %v1517_v52 = vrot.slane %v1515_v54, 1  ;;  %v10591_v2 = vcombine.low %v9208_v24, %v9209_v29  ;;  %v3472_v54 = vrot.slane %v10564_v49, 1 }
 0x142   : > { %3522 = vrot.lane.b32.xlu1 %v3469_v9, %s9268_s27  ;;  %8523 = vmatmul.mubr.msk.bf16.gmra.mxu1 %vm2373_vm11, %v1787_v12  ;;  %v10574_v35 = vpop.permute.xlu0 %3382  ;;  %v1654_v9 = vrot.slane %v10555_v7, 1  ;;  %v1519_v12 = vshrl.u32 %v10555_v7, 16 }
 0x143   : > { %8526 = vmatprep.mubr.msk.bf16.mxu1 %vm9270_vm8, %v13190_v27  ;;  %v1518_v61 = vsel %vm1330_vm5, %v1513_v48, %v1517_v52  ;;  %v1523_v46 = vshll.u32 %v10591_v2, 16  ;;  %v3473_v29 = vsel %vm1608_vm6, %v3470_v14, %v3472_v54 }
 0x144   : > { %v10582_v13 = vpop.permute.xlu1 %3494  ;;  %1593 = vrot.lane.b32.xlu0 %v1510_v58, %s9267_s26  ;;  %v2300_v58 = vsel %vm1718_vm9, %v9782_v16, %v10247_v62  ;;  %v1655_v4 = vsel %vm1608_vm6, %v1652_v45, %v1654_v9  ;;  %v3338_v16 = vshrl.u32 %v10564_v49, 16 }
 0x145   : > { %v2354_v62 = vsel %vm1773_vm10, %v2300_v58, %v10251_v6  ;;  %v1525_v45 = vrot.slane %v1523_v46, 1 }
 0x146   : > { %1706 = vrot.lane.b32.xlu1 %v1653_v50, %s9268_s27  ;;  %v1566_v25 = vpop.permute.xlu0 %1565  ;;  %v3337_v50 = vsel %vm1330_vm5, %v3332_v23, %v3336_v21  ;;  %v2302_v23 = vsel %vm1718_vm9, %v9790_v44, %v10266_v22 }
 0x147   : > { %v1734_v38 = vsel %vm1718_vm9, %v10006_v28, %v1566_v25  ;;  %v10605_v28 = vld [vmem:[#allocation2 + $0xd8] sm:$0xff]   ;;  %v1656_v25 = vrot.slane %v10591_v2, 1  ;;  %v2356_v22 = vsel %vm1773_vm10, %v2302_v23, %v10270_v19 }
 0x148   : > { %v1679_v26 = vpop.permute.xlu1 %1678  ;;  %8469 = vmatmul.mubr.msk.bf16.gmra.mxu0 %vm2373_vm11, %v2352_v37  ;;  %3412 = vrot.lane.b32.xlu0 %v3329_v20, %s9267_s26  ;;  %v1521_v20 = vor.u32 %v1519_v12, %v1517_v52  ;;  %v3342_v0 = vshll.u32 %v10605_v28, 16  ;;  %v9211_v37 = vld [vmem:[#allocation2 + $0xcc] sm:$0xf]  ;;  %v3474_v46 = vrot.slane %v10605_v28, 1 }
 0x149   : > { %v1789_v30 = vsel %vm1773_vm10, %v1734_v38, %v1679_v26  ;;  %8472 = vmatprep.mubr.msk.bf16.mxu0 %vm9270_vm8, %v13190_v27  ;;  %v10627_v48 = vcombine.low %v9210_v18, %v9211_v37  ;;  %v10637_v38 = vld [vmem:[#allocation2 + $0xe0] sm:$0xff]   ;;  %v3340_v26 = vor.u32 %v3338_v16, %v3336_v21  ;;  %v9213_v16 = vld [vmem:[#allocation2 + $0xd4] sm:$0xf] }
 0x14a   : > { %3524 = vrot.lane.b32.xlu1 %v3471_v33, %s9268_s27  ;;  %8527 = vmatmul.mubr.msk.bf16.gmra.mxu1 %vm2373_vm11, %v1789_v30  ;;  %v10610_v3 = vpop.permute.xlu0 %3384  ;;  %v1527_v33 = vshrl.u32 %v10591_v2, 16  ;;  %v1526_v14 = vsel %vm1330_vm5, %v1521_v20, %v1525_v45  ;;  %v3344_v30 = vrot.slane %v3342_v0, 1  ;;  %v3350_v44 = vshll.u32 %v10637_v38, 16  ;;  %v9212_v20 = vld [vmem:[#allocation2 + $0xd0] sm:$0xf] }
 0x14b   : > { %8530 = vmatprep.mubr.msk.bf16.mxu1 %vm9270_vm8, %v13190_v27  ;;  %v3475_v18 = vsel %vm1608_vm6, %v3472_v54, %v3474_v46  ;;  %v3476_v23 = vrot.slane %v10637_v38, 1 }
 0x14c   : > { %v10618_v32 = vpop.permute.xlu1 %3496  ;;  %1595 = vrot.lane.b32.xlu0 %v1518_v61, %s9267_s26  ;;  %v1657_v61 = vsel %vm1608_vm6, %v1654_v9, %v1656_v25  ;;  %v1529_v58 = vor.u32 %v1527_v33, %v1525_v45  ;;  %v3345_v9 = vsel %vm1330_vm5, %v3340_v26, %v3344_v30  ;;  %v1658_v45 = vrot.slane %v10627_v48, 1  ;;  %v10677_v33 = vld [vmem:[#allocation2 + $0xe8] sm:$0xff]  }
 0x14e   : > { %1708 = vrot.lane.b32.xlu1 %v1655_v4, %s9268_s27  ;;  %v1568_v24 = vpop.permute.xlu0 %1567  ;;  %v3346_v4 = vshrl.u32 %v10605_v28, 16  ;;  %v13209_v28 = vld [vmem:[#allocation12_spill] sm:$0xff] }
 0x14f   : > { %v1736_v49 = vsel %vm1718_vm9, %v10039_v55, %v1568_v24  ;;  %v1531_v55 = vshll.u32 %v10627_v48, 16 }
 0x150   : > { %v1681_v52 = vpop.permute.xlu1 %1680  ;;  %8473 = vmatmul.mubr.msk.bf16.gmra.mxu0 %vm2373_vm11, %v2354_v62  ;;  %3414 = vrot.lane.b32.xlu0 %v3337_v50, %s9267_s26  ;;  %v10663_v62 = vcombine.low %v9212_v20, %v9213_v16  ;;  %v3477_v16 = vsel %vm1608_vm6, %v3474_v46, %v3476_v23 }
 0x151   : > { %v1791_v6 = vsel %vm1773_vm10, %v1736_v49, %v1681_v52  ;;  %8476 = vmatprep.mubr.msk.bf16.mxu0 %vm9270_vm8, %v13190_v27  ;;  %v1533_v50 = vrot.slane %v1531_v55, 1  ;;  %v3352_v49 = vrot.slane %v3350_v44, 1  ;;  %v1535_v52 = vshrl.u32 %v10627_v48, 16 }
 0x152   : > { %3526 = vrot.lane.b32.xlu1 %v3473_v29, %s9268_s27  ;;  %8531 = vmatmul.mubr.msk.bf16.gmra.mxu1 %vm2373_vm11, %v1791_v6  ;;  %v10646_v12 = vpop.permute.xlu0 %3386  ;;  %v3348_v29 = vor.u32 %v3346_v4, %v3344_v30  ;;  %v1539_v6 = vshll.u32 %v10663_v62, 16  ;;  %v1659_v30 = vsel %vm1608_vm6, %v1656_v25, %v1658_v45  ;;  %v3354_v44 = vshrl.u32 %v10637_v38, 16 }
 0x153   : > { %8534 = vmatprep.mubr.msk.bf16.mxu1 %vm9270_vm8, %v13190_v27  ;;  %v1534_v54 = vsel %vm1330_vm5, %v1529_v58, %v1533_v50  ;;  %v1537_v4 = vor.u32 %v1535_v52, %v1533_v50 }
 0x154   : > { %v10654_v21 = vpop.permute.xlu1 %3498  ;;  %1597 = vrot.lane.b32.xlu0 %v1526_v14, %s9267_s26  ;;  %v13210_v14 = vld [vmem:[#allocation6_spill] sm:$0xff]  ;;  %v3353_v58 = vsel %vm1330_vm5, %v3348_v29, %v3352_v49  ;;  %v1541_v25 = vrot.slane %v1539_v6, 1  ;;  %v3356_v46 = vor.u32 %v3354_v44, %v3352_v49  ;;  %v13212_v29 = vld [vmem:[#allocation7_spill] sm:$0xff] }
 0x155   : > { %v2304_v26 = vsel %vm1718_vm9, %v13210_v14, %v10281_v53  ;;  %v2306_v52 = vsel %vm1718_vm9, %v13212_v29, %v10300_v51  ;;  %v3478_v14 = vrot.slane %v10677_v33, 1 }
 0x156   : > { %1710 = vrot.lane.b32.xlu1 %v1657_v61, %s9268_s27  ;;  %v1570_v0 = vpop.permute.xlu0 %1569  ;;  %v2358_v53 = vsel %vm1773_vm10, %v2304_v26, %v10285_v36  ;;  %v1543_v36 = vshrl.u32 %v10663_v62, 16  ;;  %v1542_v38 = vsel %vm1330_vm5, %v1537_v4, %v1541_v25  ;;  %v13213_v26 = vld [vmem:[#allocation19_spill] sm:$0xff] }
 0x157   : > { %v1738_v37 = vsel %vm1718_vm9, %v13209_v28, %v1570_v0  ;;  %v1660_v0 = vrot.slane %v10663_v62, 1 }
 0x158   : > { %v1683_v24 = vpop.permute.xlu1 %1682  ;;  %8477 = vmatmul.mubr.msk.bf16.gmra.mxu0 %vm2373_vm11, %v2356_v22  ;;  %3416 = vrot.lane.b32.xlu0 %v3345_v9, %s9267_s26  ;;  %v3358_v22 = vshll.u32 %v10677_v33, 16  ;;  %v8959_v9 = vld [vmem:[#allocation2 + $0xd8] ss:$0 sps:$4 sm:$0x11]  }
 0x159   : > { %v1793_v19 = vsel %vm1773_vm10, %v1738_v37, %v1683_v24  ;;  %8480 = vmatprep.mubr.msk.bf16.mxu0 %vm9270_vm8, %v13190_v27  ;;  %v1661_v6 = vsel %vm1608_vm6, %v1658_v45, %v1660_v0  ;;  %v1545_v45 = vor.u32 %v1543_v36, %v1541_v25  ;;  %v1662_v44 = vrot.slane %v8959_v9, 1 }
 0x15a   : > { %3528 = vrot.lane.b32.xlu1 %v3475_v18, %s9268_s27  ;;  %8535 = vmatmul.mubr.msk.bf16.gmra.mxu1 %vm2373_vm11, %v1793_v19  ;;  %v10682_v55 = vpop.permute.xlu0 %3388  ;;  %v13211_v18 = vld [vmem:[#allocation13_spill] sm:$0xff]  ;;  %v10710_v24 = vrot.slane %v3358_v22, 1  ;;  %v1547_v19 = vshll.u32 %v8959_v9, 16  ;;  %v13214_v22 = vld [vmem:[#allocation14_spill] sm:$0xff] }
 0x15b   : > { %8538 = vmatprep.mubr.msk.bf16.mxu1 %vm9270_vm8, %v13190_v27  ;;  %v1663_v36 = vsel %vm1608_vm6, %v1660_v0, %v1662_v44  ;;  %v13216_v0 = vld [vmem:[#allocation15_spill] sm:$0xff]  ;;  %v8961_v44 = vld [vmem:[#allocation2 + $0xf0] ss:$0 sps:$4 sm:$0x11]  }
 0x15c   : > { %v10690_v61 = vpop.permute.xlu1 %3500  ;;  %1599 = vrot.lane.b32.xlu0 %v1534_v54, %s9267_s26  ;;  %v3361_v51 = vsel %vm1330_vm5, %v3356_v46, %v10710_v24 }
 0x15e   : > { %1712 = vrot.lane.b32.xlu1 %v1659_v30, %s9268_s27  ;;  %v1572_v20 = vpop.permute.xlu0 %1571  ;;  %v2360_v30 = vsel %vm1773_vm10, %v2306_v52, %v13213_v26 }
 0x15f   : > { %v1740_v28 = vsel %vm1718_vm9, %v13211_v18, %v1572_v20 }
 0x160   : > { %v1685_v50 = vpop.permute.xlu1 %1684  ;;  %8481 = vmatmul.mubr.msk.bf16.gmra.mxu0 %vm2373_vm11, %v2358_v53  ;;  %3418 = vrot.lane.b32.xlu0 %v3353_v58, %s9267_s26  ;;  %v1549_v58 = vrot.slane %v1547_v19, 1  ;;  %v3479_v53 = vsel %vm1608_vm6, %v3476_v23, %v3478_v14  ;;  %v13215_v23 = vld [vmem:[#allocation8_spill] sm:$0xff] }
 0x161   : > { %v1795_v37 = vsel %vm1773_vm10, %v1740_v28, %v1685_v50  ;;  %8484 = vmatprep.mubr.msk.bf16.mxu0 %vm9270_vm8, %v13190_v27  ;;  %v2308_v9 = vsel %vm1718_vm9, %v13215_v23, %v10315_v43  ;;  %v3366_v23 = vshll.u32 %v8961_v44, 16 }
 0x162   : > { %3530 = vrot.lane.b32.xlu1 %v3477_v16, %s9268_s27  ;;  %8539 = vmatmul.mubr.msk.bf16.gmra.mxu1 %vm2373_vm11, %v1795_v37  ;;  %v10715_v54 = vpop.permute.xlu0 %3390  ;;  %v1550_v25 = vsel %vm1330_vm5, %v1545_v45, %v1549_v58  ;;  %v2362_v43 = vsel %vm1773_vm10, %v2308_v9, %v10319_v11 }
 0x163   : > { %8542 = vmatprep.mubr.msk.bf16.mxu1 %vm9270_vm8, %v13190_v27 }
 0x164   : > { %v10723_v49 = vpop.permute.xlu1 %3502  ;;  %1601 = vrot.lane.b32.xlu0 %v1542_v38, %s9267_s26 }
 0x166   : > { %1714 = vrot.lane.b32.xlu1 %v1661_v6, %s9268_s27  ;;  %v1574_v4 = vpop.permute.xlu0 %1573 }
 0x167   : > { %v1742_v20 = vsel %vm1718_vm9, %v13214_v22, %v1574_v4  ;;  %v13217_v22 = vld [vmem:[#allocation21_spill] sm:$0xff] }
 0x168   : > { %v1687_v16 = vpop.permute.xlu1 %1686  ;;  %v10737_v28 = vpop.f32.mrf.mxu0  ;;  %8485 = vmatmul.mubr.msk.bf16.gmra.mxu0 %vm2373_vm11, %v2360_v30  ;;  %3420 = vrot.lane.b32.xlu0 %v3361_v51, %s9267_s26  ;;  %v9214_v51 = vld [vmem:[#allocation2 + $0xdc] sm:$0xff]  }
 0x169   : > { %v1797_v18 = vsel %vm1773_vm10, %v1742_v20, %v1687_v16  ;;  %8488 = vmatprep.mubr.msk.bf16.mxu0 %vm9270_vm8, %v13190_v27  ;;  %v2310_v11 = vsel %vm1718_vm9, %v9214_v51, %v10334_v56  ;;  %v13218_v56 = vld [vmem:[#allocation16_spill] sm:$0xff] }
 0x16a   : > { %3532 = vrot.lane.b32.xlu1 %v3479_v53, %s9268_s27  ;;  %8543 = vmatmul.mubr.msk.bf16.gmra.mxu1 %vm2373_vm11, %v1797_v18  ;;  %v8390_v50 = vpop.f32.mrf.mxu0  ;;  %v10747_v37 = vpop.permute.xlu0 %3392  ;;  %v2364_v20 = vsel %vm1773_vm10, %v2310_v11, %v13217_v22 }
 0x16b   : > { %8546 = vmatprep.mubr.msk.bf16.mxu1 %vm9270_vm8, %v13190_v27 }
 0x16c   : > { %v10754_v38 = vpop.permute.xlu1 %3504  ;;  %v10756_v46 = vpop.f32.mrf.mxu0  ;;  %1603 = vrot.lane.b32.xlu0 %v1550_v25, %s9267_s26  ;;  %v3362_v25 = vshrl.u32 %v10677_v33, 16  ;;  %v13221_v33 = vld [vmem:[#allocation10_spill] sm:$0xff] }
 0x16e   : > { %1716 = vrot.lane.b32.xlu1 %v1663_v36, %s9268_s27  ;;  %v8391_v19 = vpop.f32.mrf.mxu0  ;;  %v1576_v29 = vpop.permute.xlu0 %1575 }
 0x16f   : > { %v1744_v52 = vsel %vm1718_vm9, %v13216_v0, %v1576_v29  ;;  %v3364_v19 = vor.u32 %v3362_v25, %v10710_v24  ;;  %v3368_v29 = vrot.slane %v3366_v23, 1  ;;  %v3480_v0 = vrot.slane %v8961_v44, 1  ;;  %v8960_v24 = vld [vmem:[%s13149_s1 + $0x10] sm:$0x3f]  }
 0x170   : > { %v1689_v6 = vpop.permute.xlu1 %1688  ;;  %v2474_v30 = vpop.f32.mrf.mxu0  ;;  %8489 = vmatmul.mubr.msk.bf16.gmra.mxu0 %vm2373_vm11, %v2362_v43 }
 0x171   : > { %v1799_v26 = vsel %vm1773_vm10, %v1744_v52, %v1689_v6  ;;  %8492 = vmatprep.mubr.msk.bf16.mxu0 %vm9270_vm8, %v13190_v27  ;;  %v13219_v52 = vld [vmem:[#allocation9_spill] sm:$0xff]  ;;  %v3369_v51 = vsel %vm1330_vm5, %v3364_v19, %v3368_v29  ;;  %v13222_v29 = vld [vmem:[#allocation23_spill] sm:$0xff] }
 0x172   : > { %8547 = vmatmul.mubr.msk.bf16.gmra.mxu1 %vm2373_vm11, %v1799_v26  ;;  %v8394_v45 = vpop.f32.mrf.mxu0  ;;  %v10771_v58 = vpop.permute.xlu0 %3394  ;;  %v1720_v6 = vsel %vm1718_vm9, %v13219_v52, %v10349_v59  ;;  %3422 = vrot.lane.b32.xlu0 %v3369_v51, %s9267_s26  ;;  %v3481_v59 = vsel %vm1608_vm6, %v3478_v14, %v3480_v0 }
 0x173   : > { %8550 = vmatprep.mubr.msk.bf16.mxu1 %vm9270_vm8, %v13190_v27  ;;  %3534 = vrot.lane.b32.xlu1 %v3481_v59, %s9268_s27  ;;  %v1775_v44 = vsel %vm1773_vm10, %v1720_v6, %v10353_v41  ;;  %v1722_v41 = vsel %vm1718_vm9, %v13221_v33, %v10368_v15  ;;  %v13225_v33 = vld [vmem:[#allocation20_spill] sm:$0xff] }
 0x174   : > { %v10775_v4 = vpop.permute.xlu1 %3506  ;;  %v10777_v53 = vpop.f32.mrf.mxu0  ;;  %v1777_v0 = vsel %vm1773_vm10, %v1722_v41, %v13222_v29 }
 0x176   : > { %v8395_v16 = vpop.f32.mrf.mxu0  ;;  %v1578_v18 = vpop.permute.xlu0 %1577 }
 0x177   : > { %v1746_v9 = vsel %vm1718_vm9, %v13218_v56, %v1578_v18  ;;  %v3707_v16 = vsel %vm2428_vm7, %v8960_v24, 0  ;;  %v13220_v18 = vld [vmem:[#allocation17_spill] sm:$0xff] }
 0x178   : > { %v1691_v50 = vpop.permute.xlu1 %1690  ;;  %v10785_v43 = vpop.f32.mrf.mxu0  ;;  %8493 = vmatmul.mubr.msk.bf16.gmra.mxu0 %vm2373_vm11, %v2364_v20 }
 0x179   : > { %v1801_v36 = vsel %vm1773_vm10, %v1746_v9, %v1691_v50  ;;  %8498 = vmatprep.mubr.msk.bf16.mxu0 %vm9270_vm8, %v13190_v27 }
 0x17a   : > { %8551 = vmatmul.mubr.msk.bf16.gmra.mxu1 %vm2373_vm11, %v1801_v36  ;;  %v8398_v26 = vpop.f32.mrf.mxu0  ;;  %v10795_v30 = vpop.permute.xlu0 %3396 }
 0x17b   : > { %8554 = vmatprep.mubr.msk.bf16.mxu1 %vm9270_vm8, %v13190_v27  ;;  %v13223_v26 = vld [vmem:[#allocation18_spill] sm:$0xff] }
 0x17c   : > { %v10803_v11 = vpop.permute.xlu1 %3508  ;;  %v2484_v45 = vpop.f32.mrf.mxu0 }
 0x17d   : > { %v13224_v45 = vld [vmem:[#allocation4_spill] sm:$0xff] }
 0x17e   : > { %v8399_v22 = vpop.f32.mrf.mxu0  ;;  %v1580_v20 = vpop.permute.xlu0 %1579 }
 0x17f   : > { %v1748_v25 = vsel %vm1718_vm9, %v13220_v18, %v1580_v20 }
 0x180   : > { %v1693_v23 = vpop.permute.xlu1 %1692  ;;  %v10816_v9 = vpop.f32.mrf.mxu0  ;;  %8499 = vmatmul.mubr.msk.bf16.vlgmr.msra.gmra.mxu0 %vm2373_vm11, %v1775_v44  ;;  %v1724_v44 = vsel %vm1718_vm9, %v13224_v45, %v10383_v8 }
 0x181   : > { %v1803_v56 = vsel %vm1773_vm10, %v1748_v25, %v1693_v23  ;;  %8607 = vmatpush3.bf16.msra.mxu0 %v3707_v16  ;;  %8502 = vmatprep.mubr.msk.bf16.mxu0 %vm9270_vm8, %v13190_v27  ;;  %v1779_v25 = vsel %vm1773_vm10, %v1724_v44, %v10387_v10  ;;  %v13228_v44 = vld [vmem:[#allocation22_spill] sm:$0xff] }
 0x182   : > { %8555 = vmatmul.mubr.msk.bf16.gmra.mxu1 %vm2373_vm11, %v1803_v56  ;;  %v8402_v14 = vpop.f32.mrf.mxu0  ;;  %v10823_v50 = vpop.permute.xlu0 %3398 }
 0x183   : > { %8558 = vmatprep.mubr.msk.bf16.mxu1 %vm9270_vm8, %v13190_v27 }
 0x184   : > { %v10829_v36 = vpop.permute.xlu1 %3510  ;;  %v10831_v19 = vpop.f32.mrf.mxu0 }
 0x186   : > { %v8403_v52 = vpop.f32.mrf.mxu0  ;;  %v1582_v6 = vpop.permute.xlu0 %1581 }
 0x187   : > { %v1750_v15 = vsel %vm1718_vm9, %v13223_v26, %v1582_v6 }
 0x188   : > { %v1695_v24 = vpop.permute.xlu1 %1694  ;;  %v2496_v59 = vpop.f32.mrf.mxu0  ;;  %8503 = vmatmul.mubr.msk.bf16.gmra.mxu0 %vm2373_vm11, %v1777_v0  ;;  %v13226_v0 = vld [vmem:[#allocation5_spill] sm:$0xff] }
 0x189   : > { %v1805_v51 = vsel %vm1773_vm10, %v1750_v15, %v1695_v24  ;;  %8506 = vmatprep.mubr.msk.bf16.mxu0 %vm9270_vm8, %v13190_v27  ;;  %v1726_v10 = vsel %vm1718_vm9, %v13226_v0, %v10402_v57  ;;  %v13227_v24 = vld [vmem:[#allocation24_spill] sm:$0xff] }
 0x18a   : > { %8559 = vmatmul.mubr.msk.bf16.gmra.mxu1 %vm2373_vm11, %v1805_v51  ;;  %v8406_v22 = vpop.f32.mrf.mxu0  ;;  %v10845_v20 = vpop.permute.xlu0 %3400  ;;  %v1781_v51 = vsel %vm1773_vm10, %v1726_v10, %v13227_v24 }
 0x18b   : > { %8562 = vmatprep.mubr.msk.bf16.mxu1 %vm9270_vm8, %v13190_v27 }
 0x18c   : > { %v10849_v16 = vpop.permute.xlu1 %3512  ;;  %v10851_v18 = vpop.f32.mrf.mxu0 }
 0x18e   : > { %v8407_v23 = vpop.f32.mrf.mxu0  ;;  %v1584_v56 = vpop.permute.xlu0 %1583 }
 0x18f   : > { %v1752_v41 = vsel %vm1718_vm9, %v13225_v33, %v1584_v56  ;;  %v13229_v56 = vld [vmem:[#allocation11_spill] sm:$0xff] }
 0x190   : > { %v1697_v14 = vpop.permute.xlu1 %1696  ;;  %v10858_v29 = vpop.f32.mrf.mxu0  ;;  %8507 = vmatmul.mubr.msk.bf16.gmra.mxu0 %vm2373_vm11, %v1779_v25  ;;  %v3537_v33 = vsel %vm1718_vm9, %v13229_v56, %v10417_v34  ;;  %v13231_v56 = vld [vmem:[#allocation26_spill] sm:$0xff] }
 0x191   : > { %v1807_v8 = vsel %vm1773_vm10, %v1752_v41, %v1697_v14  ;;  %8510 = vmatprep.mubr.msk.bf16.mxu0 %vm9270_vm8, %v13190_v27  ;;  %v3591_v10 = vsel %vm1773_vm10, %v3537_v33, %v10421_v39 }
 0x192   : > { %8563 = vmatmul.mubr.msk.bf16.gmra.mxu1 %vm2373_vm11, %v1807_v8  ;;  %v8410_v52 = vpop.f32.mrf.mxu0  ;;  %v10867_v6 = vpop.permute.xlu0 %3402 }
 0x193   : > { %8566 = vmatprep.mubr.msk.bf16.mxu1 %vm9270_vm8, %v13190_v27 }
 0x194   : > { %v10871_v26 = vpop.permute.xlu1 %3514  ;;  %v2506_v15 = vpop.f32.mrf.mxu0 }
 0x196   : > { %v8411_v59 = vpop.f32.mrf.mxu0  ;;  %v1586_v45 = vpop.permute.xlu0 %1585 }
 0x197   : > { %v1754_v22 = vsel %vm1718_vm9, %v13228_v44, %v1586_v45  ;;  %v9215_v45 = vld [vmem:[#allocation2 + $0x20] sm:$0xff]   ;;  %v13230_v44 = vld [vmem:[#allocation25_spill] sm:$0xff] }
 0x198   : > { %v1699_v25 = vpop.permute.xlu1 %1698  ;;  %v10878_v23 = vpop.f32.mrf.mxu0  ;;  %8511 = vmatmul.mubr.msk.bf16.gmra.mxu0 %vm2373_vm11, %v1781_v51  ;;  %v3539_v39 = vsel %vm1718_vm9, %v9215_v45, %v13230_v44 }
 0x199   : > { %v1809_v57 = vsel %vm1773_vm10, %v1754_v22, %v1699_v25  ;;  %8608 = vmatprep.mubr.msk.bf16.mxu0 %vm9270_vm8, %v13190_v27  ;;  %v3593_v33 = vsel %vm1773_vm10, %v3539_v39, %v13231_v56  ;;  %v13233_v56 = vld [vmem:[#allocation28_spill] sm:$0xff] }
 0x19a   : > { %8567 = vmatmul.mubr.msk.bf16.gmra.mxu1 %vm2373_vm11, %v1809_v57  ;;  %v8414_v41 = vpop.f32.mrf.mxu0  ;;  %v10887_v14 = vpop.permute.xlu0 %3404 }
 0x19b   : > { %8570 = vmatprep.mubr.msk.bf16.mxu1 %vm9270_vm8, %v13190_v27 }
 0x19c   : > { %v10891_v8 = vpop.permute.xlu1 %3516  ;;  %v10893_v0 = vpop.f32.mrf.mxu0 }
 0x19e   : > { %v8415_v52 = vpop.f32.mrf.mxu0  ;;  %v1588_v15 = vpop.permute.xlu0 %1587 }
 0x19f   : > { %v1756_v24 = vsel %vm1718_vm9, %v10381_v1, %v1588_v15 }
 0x1a0   : > { %v1701_v51 = vpop.permute.xlu1 %1700  ;;  %v2518_v59 = vpop.f32.mrf.mxu0  ;;  %8609 = vmatmul.mubr.msk.bf16.vlgmr.msra.gmra.mxu0 %vm2373_vm11, %v3591_v10 }
 0x1a1   : > { %v1811_v34 = vsel %vm1773_vm10, %v1756_v24, %v1701_v51  ;;  %8612 = vmatprep.mubr.msk.bf16.mxu0 %vm9270_vm8, %v13190_v27  ;;  %v13232_v59 = vld [vmem:[#allocation27_spill] sm:$0xff] }
 0x1a2   : > { %8571 = vmatmul.mubr.msk.bf16.gmra.mxu1 %vm2373_vm11, %v1811_v34  ;;  %v8418_v22 = vpop.f32.mrf.mxu0  ;;  %v10906_v25 = vpop.permute.xlu0 %3406  ;;  %v9216_v34 = vld [vmem:[#allocation2 + $0x28] sm:$0xff]  }
 0x1a3   : > { %8574 = vmatprep.mubr.msk.bf16.mxu1 %vm9270_vm8, %v13190_v27  ;;  %v3541_v45 = vsel %vm1718_vm9, %v9216_v34, %v13232_v59  ;;  %v9217_v59 = vld [vmem:[#allocation2 + $0x30] sm:$0xff]  }
 0x1a4   : > { %v10910_v1 = vpop.permute.xlu1 %3518  ;;  %v10912_v57 = vpop.f32.mrf.mxu0 }
 0x1a6   : > { %v8419_v41 = vpop.f32.mrf.mxu0  ;;  %v1590_v10 = vpop.permute.xlu0 %1589 }
 0x1a7   : > { %v1758_v52 = vsel %vm1718_vm9, %v10415_v47, %v1590_v10 }
 0x1a8   : > { %v1703_v15 = vpop.permute.xlu1 %1702  ;;  %v10919_v51 = vpop.f32.mrf.mxu0  ;;  %8613 = vmatmul.mubr.msk.bf16.gmra.mxu0 %vm2373_vm11, %v3593_v33  ;;  %v3595_v33 = vsel %vm1773_vm10, %v3541_v45, %v13233_v56 }
 0x1a9   : > { %v1813_v24 = vsel %vm1773_vm10, %v1758_v52, %v1703_v15  ;;  %8616 = vmatprep.mubr.msk.bf16.mxu0 %vm9270_vm8, %v13190_v27 }
 0x1aa   : > { %8575 = vmatmul.mubr.msk.bf16.gmra.mxu1 %vm2373_vm11, %v1813_v24  ;;  %v8422_v44 = vpop.f32.mrf.mxu0  ;;  %v10927_v39 = vpop.permute.xlu0 %3408 }
 0x1ab   : > { %8578 = vmatprep.mubr.msk.bf16.mxu1 %vm9270_vm8, %v13190_v27  ;;  %v13235_v44 = vld [vmem:[#allocation29_spill] sm:$0xff] }
 0x1ac   : > { %v10931_v47 = vpop.permute.xlu1 %3520  ;;  %v2528_v22 = vpop.f32.mrf.mxu0  ;;  %v3543_v45 = vsel %vm1718_vm9, %v9217_v59, %v13235_v44 }
 0x1ae   : > { %v8423_v41 = vpop.f32.mrf.mxu0  ;;  %v1592_v10 = vpop.permute.xlu0 %1591 }
 0x1af   : > { %v1760_v52 = vsel %vm1718_vm9, %v10449_v42, %v1592_v10 }
 0x1b0   : > { %v1705_v15 = vpop.permute.xlu1 %1704  ;;  %v10938_v34 = vpop.f32.mrf.mxu0  ;;  %8617 = vmatmul.mubr.msk.bf16.gmra.mxu0 %vm2373_vm11, %v3595_v33  ;;  %v13236_v33 = vld [vmem:[#allocation30_spill] sm:$0xff] }
 0x1b1   : > { %v1815_v24 = vsel %vm1773_vm10, %v1760_v52, %v1705_v15  ;;  %13234 = vst [vmem:[#allocation12_spill] sm:$0xff] %v10938_v34  ;;  %8620 = vmatprep.mubr.msk.bf16.mxu0 %vm9270_vm8, %v13190_v27  ;;  %v3597_v10 = vsel %vm1773_vm10, %v3543_v45, %v13236_v33 }
 0x1b2   : > { %8579 = vmatmul.mubr.msk.bf16.gmra.mxu1 %vm2373_vm11, %v1815_v24  ;;  %v8426_v22 = vpop.f32.mrf.mxu0  ;;  %v10946_v56 = vpop.permute.xlu0 %3410 }
 0x1b3   : > { %8582 = vmatprep.mubr.msk.bf16.mxu1 %vm9270_vm8, %v13190_v27  ;;  %v9218_v22 = vld [vmem:[#allocation2 + $0x38] sm:$0xff]  }
 0x1b4   : > { %v10950_v42 = vpop.permute.xlu1 %3522  ;;  %v10952_v41 = vpop.f32.mrf.mxu0  ;;  %v3545_v45 = vsel %vm1718_vm9, %v9218_v22, %v10502_v40 }
 0x1b6   : > { %v8427_v52 = vpop.f32.mrf.mxu0  ;;  %v1594_v15 = vpop.permute.xlu0 %1593 }
 0x1b7   : > { %v1762_v24 = vsel %vm1718_vm9, %v10483_v31, %v1594_v15 }
 0x1b8   : > { %v1707_v34 = vpop.permute.xlu1 %1706  ;;  %v2540_v44 = vpop.f32.mrf.mxu0  ;;  %8621 = vmatmul.mubr.msk.bf16.gmra.mxu0 %vm2373_vm11, %v3597_v10  ;;  %v3599_v10 = vsel %vm1773_vm10, %v3545_v45, %v10510_v5 }
 0x1b9   : > { %v1817_v59 = vsel %vm1773_vm10, %v1762_v24, %v1707_v34  ;;  %8624 = vmatprep.mubr.msk.bf16.mxu0 %vm9270_vm8, %v13190_v27 }
 0x1ba   : > { %8583 = vmatmul.mubr.msk.bf16.gmra.mxu1 %vm2373_vm11, %v1817_v59  ;;  %v8430_v33 = vpop.f32.mrf.mxu0  ;;  %v10965_v52 = vpop.permute.xlu0 %3412 }
 0x1bb   : > { %8586 = vmatprep.mubr.msk.bf16.mxu1 %vm9270_vm8, %v13190_v27  ;;  %v9219_v33 = vld [vmem:[#allocation2 + $0x40] sm:$0xff]  }
 0x1bc   : > { %v10969_v31 = vpop.permute.xlu1 %3524  ;;  %v10971_v34 = vpop.f32.mrf.mxu0  ;;  %v3547_v5 = vsel %vm1718_vm9, %v9219_v33, %v10538_v63 }
 0x1be   : > { %v8431_v15 = vpop.f32.mrf.mxu0  ;;  %v1596_v24 = vpop.permute.xlu0 %1595 }
 0x1bf   : > { %v1764_v59 = vsel %vm1718_vm9, %v10519_v60, %v1596_v24 }
 0x1c0   : > { %v1709_v44 = vpop.permute.xlu1 %1708  ;;  %v10978_v22 = vpop.f32.mrf.mxu0  ;;  %8625 = vmatmul.mubr.msk.bf16.gmra.mxu0 %vm2373_vm11, %v3599_v10  ;;  %v3601_v10 = vsel %vm1773_vm10, %v3547_v5, %v10546_v17 }
 0x1c1   : > { %v1819_v40 = vsel %vm1773_vm10, %v1764_v59, %v1709_v44  ;;  %13237 = vst [vmem:[#allocation6_spill] sm:$0xff] %v10978_v22  ;;  %8628 = vmatprep.mubr.msk.bf16.mxu0 %vm9270_vm8, %v13190_v27 }
 0x1c2   : > { %8587 = vmatmul.mubr.msk.bf16.gmra.mxu1 %vm2373_vm11, %v1819_v40  ;;  %v8434_v45 = vpop.f32.mrf.mxu0  ;;  %v10986_v15 = vpop.permute.xlu0 %3414 }
 0x1c3   : > { %8590 = vmatprep.mubr.msk.bf16.mxu1 %vm9270_vm8, %v13190_v27  ;;  %v9220_v45 = vld [vmem:[#allocation2 + $0x48] sm:$0xff]  }
 0x1c4   : > { %v10990_v60 = vpop.permute.xlu1 %3526  ;;  %v2550_v24 = vpop.f32.mrf.mxu0  ;;  %v3549_v17 = vsel %vm1718_vm9, %v9220_v45, %v10574_v35 }
 0x1c6   : > { %v8435_v59 = vpop.f32.mrf.mxu0  ;;  %v1598_v44 = vpop.permute.xlu0 %1597 }
 0x1c7   : > { %v1766_v40 = vsel %vm1718_vm9, %v10555_v7, %v1598_v44 }
 0x1c8   : > { %v1711_v22 = vpop.permute.xlu1 %1710  ;;  %v10997_v33 = vpop.f32.mrf.mxu0  ;;  %8629 = vmatmul.mubr.msk.bf16.gmra.mxu0 %vm2373_vm11, %v3601_v10  ;;  %v3603_v10 = vsel %vm1773_vm10, %v3549_v17, %v10582_v13 }
 0x1c9   : > { %v1821_v63 = vsel %vm1773_vm10, %v1766_v40, %v1711_v22  ;;  %8632 = vmatprep.mubr.msk.bf16.mxu0 %vm9270_vm8, %v13190_v27 }
 0x1ca   : > { %8591 = vmatmul.mubr.msk.bf16.gmra.mxu1 %vm2373_vm11, %v1821_v63  ;;  %v8438_v5 = vpop.f32.mrf.mxu0  ;;  %v11005_v24 = vpop.permute.xlu0 %3416 }
 0x1cb   : > { %8594 = vmatprep.mubr.msk.bf16.mxu1 %vm9270_vm8, %v13190_v27  ;;  %v9221_v5 = vld [vmem:[#allocation2 + $0x50] sm:$0xff]  }
 0x1cc   : > { %v11009_v7 = vpop.permute.xlu1 %3528  ;;  %v11011_v22 = vpop.f32.mrf.mxu0  ;;  %v3551_v13 = vsel %vm1718_vm9, %v9221_v5, %v10610_v3 }
 0x1ce   : > { %v8439_v59 = vpop.f32.mrf.mxu0  ;;  %v1600_v44 = vpop.permute.xlu0 %1599 }
 0x1cf   : > { %v1768_v40 = vsel %vm1718_vm9, %v10591_v2, %v1600_v44 }
 0x1d0   : > { %v1713_v63 = vpop.permute.xlu1 %1712  ;;  %v2562_v45 = vpop.f32.mrf.mxu0  ;;  %8633 = vmatmul.mubr.msk.bf16.gmra.mxu0 %vm2373_vm11, %v3603_v10  ;;  %v3605_v10 = vsel %vm1773_vm10, %v3551_v13, %v10618_v32 }
 0x1d1   : > { %v1823_v35 = vsel %vm1773_vm10, %v1768_v40, %v1713_v63  ;;  %8636 = vmatprep.mubr.msk.bf16.mxu0 %vm9270_vm8, %v13190_v27 }
 0x1d2   : > { %8595 = vmatmul.mubr.msk.bf16.gmra.mxu1 %vm2373_vm11, %v1823_v35  ;;  %v8442_v17 = vpop.f32.mrf.mxu0  ;;  %v11024_v59 = vpop.permute.xlu0 %3418 }
 0x1d3   : > { %8598 = vmatprep.mubr.msk.bf16.mxu1 %vm9270_vm8, %v13190_v27  ;;  %v9222_v17 = vld [vmem:[#allocation2 + $0x58] sm:$0xff]  }
 0x1d4   : > { %v11028_v2 = vpop.permute.xlu1 %3530  ;;  %v11030_v44 = vpop.f32.mrf.mxu0  ;;  %v3553_v32 = vsel %vm1718_vm9, %v9222_v17, %v10646_v12 }
 0x1d6   : > { %v8443_v40 = vpop.f32.mrf.mxu0  ;;  %v1602_v63 = vpop.permute.xlu0 %1601 }
 0x1d7   : > { %v1770_v35 = vsel %vm1718_vm9, %v10627_v48, %v1602_v63 }
 0x1d8   : > { %v1715_v45 = vpop.permute.xlu1 %1714  ;;  %v11037_v5 = vpop.f32.mrf.mxu0  ;;  %8637 = vmatmul.mubr.msk.bf16.gmra.mxu0 %vm2373_vm11, %v3605_v10  ;;  %v3607_v10 = vsel %vm1773_vm10, %v3553_v32, %v10654_v21 }
 0x1d9   : > { %v1825_v3 = vsel %vm1773_vm10, %v1770_v35, %v1715_v45  ;;  %13238 = vst [vmem:[#allocation13_spill] sm:$0xff] %v11037_v5  ;;  %8640 = vmatprep.mubr.msk.bf16.mxu0 %vm9270_vm8, %v13190_v27 }
 0x1da   : > { %8599 = vmatmul.mubr.msk.bf16.gmra.mxu1 %vm2373_vm11, %v1825_v3  ;;  %v8446_v13 = vpop.f32.mrf.mxu0  ;;  %v11045_v40 = vpop.permute.xlu0 %3420 }
 0x1db   : > { %8602 = vmatprep.mubr.msk.bf16.mxu1 %vm9270_vm8, %v13190_v27  ;;  %v9223_v13 = vld [vmem:[#allocation2 + $0x60] sm:$0xff]  }
 0x1dc   : > { %v11049_v48 = vpop.permute.xlu1 %3532  ;;  %v2572_v63 = vpop.f32.mrf.mxu0  ;;  %v3555_v21 = vsel %vm1718_vm9, %v9223_v13, %v10682_v55 }
 0x1de   : > { %v8447_v35 = vpop.f32.mrf.mxu0  ;;  %v1604_v45 = vpop.permute.xlu0 %1603 }
 0x1df   : > { %v1772_v3 = vsel %vm1718_vm9, %v10663_v62, %v1604_v45  ;;  %v3609_v62 = vsel %vm1773_vm10, %v3555_v21, %v10690_v61  ;;  %v9225_v21 = vld [vmem:[#allocation2 + $0x70] sm:$0xff]  }
 0x1e0   : > { %v1717_v5 = vpop.permute.xlu1 %1716  ;;  %v11056_v17 = vpop.f32.mrf.mxu0  ;;  %8641 = vmatmul.mubr.msk.bf16.gmra.mxu0 %vm2373_vm11, %v3607_v10  ;;  %v9224_v10 = vld [vmem:[#allocation2 + $0x68] sm:$0xff]  }
 0x1e1   : > { %v1827_v12 = vsel %vm1773_vm10, %v1772_v3, %v1717_v5  ;;  %8644 = vmatprep.mubr.msk.bf16.mxu0 %vm9270_vm8, %v13190_v27  ;;  %v3557_v45 = vsel %vm1718_vm9, %v9224_v10, %v10715_v54 }
 0x1e2   : > { %8603 = vmatmul.mubr.msk.bf16.gmra.mxu1 %vm2373_vm11, %v1827_v12  ;;  %v8450_v32 = vpop.f32.mrf.mxu0  ;;  %v3611_v55 = vsel %vm1773_vm10, %v3557_v45, %v10723_v49 }
 0x1e4   : > { %v11064_v63 = vpop.f32.mrf.mxu0 }
 0x1e6   : > { %v8451_v5 = vpop.f32.mrf.mxu0 }
 0x1e8   : > { %v2584_v35 = vpop.f32.mrf.mxu0  ;;  %8645 = vmatmul.mubr.msk.bf16.gmra.mxu0 %vm2373_vm11, %v3609_v62  ;;  %v3559_v62 = vsel %vm1718_vm9, %v9225_v21, %v10747_v37  ;;  %v9226_v37 = vld [vmem:[#allocation2 + $0x78] sm:$0xff]  }
 0x1e9   : > { %8648 = vmatprep.mubr.msk.bf16.mxu0 %vm9270_vm8, %v13190_v27  ;;  %v3613_v10 = vsel %vm1773_vm10, %v3559_v62, %v10754_v38 }
 0x1ea   : > { %v8454_v3 = vpop.f32.mrf.mxu0 }
 0x1ec   : > { %v11073_v12 = vpop.f32.mrf.mxu0 }
 0x1ee   : > { %v8455_v13 = vpop.f32.mrf.mxu0 }
 0x1f0   : > { %v11077_v32 = vpop.f32.mrf.mxu0  ;;  %8649 = vmatmul.mubr.msk.bf16.gmra.mxu0 %vm2373_vm11, %v3611_v55 }
 0x1f1   : > { %8652 = vmatprep.mubr.msk.bf16.mxu0 %vm9270_vm8, %v13190_v27 }
 0x1f2   : > { %v2789_v61 = vpop.f32.mrf.mxu1  ;;  %v8458_v54 = vpop.f32.mrf.mxu0 }
 0x1f3   : > { %v3561_v61 = vsel %vm1718_vm9, %v9226_v37, %v10771_v58 }
 0x1f4   : > { %v8516_v5 = vpop.f32.mrf.mxu1  ;;  %v2594_v35 = vpop.f32.mrf.mxu0  ;;  %v3615_v62 = vsel %vm1773_vm10, %v3561_v61, %v10775_v4 }
 0x1f6   : > { %v11086_v49 = vpop.f32.mrf.mxu1  ;;  %v8459_v45 = vpop.f32.mrf.mxu0 }
 0x1f8   : > { %v8517_v3 = vpop.f32.mrf.mxu1  ;;  %v11088_v13 = vpop.f32.mrf.mxu0  ;;  %8653 = vmatmul.mubr.msk.bf16.gmra.mxu0 %vm2373_vm11, %v3613_v10 }
 0x1f9   : > { %13239 = vst [vmem:[#allocation7_spill] sm:$0xff] %v11088_v13  ;;  %8656 = vmatprep.mubr.msk.bf16.mxu0 %vm9270_vm8, %v13190_v27  ;;  %v9227_v13 = vld [vmem:[#allocation2 + $0x80] sm:$0xff]  }
 0x1fa   : > { %v11091_v55 = vpop.f32.mrf.mxu1  ;;  %v8462_v21 = vpop.f32.mrf.mxu0  ;;  %v3563_v58 = vsel %vm1718_vm9, %v9227_v13, %v10795_v30  ;;  %v9228_v30 = vld [vmem:[#allocation2 + $0x88] sm:$0xff]  }
 0x1fb   : > { %v3617_v4 = vsel %vm1773_vm10, %v3563_v58, %v10803_v11  ;;  %v3565_v13 = vsel %vm1718_vm9, %v9228_v30, %v10823_v50  ;;  %v9229_v50 = vld [vmem:[#allocation2 + $0x90] sm:$0xff]  }
 0x1fc   : > { %v8520_v54 = vpop.f32.mrf.mxu1  ;;  %v11097_v38 = vpop.f32.mrf.mxu0  ;;  %v3619_v11 = vsel %vm1773_vm10, %v3565_v13, %v10829_v36 }
 0x1fe   : > { %v2799_v5 = vpop.f32.mrf.mxu1  ;;  %v8463_v35 = vpop.f32.mrf.mxu0 }
 0x200   : > { %v8521_v45 = vpop.f32.mrf.mxu1  ;;  %v2606_v10 = vpop.f32.mrf.mxu0  ;;  %8657 = vmatmul.mubr.msk.bf16.gmra.mxu0 %vm2373_vm11, %v3615_v62 }
 0x201   : > { %8660 = vmatprep.mubr.msk.bf16.mxu0 %vm9270_vm8, %v13190_v27 }
 0x202   : > { %v11102_v3 = vpop.f32.mrf.mxu1  ;;  %v8466_v37 = vpop.f32.mrf.mxu0 }
 0x204   : > { %v8524_v21 = vpop.f32.mrf.mxu1  ;;  %v11108_v54 = vpop.f32.mrf.mxu0 }
 0x206   : > { %v11112_v61 = vpop.f32.mrf.mxu1  ;;  %v8467_v5 = vpop.f32.mrf.mxu0 }
 0x208   : > { %v8525_v62 = vpop.f32.mrf.mxu1  ;;  %v11114_v35 = vpop.f32.mrf.mxu0  ;;  %8661 = vmatmul.mubr.msk.bf16.gmra.mxu0 %vm2373_vm11, %v3617_v4 }
 0x209   : > { %13240 = vst [vmem:[#allocation19_spill] sm:$0xff] %v11114_v35  ;;  %8664 = vmatprep.mubr.msk.bf16.mxu0 %vm9270_vm8, %v13190_v27 }
 0x20a   : > { %v2811_v45 = vpop.f32.mrf.mxu1  ;;  %v8470_v10 = vpop.f32.mrf.mxu0 }
 0x20b   : > { %v3567_v45 = vsel %vm1718_vm9, %v9229_v50, %v10845_v20 }
 0x20c   : > { %v8528_v37 = vpop.f32.mrf.mxu1  ;;  %v2616_v21 = vpop.f32.mrf.mxu0  ;;  %v3621_v13 = vsel %vm1773_vm10, %v3567_v45, %v10849_v16 }
 0x20e   : > { %v11123_v58 = vpop.f32.mrf.mxu1  ;;  %v8471_v5 = vpop.f32.mrf.mxu0 }
 0x210   : > { %v8529_v62 = vpop.f32.mrf.mxu1  ;;  %v11125_v35 = vpop.f32.mrf.mxu0  ;;  %8665 = vmatmul.mubr.msk.bf16.gmra.mxu0 %vm2373_vm11, %v3619_v11 }
 0x211   : > { %13241 = vst [vmem:[#allocation14_spill] sm:$0xff] %v11125_v35  ;;  %8668 = vmatprep.mubr.msk.bf16.mxu0 %vm9270_vm8, %v13190_v27  ;;  %v9230_v35 = vld [vmem:[#allocation2 + $0x98] sm:$0xff]  }
 0x212   : > { %v11128_v4 = vpop.f32.mrf.mxu1  ;;  %v8474_v30 = vpop.f32.mrf.mxu0  ;;  %v3569_v20 = vsel %vm1718_vm9, %v9230_v35, %v10867_v6  ;;  %v9231_v6 = vld [vmem:[#allocation2 + $0xa0] sm:$0xff]  }
 0x213   : > { %v3623_v16 = vsel %vm1773_vm10, %v3569_v20, %v10871_v26  ;;  %v3571_v35 = vsel %vm1718_vm9, %v9231_v6, %v10887_v14  ;;  %v9232_v14 = vld [vmem:[#allocation2 + $0xa8] sm:$0xff]  }
 0x214   : > { %v8532_v10 = vpop.f32.mrf.mxu1  ;;  %v11134_v36 = vpop.f32.mrf.mxu0  ;;  %v3625_v26 = vsel %vm1773_vm10, %v3571_v35, %v10891_v8 }
 0x216   : > { %v2821_v37 = vpop.f32.mrf.mxu1  ;;  %v8475_v21 = vpop.f32.mrf.mxu0 }
 0x218   : > { %v8533_v5 = vpop.f32.mrf.mxu1  ;;  %v2628_v11 = vpop.f32.mrf.mxu0  ;;  %8669 = vmatmul.mubr.msk.bf16.gmra.mxu0 %vm2373_vm11, %v3621_v13 }
 0x219   : > { %8672 = vmatprep.mubr.msk.bf16.mxu0 %vm9270_vm8, %v13190_v27 }
 0x21a   : > { %v11139_v62 = vpop.f32.mrf.mxu1  ;;  %v8478_v50 = vpop.f32.mrf.mxu0 }
 0x21c   : > { %v8536_v30 = vpop.f32.mrf.mxu1  ;;  %v11145_v10 = vpop.f32.mrf.mxu0 }
 0x21d   : > { %13242 = vst [vmem:[#allocation8_spill] sm:$0xff] %v11145_v10  ;;  %v11249_v10 = vld [vmem:[%s13151_s3] ss:$0 sm:$0xff] }
 0x21e   : > { %v11149_v45 = vpop.f32.mrf.mxu1  ;;  %v8479_v37 = vpop.f32.mrf.mxu0 }
 0x220   : > { %v8537_v13 = vpop.f32.mrf.mxu1  ;;  %v11151_v21 = vpop.f32.mrf.mxu0  ;;  %8673 = vmatmul.mubr.msk.bf16.gmra.mxu0 %vm2373_vm11, %v3623_v16 }
 0x221   : > { %13243 = vst [vmem:[#allocation15_spill] sm:$0xff] %v11151_v21  ;;  %8676 = vmatprep.mubr.msk.bf16.mxu0 %vm9270_vm8, %v13190_v27 }
 0x222   : > { %v2833_v5 = vpop.f32.mrf.mxu1  ;;  %v8482_v11 = vpop.f32.mrf.mxu0 }
 0x223   : > { %v3573_v5 = vsel %vm1718_vm9, %v9232_v14, %v10906_v25 }
 0x224   : > { %v8540_v50 = vpop.f32.mrf.mxu1  ;;  %v2638_v30 = vpop.f32.mrf.mxu0  ;;  %v3627_v35 = vsel %vm1773_vm10, %v3573_v5, %v10910_v1 }
 0x226   : > { %v11160_v20 = vpop.f32.mrf.mxu1  ;;  %v8483_v37 = vpop.f32.mrf.mxu0 }
 0x228   : > { %v8541_v13 = vpop.f32.mrf.mxu1  ;;  %v11162_v21 = vpop.f32.mrf.mxu0  ;;  %8677 = vmatmul.mubr.msk.bf16.gmra.mxu0 %vm2373_vm11, %v3625_v26 }
 0x229   : > { %13244 = vst [vmem:[#allocation21_spill] sm:$0xff] %v11162_v21  ;;  %8680 = vmatprep.mubr.msk.bf16.mxu0 %vm9270_vm8, %v13190_v27  ;;  %v9233_v21 = vld [vmem:[#allocation2 + $0xb0] sm:$0xff]  }
 0x22a   : > { %v11165_v16 = vpop.f32.mrf.mxu1  ;;  %v8486_v6 = vpop.f32.mrf.mxu0  ;;  %v3575_v25 = vsel %vm1718_vm9, %v9233_v21, %v10927_v39  ;;  %v9234_v39 = vld [vmem:[#allocation2 + $0xb8] sm:$0xff]  }
 0x22b   : > { %v3629_v1 = vsel %vm1773_vm10, %v3575_v25, %v10931_v47  ;;  %v3577_v21 = vsel %vm1718_vm9, %v9234_v39, %v10946_v56 }
 0x22c   : > { %v8544_v11 = vpop.f32.mrf.mxu1  ;;  %v11171_v8 = vpop.f32.mrf.mxu0  ;;  %v3631_v47 = vsel %vm1773_vm10, %v3577_v21, %v10950_v42 }
 0x22d   : > { %13245 = vst [vmem:[#allocation16_spill] sm:$0xff] %v11171_v8 }
 0x22e   : > { %v2843_v50 = vpop.f32.mrf.mxu1  ;;  %v8487_v30 = vpop.f32.mrf.mxu0 }
 0x230   : > { %v8545_v37 = vpop.f32.mrf.mxu1  ;;  %v2650_v26 = vpop.f32.mrf.mxu0  ;;  %8681 = vmatmul.mubr.msk.bf16.gmra.mxu0 %vm2373_vm11, %v3627_v35 }
 0x231   : > { %8684 = vmatprep.mubr.msk.bf16.mxu0 %vm9270_vm8, %v13190_v27 }
 0x232   : > { %v11176_v13 = vpop.f32.mrf.mxu1  ;;  %v8490_v14 = vpop.f32.mrf.mxu0 }
 0x234   : > { %v8548_v6 = vpop.f32.mrf.mxu1  ;;  %v11182_v11 = vpop.f32.mrf.mxu0 }
 0x235   : > { %13246 = vst [vmem:[#allocation9_spill] sm:$0xff] %v11182_v11  ;;  %v9236_v11 = vld [vmem:[#allocation2 + $0xc8] sm:$0xff]  }
 0x236   : > { %v11186_v5 = vpop.f32.mrf.mxu1  ;;  %v8491_v50 = vpop.f32.mrf.mxu0 }
 0x238   : > { %v8549_v35 = vpop.f32.mrf.mxu1  ;;  %v11188_v30 = vpop.f32.mrf.mxu0  ;;  %8685 = vmatmul.mubr.msk.bf16.gmra.mxu0 %vm2373_vm11, %v3629_v1 }
 0x239   : > { %13247 = vst [vmem:[#allocation17_spill] sm:$0xff] %v11188_v30  ;;  %8688 = vmatprep.mubr.msk.bf16.mxu0 %vm9270_vm8, %v13190_v27 }
 0x23a   : > { %v2855_v37 = vpop.f32.mrf.mxu1  ;;  %v8494_v26 = vpop.f32.mrf.mxu0 }
 0x23b   : > { %v9235_v37 = vld [vmem:[#allocation2 + $0xc0] sm:$0xff]  }
 0x23c   : > { %v8552_v14 = vpop.f32.mrf.mxu1  ;;  %v2660_v6 = vpop.f32.mrf.mxu0  ;;  %v3579_v56 = vsel %vm1718_vm9, %v9235_v37, %v10965_v52  ;;  %v3581_v52 = vsel %vm1718_vm9, %v9236_v11, %v10986_v15  ;;  %v9237_v15 = vld [vmem:[#allocation2 + $0xd0] sm:$0xff]  }
 0x23d   : > { %v3633_v42 = vsel %vm1773_vm10, %v3579_v56, %v10969_v31  ;;  %v3635_v31 = vsel %vm1773_vm10, %v3581_v52, %v10990_v60  ;;  %v3583_v11 = vsel %vm1718_vm9, %v9237_v15, %v11005_v24  ;;  %v9238_v24 = vld [vmem:[#allocation2 + $0xd8] sm:$0xff]  }
 0x23e   : > { %v11197_v25 = vpop.f32.mrf.mxu1  ;;  %v8495_v50 = vpop.f32.mrf.mxu0  ;;  %v3637_v60 = vsel %vm1773_vm10, %v3583_v11, %v11009_v7 }
 0x240   : > { %v8553_v35 = vpop.f32.mrf.mxu1  ;;  %v2759_v30 = vpop.f32.mrf.mxu0  ;;  %8689 = vmatmul.mubr.msk.bf16.gmra.mxu0 %vm2373_vm11, %v3631_v47 }
 0x241   : > { %8692 = vmatprep.mubr.msk.bf16.mxu0 %vm9270_vm8, %v13190_v27 }
 0x242   : > { %v11200_v1 = vpop.f32.mrf.mxu1  ;;  %v8500_v39 = vpop.f32.mrf.mxu0 }
 0x244   : > { %v8556_v26 = vpop.f32.mrf.mxu1  ;;  %v2762_v14 = vpop.f32.mrf.mxu0 }
 0x246   : > { %v2865_v21 = vpop.f32.mrf.mxu1  ;;  %v8501_v6 = vpop.f32.mrf.mxu0 }
 0x248   : > { %v8557_v50 = vpop.f32.mrf.mxu1  ;;  %v2767_v35 = vpop.f32.mrf.mxu0  ;;  %8693 = vmatmul.mubr.msk.bf16.gmra.mxu0 %vm2373_vm11, %v3633_v42 }
 0x249   : > { %8696 = vmatprep.mubr.msk.bf16.mxu0 %vm9270_vm8, %v13190_v27 }
 0x24a   : > { %v11209_v47 = vpop.f32.mrf.mxu1  ;;  %v8504_v37 = vpop.f32.mrf.mxu0 }
 0x24c   : > { %v8560_v39 = vpop.f32.mrf.mxu1  ;;  %v11215_v26 = vpop.f32.mrf.mxu0 }
 0x24e   : > { %v11219_v56 = vpop.f32.mrf.mxu1  ;;  %v8505_v21 = vpop.f32.mrf.mxu0 }
 0x250   : > { %v8561_v42 = vpop.f32.mrf.mxu1  ;;  %v11221_v6 = vpop.f32.mrf.mxu0  ;;  %8697 = vmatmul.mubr.msk.bf16.gmra.mxu0 %vm2373_vm11, %v3635_v31 }
 0x251   : > { %8700 = vmatprep.mubr.msk.bf16.mxu0 %vm9270_vm8, %v13190_v27 }
 0x252   : > { %v2877_v50 = vpop.f32.mrf.mxu1  ;;  %v8508_v35 = vpop.f32.mrf.mxu0 }
 0x253   : > { %v3585_v50 = vsel %vm1718_vm9, %v9238_v24, %v11024_v59 }
 0x254   : > { %v8564_v37 = vpop.f32.mrf.mxu1  ;;  %v2777_v39 = vpop.f32.mrf.mxu0  ;;  %v3639_v11 = vsel %vm1773_vm10, %v3585_v50, %v11028_v2  ;;  %v9239_v2 = vld [vmem:[#allocation2 + $0xe0] sm:$0xff]  }
 0x255   : > { %v3587_v50 = vsel %vm1718_vm9, %v9239_v2, %v11045_v40 }
 0x256   : > { %v11230_v52 = vpop.f32.mrf.mxu1  ;;  %v8509_v21 = vpop.f32.mrf.mxu0 }
 0x258   : > { %v8565_v42 = vpop.f32.mrf.mxu1  ;;  %v11232_v8 = vpop.f32.mrf.mxu0  ;;  %8701 = vmatmul.mubr.msk.bf16.gmra.mxu0 %vm2373_vm11, %v3637_v60  ;;  %v2760_v60 = vadd.f32 %v2759_v30, %v10737_v28  ;;  %v2763_v30 = vadd.f32 %v2762_v14, %v10756_v46 }
 0x259   : > { %8704 = vmatprep.mubr.msk.bf16.mxu0 %vm9270_vm8, %v13190_v27  ;;  %v3423_v46 = vpop.permute.xlu0 %3422 }
 0x25a   : > { %v11235_v31 = vpop.f32.mrf.mxu1  ;;  %v8512_v15 = vpop.f32.mrf.mxu0 }
 0x25c   : > { %v8568_v35 = vpop.f32.mrf.mxu1  ;;  %v11241_v7 = vpop.f32.mrf.mxu0 }
 0x25e   : > { %v2887_v37 = vpop.f32.mrf.mxu1  ;;  %v8513_v39 = vpop.f32.mrf.mxu0 }
 0x260   : > { %v8569_v21 = vpop.f32.mrf.mxu1  ;;  %v3743_v42 = vpop.f32.mrf.mxu0  ;;  %8705 = vmatmul.mubr.msk.bf16.gmra.mxu0 %vm2373_vm11, %v3639_v11  ;;  %v3641_v11 = vsel %vm1773_vm10, %v3587_v50, %v11049_v48  ;;  %v9240_v50 = vld [vmem:[#allocation2 + $0xe8] sm:$0xff]  }
 0x261   : > { %v3940_v59 = vadd.f32 %v3743_v42, %v2760_v60  ;;  %8708 = vmatprep.mubr.msk.bf16.mxu0 %vm9270_vm8, %v13190_v27 }
 0x262   : > { %v11252_v24 = vpop.f32.mrf.mxu1  ;;  %v8610_v28 = vpop.f32.mrf.mxu0 }
 0x263   : > { %v11260_v15 = vadd.f32 %v11249_v10, %v3940_v59 }
 0x264   : > { %v8572_v35 = vpop.f32.mrf.mxu1  ;;  %v3746_v37 = vpop.f32.mrf.mxu0 }
 0x265   : > { %v7921_v39 = vmul.f32 -1.442695, %v11260_v15  ;;  %v3941_v60 = vadd.f32 %v3746_v37, %v2763_v30  ;;  %v3589_v30 = vsel %vm1718_vm9, %v9240_v50, %v3423_v46  ;;  %v3535_v35 = vpop.permute.xlu1 %3534  ;;  %v2770_v37 = vadd.f32 %v11215_v26, %v10777_v53 }
 0x266   : > { %v11265_v21 = vpop.f32.mrf.mxu1  ;;  %v8611_v42 = vpop.f32.mrf.mxu0 }
 0x267   : > { %9023 = vpow2.f32 %v7921_v39  ;;  %v11268_v40 = vadd.f32 %v11249_v10, %v3941_v60 }
 0x268   : > { %v8573_v2 = vpop.f32.mrf.mxu1  ;;  %v3751_v14 = vpop.f32.mrf.mxu0  ;;  %8709 = vmatmul.mubr.msk.bf16.gmra.mxu0 %vm2373_vm11, %v3641_v11  ;;  %v3643_v11 = vsel %vm1773_vm10, %v3589_v30, %v3535_v35 }
 0x269   : > { %v7922_v59 = vmul.f32 -1.442695, %v11268_v40  ;;  %8712 = vmatprep.mubr.msk.bf16.mxu0 %vm9270_vm8, %v13190_v27  ;;  %v2775_v27 = vadd.f32 %v11221_v6, %v10785_v43 }
 0x26a   : > { %v2899_v28 = vpop.f32.mrf.mxu1  ;;  %v8614_v48 = vpop.f32.mrf.mxu0 }
 0x26b   : > { %9025 = vpow2.f32 %v7922_v59 }
 0x26c   : > { %v8576_v39 = vpop.f32.mrf.mxu1  ;;  %v3753_v60 = vpop.f32.mrf.mxu0 }
 0x26d   : > { %v3942_v42 = vadd.f32 %v3753_v60, %v2770_v37 }
 0x26e   : > { %v11277_v2 = vpop.f32.mrf.mxu1  ;;  %v8615_v14 = vpop.f32.mrf.mxu0 }
 0x26f   : > { %v11283_v28 = vadd.f32 %v11249_v10, %v3942_v42 }
 0x270   : > { %v8577_v46 = vpop.f32.mrf.mxu1  ;;  %v3758_v48 = vpop.f32.mrf.mxu0  ;;  %8713 = vmatmul.mubr.msk.bf16.gmra.mxu0 %vm2373_vm11, %v3643_v11  ;;  %v2782_v11 = vadd.f32 %v11232_v8, %v10816_v9  ;;  %v2785_v9 = vadd.f32 %v11241_v7, %v10831_v19 }
 0x271   : > { %v7923_v53 = vmul.f32 -1.442695, %v11283_v28  ;;  %v3943_v26 = vadd.f32 %v3758_v48, %v2775_v27  ;;  %v8967_v48 = vld [vmem:[%s13150_s2 + $0x8] sm:$0x3f]  }
 0x272   : > { %v11287_v59 = vpop.f32.mrf.mxu1  ;;  %v8618_v50 = vpop.f32.mrf.mxu0  ;;  %8868 = vmatprep.subr.msk.bf16.mxu1 %vm2428_vm7, %v8967_v48 }
 0x273   : > { %9027 = vpow2.f32 %v7923_v53  ;;  %v11290_v30 = vadd.f32 %v11249_v10, %v3943_v26 }
 0x274   : > { %v8580_v35 = vpop.f32.mrf.mxu1  ;;  %v9024_v37 = vpop.eup %9023 }
 0x275   : > { %v3761_v43 = vpop.f32.mrf.mxu0  ;;  %v4127_v6 = vadd.f32 1.0, %v9024_v37  ;;  %v7924_v39 = vmul.f32 -1.442695, %v11290_v30  ;;  %v5983_v37 = vsel %vm2428_vm7, %v8967_v48, 0 }
 0x276   : > { %v2909_v60 = vpop.f32.mrf.mxu1  ;;  %8717 = vmatpush3.bf16.msra.mxu1 %v5983_v37 }
 0x277   : > { %v8619_v42 = vpop.f32.mrf.mxu0  ;;  %9029 = vrcp.f32 %v4127_v6 }
 0x278   : > { %v8581_v14 = vpop.f32.mrf.mxu1  ;;  %v9026_v27 = vpop.eup %9025  ;;  %9031 = vpow2.f32 %v7924_v39 }
 0x279   : > { %v3765_v46 = vpop.f32.mrf.mxu0  ;;  %v4128_v53 = vadd.f32 1.0, %v9026_v27 }
 0x27a   : > { %v3944_v26 = vadd.f32 %v3765_v46, %v2782_v11  ;;  %v11298_v50 = vpop.f32.mrf.mxu1 }
 0x27b   : > { %v8622_v35 = vpop.f32.mrf.mxu0  ;;  %9033 = vrcp.f32 %v4128_v53 }
 0x27c   : > { %v11305_v8 = vadd.f32 %v11249_v10, %v3944_v26  ;;  %v8584_v43 = vpop.f32.mrf.mxu1  ;;  %v2792_v35 = vadd.f32 %v11086_v49, %v10851_v18 }
 0x27d   : > { %v3768_v6 = vpop.f32.mrf.mxu0 }
 0x27e   : > { %v7925_v39 = vmul.f32 -1.442695, %v11305_v8  ;;  %v3945_v60 = vadd.f32 %v3768_v6, %v2785_v9  ;;  %v11308_v42 = vpop.f32.mrf.mxu1 }
 0x27f   : > { %v8623_v11 = vpop.f32.mrf.mxu0 }
 0x280   : > { %9035 = vpow2.f32 %v7925_v39  ;;  %v11311_v14 = vadd.f32 %v11249_v10, %v3945_v60  ;;  %v8585_v27 = vpop.f32.mrf.mxu1  ;;  %v9028_v46 = vpop.eup %9027 }
 0x281   : > { %v3773_v19 = vpop.f32.mrf.mxu0  ;;  %v4129_v7 = vadd.f32 1.0, %v9028_v46 }
 0x282   : > { %v7926_v48 = vmul.f32 -1.442695, %v11311_v14  ;;  %v2921_v53 = vpop.f32.mrf.mxu1  ;;  %v2797_v19 = vadd.f32 %v11091_v55, %v10858_v29 }
 0x283   : > { %v8626_v26 = vpop.f32.mrf.mxu0  ;;  %9037 = vrcp.f32 %v4129_v7 }
 0x284   : > { %v8588_v37 = vpop.f32.mrf.mxu1  ;;  %v9030_v9 = vpop.eup %9029  ;;  %9039 = vpow2.f32 %v7926_v48 }
 0x285   : > { %v3775_v43 = vpop.f32.mrf.mxu0  ;;  %v9032_v6 = vpop.eup %9031  ;;  %v4235_v39 = vmul.f32 %v9030_v9, %v11260_v15 }
 0x286   : > { %v3946_v60 = vadd.f32 %v3775_v43, %v2792_v35  ;;  %v11317_v11 = vpop.f32.mrf.mxu1  ;;  %v4130_v27 = vadd.f32 1.0, %v9032_v6 }
 0x287   : > { %v8627_v46 = vpop.f32.mrf.mxu0  ;;  %v4289_v53 = vrot.slane %v4235_v39, 1  ;;  %v4344_v26 = vrot.slane %v4235_v39, 7 }
 0x288   : > { %v11322_v18 = vadd.f32 %v11249_v10, %v3946_v60  ;;  %v8589_v49 = vpop.f32.mrf.mxu1  ;;  %v9034_v7 = vpop.eup %9033  ;;  %9041 = vrcp.f32 %v4130_v27 }
 0x289   : > { %v3780_v48 = vpop.f32.mrf.mxu0  ;;  %v4488_v37 = vsel %vm280_vm0, %v4289_v53, %v4344_v26  ;;  %v4236_v15 = vmul.f32 %v9034_v7, %v11268_v40 }
 0x28a   : > { %v7927_v35 = vmul.f32 -1.442695, %v11322_v18  ;;  %v3947_v9 = vadd.f32 %v3780_v48, %v2797_v19  ;;  %v11327_v43 = vpop.f32.mrf.mxu1  ;;  %v8173_v6 = vpack.c.bf16 %v4488_v37, %v4488_v37 }
 0x28b   : > { %v8630_v29 = vpop.f32.mrf.mxu0  ;;  %v4345_v55 = vrot.slane %v4236_v15, 7  ;;  %v4452_v39 = vrot.slane %v4236_v15, 5 }
 0x28c   : > { %9043 = vpow2.f32 %v7927_v35  ;;  %v11330_v60 = vadd.f32 %v11249_v10, %v3947_v9  ;;  %v8592_v27 = vpop.f32.mrf.mxu1  ;;  %4759 = vst.msk [vmem:[#allocation3] sm:$0xf] %vm296_vm2, %v8173_v6  ;;  %v2804_v9 = vadd.f32 %v11102_v3, %v10878_v23  ;;  %v2807_v23 = vadd.f32 %v11112_v61, %v10893_v0 }
 0x28d   : > { %v9036_v46 = vpop.eup %9035  ;;  %v3783_v53 = vpop.f32.mrf.mxu0  ;;  %v4346_v40 = vsel %vm280_vm0, %v4344_v26, %v4345_v55  ;;  %v4506_v19 = vsel %vm280_vm0, %v4345_v55, %v4452_v39 }
 0x28e   : > { %v4131_v49 = vadd.f32 1.0, %v9036_v46  ;;  %v7928_v7 = vmul.f32 -1.442695, %v11330_v60  ;;  %v2931_v48 = vpop.f32.mrf.mxu1  ;;  %v4525_v37 = vsel %vm4524_vm12, %v4506_v19, 0.0  ;;  %v8174_v15 = vpack.c.bf16 %v4346_v40, %v4346_v40 }
 0x28f   : > { %v8631_v35 = vpop.f32.mrf.mxu0  ;;  %v8175_v29 = vpack.c.bf16 %v4525_v37, %v4525_v37 }
 0x290   : > { %9045 = vrcp.f32 %v4131_v49  ;;  %v8593_v27 = vpop.f32.mrf.mxu1  ;;  %v9038_v6 = vpop.eup %9037  ;;  %4760 = vst.msk [vmem:[#allocation3 + $0x4] sm:$0xf] %vm296_vm2, %v8174_v15 }
 0x291   : > { %9047 = vpow2.f32 %v7928_v7  ;;  %v3787_v26 = vpop.f32.mrf.mxu0  ;;  %v9040_v55 = vpop.eup %9039  ;;  %4761 = vst.msk [vmem:[#allocation3 + $0x8] sm:$0xf] %vm296_vm2, %v8175_v29  ;;  %v4237_v39 = vmul.f32 %v9038_v6, %v11283_v28 }
 0x292   : > { %v3948_v46 = vadd.f32 %v3787_v26, %v2804_v9  ;;  %v11342_v53 = vpop.f32.mrf.mxu1  ;;  %v4132_v40 = vadd.f32 1.0, %v9040_v55 }
 0x293   : > { %v8634_v19 = vpop.f32.mrf.mxu0  ;;  %v4290_v3 = vrot.slane %v4237_v39, 1  ;;  %v4347_v49 = vrot.slane %v4237_v39, 7 }
 0x294   : > { %v11347_v48 = vadd.f32 %v11249_v10, %v3948_v46  ;;  %v8596_v7 = vpop.f32.mrf.mxu1  ;;  %9049 = vrcp.f32 %v4132_v40 }
 0x295   : > { %v3790_v37 = vpop.f32.mrf.mxu0  ;;  %v9042_v15 = vpop.eup %9041  ;;  %v4489_v35 = vsel %vm280_vm0, %v4290_v3, %v4347_v49 }
 0x296   : > { %v7929_v28 = vmul.f32 -1.442695, %v11347_v48  ;;  %v3949_v9 = vadd.f32 %v3790_v37, %v2807_v23  ;;  %v11351_v29 = vpop.f32.mrf.mxu1  ;;  %v8176_v27 = vpack.c.bf16 %v4489_v35, %v4489_v35  ;;  %v4238_v6 = vmul.f32 %v9042_v15, %v11290_v30 }
 0x297   : > { %v8635_v0 = vpop.f32.mrf.mxu0  ;;  %v2814_v15 = vadd.f32 %v11123_v58, %v10912_v57 }
 0x298   : > { %9051 = vpow2.f32 %v7929_v28  ;;  %v11355_v61 = vadd.f32 %v11249_v10, %v3949_v9  ;;  %v8597_v26 = vpop.f32.mrf.mxu1  ;;  %4762 = vst.msk [vmem:[#allocation3 + $0xc] sm:$0xf] %vm296_vm2, %v8176_v27  ;;  %v4348_v39 = vrot.slane %v4238_v6, 7  ;;  %v4453_v46 = vrot.slane %v4238_v6, 5 }
 0x299   : > { %v9044_v55 = vpop.eup %9043  ;;  %v3795_v40 = vpop.f32.mrf.mxu0 }
 0x29a   : > { %v4133_v19 = vadd.f32 1.0, %v9044_v55  ;;  %v7930_v23 = vmul.f32 -1.442695, %v11355_v61  ;;  %v2943_v3 = vpop.f32.mrf.mxu1  ;;  %v4349_v7 = vsel %vm280_vm0, %v4347_v49, %v4348_v39  ;;  %v4507_v30 = vsel %vm280_vm0, %v4348_v39, %v4453_v46 }
 0x29b   : > { %v8638_v37 = vpop.f32.mrf.mxu0  ;;  %v4526_v35 = vsel %vm4524_vm12, %v4507_v30, 0.0  ;;  %v8177_v28 = vpack.c.bf16 %v4349_v7, %v4349_v7  ;;  %v2819_v46 = vadd.f32 %v11128_v4, %v10919_v51 }
 0x29c   : > { %9053 = vrcp.f32 %v4133_v19  ;;  %v8600_v9 = vpop.f32.mrf.mxu1  ;;  %v8178_v6 = vpack.c.bf16 %v4526_v35, %v4526_v35 }
 0x29d   : > { %v9046_v27 = vpop.eup %9045  ;;  %9055 = vpow2.f32 %v7930_v23  ;;  %v3797_v0 = vpop.f32.mrf.mxu0  ;;  %4763 = vst.msk [vmem:[#allocation3 + $0x10] sm:$0xf] %vm296_vm2, %v8177_v28 }
 0x29e   : > { %v9048_v26 = vpop.eup %9047  ;;  %v4239_v49 = vmul.f32 %v9046_v27, %v11305_v8  ;;  %v3950_v55 = vadd.f32 %v3797_v0, %v2814_v15  ;;  %v11366_v39 = vpop.f32.mrf.mxu1  ;;  %4764 = vst.msk [vmem:[#allocation3 + $0x14] sm:$0xf] %vm296_vm2, %v8178_v6 }
 0x29f   : > { %v4134_v57 = vadd.f32 1.0, %v9048_v26  ;;  %v8639_v58 = vpop.f32.mrf.mxu0 }
 0x2a0   : > { %v4291_v40 = vrot.slane %v4239_v49, 1  ;;  %v4350_v19 = vrot.slane %v4239_v49, 7  ;;  %v11372_v23 = vadd.f32 %v11249_v10, %v3950_v55  ;;  %v8601_v3 = vpop.f32.mrf.mxu1  ;;  %v4836_v55 = vld [vmem:[#allocation3 + $0xc] sm:$0xf] }
 0x2a1   : > { %9057 = vrcp.f32 %v4134_v57  ;;  %v3802_v7 = vpop.f32.mrf.mxu0  ;;  %v9050_v30 = vpop.eup %9049 }
 0x2a2   : > { %v4490_v8 = vsel %vm280_vm0, %v4291_v40, %v4350_v19  ;;  %v7931_v37 = vmul.f32 -1.442695, %v11372_v23  ;;  %v3951_v15 = vadd.f32 %v3802_v7, %v2819_v46  ;;  %v11376_v35 = vpop.f32.mrf.mxu1  ;;  %v4240_v9 = vmul.f32 %v9050_v30, %v11311_v14 }
 0x2a3   : > { %v8179_v28 = vpack.c.bf16 %v4490_v8, %v4490_v8  ;;  %v8642_v51 = vpop.f32.mrf.mxu0 }
 0x2a4   : > { %9059 = vpow2.f32 %v7931_v37  ;;  %v11380_v4 = vadd.f32 %v11249_v10, %v3951_v15  ;;  %v8604_v27 = vpop.f32.mrf.mxu1  ;;  %v4351_v0 = vrot.slane %v4240_v9, 7  ;;  %v4454_v26 = vrot.slane %v4240_v9, 5  ;;  %v11383_v57 = vld [vmem:[#allocation3 + $0x10] sm:$0xf]  ;;  %v13249_v15 = vld [vmem:[#allocation12_spill] sm:$0xff] }
 0x2a5   : > { %v9052_v6 = vpop.eup %9051  ;;  %4765 = vst.msk [vmem:[#allocation3 + $0x18] sm:$0xf] %vm296_vm2, %v8179_v28  ;;  %v3805_v49 = vpop.f32.mrf.mxu0  ;;  %v4838_v40 = vld [vmem:[#allocation3 + $0x14] sm:$0xf]  ;;  %v11387_v14 = vcombine.low %v4836_v55, %v11383_v57  ;;  %v2826_v28 = vadd.f32 %v11139_v62, %v13249_v15 }
 0x2a6   : > { %v4135_v58 = vadd.f32 1.0, %v9052_v6  ;;  %v7932_v46 = vmul.f32 -1.442695, %v11380_v4  ;;  %v2953_v3 = vpop.f32.mrf.mxu1  ;;  %v4352_v7 = vsel %vm280_vm0, %v4350_v19, %v4351_v0  ;;  %v4508_v30 = vsel %vm280_vm0, %v4351_v0, %v4454_v26 }
 0x2a7   : > { %v8643_v8 = vpop.f32.mrf.mxu0  ;;  %v11392_v37 = vcombine.low %v11383_v57, %v4838_v40  ;;  %v4527_v9 = vsel %vm4524_vm12, %v4508_v30, 0.0  ;;  %v8180_v51 = vpack.c.bf16 %v4352_v7, %v4352_v7  ;;  %v5489_v19 = vshll.u32 %v11387_v14, 16 }
 0x2a8   : > { %9061 = vrcp.f32 %v4135_v58  ;;  %v8605_v27 = vpop.f32.mrf.mxu1  ;;  %v8181_v49 = vpack.c.bf16 %v4527_v9, %v4527_v9  ;;  %v2829_v58 = vadd.f32 %v11149_v45, %v10952_v41 }
 0x2a9   : > { %13248 = vst [vmem:[#allocation10_spill] sm:$0xff] %v11392_v37  ;;  %v9054_v6 = vpop.eup %9053  ;;  %9063 = vpow2.f32 %v7932_v46  ;;  %v3809_v55 = vpop.f32.mrf.mxu0  ;;  %4766 = vst.msk [vmem:[#allocation3 + $0x1c] sm:$0xf] %vm296_vm2, %v8180_v51  ;;  %v5452_v27 = vld [vmem:[#allocation3 + $0xc] sm:$0xe] }
 0x2aa   : > { %v9056_v3 = vpop.eup %9055  ;;  %v4241_v0 = vmul.f32 %v9054_v6, %v11322_v18  ;;  %v3952_v26 = vadd.f32 %v3809_v55, %v2826_v28  ;;  %4767 = vst.msk [vmem:[#allocation3 + $0x20] sm:$0xf] %vm296_vm2, %v8181_v49  ;;  %v5491_v28 = vrot.slane %v5489_v19, 1  ;;  %v8062_v55 = vcombine.low %v5452_v27, %v11383_v57 }
 0x2ab   : > { %v4136_v62 = vadd.f32 1.0, %v9056_v3  ;;  %v8646_v8 = vpop.f32.mrf.mxu0 }
 0x2ac   : > { %v4817_v7 = vld [vmem:[#allocation3 + $0x18] sm:$0xf]  ;;  %v4292_v30 = vrot.slane %v4241_v0, 1  ;;  %v4353_v15 = vrot.slane %v4241_v0, 7  ;;  %v11404_v46 = vadd.f32 %v11249_v10, %v3952_v26  ;;  %v5487_v8 = vshrl.u32 %v11387_v14, 16 }
 0x2ad   : > { %v4839_v9 = vld [vmem:[#allocation3 + $0x18] sm:$0xf]  ;;  %4820 = vst.msk [vmem:[#allocation3] sm:$0xf] %vm296_vm2, %v4817_v7  ;;  %9065 = vrcp.f32 %v4136_v62  ;;  %v3812_v51 = vpop.f32.mrf.mxu0 }
 0x2ae   : > { %v11407_v18 = vcombine.low %v4838_v40, %v4839_v9  ;;  %v9058_v6 = vpop.eup %9057  ;;  %v4491_v49 = vsel %vm280_vm0, %v4292_v30, %v4353_v15  ;;  %v7933_v41 = vmul.f32 -1.442695, %v11404_v46  ;;  %v3953_v45 = vadd.f32 %v3812_v51, %v2829_v58 }
 0x2af   : > { %v8182_v3 = vpack.c.bf16 %v4491_v49, %v4491_v49  ;;  %v4242_v0 = vmul.f32 %v9058_v6, %v11330_v60  ;;  %v8647_v26 = vpop.f32.mrf.mxu0  ;;  %v5492_v57 = vor.u32 %v5491_v28, %v5487_v8  ;;  %v2836_v60 = vadd.f32 %v11160_v20, %v10971_v34 }
 0x2b0   : > { %v5494_v62 = vshll.u32 %v11407_v18, 16  ;;  %9067 = vpow2.f32 %v7933_v41  ;;  %v11416_v40 = vadd.f32 %v11249_v10, %v3953_v45  ;;  %v4818_v7 = vld [vmem:[#allocation3 + $0x1c] sm:$0xf]  ;;  %v5733_v45 = vrot.slane %v8062_v55, 1 }
 0x2b1   : > { %v9060_v19 = vpop.eup %9059  ;;  %4768 = vst.msk [vmem:[#allocation3 + $0x24] sm:$0xf] %vm296_vm2, %v8182_v3  ;;  %v4354_v30 = vrot.slane %v4242_v0, 7  ;;  %v4455_v58 = vrot.slane %v4242_v0, 5  ;;  %v3817_v51 = vpop.f32.mrf.mxu0  ;;  %v4819_v6 = vld [vmem:[#allocation3 + $0x20] sm:$0xf] }
 0x2b2   : > { %v5496_v27 = vrot.slane %v5494_v62, 1  ;;  %4821 = vst.msk [vmem:[#allocation3 + $0x4] sm:$0xf] %vm296_vm2, %v4818_v7  ;;  %v4137_v49 = vadd.f32 1.0, %v9060_v19  ;;  %v7934_v41 = vmul.f32 -1.442695, %v11416_v40 }
 0x2b3   : > { %4822 = vst.msk [vmem:[#allocation3 + $0x8] sm:$0xf] %vm296_vm2, %v4819_v6  ;;  %v4355_v26 = vsel %vm280_vm0, %v4353_v15, %v4354_v30  ;;  %v4509_v3 = vsel %vm280_vm0, %v4354_v30, %v4455_v58  ;;  %v8650_v0 = vpop.f32.mrf.mxu0  ;;  %v5734_v8 = vrot.slane %v11407_v18, 1  ;;  %v4840_v62 = vld [vmem:[#allocation3 + $0x1c] sm:$0xf]  ;;  %v5498_v58 = vshrl.u32 %v11407_v18, 16 }
 0x2b4   : > { %v5497_v28 = vsel %vm1330_vm5, %v5492_v57, %v5496_v27  ;;  %v11428_v34 = vld [vmem:[#allocation3 + $0x20] sm:$0xf]  ;;  %v4528_v20 = vsel %vm4524_vm12, %v4509_v3, 0.0  ;;  %v8183_v19 = vpack.c.bf16 %v4355_v26, %v4355_v26  ;;  %9069 = vrcp.f32 %v4137_v49  ;;  %v13251_v3 = vld [vmem:[#allocation6_spill] sm:$0xff] }
 0x2b5   : > { %5682 = vrot.lane.b32.xlu0 %v5497_v28, %s9267_s26  ;;  %v11433_v55 = vcombine.low %v4840_v62, %v11428_v34  ;;  %v9062_v15 = vpop.eup %9061  ;;  %v8184_v7 = vpack.c.bf16 %v4528_v20, %v4528_v20  ;;  %9071 = vpow2.f32 %v7934_v41  ;;  %v3819_v30 = vpop.f32.mrf.mxu0  ;;  %v11436_v51 = vcombine.low %v4839_v9, %v4840_v62 }
 0x2b6   : > { %v9064_v57 = vpop.eup %9063  ;;  %4769 = vst.msk [vmem:[#allocation3 + $0x28] sm:$0xf] %vm296_vm2, %v8183_v19  ;;  %v4243_v6 = vmul.f32 %v9062_v15, %v11347_v48  ;;  %v3954_v26 = vadd.f32 %v3819_v30, %v2836_v60  ;;  %v2841_v0 = vadd.f32 %v11165_v16, %v13251_v3  ;;  %v5735_v20 = vsel %vm1608_vm6, %v5733_v45, %v5734_v8 }
 0x2b7   : > { %13250 = vst [vmem:[#allocation23_spill] sm:$0xff] %v11436_v51  ;;  %v5502_v49 = vshll.u32 %v11433_v55, 16  ;;  %4770 = vst.msk [vmem:[#allocation3 + $0x2c] sm:$0xf] %vm296_vm2, %v8184_v7  ;;  %v4138_v28 = vadd.f32 1.0, %v9064_v57  ;;  %v8651_v41 = vpop.f32.mrf.mxu0  ;;  %v5500_v37 = vor.u32 %v5498_v58, %v5496_v27  ;;  %v5736_v19 = vrot.slane %v11433_v55, 1 }
 0x2b8   : > { %v4293_v9 = vrot.slane %v4243_v6, 1  ;;  %v4356_v62 = vrot.slane %v4243_v6, 7  ;;  %v11446_v51 = vadd.f32 %v11249_v10, %v3954_v26  ;;  %v11459_v41 = vld [vmem:[#allocation3 + $0x24] sm:$0xf] }
 0x2b9   : > { %5782 = vrot.lane.b32.xlu0 %v5735_v20, %s9268_s27  ;;  %v5504_v48 = vrot.slane %v5502_v49, 1  ;;  %9073 = vrcp.f32 %v4138_v28  ;;  %v3824_v60 = vpop.f32.mrf.mxu0  ;;  %v5737_v20 = vsel %vm1608_vm6, %v5734_v8, %v5736_v19 }
 0x2ba   : > { %v9066_v16 = vpop.eup %9065  ;;  %v4492_v15 = vsel %vm280_vm0, %v4293_v9, %v4356_v62  ;;  %v7935_v7 = vmul.f32 -1.442695, %v11446_v51  ;;  %v3955_v27 = vadd.f32 %v3824_v60, %v2841_v0  ;;  %v2848_v60 = vadd.f32 %v11176_v13, %v10997_v33 }
 0x2bb   : > { %v5505_v45 = vsel %vm1330_vm5, %v5500_v37, %v5504_v48  ;;  %v8185_v30 = vpack.c.bf16 %v4492_v15, %v4492_v15  ;;  %v4244_v58 = vmul.f32 %v9066_v16, %v11355_v61  ;;  %v8654_v57 = vpop.f32.mrf.mxu0 }
 0x2bc   : > { %5684 = vrot.lane.b32.xlu1 %v5505_v45, %s9267_s26  ;;  %9075 = vpow2.f32 %v7935_v7  ;;  %v11456_v6 = vadd.f32 %v11249_v10, %v3955_v27  ;;  %v5506_v45 = vshrl.u32 %v11433_v55, 16 }
 0x2bd   : > { %v9068_v26 = vpop.eup %9067  ;;  %4771 = vst.msk [vmem:[#allocation3 + $0x30] sm:$0xf] %vm296_vm2, %v8185_v30  ;;  %v4357_v49 = vrot.slane %v4244_v58, 7  ;;  %v4456_v3 = vrot.slane %v4244_v58, 5  ;;  %v3827_v28 = vpop.f32.mrf.mxu0  ;;  %v11461_v37 = vld [vmem:[#allocation3 + $0x28] sm:$0xf] }
 0x2be   : > { %v4139_v0 = vadd.f32 1.0, %v9068_v26  ;;  %v7936_v61 = vmul.f32 -1.442695, %v11456_v6  ;;  %v11469_v9 = vcombine.low %v11459_v41, %v11461_v37  ;;  %v2851_v28 = vadd.f32 %v11186_v5, %v11011_v22 }
 0x2bf   : > { %v4358_v16 = vsel %vm280_vm0, %v4356_v62, %v4357_v49  ;;  %v4510_v15 = vsel %vm280_vm0, %v4357_v49, %v4456_v3  ;;  %v8655_v7 = vpop.f32.mrf.mxu0  ;;  %v5508_v49 = vor.u32 %v5506_v45, %v5504_v48 }
 0x2c0   : > { %13252 = vst [vmem:[#allocation18_spill] sm:$0xff] %v11469_v9  ;;  %5784 = vrot.lane.b32.xlu1 %v5737_v20, %s9268_s27  ;;  %v4529_v27 = vsel %vm4524_vm12, %v4510_v15, 0.0  ;;  %v8186_v30 = vpack.c.bf16 %v4358_v16, %v4358_v16  ;;  %9077 = vrcp.f32 %v4139_v0  ;;  %v5510_v8 = vshll.u32 %v11469_v9, 16  ;;  %v11485_v15 = vld [vmem:[#allocation3 + $0x2c] sm:$0xf] }
 0x2c1   : > { %v9070_v58 = vpop.eup %9069  ;;  %v8187_v57 = vpack.c.bf16 %v4529_v27, %v4529_v27  ;;  %9079 = vpow2.f32 %v7936_v61  ;;  %v3831_v26 = vpop.f32.mrf.mxu0  ;;  %v5738_v16 = vrot.slane %v11469_v9, 1 }
 0x2c2   : > { %v9072_v33 = vpop.eup %9071  ;;  %4772 = vst.msk [vmem:[#allocation3 + $0x34] sm:$0xf] %vm296_vm2, %v8186_v30  ;;  %v4245_v13 = vmul.f32 %v9070_v58, %v11372_v23  ;;  %v3956_v62 = vadd.f32 %v3831_v26, %v2848_v60  ;;  %v5512_v3 = vrot.slane %v5510_v8, 1 }
 0x2c3   : > { %4773 = vst.msk [vmem:[#allocation3 + $0x38] sm:$0xf] %vm296_vm2, %v8187_v57  ;;  %v4140_v0 = vadd.f32 1.0, %v9072_v33  ;;  %v8658_v20 = vpop.f32.mrf.mxu0  ;;  %v5514_v33 = vshrl.u32 %v11469_v9, 16 }
 0x2c4   : > { %v4294_v61 = vrot.slane %v4245_v13, 1  ;;  %v4359_v7 = vrot.slane %v4245_v13, 7  ;;  %v11488_v27 = vadd.f32 %v11249_v10, %v3956_v62  ;;  %v5513_v23 = vsel %vm1330_vm5, %v5508_v49, %v5512_v3  ;;  %v11491_v48 = vld [vmem:[#allocation3 + $0x30] sm:$0xf] }
 0x2c5   : > { %9081 = vrcp.f32 %v4140_v0  ;;  %5686 = vrot.lane.b32.xlu0 %v5513_v23, %s9267_s26  ;;  %v3834_v22 = vpop.f32.mrf.mxu0  ;;  %v11496_v5 = vcombine.low %v11485_v15, %v11491_v48  ;;  %v5739_v49 = vsel %vm1608_vm6, %v5736_v19, %v5738_v16 }
 0x2c6   : > { %v9074_v60 = vpop.eup %9073  ;;  %v4493_v45 = vsel %vm280_vm0, %v4294_v61, %v4359_v7  ;;  %v7937_v30 = vmul.f32 -1.442695, %v11488_v27  ;;  %v3957_v8 = vadd.f32 %v3834_v22, %v2851_v28  ;;  %v5516_v61 = vor.u32 %v5514_v33, %v5512_v3 }
 0x2c7   : > { %13253 = vst [vmem:[#allocation4_spill] sm:$0xff] %v11496_v5  ;;  %v8188_v58 = vpack.c.bf16 %v4493_v45, %v4493_v45  ;;  %v4246_v57 = vmul.f32 %v9074_v60, %v11380_v4  ;;  %v8659_v26 = vpop.f32.mrf.mxu0  ;;  %v5518_v13 = vshll.u32 %v11496_v5, 16  ;;  %v2858_v33 = vadd.f32 %v11197_v25, %v11030_v44 }
 0x2c8   : > { %9083 = vpow2.f32 %v7937_v30  ;;  %v11504_v62 = vadd.f32 %v11249_v10, %v3957_v8  ;;  %v5740_v30 = vrot.slane %v11496_v5, 1 }
 0x2c9   : > { %v9076_v0 = vpop.eup %9075  ;;  %4774 = vst.msk [vmem:[#allocation3 + $0x3c] sm:$0xf] %vm296_vm2, %v8188_v58  ;;  %v4360_v28 = vrot.slane %v4246_v57, 7  ;;  %v4457_v20 = vrot.slane %v4246_v57, 5  ;;  %5786 = vrot.lane.b32.xlu0 %v5739_v49, %s9268_s27  ;;  %v3839_v4 = vpop.f32.mrf.mxu0  ;;  %v5520_v23 = vrot.slane %v5518_v13, 1 }
 0x2ca   : > { %v11511_v22 = vld [vmem:[#allocation3 + $0x34] sm:$0xf]  ;;  %v4141_v60 = vadd.f32 1.0, %v9076_v0  ;;  %v7938_v45 = vmul.f32 -1.442695, %v11504_v62  ;;  %v5741_v25 = vsel %vm1608_vm6, %v5738_v16, %v5740_v30 }
 0x2cb   : > { %v11515_v8 = vld [vmem:[#allocation3 + $0x38] sm:$0xf]  ;;  %v4361_v19 = vsel %vm280_vm0, %v4359_v7, %v4360_v28  ;;  %v4511_v58 = vsel %vm280_vm0, %v4360_v28, %v4457_v20  ;;  %v8662_v26 = vpop.f32.mrf.mxu0  ;;  %v5521_v57 = vsel %vm1330_vm5, %v5516_v61, %v5520_v23  ;;  %v5522_v20 = vshrl.u32 %v11496_v5, 16 }
 0x2cc   : > { %v11522_v3 = vcombine.low %v11511_v22, %v11515_v8  ;;  %v4530_v13 = vsel %vm4524_vm12, %v4511_v58, 0.0  ;;  %v8189_v49 = vpack.c.bf16 %v4361_v19, %v4361_v19  ;;  %9085 = vrcp.f32 %v4141_v60  ;;  %5688 = vrot.lane.b32.xlu1 %v5521_v57, %s9267_s26 }
 0x2cd   : > { %v9078_v0 = vpop.eup %9077  ;;  %v8190_v7 = vpack.c.bf16 %v4530_v13, %v4530_v13  ;;  %9087 = vpow2.f32 %v7938_v45  ;;  %v3841_v28 = vpop.f32.mrf.mxu0  ;;  %v5524_v58 = vor.u32 %v5522_v20, %v5520_v23  ;;  %v11536_v45 = vcombine.low %v11428_v34, %v11459_v41  ;;  %v13254_v13 = vld [vmem:[#allocation13_spill] sm:$0xff] }
 0x2ce   : > { %v5526_v4 = vshll.u32 %v11522_v3, 16  ;;  %v9080_v61 = vpop.eup %9079  ;;  %4775 = vst.msk [vmem:[#allocation3 + $0x40] sm:$0xf] %vm296_vm2, %v8189_v49  ;;  %v4247_v26 = vmul.f32 %v9078_v0, %v11404_v46  ;;  %v3958_v44 = vadd.f32 %v3841_v28, %v2858_v33  ;;  %v2863_v5 = vadd.f32 %v11200_v1, %v13254_v13 }
 0x2cf   : > { %4776 = vst.msk [vmem:[#allocation3 + $0x44] sm:$0xf] %vm296_vm2, %v8190_v7  ;;  %v4142_v60 = vadd.f32 1.0, %v9080_v61  ;;  %v8663_v19 = vpop.f32.mrf.mxu0  ;;  %v5742_v23 = vrot.slane %v11522_v3, 1  ;;  %v11548_v34 = vcombine.low %v11461_v37, %v11485_v15 }
 0x2d0   : > { %v5528_v57 = vrot.slane %v5526_v4, 1  ;;  %v4295_v9 = vrot.slane %v4247_v26, 1  ;;  %v4362_v49 = vrot.slane %v4247_v26, 7  ;;  %v11541_v46 = vadd.f32 %v11249_v10, %v3958_v44  ;;  %5788 = vrot.lane.b32.xlu1 %v5741_v25, %s9268_s27  ;;  %v4848_v25 = vld [vmem:[#allocation3 + $0x3c] sm:$0xf] }
 0x2d1   : > { %9089 = vrcp.f32 %v4142_v60  ;;  %v3846_v33 = vpop.f32.mrf.mxu0 }
 0x2d2   : > { %v5529_v16 = vsel %vm1330_vm5, %v5524_v58, %v5528_v57  ;;  %v9082_v41 = vpop.eup %9081  ;;  %v4494_v1 = vsel %vm280_vm0, %v4295_v9, %v4362_v49  ;;  %v7939_v0 = vmul.f32 -1.442695, %v11541_v46  ;;  %v3959_v7 = vadd.f32 %v3846_v33, %v2863_v5 }
 0x2d3   : > { %5690 = vrot.lane.b32.xlu0 %v5529_v16, %s9267_s26  ;;  %v8191_v28 = vpack.c.bf16 %v4494_v1, %v4494_v1  ;;  %v4248_v20 = vmul.f32 %v9082_v41, %v11416_v40  ;;  %v8666_v4 = vpop.f32.mrf.mxu0  ;;  %v5743_v9 = vsel %vm1608_vm6, %v5740_v30, %v5742_v23  ;;  %v2870_v58 = vadd.f32 %v11209_v47, %v11056_v17 }
 0x2d4   : > { %9091 = vpow2.f32 %v7939_v0  ;;  %v11555_v61 = vadd.f32 %v11249_v10, %v3959_v7  ;;  %v5530_v33 = vshrl.u32 %v11522_v3, 16 }
 0x2d5   : > { %v9084_v26 = vpop.eup %9083  ;;  %4777 = vst.msk [vmem:[#allocation3 + $0x48] sm:$0xf] %vm296_vm2, %v8191_v28  ;;  %v4363_v37 = vrot.slane %v4248_v20, 7  ;;  %v4458_v15 = vrot.slane %v4248_v20, 5  ;;  %v3849_v44 = vpop.f32.mrf.mxu0  ;;  %v11561_v5 = vld [vmem:[#allocation3 + $0x40] sm:$0xf] }
 0x2d6   : > { %v4143_v60 = vadd.f32 1.0, %v9084_v26  ;;  %v7940_v40 = vmul.f32 -1.442695, %v11555_v61  ;;  %v11566_v19 = vcombine.low %v4848_v25, %v11561_v5 }
 0x2d7   : > { %5790 = vrot.lane.b32.xlu0 %v5743_v9, %s9268_s27  ;;  %v4364_v13 = vsel %vm280_vm0, %v4362_v49, %v4363_v37  ;;  %v4512_v16 = vsel %vm280_vm0, %v4363_v37, %v4458_v15  ;;  %v8667_v30 = vpop.f32.mrf.mxu0  ;;  %v5532_v49 = vor.u32 %v5530_v33, %v5528_v57  ;;  %v2873_v37 = vadd.f32 %v11219_v56, %v11064_v63 }
 0x2d8   : > { %v4531_v41 = vsel %vm4524_vm12, %v4512_v16, 0.0  ;;  %v8192_v1 = vpack.c.bf16 %v4364_v13, %v4364_v13  ;;  %9093 = vrcp.f32 %v4143_v60  ;;  %v5534_v0 = vshll.u32 %v11566_v19, 16 }
 0x2d9   : > { %v9086_v7 = vpop.eup %9085  ;;  %v8193_v28 = vpack.c.bf16 %v4531_v41, %v4531_v41  ;;  %9095 = vpow2.f32 %v7940_v40  ;;  %v3853_v20 = vpop.f32.mrf.mxu0  ;;  %v5744_v44 = vrot.slane %v11566_v19, 1 }
 0x2da   : > { %v9088_v4 = vpop.eup %9087  ;;  %4778 = vst.msk [vmem:[#allocation3 + $0x4c] sm:$0xf] %vm296_vm2, %v8192_v1  ;;  %v4249_v17 = vmul.f32 %v9086_v7, %v11446_v51  ;;  %v3960_v47 = vadd.f32 %v3853_v20, %v2870_v58  ;;  %v5536_v26 = vrot.slane %v5534_v0, 1  ;;  %v4850_v51 = vld [vmem:[#allocation3 + $0x44] sm:$0xf] }
 0x2db   : > { %4779 = vst.msk [vmem:[#allocation3 + $0x50] sm:$0xf] %vm296_vm2, %v8193_v28  ;;  %v4144_v15 = vadd.f32 1.0, %v9088_v4  ;;  %v8670_v9 = vpop.f32.mrf.mxu0  ;;  %v5538_v28 = vshrl.u32 %v11566_v19, 16  ;;  %v11603_v4 = vld [vmem:[%s13151_s3] ss:$0 sm:$0xff] }
 0x2dc   : > { %v4296_v60 = vrot.slane %v4249_v17, 1  ;;  %v4365_v40 = vrot.slane %v4249_v17, 7  ;;  %v11582_v13 = vadd.f32 %v11249_v10, %v3960_v47  ;;  %v5537_v16 = vsel %vm1330_vm5, %v5532_v49, %v5536_v26  ;;  %v11585_v58 = vld [vmem:[#allocation3 + $0x48] sm:$0xf] }
 0x2dd   : > { %9097 = vrcp.f32 %v4144_v15  ;;  %5692 = vrot.lane.b32.xlu1 %v5537_v16, %s9267_s26  ;;  %v3856_v63 = vpop.f32.mrf.mxu0  ;;  %v11589_v56 = vcombine.low %v4850_v51, %v11585_v58  ;;  %v11595_v10 = vcombine.low %v11491_v48, %v11511_v22  ;;  %v11614_v48 = vcombine.low %v11515_v8, %v4848_v25 }
 0x2de   : > { %v9090_v57 = vpop.eup %9089  ;;  %v4495_v30 = vsel %vm280_vm0, %v4296_v60, %v4365_v40  ;;  %v7941_v33 = vmul.f32 -1.442695, %v11582_v13  ;;  %v3961_v41 = vadd.f32 %v3856_v63, %v2873_v37  ;;  %v5540_v15 = vor.u32 %v5538_v28, %v5536_v26 }
 0x2df   : > { %v8194_v1 = vpack.c.bf16 %v4495_v30, %v4495_v30  ;;  %v4250_v0 = vmul.f32 %v9090_v57, %v11456_v6  ;;  %v8671_v7 = vpop.f32.mrf.mxu0  ;;  %v5542_v20 = vshll.u32 %v11589_v56, 16  ;;  %v5745_v6 = vsel %vm1608_vm6, %v5742_v23, %v5744_v44 }
 0x2e0   : > { %9099 = vpow2.f32 %v7941_v33  ;;  %v11606_v17 = vadd.f32 %v11603_v4, %v3961_v41  ;;  %v5746_v23 = vrot.slane %v11589_v56, 1  ;;  %v11625_v8 = vcombine.low %v11561_v5, %v4850_v51 }
 0x2e1   : > { %v9092_v22 = vpop.eup %9091  ;;  %4780 = vst.msk [vmem:[#allocation3 + $0x54] sm:$0xf] %vm296_vm2, %v8194_v1  ;;  %v4366_v47 = vrot.slane %v4250_v0, 7  ;;  %v4459_v49 = vrot.slane %v4250_v0, 5  ;;  %5792 = vrot.lane.b32.xlu1 %v5745_v6, %s9268_s27  ;;  %v3861_v37 = vpop.f32.mrf.mxu0  ;;  %v5544_v9 = vrot.slane %v5542_v20, 1  ;;  %v2880_v1 = vadd.f32 %v11230_v52, %v11073_v12 }
 0x2e2   : > { %v11618_v60 = vld [vmem:[#allocation3 + $0x4c] sm:$0xf]  ;;  %v4145_v16 = vadd.f32 1.0, %v9092_v22  ;;  %v7942_v63 = vmul.f32 -1.442695, %v11606_v17  ;;  %v5546_v28 = vshrl.u32 %v11589_v56, 16 }
 0x2e3   : > { %v11622_v57 = vld [vmem:[#allocation3 + $0x50] sm:$0xf]  ;;  %v4367_v25 = vsel %vm280_vm0, %v4365_v40, %v4366_v47  ;;  %v4513_v30 = vsel %vm280_vm0, %v4366_v47, %v4459_v49  ;;  %v8674_v33 = vpop.f32.mrf.mxu0  ;;  %v5545_v26 = vsel %vm1330_vm5, %v5540_v15, %v5544_v9  ;;  %v5747_v49 = vsel %vm1608_vm6, %v5744_v44, %v5746_v23 }
 0x2e4   : > { %v11632_v41 = vcombine.low %v11618_v60, %v11622_v57  ;;  %v4532_v0 = vsel %vm4524_vm12, %v4513_v30, 0.0  ;;  %v8195_v7 = vpack.c.bf16 %v4367_v25, %v4367_v25  ;;  %9101 = vrcp.f32 %v4145_v16  ;;  %5694 = vrot.lane.b32.xlu0 %v5545_v26, %s9267_s26 }
 0x2e5   : > { %v9094_v5 = vpop.eup %9093  ;;  %v8196_v40 = vpack.c.bf16 %v4532_v0, %v4532_v0  ;;  %9103 = vpow2.f32 %v7942_v63  ;;  %v3863_v51 = vpop.f32.mrf.mxu0  ;;  %v5548_v37 = vor.u32 %v5546_v28, %v5544_v9  ;;  %v2885_v16 = vadd.f32 %v11235_v31, %v11077_v32 }
 0x2e6   : > { %v5550_v20 = vshll.u32 %v11632_v41, 16  ;;  %v9096_v6 = vpop.eup %9095  ;;  %4781 = vst.msk [vmem:[#allocation3 + $0x58] sm:$0xf] %vm296_vm2, %v8195_v7  ;;  %v4251_v22 = vmul.f32 %v9094_v5, %v11488_v27  ;;  %v3962_v12 = vadd.f32 %v3863_v51, %v2880_v1  ;;  %v5748_v26 = vrot.slane %v11632_v41, 1 }
 0x2e7   : > { %4782 = vst.msk [vmem:[#allocation3 + $0x5c] sm:$0xf] %vm296_vm2, %v8196_v40  ;;  %v4146_v52 = vadd.f32 1.0, %v9096_v6  ;;  %v8675_v47 = vpop.f32.mrf.mxu0 }
 0x2e8   : > { %v5552_v15 = vrot.slane %v5550_v20, 1  ;;  %v4297_v63 = vrot.slane %v4251_v22, 1  ;;  %v4368_v25 = vrot.slane %v4251_v22, 7  ;;  %v11649_v30 = vadd.f32 %v11603_v4, %v3962_v12  ;;  %5794 = vrot.lane.b32.xlu0 %v5747_v49, %s9268_s27  ;;  %v11661_v40 = vld [vmem:[#allocation3 + $0x54] sm:$0xf] }
 0x2e9   : > { %9105 = vrcp.f32 %v4146_v52  ;;  %v3868_v33 = vpop.f32.mrf.mxu0  ;;  %v5749_v6 = vsel %vm1608_vm6, %v5746_v23, %v5748_v26 }
 0x2ea   : > { %v5553_v27 = vsel %vm1330_vm5, %v5548_v37, %v5552_v15  ;;  %v9098_v1 = vpop.eup %9097  ;;  %v4496_v44 = vsel %vm280_vm0, %v4297_v63, %v4368_v25  ;;  %v7943_v9 = vmul.f32 -1.442695, %v11649_v30  ;;  %v3963_v32 = vadd.f32 %v3868_v33, %v2885_v16 }
 0x2eb   : > { %5696 = vrot.lane.b32.xlu1 %v5553_v27, %s9267_s26  ;;  %v8197_v31 = vpack.c.bf16 %v4496_v44, %v4496_v44  ;;  %v4252_v0 = vmul.f32 %v9098_v1, %v11504_v62  ;;  %v8678_v7 = vpop.f32.mrf.mxu0  ;;  %v13255_v62 = vld [vmem:[#allocation7_spill] sm:$0xff]  ;;  %v5554_v27 = vshrl.u32 %v11632_v41, 16  ;;  %v11682_v33 = vcombine.low %v11585_v58, %v11618_v60 }
 0x2ec   : > { %9107 = vpow2.f32 %v7943_v9  ;;  %v11659_v5 = vadd.f32 %v11603_v4, %v3963_v32  ;;  %v2892_v52 = vadd.f32 %v11252_v24, %v13255_v62  ;;  %v2895_v58 = vadd.f32 %v11265_v21, %v11097_v38 }
 0x2ed   : > { %v9100_v51 = vpop.eup %9099  ;;  %4783 = vst.msk [vmem:[#allocation3 + $0x60] sm:$0xf] %vm296_vm2, %v8197_v31  ;;  %v4369_v28 = vrot.slane %v4252_v0, 7  ;;  %v4460_v20 = vrot.slane %v4252_v0, 5  ;;  %v3871_v22 = vpop.f32.mrf.mxu0  ;;  %v11667_v12 = vld [vmem:[#allocation3 + $0x58] sm:$0xf] }
 0x2ee   : > { %v4147_v47 = vadd.f32 1.0, %v9100_v51  ;;  %v7944_v49 = vmul.f32 -1.442695, %v11659_v5  ;;  %v11675_v37 = vcombine.low %v11661_v40, %v11667_v12  ;;  %v5556_v51 = vor.u32 %v5554_v27, %v5552_v15  ;;  %v11692_v22 = vld [vmem:[#allocation3 + $0x5c] sm:$0xf] }
 0x2ef   : > { %5796 = vrot.lane.b32.xlu1 %v5749_v6, %s9268_s27  ;;  %v4370_v16 = vsel %vm280_vm0, %v4368_v25, %v4369_v28  ;;  %v4514_v63 = vsel %vm280_vm0, %v4369_v28, %v4460_v20  ;;  %v8679_v23 = vpop.f32.mrf.mxu0 }
 0x2f0   : > { %v4533_v24 = vsel %vm4524_vm12, %v4514_v63, 0.0  ;;  %v8198_v1 = vpack.c.bf16 %v4370_v16, %v4370_v16  ;;  %9109 = vrcp.f32 %v4147_v47  ;;  %v5558_v44 = vshll.u32 %v11675_v37, 16 }
 0x2f1   : > { %v9102_v9 = vpop.eup %9101  ;;  %v8199_v32 = vpack.c.bf16 %v4533_v24, %v4533_v24  ;;  %9111 = vpow2.f32 %v7944_v49  ;;  %v3875_v31 = vpop.f32.mrf.mxu0  ;;  %v5750_v6 = vrot.slane %v11675_v37, 1 }
 0x2f2   : > { %v9104_v25 = vpop.eup %9103  ;;  %4784 = vst.msk [vmem:[#allocation3 + $0x64] sm:$0xf] %vm296_vm2, %v8198_v1  ;;  %v4253_v0 = vmul.f32 %v9102_v9, %v11541_v46  ;;  %v3964_v7 = vadd.f32 %v3875_v31, %v2892_v52  ;;  %v5560_v28 = vrot.slane %v5558_v44, 1  ;;  %v5562_v44 = vshrl.u32 %v11675_v37, 16 }
 0x2f3   : > { %4785 = vst.msk [vmem:[#allocation3 + $0x68] sm:$0xf] %vm296_vm2, %v8199_v32  ;;  %v4148_v60 = vadd.f32 1.0, %v9104_v25  ;;  %v8682_v20 = vpop.f32.mrf.mxu0  ;;  %v5751_v31 = vsel %vm1608_vm6, %v5748_v26, %v5750_v6 }
 0x2f4   : > { %v4298_v62 = vrot.slane %v4253_v0, 1  ;;  %v4371_v47 = vrot.slane %v4253_v0, 7  ;;  %v11695_v49 = vadd.f32 %v11603_v4, %v3964_v7  ;;  %v5561_v46 = vsel %vm1330_vm5, %v5556_v51, %v5560_v28  ;;  %v11698_v15 = vld [vmem:[#allocation3 + $0x60] sm:$0xf] }
 0x2f5   : > { %9113 = vrcp.f32 %v4148_v60  ;;  %5698 = vrot.lane.b32.xlu0 %v5561_v46, %s9267_s26  ;;  %v3878_v38 = vpop.f32.mrf.mxu0  ;;  %v11703_v21 = vcombine.low %v11692_v22, %v11698_v15  ;;  %v5564_v51 = vor.u32 %v5562_v44, %v5560_v28 }
 0x2f6   : > { %v9106_v52 = vpop.eup %9105  ;;  %v4497_v16 = vsel %vm280_vm0, %v4298_v62, %v4371_v47  ;;  %v7945_v63 = vmul.f32 -1.442695, %v11695_v49  ;;  %v3965_v23 = vadd.f32 %v3878_v38, %v2895_v58 }
 0x2f7   : > { %v8200_v27 = vpack.c.bf16 %v4497_v16, %v4497_v16  ;;  %v4254_v24 = vmul.f32 %v9106_v52, %v11555_v61  ;;  %v8683_v1 = vpop.f32.mrf.mxu0  ;;  %v5566_v9 = vshll.u32 %v11703_v21, 16  ;;  %v5752_v46 = vrot.slane %v11703_v21, 1 }
 0x2f8   : > { %9115 = vpow2.f32 %v7945_v63  ;;  %v11711_v32 = vadd.f32 %v11603_v4, %v3965_v23  ;;  %v2902_v23 = vadd.f32 %v11277_v2, %v11108_v54 }
 0x2f9   : > { %v9108_v25 = vpop.eup %9107  ;;  %4786 = vst.msk [vmem:[#allocation3 + $0x6c] sm:$0xf] %vm296_vm2, %v8200_v27  ;;  %v4372_v0 = vrot.slane %v4254_v24, 7  ;;  %v4461_v7 = vrot.slane %v4254_v24, 5  ;;  %5798 = vrot.lane.b32.xlu0 %v5751_v31, %s9268_s27  ;;  %v3883_v61 = vpop.f32.mrf.mxu0  ;;  %v5568_v58 = vrot.slane %v5566_v9, 1  ;;  %v5570_v9 = vshrl.u32 %v11703_v21, 16 }
 0x2fa   : > { %v11718_v60 = vld [vmem:[#allocation3 + $0x64] sm:$0xf]  ;;  %v4149_v20 = vadd.f32 1.0, %v9108_v25  ;;  %v7946_v62 = vmul.f32 -1.442695, %v11711_v32  ;;  %v5753_v61 = vsel %vm1608_vm6, %v5750_v6, %v5752_v46 }
 0x2fb   : > { %v11722_v38 = vld [vmem:[#allocation3 + $0x68] sm:$0xf]  ;;  %v4373_v26 = vsel %vm280_vm0, %v4371_v47, %v4372_v0  ;;  %v4515_v52 = vsel %vm280_vm0, %v4372_v0, %v4461_v7  ;;  %v8686_v16 = vpop.f32.mrf.mxu0  ;;  %v5569_v63 = vsel %vm1330_vm5, %v5564_v51, %v5568_v58  ;;  %v5572_v51 = vor.u32 %v5570_v9, %v5568_v58 }
 0x2fc   : > { %v11729_v28 = vcombine.low %v11718_v60, %v11722_v38  ;;  %v4534_v27 = vsel %vm4524_vm12, %v4515_v52, 0.0  ;;  %v8201_v24 = vpack.c.bf16 %v4373_v26, %v4373_v26  ;;  %9117 = vrcp.f32 %v4149_v20  ;;  %5700 = vrot.lane.b32.xlu1 %v5569_v63, %s9267_s26 }
 0x2fd   : > { %v9110_v1 = vpop.eup %9109  ;;  %v8202_v47 = vpack.c.bf16 %v4534_v27, %v4534_v27  ;;  %9119 = vpow2.f32 %v7946_v62  ;;  %v3885_v44 = vpop.f32.mrf.mxu0  ;;  %v13256_v62 = vld [vmem:[#allocation19_spill] sm:$0xff]  ;;  %v11755_v9 = vcombine.low %v11622_v57, %v11661_v40 }
 0x2fe   : > { %v5574_v31 = vshll.u32 %v11729_v28, 16  ;;  %v9112_v25 = vpop.eup %9111  ;;  %4787 = vst.msk [vmem:[#allocation3 + $0x70] sm:$0xf] %vm296_vm2, %v8201_v24  ;;  %v4255_v0 = vmul.f32 %v9110_v1, %v11582_v13  ;;  %v3966_v54 = vadd.f32 %v3885_v44, %v2902_v23  ;;  %v2907_v26 = vadd.f32 %v11287_v59, %v13256_v62 }
 0x2ff   : > { %4788 = vst.msk [vmem:[#allocation3 + $0x74] sm:$0xf] %vm296_vm2, %v8202_v47  ;;  %v4150_v2 = vadd.f32 1.0, %v9112_v25  ;;  %v8687_v7 = vpop.f32.mrf.mxu0  ;;  %v5754_v27 = vrot.slane %v11729_v28, 1  ;;  %v11762_v25 = vcombine.low %v11667_v12, %v11692_v22  ;;  %v13258_v22 = vld [vmem:[#allocation14_spill] sm:$0xff] }
 0x300   : > { %v5576_v20 = vrot.slane %v5574_v31, 1  ;;  %v4299_v52 = vrot.slane %v4255_v0, 1  ;;  %v4374_v16 = vrot.slane %v4255_v0, 7  ;;  %v11744_v63 = vadd.f32 %v11603_v4, %v3966_v54  ;;  %5800 = vrot.lane.b32.xlu1 %v5753_v61, %s9268_s27  ;;  %v11768_v57 = vld [vmem:[#allocation3 + $0x6c] sm:$0xf] }
 0x301   : > { %9121 = vrcp.f32 %v4150_v2  ;;  %v3890_v23 = vpop.f32.mrf.mxu0  ;;  %v2914_v62 = vadd.f32 %v11298_v50, %v13258_v22 }
 0x302   : > { %v5577_v13 = vsel %vm1330_vm5, %v5572_v51, %v5576_v20  ;;  %v9114_v24 = vpop.eup %9113  ;;  %v4498_v6 = vsel %vm280_vm0, %v4299_v52, %v4374_v16  ;;  %v7947_v58 = vmul.f32 -1.442695, %v11744_v63  ;;  %v3967_v59 = vadd.f32 %v3890_v23, %v2907_v26  ;;  %v11786_v23 = vld [vmem:[%s13150_s2] sm:$0x3f]  }
 0x303   : > { %5702 = vrot.lane.b32.xlu0 %v5577_v13, %s9267_s26  ;;  %v8203_v1 = vpack.c.bf16 %v4498_v6, %v4498_v6  ;;  %v4256_v47 = vmul.f32 %v9114_v24, %v11606_v17  ;;  %v8690_v44 = vpop.f32.mrf.mxu0  ;;  %v5755_v17 = vsel %vm1608_vm6, %v5752_v46, %v5754_v27  ;;  %v5578_v13 = vshrl.u32 %v11729_v28, 16  ;;  %8869 = vmatprep.subr.msk.bf16.mxu1 %vm2428_vm7, %v11786_v23 }
 0x304   : > { %9123 = vpow2.f32 %v7947_v58  ;;  %v11758_v31 = vadd.f32 %v11603_v4, %v3967_v59 }
 0x305   : > { %v9116_v0 = vpop.eup %9115  ;;  %4789 = vst.msk [vmem:[#allocation3 + $0x78] sm:$0xf] %vm296_vm2, %v8203_v1  ;;  %v4375_v54 = vrot.slane %v4256_v47, 7  ;;  %v4462_v2 = vrot.slane %v4256_v47, 5  ;;  %v3893_v7 = vpop.f32.mrf.mxu0  ;;  %v11770_v40 = vld [vmem:[#allocation3 + $0x70] sm:$0xf] }
 0x306   : > { %v4151_v61 = vadd.f32 1.0, %v9116_v0  ;;  %v7948_v51 = vmul.f32 -1.442695, %v11758_v31  ;;  %v11776_v12 = vcombine.low %v11768_v57, %v11770_v40  ;;  %v5580_v0 = vor.u32 %v5578_v13, %v5576_v20 }
 0x307   : > { %5802 = vrot.lane.b32.xlu0 %v5755_v17, %s9268_s27  ;;  %v4376_v26 = vsel %vm280_vm0, %v4374_v16, %v4375_v54  ;;  %v4516_v46 = vsel %vm280_vm0, %v4375_v54, %v4462_v2  ;;  %v8691_v52 = vpop.f32.mrf.mxu0  ;;  %v2917_v2 = vadd.f32 %v11308_v42, %v11134_v36 }
 0x308   : > { %13257 = vst [vmem:[#allocation20_spill] sm:$0xff] %v11776_v12  ;;  %v4535_v24 = vsel %vm4524_vm12, %v4516_v46, 0.0  ;;  %v8204_v6 = vpack.c.bf16 %v4376_v26, %v4376_v26  ;;  %9125 = vrcp.f32 %v4151_v61  ;;  %v5582_v58 = vshll.u32 %v11776_v12, 16 }
 0x309   : > { %v9118_v59 = vpop.eup %9117  ;;  %v8205_v50 = vpack.c.bf16 %v4535_v24, %v4535_v24  ;;  %9127 = vpow2.f32 %v7948_v51  ;;  %v3897_v16 = vpop.f32.mrf.mxu0  ;;  %v5756_v61 = vrot.slane %v11776_v12, 1  ;;  %v11798_v51 = vld [vmem:[#allocation3 + $0x74] sm:$0xf] }
 0x30a   : > { %v9120_v1 = vpop.eup %9119  ;;  %4790 = vst.msk [vmem:[#allocation3 + $0x7c] sm:$0xf] %vm296_vm2, %v8204_v6  ;;  %v4257_v47 = vmul.f32 %v9118_v59, %v11649_v30  ;;  %v3968_v44 = vadd.f32 %v3897_v16, %v2914_v62  ;;  %v5584_v54 = vrot.slane %v5582_v58, 1 }
 0x30b   : > { %4791 = vst.msk [vmem:[#allocation3 + $0x80] sm:$0xf] %vm296_vm2, %v8205_v50  ;;  %v4152_v17 = vadd.f32 1.0, %v9120_v1  ;;  %v8694_v7 = vpop.f32.mrf.mxu0  ;;  %v5586_v50 = vshrl.u32 %v11776_v12, 16 }
 0x30c   : > { %v4300_v22 = vrot.slane %v4257_v47, 1  ;;  %v4377_v26 = vrot.slane %v4257_v47, 7  ;;  %v11801_v46 = vadd.f32 %v11603_v4, %v3968_v44  ;;  %v5585_v30 = vsel %vm1330_vm5, %v5580_v0, %v5584_v54  ;;  %v11804_v20 = vld [vmem:[#allocation3 + $0x78] sm:$0xf] }
 0x30d   : > { %9129 = vrcp.f32 %v4152_v17  ;;  %5704 = vrot.lane.b32.xlu1 %v5585_v30, %s9267_s26  ;;  %v3900_v36 = vpop.f32.mrf.mxu0  ;;  %v11809_v42 = vcombine.low %v11798_v51, %v11804_v20  ;;  %v5757_v47 = vsel %vm1608_vm6, %v5754_v27, %v5756_v61  ;;  %v5588_v17 = vor.u32 %v5586_v50, %v5584_v54 }
 0x30e   : > { %v9122_v62 = vpop.eup %9121  ;;  %v4499_v52 = vsel %vm280_vm0, %v4300_v22, %v4377_v26  ;;  %v7949_v13 = vmul.f32 -1.442695, %v11801_v46  ;;  %v3969_v24 = vadd.f32 %v3900_v36, %v2917_v2 }
 0x30f   : > { %13259 = vst [vmem:[#allocation5_spill] sm:$0xff] %v11809_v42  ;;  %v8206_v6 = vpack.c.bf16 %v4499_v52, %v4499_v52  ;;  %v4258_v58 = vmul.f32 %v9122_v62, %v11659_v5  ;;  %v8695_v59 = vpop.f32.mrf.mxu0  ;;  %v5590_v16 = vshll.u32 %v11809_v42, 16  ;;  %v5758_v62 = vrot.slane %v11809_v42, 1 }
 0x310   : > { %9131 = vpow2.f32 %v7949_v13  ;;  %v11817_v1 = vadd.f32 %v11603_v4, %v3969_v24 }
 0x311   : > { %v9124_v44 = vpop.eup %9123  ;;  %4792 = vst.msk [vmem:[#allocation3 + $0x84] sm:$0xf] %vm296_vm2, %v8206_v6  ;;  %v4378_v0 = vrot.slane %v4258_v58, 7  ;;  %v4463_v2 = vrot.slane %v4258_v58, 5  ;;  %5804 = vrot.lane.b32.xlu1 %v5757_v47, %s9268_s27  ;;  %v3905_v5 = vpop.f32.mrf.mxu0  ;;  %v5592_v7 = vrot.slane %v5590_v16, 1  ;;  %v13260_v58 = vld [vmem:[#allocation8_spill] sm:$0xff] }
 0x312   : > { %v11824_v22 = vld [vmem:[#allocation3 + $0x7c] sm:$0xf]  ;;  %v4153_v30 = vadd.f32 1.0, %v9124_v44  ;;  %v7950_v36 = vmul.f32 -1.442695, %v11817_v1  ;;  %v2924_v59 = vadd.f32 %v11317_v11, %v13260_v58 }
 0x313   : > { %v11828_v52 = vld [vmem:[#allocation3 + $0x80] sm:$0xf]  ;;  %v4379_v27 = vsel %vm280_vm0, %v4377_v26, %v4378_v0  ;;  %v4517_v13 = vsel %vm280_vm0, %v4378_v0, %v4463_v2  ;;  %v8698_v24 = vpop.f32.mrf.mxu0  ;;  %v5593_v6 = vsel %vm1330_vm5, %v5588_v17, %v5592_v7  ;;  %v5594_v0 = vshrl.u32 %v11809_v42, 16 }
 0x314   : > { %v11835_v54 = vcombine.low %v11824_v22, %v11828_v52  ;;  %v4536_v50 = vsel %vm4524_vm12, %v4517_v13, 0.0  ;;  %v8207_v16 = vpack.c.bf16 %v4379_v27, %v4379_v27  ;;  %9133 = vrcp.f32 %v4153_v30  ;;  %5706 = vrot.lane.b32.xlu0 %v5593_v6, %s9267_s26  ;;  %v13261_v17 = vld [vmem:[#allocation15_spill] sm:$0xff] }
 0x315   : > { %v9126_v47 = vpop.eup %9125  ;;  %v8208_v26 = vpack.c.bf16 %v4536_v50, %v4536_v50  ;;  %9135 = vpow2.f32 %v7950_v36  ;;  %v3907_v44 = vpop.f32.mrf.mxu0  ;;  %v2929_v24 = vadd.f32 %v11327_v43, %v13261_v17  ;;  %v5759_v30 = vsel %vm1608_vm6, %v5756_v61, %v5758_v62 }
 0x316   : > { %v5598_v2 = vshll.u32 %v11835_v54, 16  ;;  %v9128_v5 = vpop.eup %9127  ;;  %4793 = vst.msk [vmem:[#allocation3 + $0x88] sm:$0xf] %vm296_vm2, %v8207_v16  ;;  %v4259_v11 = vmul.f32 %v9126_v47, %v11695_v49  ;;  %v3970_v27 = vadd.f32 %v3907_v44, %v2924_v59  ;;  %v5596_v6 = vor.u32 %v5594_v0, %v5592_v7 }
 0x317   : > { %4794 = vst.msk [vmem:[#allocation3 + $0x8c] sm:$0xf] %vm296_vm2, %v8208_v26  ;;  %v4154_v13 = vadd.f32 1.0, %v9128_v5  ;;  %v8699_v36 = vpop.f32.mrf.mxu0  ;;  %v11851_v50 = vcombine.low %v11698_v15, %v11718_v60  ;;  %v11859_v49 = vcombine.low %v11722_v38, %v11768_v57  ;;  %v5760_v59 = vrot.slane %v11835_v54, 1 }
 0x318   : > { %v5600_v58 = vrot.slane %v5598_v2, 1  ;;  %v4301_v42 = vrot.slane %v4259_v11, 1  ;;  %v4380_v12 = vrot.slane %v4259_v11, 7  ;;  %v11854_v43 = vadd.f32 %v11603_v4, %v3970_v27  ;;  %5806 = vrot.lane.b32.xlu0 %v5759_v30, %s9268_s27  ;;  %v11874_v11 = vld [vmem:[#allocation3 + $0x84] sm:$0xf] }
 0x319   : > { %9137 = vrcp.f32 %v4154_v13  ;;  %v3912_v7 = vpop.f32.mrf.mxu0  ;;  %v13262_v13 = vld [vmem:[#allocation21_spill] sm:$0xff] }
 0x31a   : > { %v5601_v61 = vsel %vm1330_vm5, %v5596_v6, %v5600_v58  ;;  %v9130_v16 = vpop.eup %9129  ;;  %v4500_v15 = vsel %vm280_vm0, %v4301_v42, %v4380_v12  ;;  %v7951_v60 = vmul.f32 -1.442695, %v11854_v43  ;;  %v3971_v47 = vadd.f32 %v3912_v7, %v2929_v24 }
 0x31b   : > { %5708 = vrot.lane.b32.xlu1 %v5601_v61, %s9267_s26  ;;  %v8209_v26 = vpack.c.bf16 %v4500_v15, %v4500_v15  ;;  %v4260_v44 = vmul.f32 %v9130_v16, %v11711_v32  ;;  %v8702_v0 = vpop.f32.mrf.mxu0  ;;  %v5761_v42 = vsel %vm1608_vm6, %v5758_v62, %v5760_v59  ;;  %v2936_v36 = vadd.f32 %v11342_v53, %v13262_v13 }
 0x31c   : > { %9139 = vpow2.f32 %v7951_v60  ;;  %v11868_v38 = vadd.f32 %v11603_v4, %v3971_v47  ;;  %v5602_v7 = vshrl.u32 %v11835_v54, 16 }
 0x31d   : > { %v9132_v57 = vpop.eup %9131  ;;  %4795 = vst.msk [vmem:[#allocation3 + $0x90] sm:$0xf] %vm296_vm2, %v8209_v26  ;;  %v4381_v2 = vrot.slane %v4260_v44, 7  ;;  %v4464_v5 = vrot.slane %v4260_v44, 5  ;;  %v3915_v17 = vpop.f32.mrf.mxu0  ;;  %v11876_v24 = vld [vmem:[#allocation3 + $0x88] sm:$0xf] }
 0x31e   : > { %v4155_v32 = vadd.f32 1.0, %v9132_v57  ;;  %v7952_v27 = vmul.f32 -1.442695, %v11868_v38  ;;  %v11882_v30 = vcombine.low %v11874_v11, %v11876_v24  ;;  %v5604_v57 = vor.u32 %v5602_v7, %v5600_v58 }
 0x31f   : > { %5808 = vrot.lane.b32.xlu1 %v5761_v42, %s9268_s27  ;;  %v4382_v6 = vsel %vm280_vm0, %v4380_v12, %v4381_v2  ;;  %v4518_v62 = vsel %vm280_vm0, %v4381_v2, %v4464_v5  ;;  %v8703_v61 = vpop.f32.mrf.mxu0  ;;  %v13263_v5 = vld [vmem:[#allocation16_spill] sm:$0xff]  ;;  %v11912_v7 = vcombine.low %v11770_v40, %v11798_v51  ;;  %v13264_v51 = vld [vmem:[#allocation9_spill] sm:$0xff] }
 0x320   : > { %v4537_v16 = vsel %vm4524_vm12, %v4518_v62, 0.0  ;;  %v8210_v15 = vpack.c.bf16 %v4382_v6, %v4382_v6  ;;  %9141 = vrcp.f32 %v4155_v32  ;;  %v5606_v60 = vshll.u32 %v11882_v30, 16  ;;  %v11897_v6 = vld [vmem:[#allocation3 + $0x8c] sm:$0xf] }
 0x321   : > { %v9134_v47 = vpop.eup %9133  ;;  %v8211_v26 = vpack.c.bf16 %v4537_v16, %v4537_v16  ;;  %9143 = vpow2.f32 %v7952_v27  ;;  %v3919_v44 = vpop.f32.mrf.mxu0  ;;  %v2939_v42 = vadd.f32 %v11351_v29, %v13263_v5  ;;  %v5762_v13 = vrot.slane %v11882_v30, 1 }
 0x322   : > { %v9136_v0 = vpop.eup %9135  ;;  %4796 = vst.msk [vmem:[#allocation3 + $0x94] sm:$0xf] %vm296_vm2, %v8210_v15  ;;  %v4261_v53 = vmul.f32 %v9134_v47, %v11744_v63  ;;  %v3972_v12 = vadd.f32 %v3919_v44, %v2936_v36  ;;  %v5608_v2 = vrot.slane %v5606_v60, 1  ;;  %v11918_v44 = vcombine.low %v11804_v20, %v11824_v22 }
 0x323   : > { %4797 = vst.msk [vmem:[#allocation3 + $0x98] sm:$0xf] %vm296_vm2, %v8211_v26  ;;  %v4156_v17 = vadd.f32 1.0, %v9136_v0  ;;  %v8706_v32 = vpop.f32.mrf.mxu0  ;;  %v2946_v5 = vadd.f32 %v11366_v39, %v13264_v51  ;;  %v5763_v20 = vsel %vm1608_vm6, %v5760_v59, %v5762_v13 }
 0x324   : > { %v4302_v27 = vrot.slane %v4261_v53, 1  ;;  %v4383_v62 = vrot.slane %v4261_v53, 7  ;;  %v11900_v61 = vadd.f32 %v11603_v4, %v3972_v12  ;;  %v5609_v63 = vsel %vm1330_vm5, %v5604_v57, %v5608_v2  ;;  %v11903_v58 = vld [vmem:[#allocation3 + $0x90] sm:$0xf] }
 0x325   : > { %9145 = vrcp.f32 %v4156_v17  ;;  %5710 = vrot.lane.b32.xlu0 %v5609_v63, %s9267_s26  ;;  %v3922_v29 = vpop.f32.mrf.mxu0  ;;  %v11908_v36 = vcombine.low %v11897_v6, %v11903_v58  ;;  %v5610_v57 = vshrl.u32 %v11882_v30, 16 }
 0x326   : > { %v9138_v16 = vpop.eup %9137  ;;  %v4501_v15 = vsel %vm280_vm0, %v4302_v27, %v4383_v62  ;;  %v7953_v60 = vmul.f32 -1.442695, %v11900_v61  ;;  %v3973_v47 = vadd.f32 %v3922_v29, %v2939_v42 }
 0x327   : > { %v5683_v26 = vpop.permute.xlu0 %5682  ;;  %v8212_v0 = vpack.c.bf16 %v4501_v15, %v4501_v15  ;;  %v4262_v53 = vmul.f32 %v9138_v16, %v11758_v31  ;;  %v8707_v12 = vpop.f32.mrf.mxu0  ;;  %v5614_v40 = vshll.u32 %v11908_v36, 16  ;;  %v5612_v27 = vor.u32 %v5610_v57, %v5608_v2 }
 0x328   : > { %9147 = vpow2.f32 %v7953_v60  ;;  %v11926_v17 = vadd.f32 %v11603_v4, %v3973_v47  ;;  %v5831_v15 = vsel %vm1718_vm9, %v11387_v14, %v5683_v26  ;;  %v5764_v59 = vrot.slane %v11908_v36, 1 }
 0x329   : > { %v9140_v22 = vpop.eup %9139  ;;  %4798 = vst.msk [vmem:[#allocation3 + $0x9c] sm:$0xf] %vm296_vm2, %v8212_v0  ;;  %v4384_v31 = vrot.slane %v4262_v53, 7  ;;  %v4465_v42 = vrot.slane %v4262_v53, 5  ;;  %5810 = vrot.lane.b32.xlu0 %v5763_v20, %s9268_s27  ;;  %v3927_v32 = vpop.f32.mrf.mxu0  ;;  %v5616_v39 = vrot.slane %v5614_v40, 1 }
 0x32a   : > { %v11935_v63 = vld [vmem:[#allocation3 + $0x94] sm:$0xf]  ;;  %v4157_v29 = vadd.f32 1.0, %v9140_v22  ;;  %v7954_v16 = vmul.f32 -1.442695, %v11926_v17 }
 0x32b   : > { %v5783_v60 = vpop.permute.xlu0 %5782  ;;  %v11941_v47 = vld [vmem:[#allocation3 + $0x98] sm:$0xf]  ;;  %v4385_v0 = vsel %vm280_vm0, %v4383_v62, %v4384_v31  ;;  %v4519_v53 = vsel %vm280_vm0, %v4384_v31, %v4465_v42  ;;  %v8710_v12 = vpop.f32.mrf.mxu0  ;;  %v5617_v57 = vsel %vm1330_vm5, %v5612_v27, %v5616_v39  ;;  %v5618_v31 = vshrl.u32 %v11908_v36, 16 }
 0x32c   : > { %v5879_v2 = vsel %vm1773_vm10, %v5831_v15, %v5783_v60  ;;  %v4538_v40 = vsel %vm4524_vm12, %v4519_v53, 0.0  ;;  %v8213_v51 = vpack.c.bf16 %v4385_v0, %v4385_v0  ;;  %9149 = vrcp.f32 %v4157_v29  ;;  %5712 = vrot.lane.b32.xlu1 %v5617_v57, %s9267_s26  ;;  %v13265_v15 = vld [vmem:[#allocation17_spill] sm:$0xff] }
 0x32d   : > { %8718 = vmatprep.mubr.msk.bf16.mxu1 %vm2373_vm11, %v5879_v2  ;;  %v11952_v14 = vcombine.low %v11935_v63, %v11941_v47  ;;  %v9142_v62 = vpop.eup %9141  ;;  %v8214_v26 = vpack.c.bf16 %v4538_v40, %v4538_v40  ;;  %9151 = vpow2.f32 %v7954_v16  ;;  %v3929_v22 = vpop.f32.mrf.mxu0  ;;  %v2951_v60 = vadd.f32 %v11376_v35, %v13265_v15 }
 0x32e   : > { %v5685_v20 = vpop.permute.xlu1 %5684  ;;  %v9144_v42 = vpop.eup %9143  ;;  %4799 = vst.msk [vmem:[#allocation3 + $0xa0] sm:$0xf] %vm296_vm2, %v8213_v51  ;;  %v4263_v32 = vmul.f32 %v9142_v62, %v11801_v46  ;;  %v3974_v27 = vadd.f32 %v3929_v22, %v2946_v5  ;;  %v5765_v16 = vsel %vm1608_vm6, %v5762_v13, %v5764_v59  ;;  %v5620_v2 = vor.u32 %v5618_v31, %v5616_v39 }
 0x32f   : > { %v5622_v29 = vshll.u32 %v11952_v14, 16  ;;  %4800 = vst.msk [vmem:[#allocation3 + $0xa4] sm:$0xf] %vm296_vm2, %v8214_v26  ;;  %v4158_v0 = vadd.f32 1.0, %v9144_v42  ;;  %v8711_v53 = vpop.f32.mrf.mxu0  ;;  %v5833_v35 = vsel %vm1718_vm9, %v11407_v18, %v5685_v20  ;;  %v5766_v62 = vrot.slane %v11952_v14, 1 }
 0x330   : > { %v4303_v12 = vrot.slane %v4263_v32, 1  ;;  %v4386_v57 = vrot.slane %v4263_v32, 7  ;;  %v11967_v46 = vadd.f32 %v11603_v4, %v3974_v27  ;;  %5812 = vrot.lane.b32.xlu1 %v5765_v16, %s9268_s27  ;;  %v6248_v13 = vsel %vm2428_vm7, %v11786_v23, 0  ;;  %v11982_v23 = vld [vmem:[#allocation3 + $0x9c] sm:$0xf] }
 0x331   : > { %v5624_v5 = vrot.slane %v5622_v29, 1  ;;  %9153 = vrcp.f32 %v4158_v0  ;;  %v3934_v51 = vpop.f32.mrf.mxu0 }
 0x332   : > { %v5785_v40 = vpop.permute.xlu1 %5784  ;;  %v9146_v39 = vpop.eup %9145  ;;  %v4502_v26 = vsel %vm280_vm0, %v4303_v12, %v4386_v57  ;;  %v7955_v22 = vmul.f32 -1.442695, %v11967_v46  ;;  %v3975_v18 = vadd.f32 %v3934_v51, %v2951_v60  ;;  %v5767_v60 = vsel %vm1608_vm6, %v5764_v59, %v5766_v62 }
 0x333   : > { %v5881_v31 = vsel %vm1773_vm10, %v5833_v35, %v5785_v40  ;;  %v5625_v42 = vsel %vm1330_vm5, %v5620_v2, %v5624_v5  ;;  %v8215_v32 = vpack.c.bf16 %v4502_v26, %v4502_v26  ;;  %v4264_v27 = vmul.f32 %v9146_v39, %v11817_v1  ;;  %v8714_v20 = vpop.f32.mrf.mxu0 }
 0x334   : > { %5714 = vrot.lane.b32.xlu0 %v5625_v42, %s9267_s26  ;;  %8719 = vmatmul.mubr.msk.bf16.vlgmr.msra.gmra.mxu1 %vm2373_vm11, %v5881_v31  ;;  %9155 = vpow2.f32 %v7955_v22  ;;  %v11986_v53 = vadd.f32 %v11603_v4, %v3975_v18  ;;  %v5626_v59 = vshrl.u32 %v11952_v14, 16  ;;  %v12010_v18 = vcombine.low %v11828_v52, %v11874_v11 }
 0x335   : > { %8767 = vmatpush3.bf16.msra.mxu1 %v6248_v13  ;;  %v9148_v29 = vpop.eup %9147  ;;  %4801 = vst.msk [vmem:[#allocation3 + $0xa8] sm:$0xf] %vm296_vm2, %v8215_v32  ;;  %v4387_v15 = vrot.slane %v4264_v27, 7  ;;  %v4466_v0 = vrot.slane %v4264_v27, 5  ;;  %v11988_v16 = vld [vmem:[#allocation3 + $0xa0] sm:$0xf]  ;;  %v3937_v1 = vpop.f32.mrf.mxu0 }
 0x336   : > { %v4159_v2 = vadd.f32 1.0, %v9148_v29  ;;  %v11997_v12 = vcombine.low %v11982_v23, %v11988_v16  ;;  %v7956_v4 = vmul.f32 -1.442695, %v11986_v53  ;;  %v5628_v27 = vor.u32 %v5626_v59, %v5624_v5  ;;  %v12015_v1 = vld [vmem:[#allocation3 + $0xa4] sm:$0xf] }
 0x337   : > { %v4388_v35 = vsel %vm280_vm0, %v4386_v57, %v4387_v15  ;;  %v4520_v40 = vsel %vm280_vm0, %v4387_v15, %v4466_v0  ;;  %v5687_v51 = vpop.permute.xlu0 %5686  ;;  %v8715_v13 = vpop.f32.mrf.mxu0 }
 0x338   : > { %5814 = vrot.lane.b32.xlu0 %v5767_v60, %s9268_s27  ;;  %v4539_v39 = vsel %vm4524_vm12, %v4520_v40, 0.0  ;;  %v8216_v26 = vpack.c.bf16 %v4388_v35, %v4388_v35  ;;  %9157 = vrcp.f32 %v4159_v2  ;;  %v5630_v42 = vshll.u32 %v11997_v12, 16 }
 0x339   : > { %v9150_v22 = vpop.eup %9149  ;;  %v8217_v31 = vpack.c.bf16 %v4539_v39, %v4539_v39  ;;  %9159 = vpow2.f32 %v7956_v4  ;;  %v5835_v29 = vsel %vm1718_vm9, %v11433_v55, %v5687_v51  ;;  %v12019_v2 = vcombine.low %v11876_v24, %v11897_v6 }
 0x33a   : > { %v9152_v57 = vpop.eup %9151  ;;  %4802 = vst.msk [vmem:[#allocation3 + $0xac] sm:$0xf] %vm296_vm2, %v8216_v26  ;;  %v4265_v32 = vmul.f32 %v9150_v22, %v11854_v43  ;;  %v5632_v0 = vrot.slane %v5630_v42, 1  ;;  %v5768_v52 = vrot.slane %v11997_v12, 1  ;;  %v5634_v13 = vshrl.u32 %v11997_v12, 16 }
 0x33b   : > { %4803 = vst.msk [vmem:[#allocation3 + $0xb0] sm:$0xf] %vm296_vm2, %v8217_v31  ;;  %v4160_v20 = vadd.f32 1.0, %v9152_v57  ;;  %v5787_v15 = vpop.permute.xlu0 %5786 }
 0x33c   : > { %v4304_v43 = vrot.slane %v4265_v32, 1  ;;  %v4389_v5 = vrot.slane %v4265_v32, 7  ;;  %v5883_v60 = vsel %vm1773_vm10, %v5835_v29, %v5787_v15  ;;  %v12023_v11 = vld [vmem:[#allocation3 + $0xa8] sm:$0xf]  ;;  %v5633_v35 = vsel %vm1330_vm5, %v5628_v27, %v5632_v0 }
 0x33d   : > { %9161 = vrcp.f32 %v4160_v20  ;;  %8722 = vmatprep.mubr.msk.bf16.mxu1 %vm2373_vm11, %v5883_v60  ;;  %v12029_v55 = vcombine.low %v12015_v1, %v12023_v11  ;;  %5716 = vrot.lane.b32.xlu1 %v5633_v35, %s9267_s26  ;;  %v5769_v26 = vsel %vm1608_vm6, %v5766_v62, %v5768_v52  ;;  %v5636_v42 = vor.u32 %v5634_v13, %v5632_v0  ;;  %v13266_v20 = vld [vmem:[#allocation18_spill] sm:$0xff] }
 0x33e   : > { %v9154_v40 = vpop.eup %9153  ;;  %v4503_v24 = vsel %vm280_vm0, %v4304_v43, %v4389_v5  ;;  %v5689_v6 = vpop.permute.xlu1 %5688 }
 0x33f   : > { %v8218_v4 = vpack.c.bf16 %v4503_v24, %v4503_v24  ;;  %v4266_v51 = vmul.f32 %v9154_v40, %v11868_v38  ;;  %v5638_v39 = vshll.u32 %v12029_v55, 16  ;;  %v5837_v38 = vsel %vm1718_vm9, %v13266_v20, %v5689_v6 }
 0x340   : > { %v5770_v15 = vrot.slane %v12029_v55, 1 }
 0x341   : > { %v9156_v59 = vpop.eup %9155  ;;  %4804 = vst.msk [vmem:[#allocation3 + $0xb4] sm:$0xf] %vm296_vm2, %v8218_v4  ;;  %v4390_v22 = vrot.slane %v4266_v51, 7  ;;  %v4467_v31 = vrot.slane %v4266_v51, 5  ;;  %v5640_v57 = vrot.slane %v5638_v39, 1  ;;  %5816 = vrot.lane.b32.xlu1 %v5769_v26, %s9268_s27  ;;  %v5642_v26 = vshrl.u32 %v12029_v55, 16 }
 0x342   : > { %v4876_v32 = vld [vmem:[#allocation3 + $0xac] sm:$0xf]  ;;  %v4161_v27 = vadd.f32 1.0, %v9156_v59  ;;  %v5789_v29 = vpop.permute.xlu1 %5788  ;;  %v12044_v43 = vld [vmem:[#allocation3 + $0xb0] sm:$0xf] }
 0x343   : > { %v4391_v62 = vsel %vm280_vm0, %v4389_v5, %v4390_v22  ;;  %v4521_v60 = vsel %vm280_vm0, %v4390_v22, %v4467_v31  ;;  %v5885_v35 = vsel %vm1773_vm10, %v5837_v38, %v5789_v29  ;;  %v5641_v0 = vsel %vm1330_vm5, %v5636_v42, %v5640_v57  ;;  %v13267_v31 = vld [vmem:[#allocation4_spill] sm:$0xff] }
 0x344   : > { %v4540_v40 = vsel %vm4524_vm12, %v4521_v60, 0.0  ;;  %v8219_v24 = vpack.c.bf16 %v4391_v62, %v4391_v62  ;;  %9163 = vrcp.f32 %v4161_v27  ;;  %5718 = vrot.lane.b32.xlu0 %v5641_v0, %s9267_s26  ;;  %8723 = vmatmul.mubr.msk.bf16.gmra.mxu1 %vm2373_vm11, %v5885_v35  ;;  %v12054_v4 = vcombine.low %v4876_v32, %v12044_v43 }
 0x345   : > { %v5691_v6 = vpop.permute.xlu0 %5690  ;;  %v9158_v51 = vpop.eup %9157  ;;  %v8220_v5 = vpack.c.bf16 %v4540_v40, %v4540_v40  ;;  %v5771_v27 = vsel %vm1608_vm6, %v5768_v52, %v5770_v15  ;;  %v5644_v62 = vor.u32 %v5642_v26, %v5640_v57  ;;  %v12068_v35 = vcombine.low %v11903_v58, %v11935_v63 }
 0x346   : > { %v9160_v13 = vpop.eup %9159  ;;  %4805 = vst.msk [vmem:[#allocation3 + $0xb8] sm:$0xf] %vm296_vm2, %v8219_v24  ;;  %v4267_v39 = vmul.f32 %v9158_v51, %v11900_v61  ;;  %v5646_v59 = vshll.u32 %v12054_v4, 16  ;;  %v5839_v42 = vsel %vm1718_vm9, %v13267_v31, %v5691_v6  ;;  %v5772_v52 = vrot.slane %v12054_v4, 1 }
 0x347   : > { %4806 = vst.msk [vmem:[#allocation3 + $0xbc] sm:$0xf] %vm296_vm2, %v8220_v5  ;;  %v4162_v22 = vadd.f32 1.0, %v9160_v13  ;;  %v12076_v57 = vcombine.low %v11941_v47, %v11982_v23  ;;  %v12090_v47 = vcombine.low %v12023_v11, %v4876_v32  ;;  %v12103_v32 = vld [vmem:[#allocation3 + $0x4] sm:$0xf] }
 0x348   : > { %v4305_v20 = vrot.slane %v4267_v39, 1  ;;  %v4392_v38 = vrot.slane %v4267_v39, 7  ;;  %5818 = vrot.lane.b32.xlu0 %v5771_v27, %s9268_s27  ;;  %v5648_v60 = vrot.slane %v5646_v59, 1  ;;  %v12081_v5 = vld [vmem:[#allocation3 + $0xb4] sm:$0xf]  ;;  %v12087_v39 = vcombine.low %v11988_v16, %v12015_v1 }
 0x349   : > { %v5791_v29 = vpop.permute.xlu0 %5790  ;;  %9165 = vrcp.f32 %v4162_v22  ;;  %v5773_v23 = vsel %vm1608_vm6, %v5770_v15, %v5772_v52  ;;  %v5650_v1 = vshrl.u32 %v12054_v4, 16 }
 0x34a   : > { %v5887_v61 = vsel %vm1773_vm10, %v5839_v42, %v5791_v29  ;;  %v9162_v0 = vpop.eup %9161  ;;  %v4504_v40 = vsel %vm280_vm0, %v4305_v20, %v4392_v38  ;;  %v5649_v24 = vsel %vm1330_vm5, %v5644_v62, %v5648_v60  ;;  %v4833_v29 = vld [vmem:[#allocation3] sm:$0xf] }
 0x34b   : > { %8726 = vmatprep.mubr.msk.bf16.mxu1 %vm2373_vm11, %v5887_v61  ;;  %v8221_v6 = vpack.c.bf16 %v4504_v40, %v4504_v40  ;;  %v4268_v51 = vmul.f32 %v9162_v0, %v11926_v17  ;;  %5720 = vrot.lane.b32.xlu1 %v5649_v24, %s9267_s26  ;;  %v5652_v20 = vor.u32 %v5650_v1, %v5648_v60  ;;  %v4835_v1 = vld [vmem:[#allocation3 + $0x8] sm:$0xf] }
 0x34c   : > { %v12112_v24 = vcombine.low %v4833_v29, %v12103_v32 }
 0x34d   : > { %4807 = vst.msk [vmem:[#allocation3 + $0xc0] sm:$0xf] %vm296_vm2, %v8221_v6  ;;  %v4393_v58 = vrot.slane %v4268_v51, 7  ;;  %v4468_v63 = vrot.slane %v4268_v51, 5  ;;  %v12083_v13 = vld [vmem:[#allocation3 + $0xb8] sm:$0xf] }
 0x34e   : > { %v12095_v17 = vcombine.low %v12081_v5, %v12083_v13  ;;  %v4880_v40 = vld [vmem:[#allocation3 + $0xbc] sm:$0xf] }
 0x34f   : > { %v4394_v26 = vsel %vm280_vm0, %v4392_v38, %v4393_v58  ;;  %v4522_v59 = vsel %vm280_vm0, %v4393_v58, %v4468_v63  ;;  %5820 = vrot.lane.b32.xlu1 %v5773_v23, %s9268_s27  ;;  %v5693_v22 = vpop.permute.xlu1 %5692 }
 0x350   : > { %v4541_v31 = vsel %vm4524_vm12, %v4522_v59, 0.0  ;;  %v8222_v16 = vpack.c.bf16 %v4394_v26, %v4394_v26  ;;  %v5654_v11 = vshll.u32 %v12095_v17, 16  ;;  %v5841_v62 = vsel %vm1718_vm9, %v11522_v3, %v5693_v22 }
 0x351   : > { %v9164_v15 = vpop.eup %9163  ;;  %v8223_v42 = vpack.c.bf16 %v4541_v31, %v4541_v31  ;;  %v5774_v0 = vrot.slane %v12095_v17, 1  ;;  %v5658_v31 = vshrl.u32 %v12095_v17, 16 }
 0x352   : > { %4808 = vst.msk [vmem:[#allocation3 + $0xc4] sm:$0xf] %vm296_vm2, %v8222_v16  ;;  %v4269_v27 = vmul.f32 %v9164_v15, %v11967_v46  ;;  %v5656_v38 = vrot.slane %v5654_v11, 1  ;;  %v4827_v11 = vld [vmem:[#allocation3 + $0xb4] sm:$0xf] }
 0x353   : > { %4809 = vst.msk [vmem:[#allocation3 + $0xc8] sm:$0xf] %vm296_vm2, %v8223_v42  ;;  %v5793_v61 = vpop.permute.xlu1 %5792  ;;  %v5775_v15 = vsel %vm1608_vm6, %v5772_v52, %v5774_v0  ;;  %v5009_v42 = vshll.u32 %v12112_v24, 16  ;;  %v9242_v52 = vld [vmem:[#allocation3 + $0xc] sm:$0xf] }
 0x354   : > { %v4306_v6 = vrot.slane %v4269_v27, 1  ;;  %v4395_v51 = vrot.slane %v4269_v27, 7  ;;  %v5889_v58 = vsel %vm1773_vm10, %v5841_v62, %v5793_v61  ;;  %v5657_v46 = vsel %vm1330_vm5, %v5652_v20, %v5656_v38  ;;  %v5448_v60 = vld [vmem:[#allocation3 + $0xc0] sm:$0xf] }
 0x355   : > { %5722 = vrot.lane.b32.xlu0 %v5657_v46, %s9267_s26  ;;  %8727 = vmatmul.mubr.msk.bf16.gmra.mxu1 %vm2373_vm11, %v5889_v58  ;;  %v12118_v63 = vcombine.low %v4880_v40, %v5448_v60  ;;  %v5660_v29 = vor.u32 %v5658_v31, %v5656_v38  ;;  %v12134_v46 = vcombine.low %v4835_v1, %v9242_v52  ;;  %v5007_v52 = vshrl.u32 %v12112_v24, 16 }
 0x356   : > { %v9166_v3 = vpop.eup %9165  ;;  %v4505_v23 = vsel %vm280_vm0, %v4306_v6, %v4395_v51  ;;  %v5695_v26 = vpop.permute.xlu0 %5694 }
 0x357   : > { %v8224_v59 = vpack.c.bf16 %v4505_v23, %v4505_v23  ;;  %v4270_v22 = vmul.f32 %v9166_v3, %v11986_v53  ;;  %v5662_v16 = vshll.u32 %v12118_v63, 16  ;;  %v5843_v53 = vsel %vm1718_vm9, %v11566_v19, %v5695_v26 }
 0x358   : > { %v5776_v6 = vrot.slane %v12118_v63, 1  ;;  %v5666_v26 = vshrl.u32 %v12118_v63, 16 }
 0x359   : > { %4810 = vst.msk [vmem:[#allocation3 + $0xcc] sm:$0xf] %vm296_vm2, %v8224_v59  ;;  %v4396_v27 = vrot.slane %v4270_v22, 7  ;;  %v4469_v20 = vrot.slane %v4270_v22, 5  ;;  %5822 = vrot.lane.b32.xlu0 %v5775_v15, %s9268_s27  ;;  %v5664_v62 = vrot.slane %v5662_v16, 1  ;;  %v12148_v15 = vcombine.low %v12044_v43, %v12081_v5 }
 0x35a   : > { %4830 = vst.msk [vmem:[#allocation3 + $0xcc] sm:$0xf] %vm296_vm2, %v4827_v11  ;;  %v5795_v61 = vpop.permute.xlu0 %5794  ;;  %v12132_v58 = vld [vmem:[#allocation3 + $0xc4] sm:$0xff]  }
 0x35b   : > { %v4397_v60 = vsel %vm280_vm0, %v4395_v51, %v4396_v27  ;;  %v4523_v3 = vsel %vm280_vm0, %v4396_v27, %v4469_v20  ;;  %v5891_v38 = vsel %vm1773_vm10, %v5843_v53, %v5795_v61  ;;  %v5665_v23 = vsel %vm1330_vm5, %v5660_v29, %v5664_v62  ;;  %v4828_v51 = vld [vmem:[#allocation3 + $0xb8] sm:$0xf]  ;;  %v4829_v20 = vld [vmem:[#allocation3 + $0xbc] sm:$0xf] }
 0x35c   : > { %v4542_v59 = vsel %vm4524_vm12, %v4523_v3, 0.0  ;;  %v8225_v22 = vpack.c.bf16 %v4397_v60, %v4397_v60  ;;  %5724 = vrot.lane.b32.xlu1 %v5665_v23, %s9267_s26  ;;  %8730 = vmatprep.mubr.msk.bf16.mxu1 %vm2373_vm11, %v5891_v38  ;;  %v5670_v31 = vshll.u32 %v12132_v58, 16  ;;  %v5668_v1 = vor.u32 %v5666_v26, %v5664_v62  ;;  %v4882_v3 = vld [vmem:[#allocation3] sm:$0xe]  ;;  %v13268_v26 = vld [vmem:[#allocation10_spill] sm:$0xff] }
 0x35d   : > { %v5697_v19 = vpop.permute.xlu1 %5696  ;;  %v8226_v16 = vpack.c.bf16 %v4542_v59, %v4542_v59  ;;  %v12151_v27 = vcombine.low %v12083_v13, %v4880_v40  ;;  %v5777_v29 = vsel %vm1608_vm6, %v5774_v0, %v5776_v6  ;;  %v5014_v53 = vshll.u32 %v12134_v46, 16 }
 0x35e   : > { %4811 = vst.msk [vmem:[#allocation3 + $0xd0] sm:$0xf] %vm296_vm2, %v8225_v22  ;;  %v5672_v11 = vrot.slane %v5670_v31, 1  ;;  %v5845_v62 = vsel %vm1718_vm9, %v11589_v56, %v5697_v19  ;;  %v5778_v5 = vrot.slane %v12132_v58, 1  ;;  %v5011_v13 = vrot.slane %v5009_v42, 1 }
 0x35f   : > { %4812 = vst.msk [vmem:[#allocation3 + $0xd4] sm:$0xf] %vm296_vm2, %v8226_v16  ;;  %4831 = vst.msk [vmem:[#allocation3 + $0xd0] sm:$0xf] %vm296_vm2, %v4828_v51  ;;  %v5674_v60 = vshrl.u32 %v12132_v58, 16  ;;  %v5016_v59 = vrot.slane %v5014_v53, 1  ;;  %v8036_v22 = vcombine.low %v4882_v3, %v12103_v32 }
 0x360   : > { %4832 = vst.msk [vmem:[#allocation3 + $0xd4] sm:$0xf] %vm296_vm2, %v4829_v20  ;;  %5824 = vrot.lane.b32.xlu1 %v5777_v29, %s9268_s27  ;;  %v5673_v43 = vsel %vm1330_vm5, %v5668_v1, %v5672_v11  ;;  %v5779_v38 = vsel %vm1608_vm6, %v5776_v6, %v5778_v5  ;;  %v5012_v23 = vor.u32 %v5011_v13, %v5007_v52  ;;  %v5022_v31 = vshll.u32 %v13268_v26, 16  ;;  %v13269_v53 = vld [vmem:[#allocation23_spill] sm:$0xff]  ;;  %v12180_v32 = vld [vmem:[%s13150_s2 + $0x10] sm:$0x3f]  }
 0x361   : > { %v5797_v61 = vpop.permute.xlu1 %5796  ;;  %5726 = vrot.lane.b32.xlu0 %v5673_v43, %s9267_s26  ;;  %v8988_v0 = vld [vmem:[#allocation3 + $0xcc] ss:$0 sps:$4 sm:$0x11]   ;;  %v5676_v42 = vor.u32 %v5674_v60, %v5672_v11  ;;  %v5253_v29 = vrot.slane %v8036_v22, 1  ;;  %v5254_v6 = vrot.slane %v12134_v46, 1  ;;  %v5018_v11 = vshrl.u32 %v12134_v46, 16  ;;  %8870 = vmatprep.subr.msk.bf16.mxu1 %vm2428_vm7, %v12180_v32 }
 0x362   : > { %v5893_v40 = vsel %vm1773_vm10, %v5845_v62, %v5797_v61  ;;  %v5678_v56 = vshll.u32 %v8988_v0, 16  ;;  %v5780_v1 = vrot.slane %v8988_v0, 1  ;;  %v5017_v20 = vsel %vm1330_vm5, %v5012_v23, %v5016_v59 }
 0x363   : > { %8731 = vmatmul.mubr.msk.bf16.gmra.mxu1 %vm2373_vm11, %v5893_v40  ;;  %v5030_v62 = vshll.u32 %v13269_v53, 16  ;;  %v5024_v61 = vrot.slane %v5022_v31, 1  ;;  %v5020_v0 = vor.u32 %v5018_v11, %v5016_v59  ;;  %v5255_v60 = vsel %vm1608_vm6, %v5253_v29, %v5254_v6 }
 0x364   : > { %v5680_v19 = vrot.slane %v5678_v56, 1  ;;  %v5781_v40 = vsel %vm1608_vm6, %v5778_v5, %v5780_v1  ;;  %v5026_v56 = vshrl.u32 %v13268_v26, 16  ;;  %v5258_v22 = vrot.slane %v13269_v53, 1 }
 0x365   : > { %5826 = vrot.lane.b32.xlu0 %v5779_v38, %s9268_s27  ;;  %v5032_v3 = vrot.slane %v5030_v62, 1  ;;  %v5025_v5 = vsel %vm1330_vm5, %v5020_v0, %v5024_v61  ;;  %v5034_v29 = vshrl.u32 %v13269_v53, 16  ;;  %v5260_v0 = vrot.slane %v11536_v45, 1 }
 0x366   : > { %v5681_v51 = vsel %vm1330_vm5, %v5676_v42, %v5680_v19  ;;  %v5028_v23 = vor.u32 %v5026_v56, %v5024_v61  ;;  %v5046_v42 = vshll.u32 %v11548_v34, 16  ;;  %v5256_v19 = vrot.slane %v13268_v26, 1 }
 0x367   : > { %v5699_v16 = vpop.permute.xlu0 %5698  ;;  %5728 = vrot.lane.b32.xlu1 %v5681_v51, %s9267_s26  ;;  %v5042_v61 = vshrl.u32 %v11536_v45, 16 }
 0x368   : > { %v5847_v43 = vsel %vm1718_vm9, %v11632_v41, %v5699_v16  ;;  %v5038_v41 = vshll.u32 %v11536_v45, 16  ;;  %v5033_v59 = vsel %vm1330_vm5, %v5028_v23, %v5032_v3  ;;  %v5259_v11 = vsel %vm1608_vm6, %v5256_v19, %v5258_v22 }
 0x369   : > { %5202 = vrot.lane.b32.xlu0 %v5017_v20, %s9267_s26  ;;  %v5257_v20 = vsel %vm1608_vm6, %v5254_v6, %v5256_v19  ;;  %v5062_v23 = vshll.u32 %v11614_v48, 16 }
 0x36a   : > { %v5040_v51 = vrot.slane %v5038_v41, 1 }
 0x36b   : > { %v5799_v13 = vpop.permute.xlu0 %5798  ;;  %5828 = vrot.lane.b32.xlu1 %v5781_v40, %s9268_s27  ;;  %v5054_v40 = vshll.u32 %v11595_v10, 16  ;;  %v5064_v19 = vrot.slane %v5062_v23, 1 }
 0x36c   : > { %v5895_v52 = vsel %vm1773_vm10, %v5847_v43, %v5799_v13  ;;  %v5048_v43 = vrot.slane %v5046_v42, 1  ;;  %v5044_v13 = vor.u32 %v5042_v61, %v5040_v51  ;;  %v5058_v42 = vshrl.u32 %v11595_v10, 16 }
 0x36d   : > { %8734 = vmatprep.mubr.msk.bf16.mxu1 %vm2373_vm11, %v5895_v52  ;;  %5302 = vrot.lane.b32.xlu0 %v5255_v60, %s9268_s27  ;;  %v5056_v41 = vrot.slane %v5054_v40, 1  ;;  %v5066_v40 = vshrl.u32 %v11614_v48, 16 }
 0x36e   : > { %v5701_v38 = vpop.permute.xlu1 %5700  ;;  %v5049_v56 = vsel %vm1330_vm5, %v5044_v13, %v5048_v43 }
 0x36f   : > { %5204 = vrot.lane.b32.xlu1 %v5025_v5, %s9267_s26  ;;  %v5849_v31 = vsel %vm1718_vm9, %v11675_v37, %v5701_v38  ;;  %v5036_v37 = vor.u32 %v5034_v29, %v5032_v3  ;;  %v5262_v38 = vrot.slane %v11548_v34, 1  ;;  %v5261_v5 = vsel %vm1608_vm6, %v5258_v22, %v5260_v0 }
 0x370   : > { %v5264_v22 = vrot.slane %v11595_v10, 1 }
 0x371   : > { %5206 = vrot.lane.b32.xlu0 %v5033_v59, %s9267_s26  ;;  %v5041_v6 = vsel %vm1330_vm5, %v5036_v37, %v5040_v51  ;;  %v5263_v59 = vsel %vm1608_vm6, %v5260_v0, %v5262_v38  ;;  %v5070_v51 = vshll.u32 %v11625_v8, 16 }
 0x372   : > { %v5801_v16 = vpop.permute.xlu1 %5800  ;;  %v5265_v13 = vsel %vm1608_vm6, %v5262_v38, %v5264_v22  ;;  %v5086_v38 = vshll.u32 %v11755_v9, 16 }
 0x373   : > { %v5897_v1 = vsel %vm1773_vm10, %v5849_v31, %v5801_v16  ;;  %5304 = vrot.lane.b32.xlu1 %v5257_v20, %s9268_s27  ;;  %v5060_v16 = vor.u32 %v5058_v42, %v5056_v41  ;;  %v5072_v61 = vrot.slane %v5070_v51, 1  ;;  %v13270_v42 = vld [vmem:[#allocation20_spill] sm:$0xff] }
 0x374   : > { %8735 = vmatmul.mubr.msk.bf16.gmra.mxu1 %vm2373_vm11, %v5897_v1 }
 0x375   : > { %v5703_v62 = vpop.permute.xlu0 %5702  ;;  %5306 = vrot.lane.b32.xlu0 %v5259_v11, %s9268_s27  ;;  %v5065_v29 = vsel %vm1330_vm5, %v5060_v16, %v5064_v19  ;;  %v5078_v11 = vshll.u32 %v11682_v33, 16  ;;  %v5088_v16 = vrot.slane %v5086_v38, 1 }
 0x376   : > { %v5851_v52 = vsel %vm1718_vm9, %v11703_v21, %v5703_v62  ;;  %v5050_v21 = vshrl.u32 %v11548_v34, 16  ;;  %v5266_v62 = vrot.slane %v11614_v48, 1 }
 0x377   : > { %5208 = vrot.lane.b32.xlu1 %v5041_v6, %s9267_s26 }
 0x378   : > { %v5052_v31 = vor.u32 %v5050_v21, %v5048_v43  ;;  %v5267_v0 = vsel %vm1608_vm6, %v5264_v22, %v5266_v62  ;;  %v5270_v21 = vrot.slane %v11682_v33, 1 }
 0x379   : > { %v5803_v60 = vpop.permute.xlu0 %5802  ;;  %5210 = vrot.lane.b32.xlu0 %v5049_v56, %s9267_s26  ;;  %v5068_v56 = vor.u32 %v5066_v40, %v5064_v19  ;;  %v5272_v40 = vrot.slane %v11755_v9, 1 }
 0x37a   : > { %v5899_v3 = vsel %vm1773_vm10, %v5851_v52, %v5803_v60  ;;  %v5057_v20 = vsel %vm1330_vm5, %v5052_v31, %v5056_v41  ;;  %v5074_v52 = vshrl.u32 %v11625_v8, 16  ;;  %v5080_v60 = vrot.slane %v5078_v11, 1 }
 0x37b   : > { %8738 = vmatprep.mubr.msk.bf16.mxu1 %vm2373_vm11, %v5899_v3  ;;  %5308 = vrot.lane.b32.xlu1 %v5261_v5, %s9268_s27  ;;  %v5073_v3 = vsel %vm1330_vm5, %v5068_v56, %v5072_v61  ;;  %v5268_v41 = vrot.slane %v11625_v8, 1  ;;  %v5090_v11 = vshrl.u32 %v11755_v9, 16 }
 0x37c   : > { %v5076_v23 = vor.u32 %v5074_v52, %v5072_v61 }
 0x37d   : > { %5310 = vrot.lane.b32.xlu0 %v5263_v59, %s9268_s27  ;;  %v5094_v59 = vshll.u32 %v11762_v25, 16 }
 0x37e   : > { %v5081_v5 = vsel %vm1330_vm5, %v5076_v23, %v5080_v60  ;;  %v5110_v23 = vshll.u32 %v11859_v49, 16 }
 0x37f   : > { %v5705_v1 = vpop.permute.xlu1 %5704  ;;  %5212 = vrot.lane.b32.xlu1 %v5057_v20, %s9267_s26  ;;  %v5082_v20 = vshrl.u32 %v11682_v33, 16  ;;  %v5096_v61 = vrot.slane %v5094_v59, 1  ;;  %v5106_v59 = vshrl.u32 %v11851_v50, 16 }
 0x380   : > { %v5853_v43 = vsel %vm1718_vm9, %v11729_v28, %v5705_v1  ;;  %v5269_v1 = vsel %vm1608_vm6, %v5266_v62, %v5268_v41 }
 0x381   : > { %5214 = vrot.lane.b32.xlu0 %v5065_v29, %s9267_s26  ;;  %v5271_v29 = vsel %vm1608_vm6, %v5268_v41, %v5270_v21  ;;  %v5098_v41 = vshrl.u32 %v11762_v25, 16 }
 0x383   : > { %v5805_v37 = vpop.permute.xlu1 %5804  ;;  %5312 = vrot.lane.b32.xlu1 %v5265_v13, %s9268_s27  ;;  %v5102_v13 = vshll.u32 %v11851_v50, 16 }
 0x384   : > { %v5901_v6 = vsel %vm1773_vm10, %v5853_v43, %v5805_v37  ;;  %v5084_v43 = vor.u32 %v5082_v20, %v5080_v60  ;;  %v5092_v37 = vor.u32 %v5090_v11, %v5088_v16 }
 0x385   : > { %8739 = vmatmul.mubr.msk.bf16.gmra.mxu1 %vm2373_vm11, %v5901_v6  ;;  %5314 = vrot.lane.b32.xlu0 %v5267_v0, %s9268_s27  ;;  %v13271_v6 = vld [vmem:[#allocation5_spill] sm:$0xff]  ;;  %v5104_v38 = vrot.slane %v5102_v13, 1  ;;  %v5114_v13 = vshrl.u32 %v11859_v49, 16 }
 0x386   : > { %v5707_v28 = vpop.permute.xlu0 %5706  ;;  %v5089_v62 = vsel %vm1330_vm5, %v5084_v43, %v5088_v16  ;;  %v5097_v56 = vsel %vm1330_vm5, %v5092_v37, %v5096_v61  ;;  %v5118_v16 = vshll.u32 %v11912_v7, 16 }
 0x387   : > { %5216 = vrot.lane.b32.xlu1 %v5073_v3, %s9267_s26  ;;  %v5855_v19 = vsel %vm1718_vm9, %v13270_v42, %v5707_v28  ;;  %v5274_v28 = vrot.slane %v11762_v25, 1  ;;  %v5273_v3 = vsel %vm1608_vm6, %v5270_v21, %v5272_v40  ;;  %v5112_v42 = vrot.slane %v5110_v23, 1 }
 0x388   : > { %v5276_v21 = vrot.slane %v11851_v50, 1  ;;  %v5120_v11 = vrot.slane %v5118_v16, 1  ;;  %v5130_v16 = vshrl.u32 %v11918_v44, 16 }
 0x389   : > { %5218 = vrot.lane.b32.xlu0 %v5081_v5, %s9267_s26  ;;  %v5275_v5 = vsel %vm1608_vm6, %v5272_v40, %v5274_v28 }
 0x38a   : > { %v5807_v31 = vpop.permute.xlu0 %5806  ;;  %v5277_v37 = vsel %vm1608_vm6, %v5274_v28, %v5276_v21  ;;  %v5134_v28 = vshll.u32 %v12010_v18, 16 }
 0x38b   : > { %v5903_v51 = vsel %vm1773_vm10, %v5855_v19, %v5807_v31  ;;  %5316 = vrot.lane.b32.xlu1 %v5269_v1, %s9268_s27  ;;  %v5100_v19 = vor.u32 %v5098_v41, %v5096_v61  ;;  %v5108_v31 = vor.u32 %v5106_v59, %v5104_v38  ;;  %v5142_v41 = vshll.u32 %v12019_v2, 16 }
 0x38c   : > { %8742 = vmatprep.mubr.msk.bf16.mxu1 %vm2373_vm11, %v5903_v51 }
 0x38d   : > { %v5709_v22 = vpop.permute.xlu1 %5708  ;;  %5318 = vrot.lane.b32.xlu0 %v5271_v29, %s9268_s27  ;;  %v5105_v1 = vsel %vm1330_vm5, %v5100_v19, %v5104_v38  ;;  %v5113_v20 = vsel %vm1330_vm5, %v5108_v31, %v5112_v42  ;;  %v5126_v29 = vshll.u32 %v11918_v44, 16 }
 0x38e   : > { %v5857_v0 = vsel %vm1718_vm9, %v13271_v6, %v5709_v22  ;;  %v5278_v22 = vrot.slane %v11859_v49, 1  ;;  %v5122_v6 = vshrl.u32 %v11912_v7, 16 }
 0x38f   : > { %5220 = vrot.lane.b32.xlu1 %v5089_v62, %s9267_s26 }
 0x390   : > { %v5279_v40 = vsel %vm1608_vm6, %v5276_v21, %v5278_v22  ;;  %v5144_v21 = vrot.slane %v5142_v41, 1 }
 0x391   : > { %v5809_v52 = vpop.permute.xlu1 %5808  ;;  %5222 = vrot.lane.b32.xlu0 %v5097_v56, %s9267_s26  ;;  %v5124_v56 = vor.u32 %v5122_v6, %v5120_v11 }
 0x392   : > { %v5905_v60 = vsel %vm1773_vm10, %v5857_v0, %v5809_v52  ;;  %v5128_v0 = vrot.slane %v5126_v29, 1  ;;  %v5116_v52 = vor.u32 %v5114_v13, %v5112_v42  ;;  %v5136_v42 = vrot.slane %v5134_v28, 1 }
 0x393   : > { %8743 = vmatmul.mubr.msk.bf16.gmra.mxu1 %vm2373_vm11, %v5905_v60  ;;  %5320 = vrot.lane.b32.xlu1 %v5273_v3, %s9268_s27  ;;  %v5280_v60 = vrot.slane %v11912_v7, 1  ;;  %v5282_v3 = vrot.slane %v11918_v44, 1  ;;  %v5158_v13 = vshll.u32 %v12076_v57, 16  ;;  %v5154_v28 = vshrl.u32 %v12068_v35, 16 }
 0x394   : > { %v5121_v23 = vsel %vm1330_vm5, %v5116_v52, %v5120_v11  ;;  %v5129_v38 = vsel %vm1330_vm5, %v5124_v56, %v5128_v0  ;;  %v5150_v11 = vshll.u32 %v12068_v35, 16 }
 0x395   : > { %5322 = vrot.lane.b32.xlu0 %v5275_v5, %s9268_s27  ;;  %v5281_v31 = vsel %vm1608_vm6, %v5278_v22, %v5280_v60 }
 0x397   : > { %v5711_v51 = vpop.permute.xlu0 %5710  ;;  %5224 = vrot.lane.b32.xlu1 %v5105_v1, %s9267_s26  ;;  %v5138_v1 = vshrl.u32 %v12010_v18, 16 }
 0x398   : > { %v5859_v61 = vsel %vm1718_vm9, %v11835_v54, %v5711_v51  ;;  %v5283_v51 = vsel %vm1608_vm6, %v5280_v60, %v5282_v3 }
 0x399   : > { %5226 = vrot.lane.b32.xlu0 %v5113_v20, %s9267_s26  ;;  %v5140_v29 = vor.u32 %v5138_v1, %v5136_v42 }
 0x39b   : > { %v5811_v43 = vpop.permute.xlu0 %5810  ;;  %5324 = vrot.lane.b32.xlu1 %v5277_v37, %s9268_s27  ;;  %v5286_v37 = vrot.slane %v12019_v2, 1 }
 0x39c   : > { %v5907_v62 = vsel %vm1773_vm10, %v5859_v61, %v5811_v43  ;;  %v5284_v61 = vrot.slane %v12010_v18, 1  ;;  %v5145_v43 = vsel %vm1330_vm5, %v5140_v29, %v5144_v21 }
 0x39d   : > { %8746 = vmatprep.mubr.msk.bf16.mxu1 %vm2373_vm11, %v5907_v62  ;;  %5326 = vrot.lane.b32.xlu0 %v5279_v40, %s9268_s27 }
 0x39e   : > { %v5713_v54 = vpop.permute.xlu1 %5712  ;;  %v5285_v52 = vsel %vm1608_vm6, %v5282_v3, %v5284_v61  ;;  %v5287_v56 = vsel %vm1608_vm6, %v5284_v61, %v5286_v37 }
 0x39f   : > { %5228 = vrot.lane.b32.xlu1 %v5121_v23, %s9267_s26  ;;  %v5861_v5 = vsel %vm1718_vm9, %v11882_v30, %v5713_v54  ;;  %v5132_v30 = vor.u32 %v5130_v16, %v5128_v0  ;;  %v5152_v0 = vrot.slane %v5150_v11, 1  ;;  %v5146_v54 = vshrl.u32 %v12019_v2, 16 }
 0x3a0   : > { %v5160_v23 = vrot.slane %v5158_v13, 1  ;;  %v5292_v13 = vrot.slane %v12087_v39, 1 }
 0x3a1   : > { %5230 = vrot.lane.b32.xlu0 %v5129_v38, %s9267_s26  ;;  %v5137_v22 = vsel %vm1330_vm5, %v5132_v30, %v5136_v42  ;;  %v5156_v60 = vor.u32 %v5154_v28, %v5152_v0  ;;  %v5166_v38 = vshll.u32 %v12087_v39, 16  ;;  %v5290_v42 = vrot.slane %v12076_v57, 1 }
 0x3a2   : > { %v5813_v59 = vpop.permute.xlu1 %5812  ;;  %v5170_v30 = vshrl.u32 %v12087_v39, 16 }
 0x3a3   : > { %v5909_v19 = vsel %vm1773_vm10, %v5861_v5, %v5813_v59  ;;  %5328 = vrot.lane.b32.xlu1 %v5281_v31, %s9268_s27  ;;  %v5288_v5 = vrot.slane %v12068_v35, 1  ;;  %v5161_v59 = vsel %vm1330_vm5, %v5156_v60, %v5160_v23  ;;  %v5168_v31 = vrot.slane %v5166_v38, 1 }
 0x3a4   : > { %8747 = vmatmul.mubr.msk.bf16.gmra.mxu1 %vm2373_vm11, %v5909_v19  ;;  %v5174_v19 = vshll.u32 %v12090_v47, 16  ;;  %v5293_v60 = vsel %vm1608_vm6, %v5290_v42, %v5292_v13  ;;  %v5178_v38 = vshrl.u32 %v12090_v47, 16 }
 0x3a5   : > { %5330 = vrot.lane.b32.xlu0 %v5283_v51, %s9268_s27  ;;  %v5289_v16 = vsel %vm1608_vm6, %v5286_v37, %v5288_v5  ;;  %v5162_v51 = vshrl.u32 %v12076_v57, 16  ;;  %v5182_v37 = vshll.u32 %v12148_v15, 16 }
 0x3a6   : > { %v5715_v20 = vpop.permute.xlu0 %5714  ;;  %v5176_v29 = vrot.slane %v5174_v19, 1 }
 0x3a7   : > { %5232 = vrot.lane.b32.xlu1 %v5137_v22, %s9267_s26  ;;  %v5863_v62 = vsel %vm1718_vm9, %v11908_v36, %v5715_v20  ;;  %v5148_v36 = vor.u32 %v5146_v54, %v5144_v21  ;;  %v5291_v20 = vsel %vm1608_vm6, %v5288_v5, %v5290_v42  ;;  %v5164_v22 = vor.u32 %v5162_v51, %v5160_v23 }
 0x3a8   : > { %v5184_v28 = vrot.slane %v5182_v37, 1  ;;  %v12390_v37 = vld [vmem:[#allocation3 + $0x28] sm:$0xff]  }
 0x3a9   : > { %5234 = vrot.lane.b32.xlu0 %v5145_v43, %s9267_s26  ;;  %v5153_v41 = vsel %vm1330_vm5, %v5148_v36, %v5152_v0  ;;  %v5172_v43 = vor.u32 %v5170_v30, %v5168_v31  ;;  %v5190_v0 = vshll.u32 %v12151_v27, 16  ;;  %v5298_v30 = vrot.slane %v12151_v27, 1 }
 0x3aa   : > { %v5815_v40 = vpop.permute.xlu0 %5814 }
 0x3ab   : > { %v5911_v6 = vsel %vm1773_vm10, %v5863_v62, %v5815_v40  ;;  %5332 = vrot.lane.b32.xlu1 %v5285_v52, %s9268_s27  ;;  %v6460_v62 = vld [vmem:[#allocation3 + $0x1c] sm:$0xf]  ;;  %v5177_v40 = vsel %vm1330_vm5, %v5172_v43, %v5176_v29  ;;  %v6459_v52 = vld [vmem:[#allocation3 + $0x18] sm:$0xf] }
 0x3ac   : > { %8750 = vmatprep.mubr.msk.bf16.mxu1 %vm2373_vm11, %v5911_v6  ;;  %v5294_v6 = vrot.slane %v12090_v47, 1  ;;  %v12367_v23 = vcombine.low %v6459_v52, %v6460_v62 }
 0x3ad   : > { %5334 = vrot.lane.b32.xlu0 %v5287_v56, %s9268_s27 }
 0x3ae   : > { %v5295_v5 = vsel %vm1608_vm6, %v5292_v13, %v5294_v6  ;;  %v6635_v42 = vshll.u32 %v12367_v23, 16  ;;  %v5194_v13 = vshrl.u32 %v12151_v27, 16 }
 0x3af   : > { %v5717_v3 = vpop.permute.xlu1 %5716  ;;  %5236 = vrot.lane.b32.xlu1 %v5153_v41, %s9267_s26  ;;  %v8995_v41 = vld [vmem:[#allocation3 + $0xc0] ss:$0 sps:$4 sm:$0x11]  }
 0x3b0   : > { %v5865_v1 = vsel %vm1718_vm9, %v11952_v14, %v5717_v3  ;;  %v5169_v14 = vsel %vm1330_vm5, %v5164_v22, %v5168_v31  ;;  %v5186_v3 = vshrl.u32 %v12148_v15, 16  ;;  %v5180_v31 = vor.u32 %v5178_v38, %v5176_v29 }
 0x3b1   : > { %5238 = vrot.lane.b32.xlu0 %v5161_v59, %s9267_s26  ;;  %v12376_v59 = vld [vmem:[#allocation3 + $0x20] sm:$0xff]   ;;  %v6637_v43 = vrot.slane %v6635_v42, 1 }
 0x3b2   : > { %v5185_v51 = vsel %vm1330_vm5, %v5180_v31, %v5184_v28  ;;  %v6880_v31 = vrot.slane %v12376_v59, 1 }
 0x3b3   : > { %v5817_v21 = vpop.permute.xlu1 %5816  ;;  %5336 = vrot.lane.b32.xlu1 %v5289_v16, %s9268_s27  ;;  %v5188_v16 = vor.u32 %v5186_v3, %v5184_v28  ;;  %v6508_v28 = vld [vmem:[#allocation3 + $0x18] sm:$0xe]  ;;  %v5300_v3 = vrot.slane %v8995_v41, 1 }
 0x3b4   : > { %v5913_v11 = vsel %vm1773_vm10, %v5865_v1, %v5817_v21  ;;  %v5296_v1 = vrot.slane %v12148_v15, 1  ;;  %v5198_v21 = vshll.u32 %v8995_v41, 16 }
 0x3b5   : > { %5338 = vrot.lane.b32.xlu0 %v5291_v20, %s9268_s27  ;;  %8751 = vmatmul.mubr.msk.bf16.gmra.mxu1 %vm2373_vm11, %v5913_v11  ;;  %v6640_v11 = vshll.u32 %v12376_v59, 16  ;;  %v5301_v41 = vsel %vm1608_vm6, %v5298_v30, %v5300_v3 }
 0x3b6   : > { %v5719_v61 = vpop.permute.xlu0 %5718 }
 0x3b7   : > { %5240 = vrot.lane.b32.xlu1 %v5169_v14, %s9267_s26  ;;  %v5867_v54 = vsel %vm1718_vm9, %v11997_v12, %v5719_v61  ;;  %v5192_v12 = vrot.slane %v5190_v0, 1  ;;  %v5297_v14 = vsel %vm1608_vm6, %v5294_v6, %v5296_v1  ;;  %v5299_v0 = vsel %vm1608_vm6, %v5296_v1, %v5298_v30 }
 0x3b8   : > { %v6642_v52 = vrot.slane %v6640_v11, 1  ;;  %v6648_v6 = vshll.u32 %v12390_v37, 16 }
 0x3b9   : > { %5242 = vrot.lane.b32.xlu0 %v5177_v40, %s9267_s26  ;;  %v5193_v20 = vsel %vm1330_vm5, %v5188_v16, %v5192_v12  ;;  %v5200_v40 = vrot.slane %v5198_v21, 1  ;;  %v6644_v21 = vshrl.u32 %v12376_v59, 16 }
 0x3ba   : > { %v5819_v56 = vpop.permute.xlu0 %5818  ;;  %v6650_v42 = vrot.slane %v6648_v6, 1 }
 0x3bb   : > { %v5915_v36 = vsel %vm1773_vm10, %v5867_v54, %v5819_v56  ;;  %5340 = vrot.lane.b32.xlu1 %v5293_v60, %s9268_s27  ;;  %v12398_v54 = vld [vmem:[#allocation3 + $0x30] sm:$0xff]   ;;  %v5196_v56 = vor.u32 %v5194_v13, %v5192_v12  ;;  %v8140_v60 = vcombine.low %v6508_v28, %v6460_v62 }
 0x3bc   : > { %8754 = vmatprep.mubr.msk.bf16.mxu1 %vm2373_vm11, %v5915_v36  ;;  %v6656_v16 = vshll.u32 %v12398_v54, 16  ;;  %v6660_v3 = vshrl.u32 %v12398_v54, 16 }
 0x3bd   : > { %v5721_v19 = vpop.permute.xlu1 %5720  ;;  %5342 = vrot.lane.b32.xlu0 %v5295_v5, %s9268_s27  ;;  %v5201_v5 = vsel %vm1330_vm5, %v5196_v56, %v5200_v40  ;;  %v6879_v12 = vrot.slane %v8140_v60, 1  ;;  %v6882_v40 = vrot.slane %v12390_v37, 1  ;;  %v12432_v60 = vld [vmem:[#allocation3 + $0x48] sm:$0xff]  }
 0x3be   : > { %v5869_v22 = vsel %vm1718_vm9, %v12029_v55, %v5721_v19  ;;  %v6633_v55 = vshrl.u32 %v12367_v23, 16 }
 0x3bf   : > { %5244 = vrot.lane.b32.xlu1 %v5185_v51, %s9267_s26  ;;  %v12408_v51 = vld [vmem:[#allocation3 + $0x38] sm:$0xff]   ;;  %v6881_v11 = vsel %vm1608_vm6, %v6879_v12, %v6880_v31  ;;  %v12441_v12 = vld [vmem:[#allocation3 + $0x50] sm:$0xff]  }
 0x3c0   : > { %v6638_v36 = vor.u32 %v6637_v43, %v6633_v55  ;;  %v6884_v55 = vrot.slane %v12398_v54, 1 }
 0x3c1   : > { %v5821_v29 = vpop.permute.xlu1 %5820  ;;  %5246 = vrot.lane.b32.xlu0 %v5193_v20, %s9267_s26 }
 0x3c2   : > { %v5917_v61 = vsel %vm1773_vm10, %v5869_v22, %v5821_v29  ;;  %v6643_v19 = vsel %vm1330_vm5, %v6638_v36, %v6642_v52  ;;  %v6652_v22 = vshrl.u32 %v12390_v37, 16  ;;  %v6658_v29 = vrot.slane %v6656_v16, 1 }
 0x3c3   : > { %8755 = vmatmul.mubr.msk.bf16.gmra.mxu1 %vm2373_vm11, %v5917_v61  ;;  %5344 = vrot.lane.b32.xlu1 %v5297_v14, %s9268_s27  ;;  %v12418_v61 = vld [vmem:[#allocation3 + $0x40] sm:$0xff]   ;;  %v6664_v14 = vshll.u32 %v12408_v51, 16  ;;  %v6668_v16 = vshrl.u32 %v12408_v51, 16 }
 0x3c4   : > { %v6654_v30 = vor.u32 %v6652_v22, %v6650_v42  ;;  %v6672_v56 = vshll.u32 %v12418_v61, 16 }
 0x3c5   : > { %5346 = vrot.lane.b32.xlu0 %v5299_v0, %s9268_s27  ;;  %v6666_v36 = vrot.slane %v6664_v14, 1 }
 0x3c6   : > { %v6659_v0 = vsel %vm1330_vm5, %v6654_v30, %v6658_v29  ;;  %v12456_v30 = vld [vmem:[#allocation3 + $0x58] sm:$0xff]  }
 0x3c7   : > { %v5723_v38 = vpop.permute.xlu0 %5722  ;;  %5248 = vrot.lane.b32.xlu1 %v5201_v5, %s9267_s26  ;;  %v6883_v5 = vsel %vm1608_vm6, %v6880_v31, %v6882_v40 }
 0x3c8   : > { %v5871_v62 = vsel %vm1718_vm9, %v12054_v4, %v5723_v38  ;;  %v6646_v4 = vor.u32 %v6644_v21, %v6642_v52 }
 0x3c9   : > { %6828 = vrot.lane.b32.xlu0 %v6643_v19, %s9267_s26  ;;  %v6885_v19 = vsel %vm1608_vm6, %v6882_v40, %v6884_v55  ;;  %v6676_v40 = vshrl.u32 %v12418_v61, 16 }
 0x3ca   : > { %v6651_v13 = vsel %vm1330_vm5, %v6646_v4, %v6650_v42  ;;  %v6662_v42 = vor.u32 %v6660_v3, %v6658_v29  ;;  %v6888_v4 = vrot.slane %v12418_v61, 1  ;;  %v6688_v29 = vshll.u32 %v12441_v12, 16 }
 0x3cb   : > { %v5823_v1 = vpop.permute.xlu0 %5822  ;;  %5348 = vrot.lane.b32.xlu1 %v5301_v41, %s9268_s27 }
 0x3cc   : > { %v5919_v20 = vsel %vm1773_vm10, %v5871_v62, %v5823_v1  ;;  %v6670_v62 = vor.u32 %v6668_v16, %v6666_v36  ;;  %v6680_v1 = vshll.u32 %v12432_v60, 16  ;;  %v6667_v21 = vsel %vm1330_vm5, %v6662_v42, %v6666_v36 }
 0x3cd   : > { %8758 = vmatprep.mubr.msk.bf16.mxu1 %vm2373_vm11, %v5919_v20  ;;  %6928 = vrot.lane.b32.xlu0 %v6881_v11, %s9268_s27  ;;  %v6886_v20 = vrot.slane %v12408_v51, 1 }
 0x3ce   : > { %v5725_v43 = vpop.permute.xlu1 %5724 }
 0x3cf   : > { %6830 = vrot.lane.b32.xlu1 %v6651_v13, %s9267_s26  ;;  %v5873_v52 = vsel %vm1718_vm9, %v12095_v17, %v5725_v43  ;;  %v6674_v17 = vrot.slane %v6672_v56, 1  ;;  %v6682_v43 = vrot.slane %v6680_v1, 1  ;;  %v6887_v13 = vsel %vm1608_vm6, %v6884_v55, %v6886_v20 }
 0x3d0   : > { %v6684_v56 = vshrl.u32 %v12432_v60, 16  ;;  %v6696_v55 = vshll.u32 %v12456_v30, 16 }
 0x3d1   : > { %6832 = vrot.lane.b32.xlu0 %v6659_v0, %s9267_s26  ;;  %v6675_v22 = vsel %vm1330_vm5, %v6670_v62, %v6674_v17  ;;  %v6889_v0 = vsel %vm1608_vm6, %v6886_v20, %v6888_v4  ;;  %v6678_v36 = vor.u32 %v6676_v40, %v6674_v17  ;;  %v6890_v62 = vrot.slane %v12432_v60, 1 }
 0x3d2   : > { %v5825_v28 = vpop.permute.xlu1 %5824  ;;  %v6892_v17 = vrot.slane %v12441_v12, 1 }
 0x3d3   : > { %v5921_v6 = vsel %vm1773_vm10, %v5873_v52, %v5825_v28  ;;  %v5727_v38 = vpop.permute.xlu0 %5726  ;;  %6930 = vrot.lane.b32.xlu1 %v6883_v5, %s9268_s27  ;;  %v6690_v52 = vrot.slane %v6688_v29, 1  ;;  %v12463_v28 = vld [vmem:[#allocation3 + $0x60] sm:$0xff]   ;;  %v6686_v5 = vor.u32 %v6684_v56, %v6682_v43  ;;  %v6683_v42 = vsel %vm1330_vm5, %v6678_v36, %v6682_v43 }
 0x3d4   : > { %8759 = vmatmul.mubr.msk.bf16.gmra.mxu1 %vm2373_vm11, %v5921_v6  ;;  %v5875_v31 = vsel %vm1718_vm9, %v12118_v63, %v5727_v38  ;;  %v6893_v29 = vsel %vm1608_vm6, %v6890_v62, %v6892_v17 }
 0x3d5   : > { %6932 = vrot.lane.b32.xlu0 %v6885_v19, %s9268_s27 }
 0x3d7   : > { %v5827_v41 = vpop.permute.xlu0 %5826  ;;  %6834 = vrot.lane.b32.xlu1 %v6667_v21, %s9267_s26  ;;  %v12482_v21 = vld [vmem:[#allocation3 + $0x68] sm:$0xff]  }
 0x3d8   : > { %v5923_v11 = vsel %vm1773_vm10, %v5875_v31, %v5827_v41  ;;  %v6704_v31 = vshll.u32 %v12463_v28, 16  ;;  %v6698_v41 = vrot.slane %v6696_v55, 1  ;;  %v6712_v36 = vshll.u32 %v12482_v21, 16 }
 0x3d9   : > { %6836 = vrot.lane.b32.xlu0 %v6675_v22, %s9267_s26  ;;  %8762 = vmatprep.mubr.msk.bf16.mxu1 %vm2373_vm11, %v5923_v11  ;;  %v5729_v63 = vpop.permute.xlu1 %5728  ;;  %v6891_v11 = vsel %vm1608_vm6, %v6888_v4, %v6890_v62  ;;  %v6692_v22 = vshrl.u32 %v12441_v12, 16  ;;  %v7129_v4 = vsel %vm2428_vm7, %v12180_v32, 0  ;;  %v6896_v32 = vrot.slane %v12463_v28, 1 }
 0x3da   : > { %v5877_v6 = vsel %vm1718_vm9, %v12132_v58, %v5729_v63  ;;  %v6691_v58 = vsel %vm1330_vm5, %v6686_v5, %v6690_v52  ;;  %v6700_v63 = vshrl.u32 %v12456_v30, 16  ;;  %v6706_v43 = vrot.slane %v6704_v31, 1 }
 0x3db   : > { %v5203_v14 = vpop.permute.xlu0 %5202  ;;  %6934 = vrot.lane.b32.xlu1 %v6887_v13, %s9268_s27  ;;  %v6694_v13 = vor.u32 %v6692_v22, %v6690_v52  ;;  %v6894_v52 = vrot.slane %v12456_v30, 1 }
 0x3dc   : > { %v5351_v3 = vsel %vm1718_vm9, %v12112_v24, %v5203_v14  ;;  %v12489_v14 = vld [vmem:[#allocation3 + $0x70] sm:$0xff]   ;;  %v6702_v56 = vor.u32 %v6700_v63, %v6698_v41 }
 0x3dd   : > { %6936 = vrot.lane.b32.xlu0 %v6889_v0, %s9268_s27  ;;  %v5829_v38 = vpop.permute.xlu1 %5828  ;;  %v6699_v55 = vsel %vm1330_vm5, %v6694_v13, %v6698_v41  ;;  %v6897_v31 = vsel %vm1608_vm6, %v6894_v52, %v6896_v32 }
 0x3de   : > { %v5925_v19 = vsel %vm1773_vm10, %v5877_v6, %v5829_v38 }
 0x3df   : > { %v5303_v16 = vpop.permute.xlu0 %5302  ;;  %6838 = vrot.lane.b32.xlu1 %v6683_v42, %s9267_s26  ;;  %8763 = vmatmul.mubr.msk.bf16.gmra.mxu1 %vm2373_vm11, %v5925_v19  ;;  %v6720_v19 = vshll.u32 %v12489_v14, 16  ;;  %v12510_v42 = vld [vmem:[#allocation3 + $0x78] sm:$0xff]  }
 0x3e0   : > { %v5399_v1 = vsel %vm1773_vm10, %v5351_v3, %v5303_v16  ;;  %v6714_v16 = vrot.slane %v6712_v36, 1 }
 0x3e1   : > { %6840 = vrot.lane.b32.xlu0 %v6691_v58, %s9267_s26  ;;  %8768 = vmatprep.mubr.msk.bf16.mxu1 %vm2373_vm11, %v5399_v1  ;;  %v5205_v24 = vpop.permute.xlu1 %5204  ;;  %v6895_v1 = vsel %vm1608_vm6, %v6892_v17, %v6894_v52  ;;  %v6708_v58 = vshrl.u32 %v12463_v28, 16  ;;  %v6722_v41 = vrot.slane %v6720_v19, 1  ;;  %v6728_v17 = vshll.u32 %v12510_v42, 16 }
 0x3e2   : > { %v5353_v40 = vsel %vm1718_vm9, %v12134_v46, %v5205_v24  ;;  %v6707_v46 = vsel %vm1330_vm5, %v6702_v56, %v6706_v43  ;;  %v6716_v24 = vshrl.u32 %v12482_v21, 16 }
 0x3e3   : > { %v5207_v20 = vpop.permute.xlu0 %5206  ;;  %6938 = vrot.lane.b32.xlu1 %v6891_v11, %s9268_s27  ;;  %v6710_v11 = vor.u32 %v6708_v58, %v6706_v43  ;;  %v6900_v43 = vrot.slane %v12489_v14, 1 }
 0x3e4   : > { %v5355_v6 = vsel %vm1718_vm9, %v13268_v26, %v5207_v20  ;;  %v12517_v20 = vld [vmem:[#allocation3 + $0x80] sm:$0xff]   ;;  %v6718_v63 = vor.u32 %v6716_v24, %v6714_v16 }
 0x3e5   : > { %6940 = vrot.lane.b32.xlu0 %v6893_v29, %s9268_s27  ;;  %v5305_v0 = vpop.permute.xlu1 %5304  ;;  %v6715_v56 = vsel %vm1330_vm5, %v6710_v11, %v6714_v16 }
 0x3e6   : > { %v5401_v38 = vsel %vm1773_vm10, %v5353_v40, %v5305_v0 }
 0x3e7   : > { %v5307_v5 = vpop.permute.xlu0 %5306  ;;  %6842 = vrot.lane.b32.xlu1 %v6699_v55, %s9267_s26  ;;  %8769 = vmatmul.mubr.msk.bf16.vlgmr.msra.gmra.mxu1 %vm2373_vm11, %v5401_v38  ;;  %v6730_v38 = vrot.slane %v6728_v17, 1  ;;  %v6902_v17 = vrot.slane %v12510_v42, 1 }
 0x3e8   : > { %v5403_v3 = vsel %vm1773_vm10, %v5355_v6, %v5307_v5  ;;  %8817 = vmatpush3.bf16.msra.mxu1 %v7129_v4  ;;  %v6898_v4 = vrot.slane %v12482_v21, 1  ;;  %v6736_v6 = vshll.u32 %v12517_v20, 16  ;;  %v12536_v5 = vld [vmem:[#allocation3 + $0x88] sm:$0xff]  }
 0x3e9   : > { %6844 = vrot.lane.b32.xlu0 %v6707_v46, %s9267_s26  ;;  %8772 = vmatprep.mubr.msk.bf16.mxu1 %vm2373_vm11, %v5403_v3  ;;  %v5209_v26 = vpop.permute.xlu1 %5208  ;;  %v6724_v46 = vshrl.u32 %v12489_v14, 16 }
 0x3ea   : > { %v5357_v22 = vsel %vm1718_vm9, %v13269_v53, %v5209_v26  ;;  %v6723_v53 = vsel %vm1330_vm5, %v6718_v63, %v6722_v41  ;;  %v6899_v3 = vsel %vm1608_vm6, %v6896_v32, %v6898_v4  ;;  %v6901_v19 = vsel %vm1608_vm6, %v6898_v4, %v6900_v43  ;;  %v12564_v4 = vld [vmem:[#allocation3 + $0x98] sm:$0xff]  }
 0x3eb   : > { %v5211_v62 = vpop.permute.xlu0 %5210  ;;  %6942 = vrot.lane.b32.xlu1 %v6895_v1, %s9268_s27  ;;  %v6732_v26 = vshrl.u32 %v12510_v42, 16  ;;  %v6738_v16 = vrot.slane %v6736_v6, 1  ;;  %v6726_v1 = vor.u32 %v6724_v46, %v6722_v41  ;;  %v6744_v32 = vshll.u32 %v12536_v5, 16 }
 0x3ec   : > { %v5359_v13 = vsel %vm1718_vm9, %v11536_v45, %v5211_v62  ;;  %v12543_v62 = vld [vmem:[#allocation3 + $0x90] sm:$0xff]   ;;  %v6904_v41 = vrot.slane %v12517_v20, 1  ;;  %v6740_v6 = vshrl.u32 %v12517_v20, 16 }
 0x3ed   : > { %6944 = vrot.lane.b32.xlu0 %v6897_v31, %s9268_s27  ;;  %v5309_v29 = vpop.permute.xlu1 %5308  ;;  %v6734_v24 = vor.u32 %v6732_v26, %v6730_v38  ;;  %v6731_v63 = vsel %vm1330_vm5, %v6726_v1, %v6730_v38  ;;  %v6748_v38 = vshrl.u32 %v12536_v5, 16  ;;  %v6760_v1 = vshll.u32 %v12564_v4, 16 }
 0x3ee   : > { %v5405_v40 = vsel %vm1773_vm10, %v5357_v22, %v5309_v29 }
 0x3ef   : > { %v5311_v0 = vpop.permute.xlu0 %5310  ;;  %6846 = vrot.lane.b32.xlu1 %v6715_v56, %s9267_s26  ;;  %8773 = vmatmul.mubr.msk.bf16.gmra.mxu1 %vm2373_vm11, %v5405_v40  ;;  %v6752_v40 = vshll.u32 %v12543_v62, 16  ;;  %v6746_v56 = vrot.slane %v6744_v32, 1 }
 0x3f0   : > { %v5407_v36 = vsel %vm1773_vm10, %v5359_v13, %v5311_v0 }
 0x3f1   : > { %6848 = vrot.lane.b32.xlu0 %v6723_v53, %s9267_s26  ;;  %8776 = vmatprep.mubr.msk.bf16.mxu1 %vm2373_vm11, %v5407_v36  ;;  %v5213_v45 = vpop.permute.xlu1 %5212  ;;  %v6903_v53 = vsel %vm1608_vm6, %v6900_v43, %v6902_v17  ;;  %v6750_v26 = vor.u32 %v6748_v38, %v6746_v56 }
 0x3f2   : > { %v5361_v58 = vsel %vm1718_vm9, %v11548_v34, %v5213_v45  ;;  %v6739_v34 = vsel %vm1330_vm5, %v6734_v24, %v6738_v16  ;;  %v6905_v45 = vsel %vm1608_vm6, %v6902_v17, %v6904_v41  ;;  %v6762_v17 = vrot.slane %v6760_v1, 1 }
 0x3f3   : > { %v5215_v52 = vpop.permute.xlu0 %5214  ;;  %6946 = vrot.lane.b32.xlu1 %v6899_v3, %s9268_s27  ;;  %v6742_v3 = vor.u32 %v6740_v6, %v6738_v16 }
 0x3f4   : > { %v8720_v55 = vpop.f32.mrf.mxu1  ;;  %v5363_v11 = vsel %vm1718_vm9, %v11595_v10, %v5215_v52  ;;  %v12571_v52 = vld [vmem:[#allocation3 + $0xa0] sm:$0xff]  }
 0x3f5   : > { %6948 = vrot.lane.b32.xlu0 %v6901_v19, %s9268_s27  ;;  %v5313_v31 = vpop.permute.xlu1 %5312  ;;  %v6754_v55 = vrot.slane %v6752_v40, 1  ;;  %v6747_v32 = vsel %vm1330_vm5, %v6742_v3, %v6746_v56 }
 0x3f6   : > { %v5409_v22 = vsel %vm1773_vm10, %v5361_v58, %v5313_v31  ;;  %v12562_v10 = vpop.f32.mrf.mxu1 }
 0x3f7   : > { %v5315_v29 = vpop.permute.xlu0 %5314  ;;  %6850 = vrot.lane.b32.xlu1 %v6731_v63, %s9267_s26  ;;  %8777 = vmatmul.mubr.msk.bf16.gmra.mxu1 %vm2373_vm11, %v5409_v22  ;;  %v6908_v22 = vrot.slane %v12543_v62, 1 }
 0x3f8   : > { %v5411_v13 = vsel %vm1773_vm10, %v5363_v11, %v5315_v29  ;;  %v12574_v46 = vpop.f32.mrf.mxu1  ;;  %v6906_v11 = vrot.slane %v12536_v5, 1  ;;  %v6768_v29 = vshll.u32 %v12571_v52, 16 }
 0x3f9   : > { %6852 = vrot.lane.b32.xlu0 %v6739_v34, %s9267_s26  ;;  %8780 = vmatprep.mubr.msk.bf16.mxu1 %vm2373_vm11, %v5411_v13  ;;  %v5217_v0 = vpop.permute.xlu1 %5216  ;;  %v12594_v13 = vld [vmem:[#allocation3 + $0xa8] sm:$0xff]  }
 0x3fa   : > { %v5365_v19 = vsel %vm1718_vm9, %v11614_v48, %v5217_v0  ;;  %v6755_v48 = vsel %vm1330_vm5, %v6750_v26, %v6754_v55  ;;  %v6907_v40 = vsel %vm1608_vm6, %v6904_v41, %v6906_v11  ;;  %v6756_v0 = vshrl.u32 %v12543_v62, 16 }
 0x3fb   : > { %v5219_v36 = vpop.permute.xlu0 %5218  ;;  %6950 = vrot.lane.b32.xlu1 %v6903_v53, %s9268_s27  ;;  %v6764_v53 = vshrl.u32 %v12564_v4, 16  ;;  %v6770_v6 = vrot.slane %v6768_v29, 1  ;;  %v6776_v26 = vshll.u32 %v12594_v13, 16 }
 0x3fc   : > { %v5367_v58 = vsel %vm1718_vm9, %v11625_v8, %v5219_v36  ;;  %v12592_v8 = vpop.f32.mrf.mxu1  ;;  %v6909_v36 = vsel %vm1608_vm6, %v6906_v11, %v6908_v22  ;;  %v6758_v38 = vor.u32 %v6756_v0, %v6754_v55  ;;  %v6772_v0 = vshrl.u32 %v12571_v52, 16 }
 0x3fd   : > { %6952 = vrot.lane.b32.xlu0 %v6905_v45, %s9268_s27  ;;  %v5317_v43 = vpop.permute.xlu1 %5316  ;;  %v12603_v45 = vld [vmem:[#allocation3 + $0xb0] sm:$0xff]  }
 0x3fe   : > { %v5413_v31 = vsel %vm1773_vm10, %v5365_v19, %v5317_v43  ;;  %v6766_v43 = vor.u32 %v6764_v53, %v6762_v17  ;;  %v6780_v53 = vshrl.u32 %v12594_v13, 16 }
 0x3ff   : > { %v5319_v24 = vpop.permute.xlu0 %5318  ;;  %6854 = vrot.lane.b32.xlu1 %v6747_v32, %s9267_s26  ;;  %8781 = vmatmul.mubr.msk.bf16.gmra.mxu1 %vm2373_vm11, %v5413_v31  ;;  %v6910_v32 = vrot.slane %v12564_v4, 1 }
 0x400   : > { %v5415_v16 = vsel %vm1773_vm10, %v5367_v58, %v5319_v24  ;;  %v6763_v24 = vsel %vm1330_vm5, %v6758_v38, %v6762_v17  ;;  %v12626_v17 = vld [vmem:[#allocation3 + $0xb8] sm:$0xff]  }
 0x401   : > { %6856 = vrot.lane.b32.xlu0 %v6755_v48, %s9267_s26  ;;  %8784 = vmatprep.mubr.msk.bf16.mxu1 %vm2373_vm11, %v5415_v16  ;;  %v5221_v63 = vpop.permute.xlu1 %5220  ;;  %v6912_v16 = vrot.slane %v12571_v52, 1 }
 0x402   : > { %v5369_v3 = vsel %vm1718_vm9, %v11682_v33, %v5221_v63  ;;  %v6771_v33 = vsel %vm1330_vm5, %v6766_v43, %v6770_v6  ;;  %v6778_v63 = vrot.slane %v6776_v26, 1 }
 0x403   : > { %v5223_v34 = vpop.permute.xlu0 %5222  ;;  %6954 = vrot.lane.b32.xlu1 %v6907_v40, %s9268_s27  ;;  %v6911_v40 = vsel %vm1608_vm6, %v6908_v22, %v6910_v32  ;;  %v6792_v22 = vshll.u32 %v12626_v17, 16 }
 0x404   : > { %v12598_v56 = vpop.f32.mrf.mxu1  ;;  %v5371_v1 = vsel %vm1718_vm9, %v11755_v9, %v5223_v34  ;;  %v6784_v9 = vshll.u32 %v12603_v45, 16 }
 0x405   : > { %6956 = vrot.lane.b32.xlu0 %v6909_v36, %s9268_s27  ;;  %v5321_v19 = vpop.permute.xlu1 %5320  ;;  %v6913_v36 = vsel %vm1608_vm6, %v6910_v32, %v6912_v16 }
 0x406   : > { %v12608_v41 = vpop.f32.mrf.mxu1  ;;  %v5417_v58 = vsel %vm1773_vm10, %v5369_v3, %v5321_v19  ;;  %v6786_v38 = vrot.slane %v6784_v9, 1  ;;  %v12633_v3 = vld [vmem:[#allocation3 + $0xc0] sm:$0xff]   ;;  %v6774_v19 = vor.u32 %v6772_v0, %v6770_v6  ;;  %v6916_v6 = vrot.slane %v12603_v45, 1 }
 0x407   : > { %v5323_v31 = vpop.permute.xlu0 %5322  ;;  %6858 = vrot.lane.b32.xlu1 %v6763_v24, %s9267_s26  ;;  %8785 = vmatmul.mubr.msk.bf16.gmra.mxu1 %vm2373_vm11, %v5417_v58  ;;  %v6800_v9 = vshll.u32 %v12633_v3, 16 }
 0x408   : > { %v5419_v55 = vsel %vm1773_vm10, %v5371_v1, %v5323_v31  ;;  %v12617_v11 = vpop.f32.mrf.mxu1  ;;  %v6782_v1 = vor.u32 %v6780_v53, %v6778_v63  ;;  %v6779_v32 = vsel %vm1330_vm5, %v6774_v19, %v6778_v63  ;;  %v12659_v19 = vld [vmem:[#allocation3 + $0xd0] sm:$0xff]  }
 0x409   : > { %6860 = vrot.lane.b32.xlu0 %v6771_v33, %s9267_s26  ;;  %8788 = vmatprep.mubr.msk.bf16.mxu1 %vm2373_vm11, %v5419_v55  ;;  %v5225_v29 = vpop.permute.xlu1 %5224  ;;  %v6914_v55 = vrot.slane %v12594_v13, 1  ;;  %v6802_v53 = vrot.slane %v6800_v9, 1  ;;  %v6920_v9 = vrot.slane %v12633_v3, 1 }
 0x40a   : > { %v6037_v48 = vpop.f32.mrf.mxu1  ;;  %v5373_v43 = vsel %vm1718_vm9, %v11762_v25, %v5225_v29  ;;  %v6787_v25 = vsel %vm1330_vm5, %v6782_v1, %v6786_v38  ;;  %v12652_v29 = vld [vmem:[#allocation3 + $0xc8] sm:$0xff]  }
 0x40b   : > { %v5227_v34 = vpop.permute.xlu0 %5226  ;;  %6958 = vrot.lane.b32.xlu1 %v6911_v40, %s9268_s27  ;;  %v6794_v48 = vrot.slane %v6792_v22, 1  ;;  %v6788_v40 = vshrl.u32 %v12603_v45, 16  ;;  %v6917_v0 = vsel %vm1608_vm6, %v6914_v55, %v6916_v6 }
 0x40c   : > { %v5375_v58 = vsel %vm1718_vm9, %v11851_v50, %v5227_v34  ;;  %v6915_v34 = vsel %vm1608_vm6, %v6912_v16, %v6914_v55 }
 0x40d   : > { %6960 = vrot.lane.b32.xlu0 %v6913_v36, %s9268_s27  ;;  %v5325_v26 = vpop.permute.xlu1 %5324  ;;  %v6796_v36 = vshrl.u32 %v12626_v17, 16 }
 0x40e   : > { %v5421_v31 = vsel %vm1773_vm10, %v5373_v43, %v5325_v26  ;;  %v6790_v26 = vor.u32 %v6788_v40, %v6786_v38 }
 0x40f   : > { %v5327_v24 = vpop.permute.xlu0 %5326  ;;  %6862 = vrot.lane.b32.xlu1 %v6779_v32, %s9267_s26  ;;  %8789 = vmatmul.mubr.msk.bf16.gmra.mxu1 %vm2373_vm11, %v5421_v31  ;;  %v6798_v22 = vor.u32 %v6796_v36, %v6794_v48 }
 0x410   : > { %v5423_v33 = vsel %vm1773_vm10, %v5375_v58, %v5327_v24  ;;  %v6808_v58 = vshll.u32 %v12652_v29, 16 }
 0x411   : > { %6864 = vrot.lane.b32.xlu0 %v6787_v25, %s9267_s26  ;;  %8792 = vmatprep.mubr.msk.bf16.mxu1 %vm2373_vm11, %v5423_v33  ;;  %v5229_v50 = vpop.permute.xlu1 %5228  ;;  %v6795_v33 = vsel %vm1330_vm5, %v6790_v26, %v6794_v48  ;;  %v6918_v25 = vrot.slane %v12626_v17, 1  ;;  %v6812_v26 = vshrl.u32 %v12652_v29, 16 }
 0x412   : > { %v5377_v1 = vsel %vm1718_vm9, %v11859_v49, %v5229_v50  ;;  %v6803_v49 = vsel %vm1330_vm5, %v6798_v22, %v6802_v53  ;;  %v9022_v22 = vld [vmem:[#allocation3 + $0xd8] ss:$0 sps:$4 sm:$0x11]  }
 0x413   : > { %v5231_v63 = vpop.permute.xlu0 %5230  ;;  %6962 = vrot.lane.b32.xlu1 %v6915_v34, %s9268_s27  ;;  %v6919_v40 = vsel %vm1608_vm6, %v6916_v6, %v6918_v25  ;;  %v6921_v36 = vsel %vm1608_vm6, %v6918_v25, %v6920_v9  ;;  %v6922_v6 = vrot.slane %v12652_v29, 1 }
 0x414   : > { %v5379_v31 = vsel %vm1718_vm9, %v11912_v7, %v5231_v63  ;;  %v6816_v7 = vshll.u32 %v12659_v19, 16  ;;  %v6810_v63 = vrot.slane %v6808_v58, 1 }
 0x415   : > { %v12661_v43 = vpop.f32.mrf.mxu1  ;;  %6964 = vrot.lane.b32.xlu0 %v6917_v0, %s9268_s27  ;;  %v5329_v16 = vpop.permute.xlu1 %5328  ;;  %v6804_v0 = vshrl.u32 %v12633_v3, 16 }
 0x416   : > { %v5425_v32 = vsel %vm1773_vm10, %v5377_v1, %v5329_v16  ;;  %v6818_v1 = vrot.slane %v6816_v7, 1  ;;  %v6924_v7 = vrot.slane %v12659_v19, 1 }
 0x417   : > { %v6049_v24 = vpop.f32.mrf.mxu1  ;;  %v5331_v55 = vpop.permute.xlu0 %5330  ;;  %6866 = vrot.lane.b32.xlu1 %v6795_v33, %s9267_s26  ;;  %8793 = vmatmul.mubr.msk.bf16.gmra.mxu1 %vm2373_vm11, %v5425_v32  ;;  %v6806_v16 = vor.u32 %v6804_v0, %v6802_v53 }
 0x418   : > { %v5427_v38 = vsel %vm1773_vm10, %v5379_v31, %v5331_v55  ;;  %v6814_v24 = vor.u32 %v6812_v26, %v6810_v63 }
 0x419   : > { %v8729_v50 = vpop.f32.mrf.mxu1  ;;  %6868 = vrot.lane.b32.xlu0 %v6803_v49, %s9267_s26  ;;  %8796 = vmatprep.mubr.msk.bf16.mxu1 %vm2373_vm11, %v5427_v38  ;;  %v5233_v48 = vpop.permute.xlu1 %5232  ;;  %v6811_v25 = vsel %vm1330_vm5, %v6806_v16, %v6810_v63  ;;  %v6824_v38 = vshll.u32 %v9022_v22, 16 }
 0x41a   : > { %v5381_v31 = vsel %vm1718_vm9, %v11918_v44, %v5233_v48  ;;  %v6819_v44 = vsel %vm1330_vm5, %v6814_v24, %v6818_v1 }
 0x41b   : > { %v5235_v34 = vpop.permute.xlu0 %5234  ;;  %6966 = vrot.lane.b32.xlu1 %v6919_v40, %s9268_s27  ;;  %v12693_v49 = vpop.f32.mrf.mxu1  ;;  %v6826_v0 = vrot.slane %v6824_v38, 1 }
 0x41c   : > { %v5383_v32 = vsel %vm1718_vm9, %v12010_v18, %v5235_v34  ;;  %v6820_v18 = vshrl.u32 %v12659_v19, 16  ;;  %v6923_v34 = vsel %vm1608_vm6, %v6920_v9, %v6922_v6 }
 0x41d   : > { %6968 = vrot.lane.b32.xlu0 %v6921_v36, %s9268_s27  ;;  %v5333_v58 = vpop.permute.xlu1 %5332  ;;  %v6925_v36 = vsel %vm1608_vm6, %v6922_v6, %v6924_v7 }
 0x41e   : > { %v5429_v55 = vsel %vm1773_vm10, %v5381_v31, %v5333_v58  ;;  %v6822_v40 = vor.u32 %v6820_v18, %v6818_v1  ;;  %v6926_v1 = vrot.slane %v9022_v22, 1 }
 0x41f   : > { %v5335_v33 = vpop.permute.xlu0 %5334  ;;  %6870 = vrot.lane.b32.xlu1 %v6811_v25, %s9267_s26  ;;  %8797 = vmatmul.mubr.msk.bf16.gmra.mxu1 %vm2373_vm11, %v5429_v55 }
 0x420   : > { %v5431_v53 = vsel %vm1773_vm10, %v5383_v32, %v5335_v33  ;;  %v6827_v9 = vsel %vm1330_vm5, %v6822_v40, %v6826_v0 }
 0x421   : > { %6872 = vrot.lane.b32.xlu0 %v6819_v44, %s9267_s26  ;;  %8800 = vmatprep.mubr.msk.bf16.mxu1 %vm2373_vm11, %v5431_v53  ;;  %v5237_v48 = vpop.permute.xlu1 %5236 }
 0x422   : > { %v5385_v26 = vsel %vm1718_vm9, %v12019_v2, %v5237_v48 }
 0x423   : > { %v8732_v50 = vpop.f32.mrf.mxu1  ;;  %v5239_v63 = vpop.permute.xlu0 %5238  ;;  %6970 = vrot.lane.b32.xlu1 %v6923_v34, %s9268_s27 }
 0x424   : > { %v5387_v31 = vsel %vm1718_vm9, %v12068_v35, %v5239_v63  ;;  %v6927_v35 = vsel %vm1608_vm6, %v6924_v7, %v6926_v1 }
 0x425   : > { %6972 = vrot.lane.b32.xlu0 %v6925_v36, %s9268_s27  ;;  %v5337_v16 = vpop.permute.xlu1 %5336  ;;  %v12717_v6 = vpop.f32.mrf.mxu1 }
 0x426   : > { %v5433_v58 = vsel %vm1773_vm10, %v5385_v26, %v5337_v16 }
 0x427   : > { %v5339_v24 = vpop.permute.xlu0 %5338  ;;  %6874 = vrot.lane.b32.xlu1 %v6827_v9, %s9267_s26  ;;  %8801 = vmatmul.mubr.msk.bf16.gmra.mxu1 %vm2373_vm11, %v5433_v58  ;;  %v12721_v33 = vpop.f32.mrf.mxu1 }
 0x428   : > { %v5435_v32 = vsel %vm1773_vm10, %v5387_v31, %v5339_v24 }
 0x429   : > { %8804 = vmatprep.mubr.msk.bf16.mxu1 %vm2373_vm11, %v5435_v32  ;;  %v5241_v2 = vpop.permute.xlu1 %5240  ;;  %v12731_v7 = vpop.f32.mrf.mxu1 }
 0x42a   : > { %v5389_v22 = vsel %vm1718_vm9, %v12076_v57, %v5241_v2 }
 0x42b   : > { %v5243_v55 = vpop.permute.xlu0 %5242  ;;  %6974 = vrot.lane.b32.xlu1 %v6927_v35, %s9268_s27 }
 0x42c   : > { %v5391_v38 = vsel %vm1718_vm9, %v12087_v39, %v5243_v55 }
 0x42d   : > { %v5341_v25 = vpop.permute.xlu1 %5340 }
 0x42e   : > { %v5437_v53 = vsel %vm1773_vm10, %v5389_v22, %v5341_v25 }
 0x42f   : > { %v5343_v44 = vpop.permute.xlu0 %5342  ;;  %8805 = vmatmul.mubr.msk.bf16.gmra.mxu1 %vm2373_vm11, %v5437_v53 }
 0x430   : > { %v5439_v18 = vsel %vm1773_vm10, %v5391_v38, %v5343_v44 }
 0x431   : > { %8808 = vmatprep.mubr.msk.bf16.mxu1 %vm2373_vm11, %v5439_v18  ;;  %v5245_v50 = vpop.permute.xlu1 %5244 }
 0x432   : > { %v5393_v57 = vsel %vm1718_vm9, %v12090_v47, %v5245_v50 }
 0x433   : > { %v5247_v48 = vpop.permute.xlu0 %5246 }
 0x434   : > { %v12733_v63 = vpop.f32.mrf.mxu1  ;;  %v5395_v40 = vsel %vm1718_vm9, %v12148_v15, %v5247_v48 }
 0x435   : > { %v5345_v39 = vpop.permute.xlu1 %5344 }
 0x436   : > { %v12737_v34 = vpop.f32.mrf.mxu1  ;;  %v5441_v0 = vsel %vm1773_vm10, %v5393_v57, %v5345_v39 }
 0x437   : > { %v5347_v36 = vpop.permute.xlu0 %5346  ;;  %8809 = vmatmul.mubr.msk.bf16.gmra.mxu1 %vm2373_vm11, %v5441_v0 }
 0x438   : > { %v5443_v26 = vsel %vm1773_vm10, %v5395_v40, %v5347_v36  ;;  %v12743_v16 = vpop.f32.mrf.mxu1 }
 0x439   : > { %8812 = vmatprep.mubr.msk.bf16.mxu1 %vm2373_vm11, %v5443_v26  ;;  %v5249_v58 = vpop.permute.xlu1 %5248 }
 0x43a   : > { %v6081_v31 = vpop.f32.mrf.mxu1  ;;  %v5397_v24 = vsel %vm1718_vm9, %v12151_v27, %v5249_v58 }
 0x43b   : > { %v6829_v47 = vpop.permute.xlu0 %6828 }
 0x43c   : > { %v6977_v15 = vsel %vm1718_vm9, %v12367_v23, %v6829_v47 }
 0x43d   : > { %v5349_v9 = vpop.permute.xlu1 %5348 }
 0x43e   : > { %v5445_v1 = vsel %vm1773_vm10, %v5397_v24, %v5349_v9 }
 0x43f   : > { %v6929_v32 = vpop.permute.xlu0 %6928  ;;  %8813 = vmatmul.mubr.msk.bf16.gmra.mxu1 %vm2373_vm11, %v5445_v1 }
 0x440   : > { %v7025_v2 = vsel %vm1773_vm10, %v6977_v15, %v6929_v32 }
 0x441   : > { %8818 = vmatprep.mubr.msk.bf16.mxu1 %vm2373_vm11, %v7025_v2  ;;  %v6831_v55 = vpop.permute.xlu1 %6830 }
 0x442   : > { %v6979_v27 = vsel %vm1718_vm9, %v12376_v59, %v6831_v55 }
 0x443   : > { %v6833_v35 = vpop.permute.xlu0 %6832 }
 0x444   : > { %v6981_v23 = vsel %vm1718_vm9, %v12390_v37, %v6833_v35 }
 0x445   : > { %v12755_v22 = vpop.f32.mrf.mxu1  ;;  %v6931_v25 = vpop.permute.xlu1 %6930 }
 0x446   : > { %v7027_v53 = vsel %vm1773_vm10, %v6979_v27, %v6931_v25 }
 0x447   : > { %v6093_v38 = vpop.f32.mrf.mxu1  ;;  %v6933_v44 = vpop.permute.xlu0 %6932  ;;  %8819 = vmatmul.mubr.msk.bf16.vlgmr.msra.gmra.mxu1 %vm2373_vm11, %v7027_v53 }
 0x448   : > { %v7029_v18 = vsel %vm1773_vm10, %v6981_v23, %v6933_v44 }
 0x449   : > { %v8741_v50 = vpop.f32.mrf.mxu1  ;;  %8822 = vmatprep.mubr.msk.bf16.mxu1 %vm2373_vm11, %v7029_v18  ;;  %v6835_v48 = vpop.permute.xlu1 %6834 }
 0x44a   : > { %v6983_v59 = vsel %vm1718_vm9, %v12398_v54, %v6835_v48 }
 0x44b   : > { %v6837_v57 = vpop.permute.xlu0 %6836  ;;  %v12770_v36 = vpop.f32.mrf.mxu1 }
 0x44c   : > { %v6985_v37 = vsel %vm1718_vm9, %v12408_v51, %v6837_v57 }
 0x44d   : > { %v6935_v39 = vpop.permute.xlu1 %6934 }
 0x44e   : > { %v7031_v40 = vsel %vm1773_vm10, %v6983_v59, %v6935_v39 }
 0x44f   : > { %v6937_v0 = vpop.permute.xlu0 %6936  ;;  %8823 = vmatmul.mubr.msk.bf16.gmra.mxu1 %vm2373_vm11, %v7031_v40 }
 0x450   : > { %v7033_v26 = vsel %vm1773_vm10, %v6985_v37, %v6937_v0 }
 0x451   : > { %8826 = vmatprep.mubr.msk.bf16.mxu1 %vm2373_vm11, %v7033_v26  ;;  %v6839_v58 = vpop.permute.xlu1 %6838 }
 0x452   : > { %v6987_v54 = vsel %vm1718_vm9, %v12418_v61, %v6839_v58 }
 0x453   : > { %v8744_v31 = vpop.f32.mrf.mxu1  ;;  %v6841_v47 = vpop.permute.xlu0 %6840 }
 0x454   : > { %v6989_v51 = vsel %vm1718_vm9, %v12432_v60, %v6841_v47 }
 0x455   : > { %v6939_v24 = vpop.permute.xlu1 %6938  ;;  %v12783_v32 = vpop.f32.mrf.mxu1 }
 0x456   : > { %v7035_v9 = vsel %vm1773_vm10, %v6987_v54, %v6939_v24 }
 0x457   : > { %v6941_v15 = vpop.permute.xlu0 %6940  ;;  %8827 = vmatmul.mubr.msk.bf16.gmra.mxu1 %vm2373_vm11, %v7035_v9  ;;  %v12785_v35 = vpop.f32.mrf.mxu1 }
 0x458   : > { %v7037_v1 = vsel %vm1773_vm10, %v6989_v51, %v6941_v15 }
 0x459   : > { %8830 = vmatprep.mubr.msk.bf16.mxu1 %vm2373_vm11, %v7037_v1  ;;  %v6843_v2 = vpop.permute.xlu1 %6842  ;;  %v12795_v53 = vpop.f32.mrf.mxu1 }
 0x45a   : > { %v6991_v61 = vsel %vm1718_vm9, %v12441_v12, %v6843_v2 }
 0x45b   : > { %v6845_v55 = vpop.permute.xlu0 %6844 }
 0x45c   : > { %v6993_v60 = vsel %vm1718_vm9, %v12456_v30, %v6845_v55 }
 0x45d   : > { %v6943_v27 = vpop.permute.xlu1 %6942 }
 0x45e   : > { %v7039_v25 = vsel %vm1773_vm10, %v6991_v61, %v6943_v27 }
 0x45f   : > { %v6945_v23 = vpop.permute.xlu0 %6944  ;;  %8831 = vmatmul.mubr.msk.bf16.gmra.mxu1 %vm2373_vm11, %v7039_v25 }
 0x460   : > { %v7041_v38 = vsel %vm1773_vm10, %v6993_v60, %v6945_v23 }
 0x461   : > { %8834 = vmatprep.mubr.msk.bf16.mxu1 %vm2373_vm11, %v7041_v38  ;;  %v6847_v44 = vpop.permute.xlu1 %6846 }
 0x462   : > { %v6995_v12 = vsel %vm1718_vm9, %v12463_v28, %v6847_v44 }
 0x463   : > { %v6849_v18 = vpop.permute.xlu0 %6848 }
 0x464   : > { %v12797_v50 = vpop.f32.mrf.mxu1  ;;  %v6997_v57 = vsel %vm1718_vm9, %v12482_v21, %v6849_v18 }
 0x465   : > { %v6947_v30 = vpop.permute.xlu1 %6946 }
 0x466   : > { %v12801_v48 = vpop.f32.mrf.mxu1  ;;  %v7043_v59 = vsel %vm1773_vm10, %v6995_v12, %v6947_v30 }
 0x467   : > { %v6949_v39 = vpop.permute.xlu0 %6948  ;;  %8835 = vmatmul.mubr.msk.bf16.gmra.mxu1 %vm2373_vm11, %v7043_v59 }
 0x468   : > { %v7045_v37 = vsel %vm1773_vm10, %v6997_v57, %v6949_v39  ;;  %v12807_v40 = vpop.f32.mrf.mxu1 }
 0x469   : > { %8838 = vmatprep.mubr.msk.bf16.mxu1 %vm2373_vm11, %v7045_v37  ;;  %v6851_v26 = vpop.permute.xlu1 %6850 }
 0x46a   : > { %v6125_v0 = vpop.f32.mrf.mxu1  ;;  %v6999_v31 = vsel %vm1718_vm9, %v12489_v14, %v6851_v26 }
 0x46b   : > { %v6853_v28 = vpop.permute.xlu0 %6852 }
 0x46c   : > { %v7001_v21 = vsel %vm1718_vm9, %v12510_v42, %v6853_v28 }
 0x46d   : > { %v6951_v58 = vpop.permute.xlu1 %6950 }
 0x46e   : > { %v7047_v47 = vsel %vm1773_vm10, %v6999_v31, %v6951_v58 }
 0x46f   : > { %v6953_v54 = vpop.permute.xlu0 %6952  ;;  %8839 = vmatmul.mubr.msk.bf16.gmra.mxu1 %vm2373_vm11, %v7047_v47 }
 0x470   : > { %v7049_v24 = vsel %vm1773_vm10, %v7001_v21, %v6953_v54 }
 0x471   : > { %8842 = vmatprep.mubr.msk.bf16.mxu1 %vm2373_vm11, %v7049_v24  ;;  %v6855_v51 = vpop.permute.xlu1 %6854 }
 0x472   : > { %v7003_v15 = vsel %vm1718_vm9, %v12517_v20, %v6855_v51 }
 0x473   : > { %v6857_v9 = vpop.permute.xlu0 %6856 }
 0x474   : > { %v7005_v42 = vsel %vm1718_vm9, %v12536_v5, %v6857_v9 }
 0x475   : > { %v12821_v1 = vpop.f32.mrf.mxu1  ;;  %v6955_v14 = vpop.permute.xlu1 %6954 }
 0x476   : > { %v7051_v2 = vsel %vm1773_vm10, %v7003_v15, %v6955_v14 }
 0x477   : > { %v6957_v55 = vpop.permute.xlu0 %6956  ;;  %v6137_v61 = vpop.f32.mrf.mxu1  ;;  %8843 = vmatmul.mubr.msk.bf16.gmra.mxu1 %vm2373_vm11, %v7051_v2 }
 0x478   : > { %v7053_v27 = vsel %vm1773_vm10, %v7005_v42, %v6957_v55 }
 0x479   : > { %8846 = vmatprep.mubr.msk.bf16.mxu1 %vm2373_vm11, %v7053_v27  ;;  %v8753_v60 = vpop.f32.mrf.mxu1  ;;  %v6859_v25 = vpop.permute.xlu1 %6858 }
 0x47a   : > { %v7007_v20 = vsel %vm1718_vm9, %v12543_v62, %v6859_v25 }
 0x47b   : > { %v6861_v23 = vpop.permute.xlu0 %6860  ;;  %v12836_v30 = vpop.f32.mrf.mxu1 }
 0x47c   : > { %v7009_v5 = vsel %vm1718_vm9, %v12564_v4, %v6861_v23 }
 0x47d   : > { %v6959_v38 = vpop.permute.xlu1 %6958 }
 0x47e   : > { %v7055_v44 = vsel %vm1773_vm10, %v7007_v20, %v6959_v38 }
 0x47f   : > { %v6961_v18 = vpop.permute.xlu0 %6960  ;;  %8847 = vmatmul.mubr.msk.bf16.gmra.mxu1 %vm2373_vm11, %v7055_v44 }
 0x480   : > { %v7057_v12 = vsel %vm1773_vm10, %v7009_v5, %v6961_v18 }
 0x481   : > { %8850 = vmatprep.mubr.msk.bf16.mxu1 %vm2373_vm11, %v7057_v12  ;;  %v6863_v57 = vpop.permute.xlu1 %6862 }
 0x482   : > { %v7011_v62 = vsel %vm1718_vm9, %v12571_v52, %v6863_v57 }
 0x483   : > { %v8756_v59 = vpop.f32.mrf.mxu1  ;;  %v6865_v39 = vpop.permute.xlu0 %6864 }
 0x484   : > { %v7013_v4 = vsel %vm1718_vm9, %v12594_v13, %v6865_v39 }
 0x485   : > { %v6963_v37 = vpop.permute.xlu1 %6962  ;;  %v12847_v31 = vpop.f32.mrf.mxu1 }
 0x486   : > { %v7059_v0 = vsel %vm1773_vm10, %v7011_v62, %v6963_v37 }
 0x487   : > { %v6965_v26 = vpop.permute.xlu0 %6964  ;;  %8851 = vmatmul.mubr.msk.bf16.gmra.mxu1 %vm2373_vm11, %v7059_v0  ;;  %v12849_v47 = vpop.f32.mrf.mxu1 }
 0x488   : > { %v7061_v28 = vsel %vm1773_vm10, %v7013_v4, %v6965_v26 }
 0x489   : > { %8854 = vmatprep.mubr.msk.bf16.mxu1 %vm2373_vm11, %v7061_v28  ;;  %v6867_v58 = vpop.permute.xlu1 %6866  ;;  %v12859_v15 = vpop.f32.mrf.mxu1 }
 0x48a   : > { %v7015_v52 = vsel %vm1718_vm9, %v12603_v45, %v6867_v58  ;;  %13272 = vst [vmem:[#allocation24_spill] sm:$0xff] %v12859_v15  ;;  %v7374_v15 = vld [vmem:[%s9327_s25] sm:$0xff] }
 0x48b   : > { %v6869_v21 = vpop.permute.xlu0 %6868 }
 0x48c   : > { %v7017_v13 = vsel %vm1718_vm9, %v12626_v17, %v6869_v21 }
 0x48d   : > { %v6967_v54 = vpop.permute.xlu1 %6966 }
 0x48e   : > { %v7063_v24 = vsel %vm1773_vm10, %v7015_v52, %v6967_v54 }
 0x48f   : > { %v6969_v51 = vpop.permute.xlu0 %6968  ;;  %8855 = vmatmul.mubr.msk.bf16.gmra.mxu1 %vm2373_vm11, %v7063_v24 }
 0x490   : > { %v7065_v9 = vsel %vm1773_vm10, %v7017_v13, %v6969_v51 }
 0x491   : > { %8858 = vmatprep.mubr.msk.bf16.mxu1 %vm2373_vm11, %v7065_v9  ;;  %v6871_v14 = vpop.permute.xlu1 %6870 }
 0x492   : > { %v7019_v45 = vsel %vm1718_vm9, %v12633_v3, %v6871_v14 }
 0x493   : > { %v6873_v42 = vpop.permute.xlu0 %6872 }
 0x494   : > { %v12861_v2 = vpop.f32.mrf.mxu1  ;;  %v7021_v61 = vsel %vm1718_vm9, %v12652_v29, %v6873_v42 }
 0x495   : > { %13273 = vst [vmem:[#allocation22_spill] sm:$0xff] %v12861_v2  ;;  %v6971_v17 = vpop.permute.xlu1 %6970 }
 0x496   : > { %v12865_v55 = vpop.f32.mrf.mxu1  ;;  %v7067_v27 = vsel %vm1773_vm10, %v7019_v45, %v6971_v17 }
 0x497   : > { %13274 = vst [vmem:[#allocation11_spill] sm:$0xff] %v12865_v55  ;;  %v6973_v60 = vpop.permute.xlu0 %6972  ;;  %8859 = vmatmul.mubr.msk.bf16.gmra.mxu1 %vm2373_vm11, %v7067_v27 }
 0x498   : > { %v7069_v25 = vsel %vm1773_vm10, %v7021_v61, %v6973_v60  ;;  %v12871_v23 = vpop.f32.mrf.mxu1 }
 0x499   : > { %13275 = vst [vmem:[#allocation25_spill] sm:$0xff] %v12871_v23  ;;  %8862 = vmatprep.mubr.msk.bf16.mxu1 %vm2373_vm11, %v7069_v25  ;;  %v6875_v38 = vpop.permute.xlu1 %6874 }
 0x49a   : > { %v6169_v20 = vpop.f32.mrf.mxu1  ;;  %v7023_v3 = vsel %vm1718_vm9, %v12659_v19, %v6875_v38 }
 0x49d   : > { %v6975_v5 = vpop.permute.xlu1 %6974 }
 0x49e   : > { %v7071_v44 = vsel %vm1773_vm10, %v7023_v3, %v6975_v5 }
 0x49f   : > { %v12878_v29 = vpop.f32.mrf.mxu1  ;;  %8863 = vmatmul.mubr.msk.bf16.gmra.mxu1 %vm2373_vm11, %v7071_v44 }
 0x4a0   : > { %13276 = vst [vmem:[#allocation26_spill] sm:$0xff] %v12878_v29 }
 0x4a1   : > { %v6181_v18 = vpop.f32.mrf.mxu1 }
 0x4a3   : > { %v8765_v12 = vpop.f32.mrf.mxu1 }
 0x4a5   : > { %v12881_v57 = vpop.f32.mrf.mxu1 }
 0x4a6   : > { %13277 = vst [vmem:[#allocation27_spill] sm:$0xff] %v12881_v57 }
 0x4a7   : > { %v8770_v59 = vpop.f32.mrf.mxu1 }
 0x4a9   : > { %v6284_v39 = vpop.f32.mrf.mxu1 }
 0x4aa   : > { %v6285_v2 = vadd.f32 %v6284_v39, %v12562_v10 }
 0x4ab   : > { %v8771_v62 = vpop.f32.mrf.mxu1 }
 0x4ad   : > { %v6287_v37 = vpop.f32.mrf.mxu1 }
 0x4af   : > { %v8774_v4 = vpop.f32.mrf.mxu1 }
 0x4b1   : > { %v12883_v0 = vpop.f32.mrf.mxu1 }
 0x4b3   : > { %v12885_v26 = vpop.f32.mrf.mxu1 }
 0x4b5   : > { %v6302_v19 = vpop.f32.mrf.mxu1 }
 0x4b7   : > { %v12887_v28 = vpop.f32.mrf.mxu1 }
 0x4b9   : > { %v6314_v58 = vpop.f32.mrf.mxu1 }
 0x4bb   : > { %v8779_v21 = vpop.f32.mrf.mxu1 }
 0x4bd   : > { %v12889_v52 = vpop.f32.mrf.mxu1 }
 0x4bf   : > { %v8782_v54 = vpop.f32.mrf.mxu1 }
 0x4c1   : > { %v12891_v13 = vpop.f32.mrf.mxu1 }
 0x4c3   : > { %v12893_v24 = vpop.f32.mrf.mxu1 }
 0x4c5   : > { %v12895_v51 = vpop.f32.mrf.mxu1 }
 0x4c7   : > { %v12897_v9 = vpop.f32.mrf.mxu1 }
 0x4c9   : > { %v12899_v14 = vpop.f32.mrf.mxu1 }
 0x4cb   : > { %v12901_v42 = vpop.f32.mrf.mxu1 }
 0x4cd   : > { %v6346_v45 = vpop.f32.mrf.mxu1 }
 0x4cf   : > { %v12903_v17 = vpop.f32.mrf.mxu1 }
 0x4d1   : > { %v6358_v61 = vpop.f32.mrf.mxu1 }
 0x4d3   : > { %v8791_v27 = vpop.f32.mrf.mxu1 }
 0x4d5   : > { %v12905_v60 = vpop.f32.mrf.mxu1 }
 0x4d7   : > { %v8794_v25 = vpop.f32.mrf.mxu1 }
 0x4d9   : > { %v12907_v20 = vpop.f32.mrf.mxu1 }
 0x4db   : > { %v12909_v38 = vpop.f32.mrf.mxu1 }
 0x4dd   : > { %v12911_v3 = vpop.f32.mrf.mxu1 }
 0x4df   : > { %v12913_v5 = vpop.f32.mrf.mxu1 }
 0x4e1   : > { %v12915_v44 = vpop.f32.mrf.mxu1 }
 0x4e3   : > { %v12917_v18 = vpop.f32.mrf.mxu1 }
 0x4e5   : > { %v6390_v12 = vpop.f32.mrf.mxu1 }
 0x4e7   : > { %v12919_v59 = vpop.f32.mrf.mxu1 }
 0x4e9   : > { %v6402_v19 = vpop.f32.mrf.mxu1 }
 0x4eb   : > { %v8803_v58 = vpop.f32.mrf.mxu1 }
 0x4ed   : > { %v12921_v21 = vpop.f32.mrf.mxu1 }
 0x4ef   : > { %v8806_v54 = vpop.f32.mrf.mxu1 }
 0x4f1   : > { %v12923_v45 = vpop.f32.mrf.mxu1 }
 0x4f3   : > { %v12925_v61 = vpop.f32.mrf.mxu1 }
 0x4f5   : > { %v12927_v27 = vpop.f32.mrf.mxu1 }
 0x4f6   : > { %13278 = vst [vmem:[#allocation28_spill] sm:$0xff] %v12927_v27 }
 0x4f7   : > { %v12929_v25 = vpop.f32.mrf.mxu1 }
 0x4f8   : > { %13279 = vst [vmem:[#allocation29_spill] sm:$0xff] %v12929_v25  ;;  %v6295_v25 = vadd.f32 %v8771_v62, %v12574_v46  ;;  %v7375_v46 = vld [vmem:[%s9327_s25 + $0x8] sm:$0xff] }
 0x4f9   : > { %v12931_v57 = vpop.f32.mrf.mxu1 }
 0x4fa   : > { %13280 = vst [vmem:[#allocation30_spill] sm:$0xff] %v12931_v57 }
 0x4fb   : > { %v12933_v12 = vpop.f32.mrf.mxu1 }
 0x4fc   : > { %13281 = vst [vmem:[#allocation12_spill] sm:$0xff] %v12933_v12 }
 0x4fd   : > { %v6434_v29 = vpop.f32.mrf.mxu1 }
 0x4fe   : > { %v12945_v29 = vld [vmem:[%s13152_s4] ss:$0 sm:$0xff] }
 0x4ff   : > { %v12935_v19 = vpop.f32.mrf.mxu1 }
 0x500   : > { %13282 = vst [vmem:[#allocation6_spill] sm:$0xff] %v12935_v19 }
 0x501   : > { %v6446_v58 = vpop.f32.mrf.mxu1 }
 0x502   : > { %v7376_v58 = vld [vmem:[%s9327_s25 + $0x10] sm:$0xff] }
 0x503   : > { %v8815_v23 = vpop.f32.mrf.mxu1 }
 0x504   : > { %v6288_v23 = vadd.f32 %v6287_v37, %v12592_v8 }
 0x505   : > { %v12937_v54 = vpop.f32.mrf.mxu1 }
 0x506   : > { %13283 = vst [vmem:[#allocation13_spill] sm:$0xff] %v12937_v54 }
 0x507   : > { %v8820_v55 = vpop.f32.mrf.mxu1 }
 0x509   : > { %v7165_v27 = vpop.f32.mrf.mxu1 }
 0x50a   : > { %v7340_v57 = vadd.f32 %v7165_v27, %v6285_v2  ;;  %v6307_v2 = vadd.f32 %v8774_v4, %v12598_v56  ;;  %v7377_v56 = vld [vmem:[%s9327_s25 + $0x18] sm:$0xff]  ;;  %v6310_v4 = vadd.f32 %v12885_v26, %v12617_v11  ;;  %v6322_v11 = vadd.f32 %v12887_v28, %v12661_v43 }
 0x50b   : > { %v8821_v19 = vpop.f32.mrf.mxu1  ;;  %v6317_v28 = vadd.f32 %v12889_v52, %v12693_v49 }
 0x50c   : > { %v7406_v12 = vadd.f32 %v7374_v15, %v7340_v57  ;;  %v7342_v54 = vadd.f32 %v8821_v19, %v6295_v25  ;;  %v7378_v15 = vld [vmem:[%s9327_s25 + $0x20] sm:$0xff]  ;;  %v6300_v57 = vadd.f32 %v12883_v0, %v12608_v41 }
 0x50d   : > { %v7168_v10 = vpop.f32.mrf.mxu1 }
 0x50e   : > { %v7445_v55 = vadd.f32 %v12945_v29, %v7406_v12  ;;  %v7408_v39 = vadd.f32 %v7376_v58, %v7342_v54  ;;  %v7341_v62 = vadd.f32 %v7168_v10, %v6288_v23  ;;  %v7379_v58 = vld [vmem:[%s9327_s25 + $0x28] sm:$0xff] }
 0x50f   : > { %v8824_v8 = vpop.f32.mrf.mxu1 }
 0x510   : > { %7477 = vst.msk [vmem:[%s12954_s29] sm:$0xff] %vm1718_vm9, %v7445_v55  ;;  %v7447_v37 = vadd.f32 %v12945_v29, %v7408_v39  ;;  %v7407_v27 = vadd.f32 %v7375_v46, %v7341_v62  ;;  %v7344_v25 = vadd.f32 %v8824_v8, %v6307_v2  ;;  %v7381_v62 = vld [vmem:[%s9327_s25 + $0x38] sm:$0xff] }
 0x511   : > { %v7180_v19 = vpop.f32.mrf.mxu1 }
 0x512   : > { %7479 = vst.msk [vmem:[%s12954_s29 + $0x10] sm:$0xff] %vm1718_vm9, %v7447_v37  ;;  %v7446_v12 = vadd.f32 %v12945_v29, %v7407_v27  ;;  %v7410_v54 = vadd.f32 %v7378_v15, %v7344_v25  ;;  %v7343_v41 = vadd.f32 %v7180_v19, %v6300_v57  ;;  %v7380_v19 = vld [vmem:[%s9327_s25 + $0x30] sm:$0xff] }
 0x513   : > { %v8825_v0 = vpop.f32.mrf.mxu1 }
 0x514   : > { %7478 = vst.msk [vmem:[%s12954_s29 + $0x8] sm:$0xff] %vm1718_vm9, %v7446_v12  ;;  %v7449_v23 = vadd.f32 %v12945_v29, %v7410_v54  ;;  %v7409_v10 = vadd.f32 %v7377_v56, %v7343_v41  ;;  %v7345_v46 = vadd.f32 %v8825_v0, %v6310_v4  ;;  %v6329_v12 = vadd.f32 %v12891_v13, %v12717_v6  ;;  %v7382_v0 = vld [vmem:[%s9327_s25 + $0x40] sm:$0xff] }
 0x515   : > { %v7183_v2 = vpop.f32.mrf.mxu1 }
 0x516   : > { %7481 = vst.msk [vmem:[%s12954_s29 + $0x20] sm:$0xff] %vm1718_vm9, %v7449_v23  ;;  %v7448_v26 = vadd.f32 %v12945_v29, %v7409_v10  ;;  %v7411_v55 = vadd.f32 %v7379_v58, %v7345_v46  ;;  %v6339_v58 = vadd.f32 %v12893_v24, %v12721_v33  ;;  %v7384_v10 = vld [vmem:[%s9327_s25 + $0x50] sm:$0xff]  ;;  %v6332_v46 = vadd.f32 %v12895_v51, %v12731_v7 }
 0x517   : > { %v8828_v39 = vpop.f32.mrf.mxu1  ;;  %v6351_v33 = vadd.f32 %v12897_v9, %v12733_v63  ;;  %v6344_v7 = vadd.f32 %v12899_v14, %v12737_v34  ;;  %v7385_v63 = vld [vmem:[%s9327_s25 + $0x58] sm:$0xff]  ;;  %v6354_v9 = vadd.f32 %v12901_v42, %v12743_v16  ;;  %v6366_v16 = vadd.f32 %v12903_v17, %v12755_v22 }
 0x518   : > { %7480 = vst.msk [vmem:[%s12954_s29 + $0x18] sm:$0xff] %vm1718_vm9, %v7448_v26  ;;  %v7450_v8 = vadd.f32 %v12945_v29, %v7411_v55  ;;  %v7347_v15 = vadd.f32 %v8828_v39, %v6322_v11  ;;  %v7383_v11 = vld [vmem:[%s9327_s25 + $0x48] sm:$0xff]  ;;  %v6361_v17 = vadd.f32 %v12905_v60, %v12770_v36 }
 0x519   : > { %v7195_v57 = vpop.f32.mrf.mxu1 }
 0x51a   : > { %7482 = vst.msk [vmem:[%s12954_s29 + $0x28] sm:$0xff] %vm1718_vm9, %v7450_v8  ;;  %v7413_v37 = vadd.f32 %v7381_v62, %v7347_v15  ;;  %v7386_v62 = vld [vmem:[%s9327_s25 + $0x60] sm:$0xff] }
 0x51b   : > { %v8829_v43 = vpop.f32.mrf.mxu1 }
 0x51c   : > { %v7452_v27 = vadd.f32 %v12945_v29, %v7413_v37 }
 0x51d   : > { %v7197_v25 = vpop.f32.mrf.mxu1 }
 0x51e   : > { %7484 = vst.msk [vmem:[%s12954_s29 + $0x38] sm:$0xff] %vm1718_vm9, %v7452_v27  ;;  %v7346_v56 = vadd.f32 %v7197_v25, %v6317_v28  ;;  %v7387_v28 = vld [vmem:[%s9327_s25 + $0x68] sm:$0xff] }
 0x51f   : > { %v8832_v4 = vpop.f32.mrf.mxu1 }
 0x520   : > { %v7412_v54 = vadd.f32 %v7380_v19, %v7346_v56 }
 0x521   : > { %v7209_v41 = vpop.f32.mrf.mxu1 }
 0x522   : > { %v7451_v49 = vadd.f32 %v12945_v29, %v7412_v54  ;;  %v7348_v52 = vadd.f32 %v7209_v41, %v6329_v12  ;;  %v7389_v54 = vld [vmem:[%s9327_s25 + $0x78] sm:$0xff] }
 0x523   : > { %v8833_v23 = vpop.f32.mrf.mxu1 }
 0x524   : > { %7483 = vst.msk [vmem:[%s12954_s29 + $0x30] sm:$0xff] %vm1718_vm9, %v7451_v49  ;;  %v7414_v2 = vadd.f32 %v7382_v0, %v7348_v52  ;;  %v7350_v6 = vadd.f32 %v8833_v23, %v6339_v58 }
 0x525   : > { %v7212_v13 = vpop.f32.mrf.mxu1 }
 0x526   : > { %v7453_v24 = vadd.f32 %v12945_v29, %v7414_v2  ;;  %v7416_v26 = vadd.f32 %v7384_v10, %v7350_v6  ;;  %v7349_v55 = vadd.f32 %v7212_v13, %v6332_v46  ;;  %v7388_v10 = vld [vmem:[%s9327_s25 + $0x70] sm:$0xff]  ;;  %v6373_v6 = vadd.f32 %v12907_v20, %v12783_v32 }
 0x527   : > { %v8836_v39 = vpop.f32.mrf.mxu1 }
 0x528   : > { %7485 = vst.msk [vmem:[%s12954_s29 + $0x40] sm:$0xff] %vm1718_vm9, %v7453_v24  ;;  %v7455_v51 = vadd.f32 %v12945_v29, %v7416_v26  ;;  %v7415_v8 = vadd.f32 %v7383_v11, %v7349_v55  ;;  %v7352_v15 = vadd.f32 %v8836_v39, %v6351_v33  ;;  %v7390_v33 = vld [vmem:[%s9327_s25 + $0x80] sm:$0xff]  ;;  %v6383_v24 = vadd.f32 %v12909_v38, %v12785_v35  ;;  %v7392_v55 = vld [vmem:[%s9327_s25 + $0x90] sm:$0xff] }
 0x529   : > { %v7224_v57 = vpop.f32.mrf.mxu1  ;;  %v6376_v39 = vadd.f32 %v12911_v3, %v12795_v53  ;;  %v6395_v35 = vadd.f32 %v12913_v5, %v12797_v50  ;;  %v6388_v53 = vadd.f32 %v12915_v44, %v12801_v48  ;;  %v7393_v50 = vld [vmem:[%s9327_s25 + $0x98] sm:$0xff]  ;;  %v6398_v5 = vadd.f32 %v12917_v18, %v12807_v40 }
 0x52a   : > { %7487 = vst.msk [vmem:[%s12954_s29 + $0x50] sm:$0xff] %vm1718_vm9, %v7455_v51  ;;  %v7454_v37 = vadd.f32 %v12945_v29, %v7415_v8  ;;  %v7418_v43 = vadd.f32 %v7386_v62, %v7352_v15  ;;  %v7351_v34 = vadd.f32 %v7224_v57, %v6344_v7  ;;  %v7391_v7 = vld [vmem:[%s9327_s25 + $0x88] sm:$0xff]  ;;  %v7394_v57 = vld [vmem:[%s9327_s25 + $0xa0] sm:$0xff]  ;;  %v6410_v40 = vadd.f32 %v12919_v59, %v12821_v1 }
 0x52b   : > { %v8837_v14 = vpop.f32.mrf.mxu1  ;;  %v6405_v59 = vadd.f32 %v12921_v21, %v12836_v30 }
 0x52c   : > { %7486 = vst.msk [vmem:[%s12954_s29 + $0x48] sm:$0xff] %vm1718_vm9, %v7454_v37  ;;  %v7457_v27 = vadd.f32 %v12945_v29, %v7418_v43  ;;  %v7417_v25 = vadd.f32 %v7385_v63, %v7351_v34  ;;  %v7353_v19 = vadd.f32 %v8837_v14, %v6354_v9  ;;  %v7395_v14 = vld [vmem:[%s9327_s25 + $0xa8] sm:$0xff] }
 0x52d   : > { %v7227_v56 = vpop.f32.mrf.mxu1 }
 0x52e   : > { %7489 = vst.msk [vmem:[%s12954_s29 + $0x60] sm:$0xff] %vm1718_vm9, %v7457_v27  ;;  %v7456_v42 = vadd.f32 %v12945_v29, %v7417_v25  ;;  %v7419_v4 = vadd.f32 %v7387_v28, %v7353_v19 }
 0x52f   : > { %v8840_v12 = vpop.f32.mrf.mxu1 }
 0x530   : > { %7488 = vst.msk [vmem:[%s12954_s29 + $0x58] sm:$0xff] %vm1718_vm9, %v7456_v42  ;;  %v7458_v41 = vadd.f32 %v12945_v29, %v7419_v4  ;;  %v7355_v0 = vadd.f32 %v8840_v12, %v6366_v16  ;;  %v7397_v42 = vld [vmem:[%s9327_s25 + $0xb8] sm:$0xff] }
 0x531   : > { %v7239_v58 = vpop.f32.mrf.mxu1 }
 0x532   : > { %7490 = vst.msk [vmem:[%s12954_s29 + $0x68] sm:$0xff] %vm1718_vm9, %v7458_v41  ;;  %v7421_v49 = vadd.f32 %v7389_v54, %v7355_v0 }
 0x533   : > { %v8841_v22 = vpop.f32.mrf.mxu1 }
 0x534   : > { %v7460_v52 = vadd.f32 %v12945_v29, %v7421_v49  ;;  %v7396_v49 = vld [vmem:[%s9327_s25 + $0xb0] sm:$0xff] }
 0x535   : > { %v7241_v23 = vpop.f32.mrf.mxu1 }
 0x536   : > { %7492 = vst.msk [vmem:[%s12954_s29 + $0x78] sm:$0xff] %vm1718_vm9, %v7460_v52  ;;  %v7354_v46 = vadd.f32 %v7241_v23, %v6361_v17  ;;  %v6417_v52 = vadd.f32 %v12923_v45, %v12847_v31 }
 0x537   : > { %v8844_v2 = vpop.f32.mrf.mxu1 }
 0x538   : > { %v7420_v13 = vadd.f32 %v7388_v10, %v7354_v46  ;;  %v7398_v46 = vld [vmem:[%s9327_s25 + $0xc0] sm:$0xff]  ;;  %v6427_v2 = vadd.f32 %v12925_v61, %v12849_v47  ;;  %v13287_v47 = vld [vmem:[#allocation29_spill] sm:$0xff] }
 0x539   : > { %v7253_v11 = vpop.f32.mrf.mxu1 }
 0x53a   : > { %v7459_v36 = vadd.f32 %v12945_v29, %v7420_v13  ;;  %v7356_v60 = vadd.f32 %v7253_v11, %v6373_v6  ;;  %v7400_v13 = vld [vmem:[%s9327_s25 + $0xd0] sm:$0xff]  ;;  %v13284_v11 = vld [vmem:[#allocation24_spill] sm:$0xff] }
 0x53b   : > { %v8845_v26 = vpop.f32.mrf.mxu1 }
 0x53c   : > { %7491 = vst.msk [vmem:[%s12954_s29 + $0x70] sm:$0xff] %vm1718_vm9, %v7459_v36  ;;  %v7422_v62 = vadd.f32 %v7390_v33, %v7356_v60  ;;  %v7358_v32 = vadd.f32 %v8845_v26, %v6383_v24  ;;  %v13285_v33 = vld [vmem:[#allocation28_spill] sm:$0xff]  ;;  %v7399_v60 = vld [vmem:[%s9327_s25 + $0xc8] sm:$0xff]  ;;  %v13286_v26 = vld [vmem:[#allocation22_spill] sm:$0xff] }
 0x53d   : > { %v7256_v20 = vpop.f32.mrf.mxu1  ;;  %v6420_v24 = vadd.f32 %v13285_v33, %v13284_v11  ;;  %v6439_v61 = vadd.f32 %v13287_v47, %v13286_v26 }
 0x53e   : > { %v7461_v38 = vadd.f32 %v12945_v29, %v7422_v62  ;;  %v7424_v51 = vadd.f32 %v7392_v55, %v7358_v32  ;;  %v7357_v8 = vadd.f32 %v7256_v20, %v6376_v39  ;;  %v7402_v20 = vld [vmem:[%s9327_s25 + $0xe0] sm:$0xff] }
 0x53f   : > { %v8848_v15 = vpop.f32.mrf.mxu1 }
 0x540   : > { %7493 = vst.msk [vmem:[%s12954_s29 + $0x80] sm:$0xff] %vm1718_vm9, %v7461_v38  ;;  %v7463_v3 = vadd.f32 %v12945_v29, %v7424_v51  ;;  %v7423_v63 = vadd.f32 %v7391_v7, %v7357_v8  ;;  %v7360_v9 = vadd.f32 %v8848_v15, %v6395_v35  ;;  %v13288_v7 = vld [vmem:[#allocation11_spill] sm:$0xff]  ;;  %v13289_v35 = vld [vmem:[#allocation30_spill] sm:$0xff] }
 0x541   : > { %v7268_v37 = vpop.f32.mrf.mxu1  ;;  %v6432_v38 = vadd.f32 %v13289_v35, %v13288_v7 }
 0x542   : > { %7495 = vst.msk [vmem:[%s12954_s29 + $0x90] sm:$0xff] %vm1718_vm9, %v7463_v3  ;;  %v7462_v43 = vadd.f32 %v12945_v29, %v7423_v63  ;;  %v7426_v34 = vadd.f32 %v7394_v57, %v7360_v9  ;;  %v7359_v48 = vadd.f32 %v7268_v37, %v6388_v53  ;;  %v7401_v53 = vld [vmem:[%s9327_s25 + $0xd8] sm:$0xff]  ;;  %v13290_v3 = vld [vmem:[#allocation25_spill] sm:$0xff]  ;;  %v13291_v63 = vld [vmem:[#allocation12_spill] sm:$0xff] }
 0x543   : > { %v8849_v44 = vpop.f32.mrf.mxu1  ;;  %v6442_v9 = vadd.f32 %v13291_v63, %v13290_v3 }
 0x544   : > { %7494 = vst.msk [vmem:[%s12954_s29 + $0x88] sm:$0xff] %vm1718_vm9, %v7462_v43  ;;  %v7465_v28 = vadd.f32 %v12945_v29, %v7426_v34  ;;  %v7425_v27 = vadd.f32 %v7393_v50, %v7359_v48  ;;  %v7361_v25 = vadd.f32 %v8849_v44, %v6398_v5  ;;  %v7403_v34 = vld [vmem:[%s9327_s25 + $0xe8] sm:$0xff] }
 0x545   : > { %v7271_v19 = vpop.f32.mrf.mxu1 }
 0x546   : > { %7497 = vst.msk [vmem:[%s12954_s29 + $0xa0] sm:$0xff] %vm1718_vm9, %v7465_v28  ;;  %v7464_v18 = vadd.f32 %v12945_v29, %v7425_v27  ;;  %v7427_v56 = vadd.f32 %v7395_v14, %v7361_v25  ;;  %v13292_v27 = vld [vmem:[#allocation26_spill] sm:$0xff] }
 0x547   : > { %v8852_v16 = vpop.f32.mrf.mxu1  ;;  %v13293_v25 = vld [vmem:[#allocation6_spill] sm:$0xff] }
 0x548   : > { %7496 = vst.msk [vmem:[%s12954_s29 + $0x98] sm:$0xff] %vm1718_vm9, %v7464_v18  ;;  %v7466_v4 = vadd.f32 %v12945_v29, %v7427_v56  ;;  %v7363_v12 = vadd.f32 %v8852_v16, %v6410_v40  ;;  %v6454_v19 = vadd.f32 %v13293_v25, %v13292_v27  ;;  %v7405_v16 = vld [vmem:[%s9327_s25 + $0xf8] sm:$0xff] }
 0x549   : > { %v7283_v54 = vpop.f32.mrf.mxu1 }
 0x54a   : > { %7498 = vst.msk [vmem:[%s12954_s29 + $0xa8] sm:$0xff] %vm1718_vm9, %v7466_v4  ;;  %v7429_v41 = vadd.f32 %v7397_v42, %v7363_v12 }
 0x54b   : > { %v8853_v1 = vpop.f32.mrf.mxu1 }
 0x54c   : > { %v7468_v0 = vadd.f32 %v12945_v29, %v7429_v41  ;;  %v13294_v1 = vld [vmem:[#allocation27_spill] sm:$0xff] }
 0x54d   : > { %v7285_v58 = vpop.f32.mrf.mxu1 }
 0x54e   : > { %7500 = vst.msk [vmem:[%s12954_s29 + $0xb8] sm:$0xff] %vm1718_vm9, %v7468_v0  ;;  %v7362_v22 = vadd.f32 %v7285_v58, %v6405_v59  ;;  %v13295_v59 = vld [vmem:[#allocation13_spill] sm:$0xff] }
 0x54f   : > { %v8856_v17 = vpop.f32.mrf.mxu1  ;;  %v6449_v0 = vadd.f32 %v13295_v59, %v13294_v1 }
 0x550   : > { %v7428_v23 = vadd.f32 %v7396_v49, %v7362_v22  ;;  %v7404_v22 = vld [vmem:[%s9327_s25 + $0xf0] sm:$0xff] }
 0x551   : > { %v7297_v10 = vpop.f32.mrf.mxu1 }
 0x552   : > { %v7467_v30 = vadd.f32 %v12945_v29, %v7428_v23  ;;  %v7364_v21 = vadd.f32 %v7297_v10, %v6417_v52 }
 0x553   : > { %v8857_v6 = vpop.f32.mrf.mxu1 }
 0x554   : > { %7499 = vst.msk [vmem:[%s12954_s29 + $0xb0] sm:$0xff] %vm1718_vm9, %v7467_v30  ;;  %v7430_v36 = vadd.f32 %v7398_v46, %v7364_v21  ;;  %v7366_v31 = vadd.f32 %v8857_v6, %v6427_v2 }
 0x555   : > { %v7300_v45 = vpop.f32.mrf.mxu1 }
 0x556   : > { %v7469_v55 = vadd.f32 %v12945_v29, %v7430_v36  ;;  %v7432_v39 = vadd.f32 %v7400_v13, %v7366_v31  ;;  %v7365_v62 = vadd.f32 %v7300_v45, %v6420_v24 }
 0x557   : > { %v8860_v32 = vpop.f32.mrf.mxu1 }
 0x558   : > { %7501 = vst.msk [vmem:[%s12954_s29 + $0xc0] sm:$0xff] %vm1718_vm9, %v7469_v55  ;;  %v7471_v51 = vadd.f32 %v12945_v29, %v7432_v39  ;;  %v7431_v8 = vadd.f32 %v7399_v60, %v7365_v62  ;;  %v7368_v15 = vadd.f32 %v8860_v32, %v6439_v61 }
 0x559   : > { %v7312_v57 = vpop.f32.mrf.mxu1 }
 0x55a   : > { %7503 = vst.msk [vmem:[%s12954_s29 + $0xd0] sm:$0xff] %vm1718_vm9, %v7471_v51  ;;  %v7470_v37 = vadd.f32 %v12945_v29, %v7431_v8  ;;  %v7434_v50 = vadd.f32 %v7402_v20, %v7368_v15  ;;  %v7367_v5 = vadd.f32 %v7312_v57, %v6432_v38 }
 0x55b   : > { %v8861_v43 = vpop.f32.mrf.mxu1 }
 0x55c   : > { %7502 = vst.msk [vmem:[%s12954_s29 + $0xc8] sm:$0xff] %vm1718_vm9, %v7470_v37  ;;  %v7473_v48 = vadd.f32 %v12945_v29, %v7434_v50  ;;  %v7433_v44 = vadd.f32 %v7401_v53, %v7367_v5  ;;  %v7369_v14 = vadd.f32 %v8861_v43, %v6442_v9 }
 0x55d   : > { %v7315_v28 = vpop.f32.mrf.mxu1 }
 0x55e   : > { %7505 = vst.msk [vmem:[%s12954_s29 + $0xe0] sm:$0xff] %vm1718_vm9, %v7473_v48  ;;  %v7472_v40 = vadd.f32 %v12945_v29, %v7433_v44  ;;  %v7435_v18 = vadd.f32 %v7403_v34, %v7369_v14 }
 0x55f   : > { %v8864_v56 = vpop.f32.mrf.mxu1 }
 0x560   : > { %7504 = vst.msk [vmem:[%s12954_s29 + $0xd8] sm:$0xff] %vm1718_vm9, %v7472_v40  ;;  %v7474_v42 = vadd.f32 %v12945_v29, %v7435_v18  ;;  %v7371_v4 = vadd.f32 %v8864_v56, %v6454_v19 }
 0x561   : > { %v7327_v12 = vpop.f32.mrf.mxu1 }
 0x562   : > { %7506 = vst.msk [vmem:[%s12954_s29 + $0xe8] sm:$0xff] %vm1718_vm9, %v7474_v42  ;;  %v7437_v54 = vadd.f32 %v7405_v16, %v7371_v4 }
 0x563   : > { %v8865_v41 = vpop.f32.mrf.mxu1 }
 0x564   : > { %v7476_v58 = vadd.f32 %v12945_v29, %v7437_v54 }
 0x565   : > { %v7329_v49 = vpop.f32.mrf.mxu1 }
 0x566   : > { %7508 = vst.msk [vmem:[%s12954_s29 + $0xf8] sm:$0xff] %vm1718_vm9, %v7476_v58  ;;  %v7370_v17 = vadd.f32 %v7329_v49, %v6449_v0 }
 0x568   : > { %v7436_v52 = vadd.f32 %v7404_v22, %v7370_v17 }
 0x56a   : > { %v7475_v23 = vadd.f32 %v12945_v29, %v7436_v52 }
 0x56c   : > { %7507 = vst.msk [vmem:[%s12954_s29 + $0xf0] sm:$0xff] %vm1718_vm9, %v7475_v23 }
 0x56d PF: > { %s15_s20 = sadd.s32 1, %s9265_s20   ;;  %s13296_s18 = smov %s9261_s19 }
 0x56e   : > { %p12_p5 = scmp.ge.s32.totalorder %s15_s20, 4   ;;  %s13297_s19 = smov %s13299_s21 }
 0x570   :  { %14 = sbr.rel (!%p12_p5) target bundleno = 2 (0x2), region = 103 }

</bundles_post_ra>
